<compile_context>
chip_gen: v7x
topology: tpu7x:2x2x1
jax: 0.10.0
libtpu: 0.0.40
codegen_flags: <defaults>
</compile_context>

<pallas_src>
import numpy as np
import jax
import jax.numpy as jnp
from jax.experimental import pallas as pl
from jax.experimental.pallas import tpu as pltpu

# ------------------------------------------------------------------ config
BATCH = 2
WIDTH = 8
HEIGHT = 8
FPS = 2
SECONDS = 2
FRAMES = FPS * SECONDS            # ConvLSTM sequence length
SEQ_LEN = 8                       # key-history LSTM sequence length
NUM_CLASSES = 16                  # stand-in for len(base_key.all_key_and_type_comb)
CONV_LSTM_HIDDEN = [64, 64, 128]
LSTM_HIDDEN = 64                  # bidirectional -> 128 features out


def _round_up(x, m):
    return (x + m - 1) // m * m


# ------------------------------------------------------------ Pallas matmul
def _matmul_kernel(a_ref, b_ref, o_ref, acc_ref):
    @pl.when(pl.program_id(2) == 0)
    def _():
        acc_ref[...] = jnp.zeros_like(acc_ref)

    acc_ref[...] += jnp.dot(a_ref[...], b_ref[...],
                            preferred_element_type=jnp.float32)

    @pl.when(pl.program_id(2) == pl.num_programs(2) - 1)
    def _():
        o_ref[...] = acc_ref[...].astype(o_ref.dtype)


def pallas_matmul(a, b, tn_cap=256, tk_cap=2048):
    """a: (M, K) @ b: (K, N) -> (M, N) f32.  bf16 MXU inputs, f32 accumulation.

    Tiles adapt to the problem: tiny-M (batch=2) matmuls are not padded to 128
    rows, and the reduction tile covers up to 2048 of K per grid step."""
    M, K = a.shape
    K2, N = b.shape
    assert K == K2
    tm = min(_round_up(M, 8), 128)
    tk = min(_round_up(K, 128), tk_cap)
    tn = min(_round_up(N, 128), tn_cap)
    Mp, Kp, Np = _round_up(M, tm), _round_up(K, tk), _round_up(N, tn)
    a_p = a.astype(jnp.bfloat16)
    b_p = b.astype(jnp.bfloat16)
    if (Mp, Kp) != (M, K):
        a_p = jnp.pad(a_p, ((0, Mp - M), (0, Kp - K)))
    if (Kp, Np) != (K, N):
        b_p = jnp.pad(b_p, ((0, Kp - K), (0, Np - N)))
    out = pl.pallas_call(
        _matmul_kernel,
        out_shape=jax.ShapeDtypeStruct((Mp, Np), jnp.float32),
        grid_spec=pltpu.PrefetchScalarGridSpec(
            num_scalar_prefetch=0,
            grid=(Mp // tm, Np // tn, Kp // tk),
            in_specs=[pl.BlockSpec((tm, tk), lambda i, j, k: (i, k)),
                      pl.BlockSpec((tk, tn), lambda i, j, k: (k, j))],
            out_specs=pl.BlockSpec((tm, tn), lambda i, j, k: (i, j)),
            scratch_shapes=[pltpu.VMEM((tm, tn), jnp.float32)],
        ),
        compiler_params=pltpu.CompilerParams(
            dimension_semantics=("parallel", "parallel", "arbitrary")),
    )(a_p, b_p)
    if (Mp, Np) != (M, N):
        out = out[:M, :N]
    return out


def linear(x, w, b):
    """PyTorch nn.Linear semantics: x @ w.T + b, w: (out, in)."""
    return pallas_matmul(x, w.T) + b[None, :]


# --------------------------------------------------------- conv via im2col
def im2col(x, kh, kw, stride, pad):
    """x: (B, C, H, W) -> col: (B*OH*OW, C*kh*kw); column order matches
    PyTorch weight.reshape(Cout, Cin*kh*kw)."""
    B, C, H, W = x.shape
    xp = jnp.pad(x, ((0, 0), (0, 0), (pad, pad), (pad, pad)))
    OH = (H + 2 * pad - kh) // stride + 1
    OW = (W + 2 * pad - kw) // stride + 1
    patches = []
    for i in range(kh):
        for j in range(kw):
            patches.append(
                xp[:, :, i:i + stride * OH:stride, j:j + stride * OW:stride])
    col = jnp.stack(patches, axis=2)                    # (B, C, kh*kw, OH, OW)
    col = col.transpose(0, 3, 4, 1, 2).reshape(B * OH * OW, C * kh * kw)
    return col, OH, OW


def conv2d_rows(x, w, b, stride=1, pad=0):
    """Conv returning matmul-layout rows: (B*OH*OW, Cout), rows ordered (b, oh, ow)."""
    Cout = w.shape[0]
    col, OH, OW = im2col(x, w.shape[2], w.shape[3], stride, pad)
    y = pallas_matmul(col, w.reshape(Cout, -1).T) + b[None, :]
    return y, OH, OW


def conv2d_nchw(x, w, b, stride=1, pad=0):
    y, OH, OW = conv2d_rows(x, w, b, stride, pad)
    B = x.shape[0]
    Cout = w.shape[0]
    return y.reshape(B, OH, OW, Cout).transpose(0, 3, 1, 2)


# ------------------------------------------------ ConvLSTM recurrence kernel
def make_shift_mats(B, H, W):
    """(9, R, R) 0/1 matrices: S_k @ h_flat == spatially-shifted (tap k of a 3x3
    conv, zero padded) h, with rows flat-ordered (b, i, j)."""
    R = B * H * W
    r = np.arange(R)
    bb, ii, jj = r // (H * W), (r // W) % H, r % W
    mats = np.zeros((9, R, R), np.float32)
    for k in range(9):
        di, dj = k // 3 - 1, k % 3 - 1
        si, sj = ii + di, jj + dj
        valid = (si >= 0) & (si < H) & (sj >= 0) & (sj < W)
        src = bb * H * W + np.clip(si, 0, H - 1) * W + np.clip(sj, 0, W - 1)
        mats[k, r[valid], src[valid]] = 1.0
    return jnp.asarray(mats, dtype=jnp.bfloat16)


def _pad_gate_cols(arr, Ch, Cp):
    """(..., 4*Ch) gate-major -> (..., 4*Cp): each gate block zero-padded to Cp
    lanes so gate slices inside kernels are 128-lane aligned."""
    if Cp == Ch:
        return arr
    lead = arr.shape[:-1]
    arr = arr.reshape(lead + (4, Ch))
    arr = jnp.pad(arr, [(0, 0)] * len(lead) + [(0, 0), (0, Cp - Ch)])
    return arr.reshape(lead + (4 * Cp,))


def _convlstm_seq_kernel(xg_ref, whh_ref, smat_ref, h_out_ref, h_scr, c_scr):
    t = pl.program_id(0)

    @pl.when(t == 0)
    def _():
        h_scr[...] = jnp.zeros_like(h_scr)
        c_scr[...] = jnp.zeros_like(c_scr)

    Cp = h_scr.shape[-1]
    ntap = smat_ref.shape[0]

    gates = xg_ref[0]                                   # (R, 4*Cp) f32 (x-part + bias)
    hb = h_scr[...].astype(jnp.bfloat16)                # (R, Cp)
    for k in range(ntap):                               # in-kernel 3x3 conv over h
        hk = jnp.dot(smat_ref[k], hb,
                     preferred_element_type=jnp.float32).astype(jnp.bfloat16)
        gates = gates + jnp.dot(hk, whh_ref[k],
                                preferred_element_type=jnp.float32)

    # ConvLSTM gate order: i, f, o, g  (each Cp lanes, vreg aligned)
    i_g = jax.nn.sigmoid(gates[:, 0 * Cp:1 * Cp])
    f_g = jax.nn.sigmoid(gates[:, 1 * Cp:2 * Cp])
    o_g = jax.nn.sigmoid(gates[:, 2 * Cp:3 * Cp])
    g_g = jnp.tanh(gates[:, 3 * Cp:4 * Cp])
    c_new = f_g * c_scr[...] + i_g * g_g
    h_new = o_g * jnp.tanh(c_new)
    c_scr[...] = c_new
    h_scr[...] = h_new
    h_out_ref[0] = h_new


def convlstm_layer(x_seq, w, b, hidden_dim, smat):
    """One ConvLSTM layer, full recurrence in a single Pallas kernel.
    x_seq: (T, B, Cin, H, W) -> h_seq: (T, R, Cp) with R=B*H*W, Cp=pad(Ch,128)."""
    T, B, Cin, H, W = x_seq.shape
    Ch = hidden_dim
    Cp = _round_up(Ch, 128)
    R = B * H * W

    # x-part of the gate conv for ALL timesteps in one matmul (rows (t, b, i, j)).
    col, _, _ = im2col(x_seq.reshape(T * B, Cin, H, W), 3, 3, 1, 1)
    wx = w[:, :Cin].reshape(4 * Ch, Cin * 9).T                    # (Cin*9, 4Ch)
    wx = _pad_gate_cols(wx, Ch, Cp)                               # (Cin*9, 4Cp)
    bias = _pad_gate_cols(b, Ch, Cp)                              # (4Cp,)
    xg = pallas_matmul(col, wx) + bias                            # (T*R, 4Cp)
    xg = xg.reshape(T, R, 4 * Cp)

    # h-part weights: one (Cp, 4Cp) matrix per 3x3 tap (zero rows/cols for padding).
    wh = w[:, Cin:]                                               # (4Ch, Ch, 3, 3)
    taps = []
    for ki in range(3):
        for kj in range(3):
            wt = _pad_gate_cols(wh[:, :, ki, kj].T, Ch, Cp)       # (Ch, 4Cp)
            wt = jnp.pad(wt, ((0, Cp - Ch), (0, 0)))              # (Cp, 4Cp)
            taps.append(wt)
    whh = jnp.stack(taps).astype(jnp.bfloat16)                    # (9, Cp, 4Cp)

    hs = pl.pallas_call(
        _convlstm_seq_kernel,
        out_shape=jax.ShapeDtypeStruct((T, R, Cp), jnp.float32),
        grid_spec=pltpu.PrefetchScalarGridSpec(
            num_scalar_prefetch=0,
            grid=(T,),
            in_specs=[pl.BlockSpec((1, R, 4 * Cp), lambda t: (t, 0, 0)),
                      pl.BlockSpec((9, Cp, 4 * Cp), lambda t: (0, 0, 0)),
                      pl.BlockSpec((9, R, R), lambda t: (0, 0, 0))],
            out_specs=pl.BlockSpec((1, R, Cp), lambda t: (t, 0, 0)),
            scratch_shapes=[pltpu.VMEM((R, Cp), jnp.float32),
                            pltpu.VMEM((R, Cp), jnp.float32)],
        ),
        compiler_params=pltpu.CompilerParams(
            dimension_semantics=("arbitrary",)),
    )(xg, whh, smat)
    return hs, Cp


# ---------------------------------------- fused bidirectional LSTM recurrence
def _interleave_gates(a_f, a_b, Hh):
    """(..., 4*Hh) fwd & bwd (PyTorch gate order i,f,g,o) ->
    (..., 4*2*Hh) with per-gate [fwd | bwd] blocks of width 2*Hh."""
    lead = a_f.shape[:-1]
    a_f = a_f.reshape(lead + (4, Hh))
    a_b = a_b.reshape(lead + (4, Hh))
    return jnp.concatenate([a_f, a_b], axis=-1).reshape(lead + (8 * Hh,))


def _bilstm_whh(w_hh_f, w_hh_r, Hh):
    """Block-diagonal recurrence weight (2Hh, 8Hh) in interleaved-gate layout."""
    zero = jnp.zeros((Hh, 4 * Hh), jnp.float32)
    top = _interleave_gates(w_hh_f.T, zero, Hh)       # fwd h rows
    bot = _interleave_gates(zero, w_hh_r.T, Hh)       # bwd h rows
    return jnp.concatenate([top, bot], axis=0)


def _bilstm_seq_kernel(xg_ref, whh_ref, h_out_ref, h_scr, c_scr):
    t = pl.program_id(0)

    @pl.when(t == 0)
    def _():
        h_scr[...] = jnp.zeros_like(h_scr)
        c_scr[...] = jnp.zeros_like(c_scr)

    G = h_scr.shape[-1]                               # 2*Hh = 128 (lane dense)
    gates = xg_ref[0] + jnp.dot(h_scr[...].astype(jnp.bfloat16), whh_ref[...],
                                preferred_element_type=jnp.float32)
    # nn.LSTM gate order: i, f, g, o — each block is [fwd | bwd], 128 lanes wide.
    i = jax.nn.sigmoid(gates[:, 0 * G:1 * G])
    f = jax.nn.sigmoid(gates[:, 1 * G:2 * G])
    g = jnp.tanh(gates[:, 2 * G:3 * G])
    o = jax.nn.sigmoid(gates[:, 3 * G:4 * G])
    c = f * c_scr[...] + i * g
    h = o * jnp.tanh(c)
    c_scr[...] = c
    h_scr[...] = h
    h_out_ref[0] = h


def bilstm_layer(x, p):
    """One bidirectional LSTM layer (both directions fused). x: (B,T,In) -> (B,T,2H)."""
    B, T, In = x.shape
    Hh = LSTM_HIDDEN
    Bp = max(_round_up(B, 8), 8)

    # Input projections for both directions and all timesteps in one matmul.
    w_cat = jnp.concatenate([p['w_ih'].T, p['w_ih_r'].T], axis=1)   # (In, 8Hh)
    proj = pallas_matmul(x.reshape(B * T, In), w_cat)               # (B*T, 8Hh)
    xg_f = proj[:, :4 * Hh].reshape(B, T, 4 * Hh) + (p['b_ih'] + p['b_hh'])
    xg_b = proj[:, 4 * Hh:].reshape(B, T, 4 * Hh) + (p['b_ih_r'] + p['b_hh_r'])
    xg_b = xg_b[:, ::-1, :]                                         # bwd consumes reversed time
    xgc = _interleave_gates(xg_f, xg_b, Hh)                         # (B, T, 8Hh)
    xgc = jnp.transpose(xgc, (1, 0, 2))                             # (T, B, 8Hh)
    if Bp != B:
        xgc = jnp.pad(xgc, ((0, 0), (0, Bp - B), (0, 0)))

    whh = _bilstm_whh(p['w_hh'], p['w_hh_r'], Hh).astype(jnp.bfloat16)

    hs = pl.pallas_call(
        _bilstm_seq_kernel,
        out_shape=jax.ShapeDtypeStruct((T, Bp, 2 * Hh), jnp.float32),
        grid_spec=pltpu.PrefetchScalarGridSpec(
            num_scalar_prefetch=0,
            grid=(T,),
            in_specs=[pl.BlockSpec((1, Bp, 8 * Hh), lambda t: (t, 0, 0)),
                      pl.BlockSpec((2 * Hh, 8 * Hh), lambda t: (0, 0))],
            out_specs=pl.BlockSpec((1, Bp, 2 * Hh), lambda t: (t, 0, 0)),
            scratch_shapes=[pltpu.VMEM((Bp, 2 * Hh), jnp.float32),
                            pltpu.VMEM((Bp, 2 * Hh), jnp.float32)],
        ),
        compiler_params=pltpu.CompilerParams(
            dimension_semantics=("arbitrary",)),
    )(xgc, whh)

    h_f = hs[:, :B, :Hh]               # fwd, already time ordered
    h_b = hs[::-1, :B, Hh:]            # bwd: recurrence step t == time T-1-t
    out = jnp.concatenate([h_f, h_b], axis=-1)          # (T, B, 2Hh)
    return jnp.transpose(out, (1, 0, 2))                # (B, T, 2Hh)


# --------------------------------------------------------------- batchnorm
def batchnorm2d_eval(x, gamma, beta, mean, var, eps=1e-5):
    inv = gamma / jnp.sqrt(var + eps)
    return x * inv[None, :, None, None] + (beta - mean * inv)[None, :, None, None]


# --------------------------------------------------------- EfficientNetV2-S
def efficientnet_forward(x, p):
    # stem: Conv 3x3 stride 2 (3 -> 24) + BN + SiLU
    y = conv2d_nchw(x, p['stem_w'], p['stem_b'], stride=2, pad=1)
    y = batchnorm2d_eval(y, p['bn_gamma'], p['bn_beta'], p['bn_mean'], p['bn_var'])
    y = jax.nn.silu(y)
    # TODO(synk): the pretrained FusedMBConv/MBConv stages of EfficientNetV2-S
    # are omitted (cannot be reproduced in-script); only stem, 1x1 head conv,
    # global average pool and the replaced classifier Linear are implemented.
    B, C, H, W = y.shape
    rows = y.transpose(0, 2, 3, 1).reshape(B * H * W, C)
    feat = jax.nn.silu(pallas_matmul(rows, p['head_w']) + p['head_b'][None, :])
    feat = feat.reshape(B, H * W, -1).mean(axis=1)            # global avg pool -> (B, 1280)
    return linear(feat, p['cls_w'], p['cls_b'])


# --------------------------------------------------------- full forward
def integration_forward(params, input1, input2, input3):
    B, T = input1.shape[0], input1.shape[1]
    H, W = input1.shape[3], input1.shape[4]

    # --- ConvLSTM branch (return_all_layers=False -> last layer only) ---
    smat = make_shift_mats(B, H, W)
    x_seq = jnp.transpose(input1.astype(jnp.float32), (1, 0, 2, 3, 4))  # (T,B,3,H,W)
    hs, Cp = None, None
    for l in range(3):
        Ch = CONV_LSTM_HIDDEN[l]
        hs, Cp = convlstm_layer(x_seq, params['convlstm'][l]['w'],
                                params['convlstm'][l]['b'], Ch, smat)
        if l < 2:
            x_seq = hs.reshape(T, B, H, W, Cp)[..., :Ch].transpose(0, 1, 4, 2, 3)
    Ch = CONV_LSTM_HIDDEN[-1]
    o = hs[-1].reshape(B, H, W, Cp)[..., :Ch].transpose(0, 3, 1, 2)     # (B,128,H,W)
    o = batchnorm2d_eval(o, params['bn_gamma'], params['bn_beta'],
                         params['bn_mean'], params['bn_var'])
    prev_frames = o.reshape(B, -1)                                      # nn.Flatten (C,H,W)
    prev_frames = linear(prev_frames, params['fc1_w'], params['fc1_b'])

    # --- key-history LSTM branch (3-layer bidirectional, batch_first) ---
    lstm_out = input2.astype(jnp.float32)
    for p in params['lstm']:
        lstm_out = bilstm_layer(lstm_out, p)
    prev_keys = linear(lstm_out[:, -1, :], params['fc2_w'], params['fc2_b'])

    # --- EfficientNetV2-S branch ---
    curr_frame = efficientnet_forward(input3.astype(jnp.float32), params['effnet'])

    # --- fusion head ---
    cat = jnp.concatenate([prev_frames, prev_keys, curr_frame], axis=1)
    cat = jax.nn.relu(cat)
    # Dropout(p=0.1): identity in eval mode.  Softmax defined but unused in forward().
    return linear(cat, params['last_w'], params['last_b'])


# ------------------------------------------------------------ parameters
def init_params(key):
    ks = iter(jax.random.split(key, 64))

    def nrm(shape, scale=0.05):
        return (scale * jax.random.normal(next(ks), shape)).astype(jnp.float32)

    params = {}
    # ConvLSTM: layer l conv weight (4*Ch, Cin+Ch, 3, 3)
    in_dims = [3, CONV_LSTM_HIDDEN[0], CONV_LSTM_HIDDEN[1]]
    params['convlstm'] = [{'w': nrm((4 * CONV_LSTM_HIDDEN[l],
                                     in_dims[l] + CONV_LSTM_HIDDEN[l], 3, 3)),
                           'b': nrm((4 * CONV_LSTM_HIDDEN[l],))}
                          for l in range(3)]
    # BatchNorm2d(128) — PyTorch defaults
    c = CONV_LSTM_HIDDEN[-1]
    params['bn_gamma'] = jnp.ones((c,), jnp.float32)
    params['bn_beta'] = jnp.zeros((c,), jnp.float32)
    params['bn_mean'] = jnp.zeros((c,), jnp.float32)
    params['bn_var'] = jnp.ones((c,), jnp.float32)
    # fc1: (num_classes, 128*W*H)
    params['fc1_w'] = nrm((NUM_CLASSES, c * WIDTH * HEIGHT))
    params['fc1_b'] = nrm((NUM_CLASSES,))
    # nn.LSTM: 3 layers, bidirectional
    lstm = []
    for l in range(3):
        in_sz = NUM_CLASSES if l == 0 else 2 * LSTM_HIDDEN
        layer = {}
        for sfx in ('', '_r'):
            layer['w_ih' + sfx] = nrm((4 * LSTM_HIDDEN, in_sz))
            layer['w_hh' + sfx] = nrm((4 * LSTM_HIDDEN, LSTM_HIDDEN))
            layer['b_ih' + sfx] = nrm((4 * LSTM_HIDDEN,))
            layer['b_hh' + sfx] = nrm((4 * LSTM_HIDDEN,))
        lstm.append(layer)
    params['lstm'] = lstm
    # fc2: (num_classes, 2*hidden)
    params['fc2_w'] = nrm((NUM_CLASSES, 2 * LSTM_HIDDEN))
    params['fc2_b'] = nrm((NUM_CLASSES,))
    # EfficientNetV2-S pieces (stem + head + replaced classifier)
    params['effnet'] = {
        'stem_w': nrm((24, 3, 3, 3)),
        'stem_b': jnp.zeros((24,), jnp.float32),
        'bn_gamma': jnp.ones((24,), jnp.float32),
        'bn_beta': jnp.zeros((24,), jnp.float32),
        'bn_mean': jnp.zeros((24,), jnp.float32),
        'bn_var': jnp.ones((24,), jnp.float32),
        'head_w': nrm((24, 1280)),
        'head_b': nrm((1280,)),
        'cls_w': nrm((NUM_CLASSES, 1280)),
        'cls_b': nrm((NUM_CLASSES,)),
    }
    # last_fc: (num_classes, 3*num_classes)
    params['last_w'] = nrm((NUM_CLASSES, 3 * NUM_CLASSES))
    params['last_b'] = nrm((NUM_CLASSES,))
    return params


if __name__ == "__main__":
    key = jax.random.PRNGKey(0)
    k1, k2, k3, kp = jax.random.split(key, 4)
    input1 = jax.random.normal(k1, (BATCH, FRAMES, 3, HEIGHT, WIDTH), jnp.float32)
    input2 = jax.random.normal(k2, (BATCH, SEQ_LEN, NUM_CLASSES), jnp.float32)
    input3 = jax.random.normal(k3, (BATCH, 3, 32, 32), jnp.float32)

    params = init_params(kp)
    fwd = jax.jit(integration_forward)
    out = jax.block_until_ready(fwd(params, input1, input2, input3))

    assert out.shape == (BATCH, NUM_CLASSES), out.shape
    assert bool(jnp.all(jnp.isfinite(out)))
    print("KERNEL_OK")
</pallas_src>

<mosaic_0001>
module attributes {stable_mosaic.version = 11 : i64} {
  func.func @_matmul_kernel(%arg0: i32, %arg1: i32, %arg2: i32, %arg3: memref<128x128xbf16, #tpu.memory_space<vmem>>, %arg4: memref<128x256xbf16, #tpu.memory_space<vmem>>, %arg5: memref<128x256xf32, #tpu.memory_space<vmem>>, %arg6: memref<128x256xf32, #tpu.memory_space<vmem>>) attributes {dimension_semantics = [#tpu.dimension_semantics<parallel>, #tpu.dimension_semantics<parallel>, #tpu.dimension_semantics<arbitrary>], iteration_bounds = array<i64: 4, 2, 1>, scalar_prefetch = 0 : i64, scratch_operands = 1 : i64, tpu.core_type = #tpu.core_type<tc>, window_params = [{transform_indices = @transform_0, window_bounds = array<i64: 128, 128>}, {transform_indices = @transform_1, window_bounds = array<i64: 128, 256>}, {transform_indices = @transform_2, window_bounds = array<i64: 128, 256>}]} {
    %c0_i32 = arith.constant 0 : i32
    %0 = arith.cmpi eq, %arg2, %c0_i32 : i32
    %1 = arith.extui %0 : i1 to i32
    %c0_i32_0 = arith.constant 0 : i32
    %2 = arith.cmpi ne, %1, %c0_i32_0 : i32
    scf.if %2 {
      %cst_10 = arith.constant 0.000000e+00 : f32
      %12 = vector.broadcast %cst_10 : f32 to vector<128x256xf32>
      %c0_11 = arith.constant 0 : index
      %c0_12 = arith.constant 0 : index
      %13 = vector.load %arg6[%c0_11, %c0_12] : memref<128x256xf32, #tpu.memory_space<vmem>>, vector<128x256xf32>
      tpu.vector_store %arg6[%c0_11, %c0_12], %12 {strides = array<i32>} : memref<128x256xf32, #tpu.memory_space<vmem>>, vector<128x256xf32>,
    } else {
    }
    %c0 = arith.constant 0 : index
    %c0_1 = arith.constant 0 : index
    %3 = vector.load %arg6[%c0, %c0_1] : memref<128x256xf32, #tpu.memory_space<vmem>>, vector<128x256xf32>
    %c0_2 = arith.constant 0 : index
    %c0_3 = arith.constant 0 : index
    %4 = vector.load %arg3[%c0_2, %c0_3] : memref<128x128xbf16, #tpu.memory_space<vmem>>, vector<128x128xbf16>
    %c0_4 = arith.constant 0 : index
    %c0_5 = arith.constant 0 : index
    %5 = vector.load %arg4[%c0_4, %c0_5] : memref<128x256xbf16, #tpu.memory_space<vmem>>, vector<128x256xbf16>
    %cst = arith.constant dense<0.000000e+00> : vector<128x256xf32>
    %6 = tpu.matmul %4, %5, %cst {dimension_numbers = #tpu.dot_dimension_numbers<[1], [0], [0], [1], [0, 0, 1, 1], [], []>} : vector<128x128xbf16>, vector<128x256xbf16>, vector<128x256xf32> -> vector<128x256xf32>
    %7 = arith.addf %3, %6 : vector<128x256xf32>
    %c0_6 = arith.constant 0 : index
    %c0_7 = arith.constant 0 : index
    %8 = vector.load %arg6[%c0_6, %c0_7] : memref<128x256xf32, #tpu.memory_space<vmem>>, vector<128x256xf32>
    tpu.vector_store %arg6[%c0_6, %c0_7], %7 {strides = array<i32>} : memref<128x256xf32, #tpu.memory_space<vmem>>, vector<128x256xf32>,
    %c0_i32_8 = arith.constant 0 : i32
    %9 = arith.cmpi eq, %arg2, %c0_i32_8 : i32
    %10 = arith.extui %9 : i1 to i32
    %c0_i32_9 = arith.constant 0 : i32
    %11 = arith.cmpi ne, %10, %c0_i32_9 : i32
    scf.if %11 {
      %c0_10 = arith.constant 0 : index
      %c0_11 = arith.constant 0 : index
      %12 = vector.load %arg6[%c0_10, %c0_11] : memref<128x256xf32, #tpu.memory_space<vmem>>, vector<128x256xf32>
      %c0_12 = arith.constant 0 : index
      %c0_13 = arith.constant 0 : index
      %13 = vector.load %arg5[%c0_12, %c0_13] : memref<128x256xf32, #tpu.memory_space<vmem>>, vector<128x256xf32>
      tpu.vector_store %arg5[%c0_12, %c0_13], %12 {strides = array<i32>} : memref<128x256xf32, #tpu.memory_space<vmem>>, vector<128x256xf32>,
    } else {
    }
    return
  }
  func.func @transform_0(%arg0: i32, %arg1: i32, %arg2: i32) -> (i32, i32) {
    %c0_i32 = arith.constant 0 : i32
    return %arg0, %arg2 : i32, i32
  }
  func.func @transform_1(%arg0: i32, %arg1: i32, %arg2: i32) -> (i32, i32) {
    %c0_i32 = arith.constant 0 : i32
    return %arg2, %arg1 : i32, i32
  }
  func.func @transform_2(%arg0: i32, %arg1: i32, %arg2: i32) -> (i32, i32) {
    %c0_i32 = arith.constant 0 : i32
    return %arg0, %arg1 : i32, i32
  }
}

module attributes {stable_mosaic.version = 11 : i64} {
  func.func @_convlstm_seq_kernel(%arg0: i32, %arg1: memref<1x128x512xf32, #tpu.memory_space<vmem>>, %arg2: memref<9x128x512xbf16, #tpu.memory_space<vmem>>, %arg3: memref<9x128x128xbf16, #tpu.memory_space<vmem>>, %arg4: memref<1x128x128xf32, #tpu.memory_space<vmem>>, %arg5: memref<128x128xf32, #tpu.memory_space<vmem>>, %arg6: memref<128x128xf32, #tpu.memory_space<vmem>>) attributes {dimension_semantics = [#tpu.dimension_semantics<arbitrary>], iteration_bounds = array<i64: 4>, scalar_prefetch = 0 : i64, scratch_operands = 2 : i64, tpu.core_type = #tpu.core_type<tc>, window_params = [{transform_indices = @transform_0, window_bounds = array<i64: 1, 128, 512>}, {pipeline_mode = #tpu.pipeline_mode<synchronous>, transform_indices = @transform_1, window_bounds = array<i64: 9, 128, 512>}, {pipeline_mode = #tpu.pipeline_mode<synchronous>, transform_indices = @transform_2, window_bounds = array<i64: 9, 128, 128>}, {transform_indices = @transform_3, window_bounds = array<i64: 1, 128, 128>}]} {
    %c0_i32 = arith.constant 0 : i32
    %0 = arith.cmpi eq, %arg0, %c0_i32 : i32
    %1 = arith.extui %0 : i1 to i32
    %c0_i32_0 = arith.constant 0 : i32
    %2 = arith.cmpi ne, %1, %c0_i32_0 : i32
    scf.if %2 {
      %cst_80 = arith.constant 0.000000e+00 : f32
      %110 = vector.broadcast %cst_80 : f32 to vector<128x128xf32>
      %c0_81 = arith.constant 0 : index
      %c0_82 = arith.constant 0 : index
      %111 = vector.load %arg5[%c0_81, %c0_82] : memref<128x128xf32, #tpu.memory_space<vmem>>, vector<128x128xf32>
      tpu.vector_store %arg5[%c0_81, %c0_82], %110 {strides = array<i32>} : memref<128x128xf32, #tpu.memory_space<vmem>>, vector<128x128xf32>,
      %cst_83 = arith.constant 0.000000e+00 : f32
      %112 = vector.broadcast %cst_83 : f32 to vector<128x128xf32>
      %c0_84 = arith.constant 0 : index
      %c0_85 = arith.constant 0 : index
      %113 = vector.load %arg6[%c0_84, %c0_85] : memref<128x128xf32, #tpu.memory_space<vmem>>, vector<128x128xf32>
      tpu.vector_store %arg6[%c0_84, %c0_85], %112 {strides = array<i32>} : memref<128x128xf32, #tpu.memory_space<vmem>>, vector<128x128xf32>,
    } else {
    }
    %c0 = arith.constant 0 : index
    %c0_1 = arith.constant 0 : index
    %c0_2 = arith.constant 0 : index
    %3 = vector.load %arg1[%c0, %c0_1, %c0_2] : memref<1x128x512xf32, #tpu.memory_space<vmem>>, vector<1x128x512xf32>
    %4 = vector.shape_cast %3 : vector<1x128x512xf32> to vector<128x512xf32>
    %c0_3 = arith.constant 0 : index
    %c0_4 = arith.constant 0 : index
    %5 = vector.load %arg5[%c0_3, %c0_4] : memref<128x128xf32, #tpu.memory_space<vmem>>, vector<128x128xf32>
    %6 = arith.truncf %5 : vector<128x128xf32> to vector<128x128xbf16>
    %c0_5 = arith.constant 0 : index
    %c0_6 = arith.constant 0 : index
    %c0_7 = arith.constant 0 : index
    %7 = vector.load %arg3[%c0_5, %c0_6, %c0_7] : memref<9x128x128xbf16, #tpu.memory_space<vmem>>, vector<1x128x128xbf16>
    %8 = vector.shape_cast %7 : vector<1x128x128xbf16> to vector<128x128xbf16>
    %cst = arith.constant dense<0.000000e+00> : vector<128x128xf32>
    %9 = tpu.matmul %8, %6, %cst {dimension_numbers = #tpu.dot_dimension_numbers<[1], [0], [0], [1], [0, 0, 1, 1], [], []>} : vector<128x128xbf16>, vector<128x128xbf16>, vector<128x128xf32> -> vector<128x128xf32>
    %10 = arith.truncf %9 : vector<128x128xf32> to vector<128x128xbf16>
    %c0_8 = arith.constant 0 : index
    %c0_9 = arith.constant 0 : index
    %c0_10 = arith.constant 0 : index
    %11 = vector.load %arg2[%c0_8, %c0_9, %c0_10] : memref<9x128x512xbf16, #tpu.memory_space<vmem>>, vector<1x128x512xbf16>
    %12 = vector.shape_cast %11 : vector<1x128x512xbf16> to vector<128x512xbf16>
    %cst_11 = arith.constant dense<0.000000e+00> : vector<128x512xf32>
    %13 = tpu.matmul %10, %12, %cst_11 {dimension_numbers = #tpu.dot_dimension_numbers<[1], [0], [0], [1], [0, 0, 1, 1], [], []>} : vector<128x128xbf16>, vector<128x512xbf16>, vector<128x512xf32> -> vector<128x512xf32>
    %14 = arith.addf %4, %13 : vector<128x512xf32>
    %c1 = arith.constant 1 : index
    %c0_12 = arith.constant 0 : index
    %c0_13 = arith.constant 0 : index
    %15 = vector.load %arg3[%c1, %c0_12, %c0_13] : memref<9x128x128xbf16, #tpu.memory_space<vmem>>, vector<1x128x128xbf16>
    %16 = vector.shape_cast %15 : vector<1x128x128xbf16> to vector<128x128xbf16>
    %cst_14 = arith.constant dense<0.000000e+00> : vector<128x128xf32>
    %17 = tpu.matmul %16, %6, %cst_14 {dimension_numbers = #tpu.dot_dimension_numbers<[1], [0], [0], [1], [0, 0, 1, 1], [], []>} : vector<128x128xbf16>, vector<128x128xbf16>, vector<128x128xf32> -> vector<128x128xf32>
    %18 = arith.truncf %17 : vector<128x128xf32> to vector<128x128xbf16>
    %c1_15 = arith.constant 1 : index
    %c0_16 = arith.constant 0 : index
    %c0_17 = arith.constant 0 : index
    %19 = vector.load %arg2[%c1_15, %c0_16, %c0_17] : memref<9x128x512xbf16, #tpu.memory_space<vmem>>, vector<1x128x512xbf16>
    %20 = vector.shape_cast %19 : vector<1x128x512xbf16> to vector<128x512xbf16>
    %cst_18 = arith.constant dense<0.000000e+00> : vector<128x512xf32>
    %21 = tpu.matmul %18, %20, %cst_18 {dimension_numbers = #tpu.dot_dimension_numbers<[1], [0], [0], [1], [0, 0, 1, 1], [], []>} : vector<128x128xbf16>, vector<128x512xbf16>, vector<128x512xf32> -> vector<128x512xf32>
    %22 = arith.addf %14, %21 : vector<128x512xf32>
    %c2 = arith.constant 2 : index
    %c0_19 = arith.constant 0 : index
    %c0_20 = arith.constant 0 : index
    %23 = vector.load %arg3[%c2, %c0_19, %c0_20] : memref<9x128x128xbf16, #tpu.memory_space<vmem>>, vector<1x128x128xbf16>
    %24 = vector.shape_cast %23 : vector<1x128x128xbf16> to vector<128x128xbf16>
    %cst_21 = arith.constant dense<0.000000e+00> : vector<128x128xf32>
    %25 = tpu.matmul %24, %6, %cst_21 {dimension_numbers = #tpu.dot_dimension_numbers<[1], [0], [0], [1], [0, 0, 1, 1], [], []>} : vector<128x128xbf16>, vector<128x128xbf16>, vector<128x128xf32> -> vector<128x128xf32>
    %26 = arith.truncf %25 : vector<128x128xf32> to vector<128x128xbf16>
    %c2_22 = arith.constant 2 : index
    %c0_23 = arith.constant 0 : index
    %c0_24 = arith.constant 0 : index
    %27 = vector.load %arg2[%c2_22, %c0_23, %c0_24] : memref<9x128x512xbf16, #tpu.memory_space<vmem>>, vector<1x128x512xbf16>
    %28 = vector.shape_cast %27 : vector<1x128x512xbf16> to vector<128x512xbf16>
    %cst_25 = arith.constant dense<0.000000e+00> : vector<128x512xf32>
    %29 = tpu.matmul %26, %28, %cst_25 {dimension_numbers = #tpu.dot_dimension_numbers<[1], [0], [0], [1], [0, 0, 1, 1], [], []>} : vector<128x128xbf16>, vector<128x512xbf16>, vector<128x512xf32> -> vector<128x512xf32>
    %30 = arith.addf %22, %29 : vector<128x512xf32>
    %c3 = arith.constant 3 : index
    %c0_26 = arith.constant 0 : index
    %c0_27 = arith.constant 0 : index
    %31 = vector.load %arg3[%c3, %c0_26, %c0_27] : memref<9x128x128xbf16, #tpu.memory_space<vmem>>, vector<1x128x128xbf16>
    %32 = vector.shape_cast %31 : vector<1x128x128xbf16> to vector<128x128xbf16>
    %cst_28 = arith.constant dense<0.000000e+00> : vector<128x128xf32>
    %33 = tpu.matmul %32, %6, %cst_28 {dimension_numbers = #tpu.dot_dimension_numbers<[1], [0], [0], [1], [0, 0, 1, 1], [], []>} : vector<128x128xbf16>, vector<128x128xbf16>, vector<128x128xf32> -> vector<128x128xf32>
    %34 = arith.truncf %33 : vector<128x128xf32> to vector<128x128xbf16>
    %c3_29 = arith.constant 3 : index
    %c0_30 = arith.constant 0 : index
    %c0_31 = arith.constant 0 : index
    %35 = vector.load %arg2[%c3_29, %c0_30, %c0_31] : memref<9x128x512xbf16, #tpu.memory_space<vmem>>, vector<1x128x512xbf16>
    %36 = vector.shape_cast %35 : vector<1x128x512xbf16> to vector<128x512xbf16>
    %cst_32 = arith.constant dense<0.000000e+00> : vector<128x512xf32>
    %37 = tpu.matmul %34, %36, %cst_32 {dimension_numbers = #tpu.dot_dimension_numbers<[1], [0], [0], [1], [0, 0, 1, 1], [], []>} : vector<128x128xbf16>, vector<128x512xbf16>, vector<128x512xf32> -> vector<128x512xf32>
    %38 = arith.addf %30, %37 : vector<128x512xf32>
    %c4 = arith.constant 4 : index
    %c0_33 = arith.constant 0 : index
    %c0_34 = arith.constant 0 : index
    %39 = vector.load %arg3[%c4, %c0_33, %c0_34] : memref<9x128x128xbf16, #tpu.memory_space<vmem>>, vector<1x128x128xbf16>
    %40 = vector.shape_cast %39 : vector<1x128x128xbf16> to vector<128x128xbf16>
    %cst_35 = arith.constant dense<0.000000e+00> : vector<128x128xf32>
    %41 = tpu.matmul %40, %6, %cst_35 {dimension_numbers = #tpu.dot_dimension_numbers<[1], [0], [0], [1], [0, 0, 1, 1], [], []>} : vector<128x128xbf16>, vector<128x128xbf16>, vector<128x128xf32> -> vector<128x128xf32>
    %42 = arith.truncf %41 : vector<128x128xf32> to vector<128x128xbf16>
    %c4_36 = arith.constant 4 : index
    %c0_37 = arith.constant 0 : index
    %c0_38 = arith.constant 0 : index
    %43 = vector.load %arg2[%c4_36, %c0_37, %c0_38] : memref<9x128x512xbf16, #tpu.memory_space<vmem>>, vector<1x128x512xbf16>
    %44 = vector.shape_cast %43 : vector<1x128x512xbf16> to vector<128x512xbf16>
    %cst_39 = arith.constant dense<0.000000e+00> : vector<128x512xf32>
    %45 = tpu.matmul %42, %44, %cst_39 {dimension_numbers = #tpu.dot_dimension_numbers<[1], [0], [0], [1], [0, 0, 1, 1], [], []>} : vector<128x128xbf16>, vector<128x512xbf16>, vector<128x512xf32> -> vector<128x512xf32>
    %46 = arith.addf %38, %45 : vector<128x512xf32>
    %c5 = arith.constant 5 : index
    %c0_40 = arith.constant 0 : index
    %c0_41 = arith.constant 0 : index
    %47 = vector.load %arg3[%c5, %c0_40, %c0_41] : memref<9x128x128xbf16, #tpu.memory_space<vmem>>, vector<1x128x128xbf16>
    %48 = vector.shape_cast %47 : vector<1x128x128xbf16> to vector<128x128xbf16>
    %cst_42 = arith.constant dense<0.000000e+00> : vector<128x128xf32>
    %49 = tpu.matmul %48, %6, %cst_42 {dimension_numbers = #tpu.dot_dimension_numbers<[1], [0], [0], [1], [0, 0, 1, 1], [], []>} : vector<128x128xbf16>, vector<128x128xbf16>, vector<128x128xf32> -> vector<128x128xf32>
    %50 = arith.truncf %49 : vector<128x128xf32> to vector<128x128xbf16>
    %c5_43 = arith.constant 5 : index
    %c0_44 = arith.constant 0 : index
    %c0_45 = arith.constant 0 : index
    %51 = vector.load %arg2[%c5_43, %c0_44, %c0_45] : memref<9x128x512xbf16, #tpu.memory_space<vmem>>, vector<1x128x512xbf16>
    %52 = vector.shape_cast %51 : vector<1x128x512xbf16> to vector<128x512xbf16>
    %cst_46 = arith.constant dense<0.000000e+00> : vector<128x512xf32>
    %53 = tpu.matmul %50, %52, %cst_46 {dimension_numbers = #tpu.dot_dimension_numbers<[1], [0], [0], [1], [0, 0, 1, 1], [], []>} : vector<128x128xbf16>, vector<128x512xbf16>, vector<128x512xf32> -> vector<128x512xf32>
    %54 = arith.addf %46, %53 : vector<128x512xf32>
    %c6 = arith.constant 6 : index
    %c0_47 = arith.constant 0 : index
    %c0_48 = arith.constant 0 : index
    %55 = vector.load %arg3[%c6, %c0_47, %c0_48] : memref<9x128x128xbf16, #tpu.memory_space<vmem>>, vector<1x128x128xbf16>
    %56 = vector.shape_cast %55 : vector<1x128x128xbf16> to vector<128x128xbf16>
    %cst_49 = arith.constant dense<0.000000e+00> : vector<128x128xf32>
    %57 = tpu.matmul %56, %6, %cst_49 {dimension_numbers = #tpu.dot_dimension_numbers<[1], [0], [0], [1], [0, 0, 1, 1], [], []>} : vector<128x128xbf16>, vector<128x128xbf16>, vector<128x128xf32> -> vector<128x128xf32>
    %58 = arith.truncf %57 : vector<128x128xf32> to vector<128x128xbf16>
    %c6_50 = arith.constant 6 : index
    %c0_51 = arith.constant 0 : index
    %c0_52 = arith.constant 0 : index
    %59 = vector.load %arg2[%c6_50, %c0_51, %c0_52] : memref<9x128x512xbf16, #tpu.memory_space<vmem>>, vector<1x128x512xbf16>
    %60 = vector.shape_cast %59 : vector<1x128x512xbf16> to vector<128x512xbf16>
    %cst_53 = arith.constant dense<0.000000e+00> : vector<128x512xf32>
    %61 = tpu.matmul %58, %60, %cst_53 {dimension_numbers = #tpu.dot_dimension_numbers<[1], [0], [0], [1], [0, 0, 1, 1], [], []>} : vector<128x128xbf16>, vector<128x512xbf16>, vector<128x512xf32> -> vector<128x512xf32>
    %62 = arith.addf %54, %61 : vector<128x512xf32>
    %c7 = arith.constant 7 : index
    %c0_54 = arith.constant 0 : index
    %c0_55 = arith.constant 0 : index
    %63 = vector.load %arg3[%c7, %c0_54, %c0_55] : memref<9x128x128xbf16, #tpu.memory_space<vmem>>, vector<1x128x128xbf16>
    %64 = vector.shape_cast %63 : vector<1x128x128xbf16> to vector<128x128xbf16>
    %cst_56 = arith.constant dense<0.000000e+00> : vector<128x128xf32>
    %65 = tpu.matmul %64, %6, %cst_56 {dimension_numbers = #tpu.dot_dimension_numbers<[1], [0], [0], [1], [0, 0, 1, 1], [], []>} : vector<128x128xbf16>, vector<128x128xbf16>, vector<128x128xf32> -> vector<128x128xf32>
    %66 = arith.truncf %65 : vector<128x128xf32> to vector<128x128xbf16>
    %c7_57 = arith.constant 7 : index
    %c0_58 = arith.constant 0 : index
    %c0_59 = arith.constant 0 : index
    %67 = vector.load %arg2[%c7_57, %c0_58, %c0_59] : memref<9x128x512xbf16, #tpu.memory_space<vmem>>, vector<1x128x512xbf16>
    %68 = vector.shape_cast %67 : vector<1x128x512xbf16> to vector<128x512xbf16>
    %cst_60 = arith.constant dense<0.000000e+00> : vector<128x512xf32>
    %69 = tpu.matmul %66, %68, %cst_60 {dimension_numbers = #tpu.dot_dimension_numbers<[1], [0], [0], [1], [0, 0, 1, 1], [], []>} : vector<128x128xbf16>, vector<128x512xbf16>, vector<128x512xf32> -> vector<128x512xf32>
    %70 = arith.addf %62, %69 : vector<128x512xf32>
    %c8 = arith.constant 8 : index
    %c0_61 = arith.constant 0 : index
    %c0_62 = arith.constant 0 : index
    %71 = vector.load %arg3[%c8, %c0_61, %c0_62] : memref<9x128x128xbf16, #tpu.memory_space<vmem>>, vector<1x128x128xbf16>
    %72 = vector.shape_cast %71 : vector<1x128x128xbf16> to vector<128x128xbf16>
    %cst_63 = arith.constant dense<0.000000e+00> : vector<128x128xf32>
    %73 = tpu.matmul %72, %6, %cst_63 {dimension_numbers = #tpu.dot_dimension_numbers<[1], [0], [0], [1], [0, 0, 1, 1], [], []>} : vector<128x128xbf16>, vector<128x128xbf16>, vector<128x128xf32> -> vector<128x128xf32>
    %74 = arith.truncf %73 : vector<128x128xf32> to vector<128x128xbf16>
    %c8_64 = arith.constant 8 : index
    %c0_65 = arith.constant 0 : index
    %c0_66 = arith.constant 0 : index
    %75 = vector.load %arg2[%c8_64, %c0_65, %c0_66] : memref<9x128x512xbf16, #tpu.memory_space<vmem>>, vector<1x128x512xbf16>
    %76 = vector.shape_cast %75 : vector<1x128x512xbf16> to vector<128x512xbf16>
    %cst_67 = arith.constant dense<0.000000e+00> : vector<128x512xf32>
    %77 = tpu.matmul %74, %76, %cst_67 {dimension_numbers = #tpu.dot_dimension_numbers<[1], [0], [0], [1], [0, 0, 1, 1], [], []>} : vector<128x128xbf16>, vector<128x512xbf16>, vector<128x512xf32> -> vector<128x512xf32>
    %78 = arith.addf %70, %77 : vector<128x512xf32>
    %79 = vector.extract_strided_slice %78 {offsets = [0, 0], sizes = [128, 128], strides = [1, 1]} : vector<128x512xf32> to vector<128x128xf32>
    %80 = arith.negf %79 : vector<128x128xf32>
    %81 = math.exp %80 : vector<128x128xf32>
    %cst_68 = arith.constant 1.000000e+00 : f32
    %82 = vector.broadcast %cst_68 : f32 to vector<128x128xf32>
    %83 = arith.addf %82, %81 : vector<128x128xf32>
    %84 = arith.divf %82, %83 : vector<128x128xf32>
    %85 = vector.extract_strided_slice %78 {offsets = [0, 128], sizes = [128, 128], strides = [1, 1]} : vector<128x512xf32> to vector<128x128xf32>
    %86 = arith.negf %85 : vector<128x128xf32>
    %87 = math.exp %86 : vector<128x128xf32>
    %cst_69 = arith.constant 1.000000e+00 : f32
    %88 = vector.broadcast %cst_69 : f32 to vector<128x128xf32>
    %89 = arith.addf %88, %87 : vector<128x128xf32>
    %90 = arith.divf %88, %89 : vector<128x128xf32>
    %91 = vector.extract_strided_slice %78 {offsets = [0, 256], sizes = [128, 128], strides = [1, 1]} : vector<128x512xf32> to vector<128x128xf32>
    %92 = arith.negf %91 : vector<128x128xf32>
    %93 = math.exp %92 : vector<128x128xf32>
    %cst_70 = arith.constant 1.000000e+00 : f32
    %94 = vector.broadcast %cst_70 : f32 to vector<128x128xf32>
    %95 = arith.addf %94, %93 : vector<128x128xf32>
    %96 = arith.divf %94, %95 : vector<128x128xf32>
    %97 = vector.extract_strided_slice %78 {offsets = [0, 384], sizes = [128, 128], strides = [1, 1]} : vector<128x512xf32> to vector<128x128xf32>
    %98 = math.tanh %97 : vector<128x128xf32>
    %c0_71 = arith.constant 0 : index
    %c0_72 = arith.constant 0 : index
    %99 = vector.load %arg6[%c0_71, %c0_72] : memref<128x128xf32, #tpu.memory_space<vmem>>, vector<128x128xf32>
    %100 = arith.mulf %90, %99 : vector<128x128xf32>
    %101 = arith.mulf %84, %98 : vector<128x128xf32>
    %102 = arith.addf %100, %101 : vector<128x128xf32>
    %103 = math.tanh %102 : vector<128x128xf32>
    %104 = arith.mulf %96, %103 : vector<128x128xf32>
    %c0_73 = arith.constant 0 : index
    %c0_74 = arith.constant 0 : index
    %105 = vector.load %arg6[%c0_73, %c0_74] : memref<128x128xf32, #tpu.memory_space<vmem>>, vector<128x128xf32>
    tpu.vector_store %arg6[%c0_73, %c0_74], %102 {strides = array<i32>} : memref<128x128xf32, #tpu.memory_space<vmem>>, vector<128x128xf32>,
    %c0_75 = arith.constant 0 : index
    %c0_76 = arith.constant 0 : index
    %106 = vector.load %arg5[%c0_75, %c0_76] : memref<128x128xf32, #tpu.memory_space<vmem>>, vector<128x128xf32>
    tpu.vector_store %arg5[%c0_75, %c0_76], %104 {strides = array<i32>} : memref<128x128xf32, #tpu.memory_space<vmem>>, vector<128x128xf32>,
    %c0_77 = arith.constant 0 : index
    %c0_78 = arith.constant 0 : index
    %c0_79 = arith.constant 0 : index
    %107 = vector.load %arg4[%c0_77, %c0_78, %c0_79] : memref<1x128x128xf32, #tpu.memory_space<vmem>>, vector<1x128x128xf32>
    %108 = vector.shape_cast %107 : vector<1x128x128xf32> to vector<128x128xf32>
    %109 = vector.shape_cast %104 : vector<128x128xf32> to vector<1x128x128xf32>
    tpu.vector_store %arg4[%c0_77, %c0_78, %c0_79], %109 {strides = array<i32>} : memref<1x128x128xf32, #tpu.memory_space<vmem>>, vector<1x128x128xf32>,
    return
  }
  func.func @transform_0(%arg0: i32) -> (i32, i32, i32) {
    %c0_i32 = arith.constant 0 : i32
    %c0_i32_0 = arith.constant 0 : i32
    %c0_i32_1 = arith.constant 0 : i32
    return %arg0, %c0_i32, %c0_i32_0 : i32, i32, i32
  }
  func.func @transform_1(%arg0: i32) -> (i32, i32, i32) {
    %c0_i32 = arith.constant 0 : i32
    %c0_i32_0 = arith.constant 0 : i32
    %c0_i32_1 = arith.constant 0 : i32
    %c0_i32_2 = arith.constant 0 : i32
    return %c0_i32, %c0_i32_0, %c0_i32_1 : i32, i32, i32
  }
  func.func @transform_2(%arg0: i32) -> (i32, i32, i32) {
    %c0_i32 = arith.constant 0 : i32
    %c0_i32_0 = arith.constant 0 : i32
    %c0_i32_1 = arith.constant 0 : i32
    %c0_i32_2 = arith.constant 0 : i32
    return %c0_i32, %c0_i32_0, %c0_i32_1 : i32, i32, i32
  }
  func.func @transform_3(%arg0: i32) -> (i32, i32, i32) {
    %c0_i32 = arith.constant 0 : i32
    %c0_i32_0 = arith.constant 0 : i32
    %c0_i32_1 = arith.constant 0 : i32
    return %arg0, %c0_i32, %c0_i32_0 : i32, i32, i32
  }
}

module attributes {stable_mosaic.version = 11 : i64} {
  func.func @_matmul_kernel(%arg0: i32, %arg1: i32, %arg2: i32, %arg3: memref<128x640xbf16, #tpu.memory_space<vmem>>, %arg4: memref<640x256xbf16, #tpu.memory_space<vmem>>, %arg5: memref<128x256xf32, #tpu.memory_space<vmem>>, %arg6: memref<128x256xf32, #tpu.memory_space<vmem>>) attributes {dimension_semantics = [#tpu.dimension_semantics<parallel>, #tpu.dimension_semantics<parallel>, #tpu.dimension_semantics<arbitrary>], iteration_bounds = array<i64: 4, 2, 1>, scalar_prefetch = 0 : i64, scratch_operands = 1 : i64, tpu.core_type = #tpu.core_type<tc>, window_params = [{transform_indices = @transform_0, window_bounds = array<i64: 128, 640>}, {transform_indices = @transform_1, window_bounds = array<i64: 640, 256>}, {transform_indices = @transform_2, window_bounds = array<i64: 128, 256>}]} {
    %c0_i32 = arith.constant 0 : i32
    %0 = arith.cmpi eq, %arg2, %c0_i32 : i32
    %1 = arith.extui %0 : i1 to i32
    %c0_i32_0 = arith.constant 0 : i32
    %2 = arith.cmpi ne, %1, %c0_i32_0 : i32
    scf.if %2 {
      %cst_10 = arith.constant 0.000000e+00 : f32
      %12 = vector.broadcast %cst_10 : f32 to vector<128x256xf32>
      %c0_11 = arith.constant 0 : index
      %c0_12 = arith.constant 0 : index
      %13 = vector.load %arg6[%c0_11, %c0_12] : memref<128x256xf32, #tpu.memory_space<vmem>>, vector<128x256xf32>
      tpu.vector_store %arg6[%c0_11, %c0_12], %12 {strides = array<i32>} : memref<128x256xf32, #tpu.memory_space<vmem>>, vector<128x256xf32>,
    } else {
    }
    %c0 = arith.constant 0 : index
    %c0_1 = arith.constant 0 : index
    %3 = vector.load %arg6[%c0, %c0_1] : memref<128x256xf32, #tpu.memory_space<vmem>>, vector<128x256xf32>
    %c0_2 = arith.constant 0 : index
    %c0_3 = arith.constant 0 : index
    %4 = vector.load %arg3[%c0_2, %c0_3] : memref<128x640xbf16, #tpu.memory_space<vmem>>, vector<128x640xbf16>
    %c0_4 = arith.constant 0 : index
    %c0_5 = arith.constant 0 : index
    %5 = vector.load %arg4[%c0_4, %c0_5] : memref<640x256xbf16, #tpu.memory_space<vmem>>, vector<640x256xbf16>
    %cst = arith.constant dense<0.000000e+00> : vector<128x256xf32>
    %6 = tpu.matmul %4, %5, %cst {dimension_numbers = #tpu.dot_dimension_numbers<[1], [0], [0], [1], [0, 0, 1, 1], [], []>} : vector<128x640xbf16>, vector<640x256xbf16>, vector<128x256xf32> -> vector<128x256xf32>
    %7 = arith.addf %3, %6 : vector<128x256xf32>
    %c0_6 = arith.constant 0 : index
    %c0_7 = arith.constant 0 : index
    %8 = vector.load %arg6[%c0_6, %c0_7] : memref<128x256xf32, #tpu.memory_space<vmem>>, vector<128x256xf32>
    tpu.vector_store %arg6[%c0_6, %c0_7], %7 {strides = array<i32>} : memref<128x256xf32, #tpu.memory_space<vmem>>, vector<128x256xf32>,
    %c0_i32_8 = arith.constant 0 : i32
    %9 = arith.cmpi eq, %arg2, %c0_i32_8 : i32
    %10 = arith.extui %9 : i1 to i32
    %c0_i32_9 = arith.constant 0 : i32
    %11 = arith.cmpi ne, %10, %c0_i32_9 : i32
    scf.if %11 {
      %c0_10 = arith.constant 0 : index
      %c0_11 = arith.constant 0 : index
      %12 = vector.load %arg6[%c0_10, %c0_11] : memref<128x256xf32, #tpu.memory_space<vmem>>, vector<128x256xf32>
      %c0_12 = arith.constant 0 : index
      %c0_13 = arith.constant 0 : index
      %13 = vector.load %arg5[%c0_12, %c0_13] : memref<128x256xf32, #tpu.memory_space<vmem>>, vector<128x256xf32>
      tpu.vector_store %arg5[%c0_12, %c0_13], %12 {strides = array<i32>} : memref<128x256xf32, #tpu.memory_space<vmem>>, vector<128x256xf32>,
    } else {
    }
    return
  }
  func.func @transform_0(%arg0: i32, %arg1: i32, %arg2: i32) -> (i32, i32) {
    %c0_i32 = arith.constant 0 : i32
    return %arg0, %arg2 : i32, i32
  }
  func.func @transform_1(%arg0: i32, %arg1: i32, %arg2: i32) -> (i32, i32) {
    %c0_i32 = arith.constant 0 : i32
    return %arg2, %arg1 : i32, i32
  }
  func.func @transform_2(%arg0: i32, %arg1: i32, %arg2: i32) -> (i32, i32) {
    %c0_i32 = arith.constant 0 : i32
    return %arg0, %arg1 : i32, i32
  }
}

module attributes {stable_mosaic.version = 11 : i64} {
  func.func @_matmul_kernel(%arg0: i32, %arg1: i32, %arg2: i32, %arg3: memref<8x2048xbf16, #tpu.memory_space<vmem>>, %arg4: memref<2048x128xbf16, #tpu.memory_space<vmem>>, %arg5: memref<8x128xf32, #tpu.memory_space<vmem>>, %arg6: memref<8x128xf32, #tpu.memory_space<vmem>>) attributes {dimension_semantics = [#tpu.dimension_semantics<parallel>, #tpu.dimension_semantics<parallel>, #tpu.dimension_semantics<arbitrary>], iteration_bounds = array<i64: 1, 1, 4>, scalar_prefetch = 0 : i64, scratch_operands = 1 : i64, tpu.core_type = #tpu.core_type<tc>, window_params = [{transform_indices = @transform_0, window_bounds = array<i64: 8, 2048>}, {transform_indices = @transform_1, window_bounds = array<i64: 2048, 128>}, {transform_indices = @transform_2, window_bounds = array<i64: 8, 128>}]} {
    %c0_i32 = arith.constant 0 : i32
    %0 = arith.cmpi eq, %arg2, %c0_i32 : i32
    %1 = arith.extui %0 : i1 to i32
    %c0_i32_0 = arith.constant 0 : i32
    %2 = arith.cmpi ne, %1, %c0_i32_0 : i32
    scf.if %2 {
      %cst_9 = arith.constant 0.000000e+00 : f32
      %12 = vector.broadcast %cst_9 : f32 to vector<8x128xf32>
      %c0_10 = arith.constant 0 : index
      %c0_11 = arith.constant 0 : index
      %13 = vector.load %arg6[%c0_10, %c0_11] : memref<8x128xf32, #tpu.memory_space<vmem>>, vector<8x128xf32>
      tpu.vector_store %arg6[%c0_10, %c0_11], %12 {strides = array<i32>} : memref<8x128xf32, #tpu.memory_space<vmem>>, vector<8x128xf32>,
    } else {
    }
    %c0 = arith.constant 0 : index
    %c0_1 = arith.constant 0 : index
    %3 = vector.load %arg6[%c0, %c0_1] : memref<8x128xf32, #tpu.memory_space<vmem>>, vector<8x128xf32>
    %c0_2 = arith.constant 0 : index
    %c0_3 = arith.constant 0 : index
    %4 = vector.load %arg3[%c0_2, %c0_3] : memref<8x2048xbf16, #tpu.memory_space<vmem>>, vector<8x2048xbf16>
    %c0_4 = arith.constant 0 : index
    %c0_5 = arith.constant 0 : index
    %5 = vector.load %arg4[%c0_4, %c0_5] : memref<2048x128xbf16, #tpu.memory_space<vmem>>, vector<2048x128xbf16>
    %cst = arith.constant dense<0.000000e+00> : vector<8x128xf32>
    %6 = tpu.matmul %4, %5, %cst {dimension_numbers = #tpu.dot_dimension_numbers<[1], [0], [0], [1], [0, 0, 1, 1], [], []>} : vector<8x2048xbf16>, vector<2048x128xbf16>, vector<8x128xf32> -> vector<8x128xf32>
    %7 = arith.addf %3, %6 : vector<8x128xf32>
    %c0_6 = arith.constant 0 : index
    %c0_7 = arith.constant 0 : index
    %8 = vector.load %arg6[%c0_6, %c0_7] : memref<8x128xf32, #tpu.memory_space<vmem>>, vector<8x128xf32>
    tpu.vector_store %arg6[%c0_6, %c0_7], %7 {strides = array<i32>} : memref<8x128xf32, #tpu.memory_space<vmem>>, vector<8x128xf32>,
    %c3_i32 = arith.constant 3 : i32
    %9 = arith.cmpi eq, %arg2, %c3_i32 : i32
    %10 = arith.extui %9 : i1 to i32
    %c0_i32_8 = arith.constant 0 : i32
    %11 = arith.cmpi ne, %10, %c0_i32_8 : i32
    scf.if %11 {
      %c0_9 = arith.constant 0 : index
      %c0_10 = arith.constant 0 : index
      %12 = vector.load %arg6[%c0_9, %c0_10] : memref<8x128xf32, #tpu.memory_space<vmem>>, vector<8x128xf32>
      %c0_11 = arith.constant 0 : index
      %c0_12 = arith.constant 0 : index
      %13 = vector.load %arg5[%c0_11, %c0_12] : memref<8x128xf32, #tpu.memory_space<vmem>>, vector<8x128xf32>
      tpu.vector_store %arg5[%c0_11, %c0_12], %12 {strides = array<i32>} : memref<8x128xf32, #tpu.memory_space<vmem>>, vector<8x128xf32>,
    } else {
    }
    return
  }
  func.func @transform_0(%arg0: i32, %arg1: i32, %arg2: i32) -> (i32, i32) {
    %c0_i32 = arith.constant 0 : i32
    return %arg0, %arg2 : i32, i32
  }
  func.func @transform_1(%arg0: i32, %arg1: i32, %arg2: i32) -> (i32, i32) {
    %c0_i32 = arith.constant 0 : i32
    return %arg2, %arg1 : i32, i32
  }
  func.func @transform_2(%arg0: i32, %arg1: i32, %arg2: i32) -> (i32, i32) {
    %c0_i32 = arith.constant 0 : i32
    return %arg0, %arg1 : i32, i32
  }
}

module attributes {stable_mosaic.version = 11 : i64} {
  func.func @_matmul_kernel(%arg0: i32, %arg1: i32, %arg2: i32, %arg3: memref<128x128xbf16, #tpu.memory_space<vmem>>, %arg4: memref<128x128xbf16, #tpu.memory_space<vmem>>, %arg5: memref<128x128xf32, #tpu.memory_space<vmem>>, %arg6: memref<128x128xf32, #tpu.memory_space<vmem>>) attributes {dimension_semantics = [#tpu.dimension_semantics<parallel>, #tpu.dimension_semantics<parallel>, #tpu.dimension_semantics<arbitrary>], iteration_bounds = array<i64: 4, 1, 1>, scalar_prefetch = 0 : i64, scratch_operands = 1 : i64, tpu.core_type = #tpu.core_type<tc>, window_params = [{transform_indices = @transform_0, window_bounds = array<i64: 128, 128>}, {transform_indices = @transform_1, window_bounds = array<i64: 128, 128>}, {transform_indices = @transform_2, window_bounds = array<i64: 128, 128>}]} {
    %c0_i32 = arith.constant 0 : i32
    %0 = arith.cmpi eq, %arg2, %c0_i32 : i32
    %1 = arith.extui %0 : i1 to i32
    %c0_i32_0 = arith.constant 0 : i32
    %2 = arith.cmpi ne, %1, %c0_i32_0 : i32
    scf.if %2 {
      %cst_10 = arith.constant 0.000000e+00 : f32
      %12 = vector.broadcast %cst_10 : f32 to vector<128x128xf32>
      %c0_11 = arith.constant 0 : index
      %c0_12 = arith.constant 0 : index
      %13 = vector.load %arg6[%c0_11, %c0_12] : memref<128x128xf32, #tpu.memory_space<vmem>>, vector<128x128xf32>
      tpu.vector_store %arg6[%c0_11, %c0_12], %12 {strides = array<i32>} : memref<128x128xf32, #tpu.memory_space<vmem>>, vector<128x128xf32>,
    } else {
    }
    %c0 = arith.constant 0 : index
    %c0_1 = arith.constant 0 : index
    %3 = vector.load %arg6[%c0, %c0_1] : memref<128x128xf32, #tpu.memory_space<vmem>>, vector<128x128xf32>
    %c0_2 = arith.constant 0 : index
    %c0_3 = arith.constant 0 : index
    %4 = vector.load %arg3[%c0_2, %c0_3] : memref<128x128xbf16, #tpu.memory_space<vmem>>, vector<128x128xbf16>
    %c0_4 = arith.constant 0 : index
    %c0_5 = arith.constant 0 : index
    %5 = vector.load %arg4[%c0_4, %c0_5] : memref<128x128xbf16, #tpu.memory_space<vmem>>, vector<128x128xbf16>
    %cst = arith.constant dense<0.000000e+00> : vector<128x128xf32>
    %6 = tpu.matmul %4, %5, %cst {dimension_numbers = #tpu.dot_dimension_numbers<[1], [0], [0], [1], [0, 0, 1, 1], [], []>} : vector<128x128xbf16>, vector<128x128xbf16>, vector<128x128xf32> -> vector<128x128xf32>
    %7 = arith.addf %3, %6 : vector<128x128xf32>
    %c0_6 = arith.constant 0 : index
    %c0_7 = arith.constant 0 : index
    %8 = vector.load %arg6[%c0_6, %c0_7] : memref<128x128xf32, #tpu.memory_space<vmem>>, vector<128x128xf32>
    tpu.vector_store %arg6[%c0_6, %c0_7], %7 {strides = array<i32>} : memref<128x128xf32, #tpu.memory_space<vmem>>, vector<128x128xf32>,
    %c0_i32_8 = arith.constant 0 : i32
    %9 = arith.cmpi eq, %arg2, %c0_i32_8 : i32
    %10 = arith.extui %9 : i1 to i32
    %c0_i32_9 = arith.constant 0 : i32
    %11 = arith.cmpi ne, %10, %c0_i32_9 : i32
    scf.if %11 {
      %c0_10 = arith.constant 0 : index
      %c0_11 = arith.constant 0 : index
      %12 = vector.load %arg6[%c0_10, %c0_11] : memref<128x128xf32, #tpu.memory_space<vmem>>, vector<128x128xf32>
      %c0_12 = arith.constant 0 : index
      %c0_13 = arith.constant 0 : index
      %13 = vector.load %arg5[%c0_12, %c0_13] : memref<128x128xf32, #tpu.memory_space<vmem>>, vector<128x128xf32>
      tpu.vector_store %arg5[%c0_12, %c0_13], %12 {strides = array<i32>} : memref<128x128xf32, #tpu.memory_space<vmem>>, vector<128x128xf32>,
    } else {
    }
    return
  }
  func.func @transform_0(%arg0: i32, %arg1: i32, %arg2: i32) -> (i32, i32) {
    %c0_i32 = arith.constant 0 : i32
    return %arg0, %arg2 : i32, i32
  }
  func.func @transform_1(%arg0: i32, %arg1: i32, %arg2: i32) -> (i32, i32) {
    %c0_i32 = arith.constant 0 : i32
    return %arg2, %arg1 : i32, i32
  }
  func.func @transform_2(%arg0: i32, %arg1: i32, %arg2: i32) -> (i32, i32) {
    %c0_i32 = arith.constant 0 : i32
    return %arg0, %arg1 : i32, i32
  }
}

module attributes {stable_mosaic.version = 11 : i64} {
  func.func @_matmul_kernel(%arg0: i32, %arg1: i32, %arg2: i32, %arg3: memref<128x128xbf16, #tpu.memory_space<vmem>>, %arg4: memref<128x256xbf16, #tpu.memory_space<vmem>>, %arg5: memref<128x256xf32, #tpu.memory_space<vmem>>, %arg6: memref<128x256xf32, #tpu.memory_space<vmem>>) attributes {dimension_semantics = [#tpu.dimension_semantics<parallel>, #tpu.dimension_semantics<parallel>, #tpu.dimension_semantics<arbitrary>], iteration_bounds = array<i64: 4, 5, 1>, scalar_prefetch = 0 : i64, scratch_operands = 1 : i64, tpu.core_type = #tpu.core_type<tc>, window_params = [{transform_indices = @transform_0, window_bounds = array<i64: 128, 128>}, {transform_indices = @transform_1, window_bounds = array<i64: 128, 256>}, {transform_indices = @transform_2, window_bounds = array<i64: 128, 256>}]} {
    %c0_i32 = arith.constant 0 : i32
    %0 = arith.cmpi eq, %arg2, %c0_i32 : i32
    %1 = arith.extui %0 : i1 to i32
    %c0_i32_0 = arith.constant 0 : i32
    %2 = arith.cmpi ne, %1, %c0_i32_0 : i32
    scf.if %2 {
      %cst_10 = arith.constant 0.000000e+00 : f32
      %12 = vector.broadcast %cst_10 : f32 to vector<128x256xf32>
      %c0_11 = arith.constant 0 : index
      %c0_12 = arith.constant 0 : index
      %13 = vector.load %arg6[%c0_11, %c0_12] : memref<128x256xf32, #tpu.memory_space<vmem>>, vector<128x256xf32>
      tpu.vector_store %arg6[%c0_11, %c0_12], %12 {strides = array<i32>} : memref<128x256xf32, #tpu.memory_space<vmem>>, vector<128x256xf32>,
    } else {
    }
    %c0 = arith.constant 0 : index
    %c0_1 = arith.constant 0 : index
    %3 = vector.load %arg6[%c0, %c0_1] : memref<128x256xf32, #tpu.memory_space<vmem>>, vector<128x256xf32>
    %c0_2 = arith.constant 0 : index
    %c0_3 = arith.constant 0 : index
    %4 = vector.load %arg3[%c0_2, %c0_3] : memref<128x128xbf16, #tpu.memory_space<vmem>>, vector<128x128xbf16>
    %c0_4 = arith.constant 0 : index
    %c0_5 = arith.constant 0 : index
    %5 = vector.load %arg4[%c0_4, %c0_5] : memref<128x256xbf16, #tpu.memory_space<vmem>>, vector<128x256xbf16>
    %cst = arith.constant dense<0.000000e+00> : vector<128x256xf32>
    %6 = tpu.matmul %4, %5, %cst {dimension_numbers = #tpu.dot_dimension_numbers<[1], [0], [0], [1], [0, 0, 1, 1], [], []>} : vector<128x128xbf16>, vector<128x256xbf16>, vector<128x256xf32> -> vector<128x256xf32>
    %7 = arith.addf %3, %6 : vector<128x256xf32>
    %c0_6 = arith.constant 0 : index
    %c0_7 = arith.constant 0 : index
    %8 = vector.load %arg6[%c0_6, %c0_7] : memref<128x256xf32, #tpu.memory_space<vmem>>, vector<128x256xf32>
    tpu.vector_store %arg6[%c0_6, %c0_7], %7 {strides = array<i32>} : memref<128x256xf32, #tpu.memory_space<vmem>>, vector<128x256xf32>,
    %c0_i32_8 = arith.constant 0 : i32
    %9 = arith.cmpi eq, %arg2, %c0_i32_8 : i32
    %10 = arith.extui %9 : i1 to i32
    %c0_i32_9 = arith.constant 0 : i32
    %11 = arith.cmpi ne, %10, %c0_i32_9 : i32
    scf.if %11 {
      %c0_10 = arith.constant 0 : index
      %c0_11 = arith.constant 0 : index
      %12 = vector.load %arg6[%c0_10, %c0_11] : memref<128x256xf32, #tpu.memory_space<vmem>>, vector<128x256xf32>
      %c0_12 = arith.constant 0 : index
      %c0_13 = arith.constant 0 : index
      %13 = vector.load %arg5[%c0_12, %c0_13] : memref<128x256xf32, #tpu.memory_space<vmem>>, vector<128x256xf32>
      tpu.vector_store %arg5[%c0_12, %c0_13], %12 {strides = array<i32>} : memref<128x256xf32, #tpu.memory_space<vmem>>, vector<128x256xf32>,
    } else {
    }
    return
  }
  func.func @transform_0(%arg0: i32, %arg1: i32, %arg2: i32) -> (i32, i32) {
    %c0_i32 = arith.constant 0 : i32
    return %arg0, %arg2 : i32, i32
  }
  func.func @transform_1(%arg0: i32, %arg1: i32, %arg2: i32) -> (i32, i32) {
    %c0_i32 = arith.constant 0 : i32
    return %arg2, %arg1 : i32, i32
  }
  func.func @transform_2(%arg0: i32, %arg1: i32, %arg2: i32) -> (i32, i32) {
    %c0_i32 = arith.constant 0 : i32
    return %arg0, %arg1 : i32, i32
  }
}

module attributes {stable_mosaic.version = 11 : i64} {
  func.func @_matmul_kernel(%arg0: i32, %arg1: i32, %arg2: i32, %arg3: memref<8x1280xbf16, #tpu.memory_space<vmem>>, %arg4: memref<1280x128xbf16, #tpu.memory_space<vmem>>, %arg5: memref<8x128xf32, #tpu.memory_space<vmem>>, %arg6: memref<8x128xf32, #tpu.memory_space<vmem>>) attributes {dimension_semantics = [#tpu.dimension_semantics<parallel>, #tpu.dimension_semantics<parallel>, #tpu.dimension_semantics<arbitrary>], iteration_bounds = array<i64: 1, 1, 1>, scalar_prefetch = 0 : i64, scratch_operands = 1 : i64, tpu.core_type = #tpu.core_type<tc>, window_params = [{transform_indices = @transform_0, window_bounds = array<i64: 8, 1280>}, {transform_indices = @transform_1, window_bounds = array<i64: 1280, 128>}, {transform_indices = @transform_2, window_bounds = array<i64: 8, 128>}]} {
    %c0_i32 = arith.constant 0 : i32
    %0 = arith.cmpi eq, %arg2, %c0_i32 : i32
    %1 = arith.extui %0 : i1 to i32
    %c0_i32_0 = arith.constant 0 : i32
    %2 = arith.cmpi ne, %1, %c0_i32_0 : i32
    scf.if %2 {
      %cst_10 = arith.constant 0.000000e+00 : f32
      %12 = vector.broadcast %cst_10 : f32 to vector<8x128xf32>
      %c0_11 = arith.constant 0 : index
      %c0_12 = arith.constant 0 : index
      %13 = vector.load %arg6[%c0_11, %c0_12] : memref<8x128xf32, #tpu.memory_space<vmem>>, vector<8x128xf32>
      tpu.vector_store %arg6[%c0_11, %c0_12], %12 {strides = array<i32>} : memref<8x128xf32, #tpu.memory_space<vmem>>, vector<8x128xf32>,
    } else {
    }
    %c0 = arith.constant 0 : index
    %c0_1 = arith.constant 0 : index
    %3 = vector.load %arg6[%c0, %c0_1] : memref<8x128xf32, #tpu.memory_space<vmem>>, vector<8x128xf32>
    %c0_2 = arith.constant 0 : index
    %c0_3 = arith.constant 0 : index
    %4 = vector.load %arg3[%c0_2, %c0_3] : memref<8x1280xbf16, #tpu.memory_space<vmem>>, vector<8x1280xbf16>
    %c0_4 = arith.constant 0 : index
    %c0_5 = arith.constant 0 : index
    %5 = vector.load %arg4[%c0_4, %c0_5] : memref<1280x128xbf16, #tpu.memory_space<vmem>>, vector<1280x128xbf16>
    %cst = arith.constant dense<0.000000e+00> : vector<8x128xf32>
    %6 = tpu.matmul %4, %5, %cst {dimension_numbers = #tpu.dot_dimension_numbers<[1], [0], [0], [1], [0, 0, 1, 1], [], []>} : vector<8x1280xbf16>, vector<1280x128xbf16>, vector<8x128xf32> -> vector<8x128xf32>
    %7 = arith.addf %3, %6 : vector<8x128xf32>
    %c0_6 = arith.constant 0 : index
    %c0_7 = arith.constant 0 : index
    %8 = vector.load %arg6[%c0_6, %c0_7] : memref<8x128xf32, #tpu.memory_space<vmem>>, vector<8x128xf32>
    tpu.vector_store %arg6[%c0_6, %c0_7], %7 {strides = array<i32>} : memref<8x128xf32, #tpu.memory_space<vmem>>, vector<8x128xf32>,
    %c0_i32_8 = arith.constant 0 : i32
    %9 = arith.cmpi eq, %arg2, %c0_i32_8 : i32
    %10 = arith.extui %9 : i1 to i32
    %c0_i32_9 = arith.constant 0 : i32
    %11 = arith.cmpi ne, %10, %c0_i32_9 : i32
    scf.if %11 {
      %c0_10 = arith.constant 0 : index
      %c0_11 = arith.constant 0 : index
      %12 = vector.load %arg6[%c0_10, %c0_11] : memref<8x128xf32, #tpu.memory_space<vmem>>, vector<8x128xf32>
      %c0_12 = arith.constant 0 : index
      %c0_13 = arith.constant 0 : index
      %13 = vector.load %arg5[%c0_12, %c0_13] : memref<8x128xf32, #tpu.memory_space<vmem>>, vector<8x128xf32>
      tpu.vector_store %arg5[%c0_12, %c0_13], %12 {strides = array<i32>} : memref<8x128xf32, #tpu.memory_space<vmem>>, vector<8x128xf32>,
    } else {
    }
    return
  }
  func.func @transform_0(%arg0: i32, %arg1: i32, %arg2: i32) -> (i32, i32) {
    %c0_i32 = arith.constant 0 : i32
    return %arg0, %arg2 : i32, i32
  }
  func.func @transform_1(%arg0: i32, %arg1: i32, %arg2: i32) -> (i32, i32) {
    %c0_i32 = arith.constant 0 : i32
    return %arg2, %arg1 : i32, i32
  }
  func.func @transform_2(%arg0: i32, %arg1: i32, %arg2: i32) -> (i32, i32) {
    %c0_i32 = arith.constant 0 : i32
    return %arg0, %arg1 : i32, i32
  }
}

module attributes {stable_mosaic.version = 11 : i64} {
  func.func @_matmul_kernel(%arg0: i32, %arg1: i32, %arg2: i32, %arg3: memref<16x128xbf16, #tpu.memory_space<vmem>>, %arg4: memref<128x256xbf16, #tpu.memory_space<vmem>>, %arg5: memref<16x256xf32, #tpu.memory_space<vmem>>, %arg6: memref<16x256xf32, #tpu.memory_space<vmem>>) attributes {dimension_semantics = [#tpu.dimension_semantics<parallel>, #tpu.dimension_semantics<parallel>, #tpu.dimension_semantics<arbitrary>], iteration_bounds = array<i64: 1, 2, 1>, scalar_prefetch = 0 : i64, scratch_operands = 1 : i64, tpu.core_type = #tpu.core_type<tc>, window_params = [{transform_indices = @transform_0, window_bounds = array<i64: 16, 128>}, {transform_indices = @transform_1, window_bounds = array<i64: 128, 256>}, {transform_indices = @transform_2, window_bounds = array<i64: 16, 256>}]} {
    %c0_i32 = arith.constant 0 : i32
    %0 = arith.cmpi eq, %arg2, %c0_i32 : i32
    %1 = arith.extui %0 : i1 to i32
    %c0_i32_0 = arith.constant 0 : i32
    %2 = arith.cmpi ne, %1, %c0_i32_0 : i32
    scf.if %2 {
      %cst_10 = arith.constant 0.000000e+00 : f32
      %12 = vector.broadcast %cst_10 : f32 to vector<16x256xf32>
      %c0_11 = arith.constant 0 : index
      %c0_12 = arith.constant 0 : index
      %13 = vector.load %arg6[%c0_11, %c0_12] : memref<16x256xf32, #tpu.memory_space<vmem>>, vector<16x256xf32>
      tpu.vector_store %arg6[%c0_11, %c0_12], %12 {strides = array<i32>} : memref<16x256xf32, #tpu.memory_space<vmem>>, vector<16x256xf32>,
    } else {
    }
    %c0 = arith.constant 0 : index
    %c0_1 = arith.constant 0 : index
    %3 = vector.load %arg6[%c0, %c0_1] : memref<16x256xf32, #tpu.memory_space<vmem>>, vector<16x256xf32>
    %c0_2 = arith.constant 0 : index
    %c0_3 = arith.constant 0 : index
    %4 = vector.load %arg3[%c0_2, %c0_3] : memref<16x128xbf16, #tpu.memory_space<vmem>>, vector<16x128xbf16>
    %c0_4 = arith.constant 0 : index
    %c0_5 = arith.constant 0 : index
    %5 = vector.load %arg4[%c0_4, %c0_5] : memref<128x256xbf16, #tpu.memory_space<vmem>>, vector<128x256xbf16>
    %cst = arith.constant dense<0.000000e+00> : vector<16x256xf32>
    %6 = tpu.matmul %4, %5, %cst {dimension_numbers = #tpu.dot_dimension_numbers<[1], [0], [0], [1], [0, 0, 1, 1], [], []>} : vector<16x128xbf16>, vector<128x256xbf16>, vector<16x256xf32> -> vector<16x256xf32>
    %7 = arith.addf %3, %6 : vector<16x256xf32>
    %c0_6 = arith.constant 0 : index
    %c0_7 = arith.constant 0 : index
    %8 = vector.load %arg6[%c0_6, %c0_7] : memref<16x256xf32, #tpu.memory_space<vmem>>, vector<16x256xf32>
    tpu.vector_store %arg6[%c0_6, %c0_7], %7 {strides = array<i32>} : memref<16x256xf32, #tpu.memory_space<vmem>>, vector<16x256xf32>,
    %c0_i32_8 = arith.constant 0 : i32
    %9 = arith.cmpi eq, %arg2, %c0_i32_8 : i32
    %10 = arith.extui %9 : i1 to i32
    %c0_i32_9 = arith.constant 0 : i32
    %11 = arith.cmpi ne, %10, %c0_i32_9 : i32
    scf.if %11 {
      %c0_10 = arith.constant 0 : index
      %c0_11 = arith.constant 0 : index
      %12 = vector.load %arg6[%c0_10, %c0_11] : memref<16x256xf32, #tpu.memory_space<vmem>>, vector<16x256xf32>
      %c0_12 = arith.constant 0 : index
      %c0_13 = arith.constant 0 : index
      %13 = vector.load %arg5[%c0_12, %c0_13] : memref<16x256xf32, #tpu.memory_space<vmem>>, vector<16x256xf32>
      tpu.vector_store %arg5[%c0_12, %c0_13], %12 {strides = array<i32>} : memref<16x256xf32, #tpu.memory_space<vmem>>, vector<16x256xf32>,
    } else {
    }
    return
  }
  func.func @transform_0(%arg0: i32, %arg1: i32, %arg2: i32) -> (i32, i32) {
    %c0_i32 = arith.constant 0 : i32
    return %arg0, %arg2 : i32, i32
  }
  func.func @transform_1(%arg0: i32, %arg1: i32, %arg2: i32) -> (i32, i32) {
    %c0_i32 = arith.constant 0 : i32
    return %arg2, %arg1 : i32, i32
  }
  func.func @transform_2(%arg0: i32, %arg1: i32, %arg2: i32) -> (i32, i32) {
    %c0_i32 = arith.constant 0 : i32
    return %arg0, %arg1 : i32, i32
  }
}

module attributes {stable_mosaic.version = 11 : i64} {
  func.func @_bilstm_seq_kernel(%arg0: i32, %arg1: memref<1x8x512xf32, #tpu.memory_space<vmem>>, %arg2: memref<128x512xbf16, #tpu.memory_space<vmem>>, %arg3: memref<1x8x128xf32, #tpu.memory_space<vmem>>, %arg4: memref<8x128xf32, #tpu.memory_space<vmem>>, %arg5: memref<8x128xf32, #tpu.memory_space<vmem>>) attributes {dimension_semantics = [#tpu.dimension_semantics<arbitrary>], iteration_bounds = array<i64: 8>, scalar_prefetch = 0 : i64, scratch_operands = 2 : i64, tpu.core_type = #tpu.core_type<tc>, window_params = [{transform_indices = @transform_0, window_bounds = array<i64: 1, 8, 512>}, {pipeline_mode = #tpu.pipeline_mode<synchronous>, transform_indices = @transform_1, window_bounds = array<i64: 128, 512>}, {transform_indices = @transform_2, window_bounds = array<i64: 1, 8, 128>}]} {
    %c0_i32 = arith.constant 0 : i32
    %0 = arith.cmpi eq, %arg0, %c0_i32 : i32
    %1 = arith.extui %0 : i1 to i32
    %c0_i32_0 = arith.constant 0 : i32
    %2 = arith.cmpi ne, %1, %c0_i32_0 : i32
    scf.if %2 {
      %cst_19 = arith.constant 0.000000e+00 : f32
      %41 = vector.broadcast %cst_19 : f32 to vector<8x128xf32>
      %c0_20 = arith.constant 0 : index
      %c0_21 = arith.constant 0 : index
      %42 = vector.load %arg4[%c0_20, %c0_21] : memref<8x128xf32, #tpu.memory_space<vmem>>, vector<8x128xf32>
      tpu.vector_store %arg4[%c0_20, %c0_21], %41 {strides = array<i32>} : memref<8x128xf32, #tpu.memory_space<vmem>>, vector<8x128xf32>,
      %cst_22 = arith.constant 0.000000e+00 : f32
      %43 = vector.broadcast %cst_22 : f32 to vector<8x128xf32>
      %c0_23 = arith.constant 0 : index
      %c0_24 = arith.constant 0 : index
      %44 = vector.load %arg5[%c0_23, %c0_24] : memref<8x128xf32, #tpu.memory_space<vmem>>, vector<8x128xf32>
      tpu.vector_store %arg5[%c0_23, %c0_24], %43 {strides = array<i32>} : memref<8x128xf32, #tpu.memory_space<vmem>>, vector<8x128xf32>,
    } else {
    }
    %c0 = arith.constant 0 : index
    %c0_1 = arith.constant 0 : index
    %c0_2 = arith.constant 0 : index
    %3 = vector.load %arg1[%c0, %c0_1, %c0_2] : memref<1x8x512xf32, #tpu.memory_space<vmem>>, vector<1x8x512xf32>
    %4 = vector.shape_cast %3 : vector<1x8x512xf32> to vector<8x512xf32>
    %c0_3 = arith.constant 0 : index
    %c0_4 = arith.constant 0 : index
    %5 = vector.load %arg4[%c0_3, %c0_4] : memref<8x128xf32, #tpu.memory_space<vmem>>, vector<8x128xf32>
    %6 = arith.truncf %5 : vector<8x128xf32> to vector<8x128xbf16>
    %c0_5 = arith.constant 0 : index
    %c0_6 = arith.constant 0 : index
    %7 = vector.load %arg2[%c0_5, %c0_6] : memref<128x512xbf16, #tpu.memory_space<vmem>>, vector<128x512xbf16>
    %cst = arith.constant dense<0.000000e+00> : vector<8x512xf32>
    %8 = tpu.matmul %6, %7, %cst {dimension_numbers = #tpu.dot_dimension_numbers<[1], [0], [0], [1], [0, 0, 1, 1], [], []>} : vector<8x128xbf16>, vector<128x512xbf16>, vector<8x512xf32> -> vector<8x512xf32>
    %9 = arith.addf %4, %8 : vector<8x512xf32>
    %10 = vector.extract_strided_slice %9 {offsets = [0, 0], sizes = [8, 128], strides = [1, 1]} : vector<8x512xf32> to vector<8x128xf32>
    %11 = arith.negf %10 : vector<8x128xf32>
    %12 = math.exp %11 : vector<8x128xf32>
    %cst_7 = arith.constant 1.000000e+00 : f32
    %13 = vector.broadcast %cst_7 : f32 to vector<8x128xf32>
    %14 = arith.addf %13, %12 : vector<8x128xf32>
    %15 = arith.divf %13, %14 : vector<8x128xf32>
    %16 = vector.extract_strided_slice %9 {offsets = [0, 128], sizes = [8, 128], strides = [1, 1]} : vector<8x512xf32> to vector<8x128xf32>
    %17 = arith.negf %16 : vector<8x128xf32>
    %18 = math.exp %17 : vector<8x128xf32>
    %cst_8 = arith.constant 1.000000e+00 : f32
    %19 = vector.broadcast %cst_8 : f32 to vector<8x128xf32>
    %20 = arith.addf %19, %18 : vector<8x128xf32>
    %21 = arith.divf %19, %20 : vector<8x128xf32>
    %22 = vector.extract_strided_slice %9 {offsets = [0, 256], sizes = [8, 128], strides = [1, 1]} : vector<8x512xf32> to vector<8x128xf32>
    %23 = math.tanh %22 : vector<8x128xf32>
    %24 = vector.extract_strided_slice %9 {offsets = [0, 384], sizes = [8, 128], strides = [1, 1]} : vector<8x512xf32> to vector<8x128xf32>
    %25 = arith.negf %24 : vector<8x128xf32>
    %26 = math.exp %25 : vector<8x128xf32>
    %cst_9 = arith.constant 1.000000e+00 : f32
    %27 = vector.broadcast %cst_9 : f32 to vector<8x128xf32>
    %28 = arith.addf %27, %26 : vector<8x128xf32>
    %29 = arith.divf %27, %28 : vector<8x128xf32>
    %c0_10 = arith.constant 0 : index
    %c0_11 = arith.constant 0 : index
    %30 = vector.load %arg5[%c0_10, %c0_11] : memref<8x128xf32, #tpu.memory_space<vmem>>, vector<8x128xf32>
    %31 = arith.mulf %21, %30 : vector<8x128xf32>
    %32 = arith.mulf %15, %23 : vector<8x128xf32>
    %33 = arith.addf %31, %32 : vector<8x128xf32>
    %34 = math.tanh %33 : vector<8x128xf32>
    %35 = arith.mulf %29, %34 : vector<8x128xf32>
    %c0_12 = arith.constant 0 : index
    %c0_13 = arith.constant 0 : index
    %36 = vector.load %arg5[%c0_12, %c0_13] : memref<8x128xf32, #tpu.memory_space<vmem>>, vector<8x128xf32>
    tpu.vector_store %arg5[%c0_12, %c0_13], %33 {strides = array<i32>} : memref<8x128xf32, #tpu.memory_space<vmem>>, vector<8x128xf32>,
    %c0_14 = arith.constant 0 : index
    %c0_15 = arith.constant 0 : index
    %37 = vector.load %arg4[%c0_14, %c0_15] : memref<8x128xf32, #tpu.memory_space<vmem>>, vector<8x128xf32>
    tpu.vector_store %arg4[%c0_14, %c0_15], %35 {strides = array<i32>} : memref<8x128xf32, #tpu.memory_space<vmem>>, vector<8x128xf32>,
    %c0_16 = arith.constant 0 : index
    %c0_17 = arith.constant 0 : index
    %c0_18 = arith.constant 0 : index
    %38 = vector.load %arg3[%c0_16, %c0_17, %c0_18] : memref<1x8x128xf32, #tpu.memory_space<vmem>>, vector<1x8x128xf32>
    %39 = vector.shape_cast %38 : vector<1x8x128xf32> to vector<8x128xf32>
    %40 = vector.shape_cast %35 : vector<8x128xf32> to vector<1x8x128xf32>
    tpu.vector_store %arg3[%c0_16, %c0_17, %c0_18], %40 {strides = array<i32>} : memref<1x8x128xf32, #tpu.memory_space<vmem>>, vector<1x8x128xf32>,
    return
  }
  func.func @transform_0(%arg0: i32) -> (i32, i32, i32) {
    %c0_i32 = arith.constant 0 : i32
    %c0_i32_0 = arith.constant 0 : i32
    %c0_i32_1 = arith.constant 0 : i32
    return %arg0, %c0_i32, %c0_i32_0 : i32, i32, i32
  }
  func.func @transform_1(%arg0: i32) -> (i32, i32) {
    %c0_i32 = arith.constant 0 : i32
    %c0_i32_0 = arith.constant 0 : i32
    %c0_i32_1 = arith.constant 0 : i32
    return %c0_i32, %c0_i32_0 : i32, i32
  }
  func.func @transform_2(%arg0: i32) -> (i32, i32, i32) {
    %c0_i32 = arith.constant 0 : i32
    %c0_i32_0 = arith.constant 0 : i32
    %c0_i32_1 = arith.constant 0 : i32
    return %arg0, %c0_i32, %c0_i32_0 : i32, i32, i32
  }
}

module attributes {stable_mosaic.version = 11 : i64} {
  func.func @_matmul_kernel(%arg0: i32, %arg1: i32, %arg2: i32, %arg3: memref<8x128xbf16, #tpu.memory_space<vmem>>, %arg4: memref<128x128xbf16, #tpu.memory_space<vmem>>, %arg5: memref<8x128xf32, #tpu.memory_space<vmem>>, %arg6: memref<8x128xf32, #tpu.memory_space<vmem>>) attributes {dimension_semantics = [#tpu.dimension_semantics<parallel>, #tpu.dimension_semantics<parallel>, #tpu.dimension_semantics<arbitrary>], iteration_bounds = array<i64: 1, 1, 1>, scalar_prefetch = 0 : i64, scratch_operands = 1 : i64, tpu.core_type = #tpu.core_type<tc>, window_params = [{transform_indices = @transform_0, window_bounds = array<i64: 8, 128>}, {transform_indices = @transform_1, window_bounds = array<i64: 128, 128>}, {transform_indices = @transform_2, window_bounds = array<i64: 8, 128>}]} {
    %c0_i32 = arith.constant 0 : i32
    %0 = arith.cmpi eq, %arg2, %c0_i32 : i32
    %1 = arith.extui %0 : i1 to i32
    %c0_i32_0 = arith.constant 0 : i32
    %2 = arith.cmpi ne, %1, %c0_i32_0 : i32
    scf.if %2 {
      %cst_10 = arith.constant 0.000000e+00 : f32
      %12 = vector.broadcast %cst_10 : f32 to vector<8x128xf32>
      %c0_11 = arith.constant 0 : index
      %c0_12 = arith.constant 0 : index
      %13 = vector.load %arg6[%c0_11, %c0_12] : memref<8x128xf32, #tpu.memory_space<vmem>>, vector<8x128xf32>
      tpu.vector_store %arg6[%c0_11, %c0_12], %12 {strides = array<i32>} : memref<8x128xf32, #tpu.memory_space<vmem>>, vector<8x128xf32>,
    } else {
    }
    %c0 = arith.constant 0 : index
    %c0_1 = arith.constant 0 : index
    %3 = vector.load %arg6[%c0, %c0_1] : memref<8x128xf32, #tpu.memory_space<vmem>>, vector<8x128xf32>
    %c0_2 = arith.constant 0 : index
    %c0_3 = arith.constant 0 : index
    %4 = vector.load %arg3[%c0_2, %c0_3] : memref<8x128xbf16, #tpu.memory_space<vmem>>, vector<8x128xbf16>
    %c0_4 = arith.constant 0 : index
    %c0_5 = arith.constant 0 : index
    %5 = vector.load %arg4[%c0_4, %c0_5] : memref<128x128xbf16, #tpu.memory_space<vmem>>, vector<128x128xbf16>
    %cst = arith.constant dense<0.000000e+00> : vector<8x128xf32>
    %6 = tpu.matmul %4, %5, %cst {dimension_numbers = #tpu.dot_dimension_numbers<[1], [0], [0], [1], [0, 0, 1, 1], [], []>} : vector<8x128xbf16>, vector<128x128xbf16>, vector<8x128xf32> -> vector<8x128xf32>
    %7 = arith.addf %3, %6 : vector<8x128xf32>
    %c0_6 = arith.constant 0 : index
    %c0_7 = arith.constant 0 : index
    %8 = vector.load %arg6[%c0_6, %c0_7] : memref<8x128xf32, #tpu.memory_space<vmem>>, vector<8x128xf32>
    tpu.vector_store %arg6[%c0_6, %c0_7], %7 {strides = array<i32>} : memref<8x128xf32, #tpu.memory_space<vmem>>, vector<8x128xf32>,
    %c0_i32_8 = arith.constant 0 : i32
    %9 = arith.cmpi eq, %arg2, %c0_i32_8 : i32
    %10 = arith.extui %9 : i1 to i32
    %c0_i32_9 = arith.constant 0 : i32
    %11 = arith.cmpi ne, %10, %c0_i32_9 : i32
    scf.if %11 {
      %c0_10 = arith.constant 0 : index
      %c0_11 = arith.constant 0 : index
      %12 = vector.load %arg6[%c0_10, %c0_11] : memref<8x128xf32, #tpu.memory_space<vmem>>, vector<8x128xf32>
      %c0_12 = arith.constant 0 : index
      %c0_13 = arith.constant 0 : index
      %13 = vector.load %arg5[%c0_12, %c0_13] : memref<8x128xf32, #tpu.memory_space<vmem>>, vector<8x128xf32>
      tpu.vector_store %arg5[%c0_12, %c0_13], %12 {strides = array<i32>} : memref<8x128xf32, #tpu.memory_space<vmem>>, vector<8x128xf32>,
    } else {
    }
    return
  }
  func.func @transform_0(%arg0: i32, %arg1: i32, %arg2: i32) -> (i32, i32) {
    %c0_i32 = arith.constant 0 : i32
    return %arg0, %arg2 : i32, i32
  }
  func.func @transform_1(%arg0: i32, %arg1: i32, %arg2: i32) -> (i32, i32) {
    %c0_i32 = arith.constant 0 : i32
    return %arg2, %arg1 : i32, i32
  }
  func.func @transform_2(%arg0: i32, %arg1: i32, %arg2: i32) -> (i32, i32) {
    %c0_i32 = arith.constant 0 : i32
    return %arg0, %arg1 : i32, i32
  }
}

</mosaic_0001>

<bundles_post_ra>
// kernel: integration_forward.18
= control target key start
LH: loop header
LB: loop body
LE: loop exit
PB: predicated region body
PF: predicated region fallthrough
CT: control target
= control target key end

     0   :  { %s1207_s9 = smov 0   ;;  %s1209_s10 = smov 0   ;;  %s1483_s0 = inlined_call_operand.vmem [shape: bf16[512,128], index: 0, kind: input, shape index: {}]   ;;  %s1484_s1 = inlined_call_operand.vmem [shape: bf16[128,512], index: 1, kind: input, shape index: {}]   ;;  %s1485_s2 = inlined_call_operand.vmem [shape: f32[512,512], index: 2, kind: output, shape index: {}]  }
   0x1   :  { %s1211_s11 = smov 0   ;;  %s1213_s12 = smov 0  }
   0x2   :  { %s1215_s13 = smov 0   ;;  %s1217_s14 = smov 0  }
   0x3   :  { %s1219_s15 = smov 0   ;;  %s1221_s16 = smov 0  }
   0x4   :  { %s1223_s17 = smov 0  }
   0x5 LB: > { %s953_s18 = sadd.s32 4294967295, %s1189_s17   ;;  %s27_s19 = sadd.s32 1, %s1181_s15  ;;  %s1189_s17 = sphi %s1223_s17, %s12_s17   ;;  %s1185_s16 = sphi %s1221_s16, %s1494_s16   ;;  %s1181_s15 = sphi %s1219_s15, %s1493_s15   ;;  %s1177_s14 = sphi %s1217_s14, %s1492_s14   ;;  %s1173_s13 = sphi %s1215_s13, %s1491_s13   ;;  %s1169_s12 = sphi %s1213_s12, %s1490_s12   ;;  %s1165_s11 = sphi %s1211_s11, %s1489_s11   ;;  %s1161_s10 = sphi %s1209_s10, %s1488_s10   ;;  %s1157_s9 = sphi %s1207_s9, %s1487_s9  }
   0x6   : > { %p29_p0 = scmp.ge.s32.totalorder %s27_s19, 2  ;;  %s31_s20 = sadd.s32 1, %s1185_s16 }
   0x7   : > { %s68_s21 = sadd.s32 1, %s1169_s12  ;;  %p75_p1 = scmp.ne.s32.totalorder %s1169_s12, %s1165_s11 }
   0x8   : > { %s1496_s19 = smov (%p29_p0, %s27_s19), 0  ;;  %s1498_s20 = smov (!%p29_p0, %s31_s20), %s1185_s16 }
   0x9   : > { %s64_s22 = ssub.s32 %s1181_s15, %s1496_s19  ;;  %p76_p2 = scmp.eq.s32.totalorder %s1189_s17, 0 }
   0xa   : > { %p33_p3 = scmp.ge.s32.totalorder %s1498_s20, 4  ;;  %p66_p4 = scmp.eq.s32.totalorder %s64_s22, 0 }
   0xb   : > { %p77_p5 = por %p76_p2, %p75_p1  ;;  %s96_s23 = sadd.s32 1, %s1161_s10 }
   0xc   : > { %s1500_s20 = smov (%p33_p3, %s1498_s20), 0  ;;  %p106_p6 = scmp.ne.s32.totalorder %s1161_s10, %s1157_s9 }
   0xd   : > { %s1268_s24 = scalar_select %p66_p4, %s1169_s12, %s68_s21  }
   0xe   : > { %s91_s25 = ssub.s32 %s1185_s16, %s1500_s20  ;;  %p107_p7 = scmp.eq.s32.totalorder %s953_s18, 7 }
   0xf   : > { %s93_s26 = sor.u32 %s91_s25, %s64_s22  ;;  %p956_p10 = scmp.ge.s32.totalorder %s1189_s17, 8 }
  0x10   : > { %p94_p8 = scmp.eq.s32.totalorder %s93_s26, 0  ;;  %p1274_p9 = por %p107_p7, %p106_p6 }
  0x11   : > { %129 = sbr.rel (%p956_p10) target bundleno = 36 (0x24), region = 16 }
  0x12   : > { %s1279_s28 = scalar_select %p94_p8, %s1161_s10, %s96_s23  }
  0x18   : > { %144 = sbr.rel (!%p77_p5) target bundleno = 36 (0x24), region = 24  ;;  %s146_s29 = sand.u32 (%p77_p5), 1, %s1169_s12  }
  0x19   : > { %s996_s30 = sshll.u32 (%p77_p5), %s1181_s15, 3  ;;  %s957_s3 = sshll.u32 (%p77_p5), %s146_s29, 7 }
  0x1a   : > { %s1287_s6 = scalar_lea.vmem (%p77_p5), %s1484_s1, %s996_s30  ;;  %s148_s7 = scalar_lea.vmem (%p77_p5), [#allocation3], %s957_s3 }
  0x1b   : > { %v212_v0 = vld [vmem:[%s1287_s6] sm:$0xff] (%p77_p5)  ;;  %v214_v1 = vld [vmem:[%s1287_s6 + $0x10] sm:$0xff] (%p77_p5) }
  0x1c   : > { %v216_v2 = vld [vmem:[%s1287_s6 + $0x20] sm:$0xff] (%p77_p5)  ;;  %213 = vst [vmem:[%s148_s7] sm:$0xff] (%p77_p5), %v212_v0  ;;  %215 = vst [vmem:[%s148_s7 + $0x8] sm:$0xff] (%p77_p5), %v214_v1  ;;  %v218_v3 = vld [vmem:[%s1287_s6 + $0x30] sm:$0xff] (%p77_p5) }
  0x1d   : > { %217 = vst [vmem:[%s148_s7 + $0x10] sm:$0xff] (%p77_p5), %v216_v2  ;;  %v220_v4 = vld [vmem:[%s1287_s6 + $0x40] sm:$0xff] (%p77_p5)  ;;  %v222_v5 = vld [vmem:[%s1287_s6 + $0x50] sm:$0xff] (%p77_p5)  ;;  %219 = vst [vmem:[%s148_s7 + $0x18] sm:$0xff] (%p77_p5), %v218_v3 }
  0x1e   : > { %221 = vst [vmem:[%s148_s7 + $0x20] sm:$0xff] (%p77_p5), %v220_v4  ;;  %223 = vst [vmem:[%s148_s7 + $0x28] sm:$0xff] (%p77_p5), %v222_v5  ;;  %v224_v6 = vld [vmem:[%s1287_s6 + $0x60] sm:$0xff] (%p77_p5)  ;;  %v226_v7 = vld [vmem:[%s1287_s6 + $0x70] sm:$0xff] (%p77_p5) }
  0x1f   : > { %v228_v8 = vld [vmem:[%s1287_s6 + $0x80] sm:$0xff]  ;;  %225 = vst [vmem:[%s148_s7 + $0x30] sm:$0xff] %v224_v6  ;;  %227 = vst [vmem:[%s148_s7 + $0x38] sm:$0xff] %v226_v7  ;;  %v230_v9 = vld [vmem:[%s1287_s6 + $0x90] sm:$0xff] }
  0x20   : > { %229 = vst [vmem:[%s148_s7 + $0x40] sm:$0xff] %v228_v8  ;;  %v232_v10 = vld [vmem:[%s1287_s6 + $0xa0] sm:$0xff]  ;;  %v234_v11 = vld [vmem:[%s1287_s6 + $0xb0] sm:$0xff]  ;;  %231 = vst [vmem:[%s148_s7 + $0x48] sm:$0xff] %v230_v9 }
  0x21   : > { %233 = vst [vmem:[%s148_s7 + $0x50] sm:$0xff] %v232_v10  ;;  %235 = vst [vmem:[%s148_s7 + $0x58] sm:$0xff] %v234_v11  ;;  %v236_v12 = vld [vmem:[%s1287_s6 + $0xc0] sm:$0xff]  ;;  %v238_v13 = vld [vmem:[%s1287_s6 + $0xd0] sm:$0xff] }
  0x22   : > { %v240_v14 = vld [vmem:[%s1287_s6 + $0xe0] sm:$0xff]  ;;  %237 = vst [vmem:[%s148_s7 + $0x60] sm:$0xff] %v236_v12  ;;  %239 = vst [vmem:[%s148_s7 + $0x68] sm:$0xff] %v238_v13  ;;  %v242_v15 = vld [vmem:[%s1287_s6 + $0xf0] sm:$0xff] }
  0x23   : > { %241 = vst [vmem:[%s148_s7 + $0x70] sm:$0xff] %v240_v14  ;;  %243 = vst [vmem:[%s148_s7 + $0x78] sm:$0xff] %v242_v15 }
  0x24 PF: > { %p960_p11 = scmp.ge.s32.totalorder %s1189_s17, 1  ;;  %p248_p12 = scmp.lt.s32.totalorder %s1189_s17, 9 }
  0x26   : > { %p249_p13 = pnand %p960_p11, %p248_p12 }
  0x27   : > { %s255_s8 = sand.u32 (!%p249_p13), 1, %s1165_s11   ;;  %s963_s18 = sshll.u32 (!%p249_p13), %s1177_s14, 4  ;;  %v1191_v16 = vmov (!%p249_p13), 0  }
  0x28   : > { %252 = sbr.rel (%p249_p13) target bundleno = 324 (0x144), region = 62  ;;  %s961_s21 = sshll.u32 (!%p249_p13), %s255_s8, 7  ;;  %557 = vmatprep.mubr.bf16.mxu0 (!%p249_p13), %v1191_v16  ;;  %597 = vmatprep.mubr.bf16.mxu1 (!%p249_p13), %v1191_v16 }
  0x29   : > { %p284_p0 = scmp.lt.s32.totalorder (!%p249_p13), %s963_s18, 63  ;;  %s1311_s22 = scalar_lea.vmem (!%p249_p13), [#allocation3], %s961_s21 }
  0x2a   : > { %v1087_v17 = vld [vmem:[%s1311_s22 + $0x4] ss:$8 sps:$4 sm:$0xff] (!%p249_p13)   ;;  %v1089_v18 = vld [vmem:[%s1311_s22] ss:$8 sps:$4 sm:$0xff] (!%p249_p13)   ;;  %v1090_v19 = vld [vmem:[%s1311_s22 + $0x14] ss:$8 sps:$4 sm:$0xff] (!%p249_p13)  }
  0x2b   : > { %525 = vmatprep.subr.bf16.mxu0 (!%p249_p13), %v1087_v17  ;;  %998 = vmatprep.subr.bf16.mxu1 (!%p249_p13), %v1087_v17  ;;  %v1092_v20 = vld [vmem:[%s1311_s22 + $0x10] ss:$8 sps:$4 sm:$0xff] (!%p249_p13)   ;;  %v1093_v21 = vld [vmem:[%s1311_s22 + $0x24] ss:$8 sps:$4 sm:$0xff] (!%p249_p13)   ;;  %v1095_v22 = vld [vmem:[%s1311_s22 + $0x20] ss:$8 sps:$4 sm:$0xff] (!%p249_p13)  }
  0x2c   : > { %526 = vmatpush1.bf16.msra.mxu0 (!%p249_p13), %v1089_v18  ;;  %1006 = vmatpush1.bf16.msra.mxu1 (!%p249_p13), %v1089_v18  ;;  %v1096_v23 = vld [vmem:[%s1311_s22 + $0x34] ss:$8 sps:$4 sm:$0xff] (!%p249_p13)   ;;  %v1098_v24 = vld [vmem:[%s1311_s22 + $0x30] ss:$8 sps:$4 sm:$0xff] (!%p249_p13)   ;;  %v1099_v25 = vld [vmem:[%s1311_s22 + $0x44] ss:$8 sps:$4 sm:$0xff] (!%p249_p13)  }
  0x2d   : > { %527 = vmatprep.subr.bf16.mxu0 (!%p249_p13), %v1090_v19  ;;  %999 = vmatprep.subr.bf16.mxu1 (!%p249_p13), %v1090_v19  ;;  %v1101_v26 = vld [vmem:[%s1311_s22 + $0x40] ss:$8 sps:$4 sm:$0xff] (!%p249_p13)   ;;  %v1102_v27 = vld [vmem:[%s1311_s22 + $0x54] ss:$8 sps:$4 sm:$0xff] (!%p249_p13)   ;;  %v1104_v28 = vld [vmem:[%s1311_s22 + $0x50] ss:$8 sps:$4 sm:$0xff] (!%p249_p13)  }
  0x2e   : > { %v1105_v29 = vld [vmem:[%s1311_s22 + $0x64] ss:$8 sps:$4 sm:$0xff] (!%p249_p13)   ;;  %v1107_v30 = vld [vmem:[%s1311_s22 + $0x60] ss:$8 sps:$4 sm:$0xff] (!%p249_p13)   ;;  %v1108_v31 = vld [vmem:[%s1311_s22 + $0x74] ss:$8 sps:$4 sm:$0xff] (!%p249_p13)  }
  0x2f   : > { %s1502_s18 = smov (!%p284_p0, %s963_s18), 63  ;;  %v1110_v32 = vld [vmem:[%s1311_s22 + $0x70] ss:$8 sps:$4 sm:$0xff]   ;;  %s280_s29 = sand.u32 1, %s1157_s9  }
  0x30   : > { %s964_s11 = sshll.u32 %s1502_s18, 2  ;;  %528 = vmatpush1.bf16.msra.mxu0 %v1092_v20  ;;  %1007 = vmatpush1.bf16.msra.mxu1 %v1092_v20  ;;  %s962_s30 = sshll.u32 %s280_s29, 8 }
  0x31   : > { %529 = vmatprep.subr.bf16.mxu0 %v1093_v21  ;;  %1000 = vmatprep.subr.bf16.mxu1 %v1093_v21  ;;  %s1323_s26 = scalar_lea.vmem %s1483_s0, %s964_s11  ;;  %s1349_s3 = scalar_lea.vmem [#allocation4], %s962_s30 }
  0x32   : > { %v1111_v33 = vld [vmem:[%s1323_s26] sm:$0xff]   ;;  %v1113_v35 = vld [vmem:[%s1323_s26 + $0x8] sm:$0xff]   ;;  %v1115_v37 = vld [vmem:[%s1323_s26 + $0x10] sm:$0xff]   ;;  %s991_s9 = sshll.u32 (%p1274_p9), %s1173_s13, 1  ;;  %s997_s4 = sshll.u32 (%p1274_p9), %s1177_s14, 6 }
  0x33   : > { %v1112_v34 = vld [vmem:[%s1323_s26 + $0x20] sm:$0xff]   ;;  %v1114_v36 = vld [vmem:[%s1323_s26 + $0x28] sm:$0xff]   ;;  %v1116_v38 = vld [vmem:[%s1323_s26 + $0x30] sm:$0xff]   ;;  %s779_s27 = sadd.s32 (%p1274_p9), %s997_s4, %s991_s9 }
  0x34   : > { %530 = vmatpush1.bf16.msra.mxu0 %v1095_v22  ;;  %1008 = vmatpush1.bf16.msra.mxu1 %v1095_v22  ;;  %v1117_v39 = vld [vmem:[%s1323_s26 + $0x18] sm:$0xff]   ;;  %s993_s5 = sshll.u32 (%p1274_p9), %s779_s27, 3 }
  0x35   : > { %531 = vmatprep.subr.bf16.mxu0 %v1096_v23  ;;  %1001 = vmatprep.subr.bf16.mxu1 %v1096_v23  ;;  %v1118_v40 = vld [vmem:[%s1323_s26 + $0x38] sm:$0xff]   ;;  %s1399_s8 = scalar_lea.vmem (%p1274_p9), %s1485_s2, %s993_s5 }
  0x38   : > { %532 = vmatpush1.bf16.msra.mxu0 %v1098_v24  ;;  %1009 = vmatpush1.bf16.msra.mxu1 %v1098_v24 }
  0x39   : > { %533 = vmatprep.subr.bf16.mxu0 %v1099_v25  ;;  %1002 = vmatprep.subr.bf16.mxu1 %v1099_v25 }
  0x3c   : > { %534 = vmatpush1.bf16.msra.mxu0 %v1101_v26  ;;  %1010 = vmatpush1.bf16.msra.mxu1 %v1101_v26 }
  0x3d   : > { %535 = vmatprep.subr.bf16.mxu0 %v1102_v27  ;;  %1003 = vmatprep.subr.bf16.mxu1 %v1102_v27 }
  0x40   : > { %536 = vmatpush1.bf16.msra.mxu0 %v1104_v28  ;;  %1011 = vmatpush1.bf16.msra.mxu1 %v1104_v28 }
  0x41   : > { %537 = vmatprep.subr.bf16.mxu0 %v1105_v29  ;;  %1004 = vmatprep.subr.bf16.mxu1 %v1105_v29 }
  0x44   : > { %538 = vmatpush1.bf16.msra.mxu0 %v1107_v30  ;;  %1012 = vmatpush1.bf16.msra.mxu1 %v1107_v30 }
  0x45   : > { %539 = vmatprep.subr.bf16.mxu0 %v1108_v31  ;;  %1005 = vmatprep.subr.bf16.mxu1 %v1108_v31 }
  0x48   : > { %540 = vmatpush1.bf16.msra.mxu0 %v1110_v32  ;;  %1013 = vmatpush1.bf16.msra.mxu1 %v1110_v32 }
  0x4b   : > { %558 = vmatmul.mubr.bf16.vlgmr.msra.gmra.mrb[0].mxu0 %v1111_v33  ;;  %598 = vmatmul.mubr.bf16.vlgmr.msra.gmra.mrb[0].mxu1 %v1112_v34 }
  0x4c   : > { %567 = vmatprep.mubr.bf16.mxu0 %v1191_v16  ;;  %607 = vmatprep.mubr.bf16.mxu1 %v1191_v16 }
  0x53   : > { %568 = vmatmul.mubr.bf16.gmra.mrb[4].mxu0 %v1113_v35  ;;  %608 = vmatmul.mubr.bf16.gmra.mrb[4].mxu1 %v1114_v36 }
  0x54   : > { %577 = vmatprep.mubr.bf16.mxu0 %v1191_v16  ;;  %617 = vmatprep.mubr.bf16.mxu1 %v1191_v16 }
  0x5b   : > { %578 = vmatmul.mubr.bf16.gmra.mrb[8].mxu0 %v1115_v37  ;;  %618 = vmatmul.mubr.bf16.gmra.mrb[8].mxu1 %v1116_v38 }
  0x5c   : > { %587 = vmatprep.mubr.bf16.mxu0 %v1191_v16  ;;  %627 = vmatprep.mubr.bf16.mxu1 %v1191_v16 }
  0x63   : > { %588 = vmatmul.mubr.bf16.gmra.mrb[12].mxu0 %v1117_v39  ;;  %628 = vmatmul.mubr.bf16.gmra.mrb[12].mxu1 %v1118_v40 }
 0x11e   : > { %v559_v41 = vpop.f32.mrb[0].mxu0  ;;  %v599_v42 = vpop.f32.mrb[0].mxu1 }
 0x11f   : > { %737 = vst [vmem:[%s1349_s3] sm:$0xff] %v559_v41  ;;  %753 = vst [vmem:[%s1349_s3 + $0x80] sm:$0xff] %v599_v42  ;;  %v561_v43 = vpop.f32.mrb[1].mxu0  ;;  %v601_v44 = vpop.f32.mrb[1].mxu1 }
 0x120   : > { %738 = vst [vmem:[%s1349_s3 + $0x8] sm:$0xff] %v561_v43  ;;  %754 = vst [vmem:[%s1349_s3 + $0x88] sm:$0xff] %v601_v44  ;;  %v563_v45 = vpop.f32.mrb[2].mxu0  ;;  %v603_v46 = vpop.f32.mrb[2].mxu1 }
 0x121   : > { %739 = vst [vmem:[%s1349_s3 + $0x10] sm:$0xff] %v563_v45  ;;  %755 = vst [vmem:[%s1349_s3 + $0x90] sm:$0xff] %v603_v46  ;;  %v565_v47 = vpop.f32.mrb[3].mxu0  ;;  %v605_v48 = vpop.f32.mrb[3].mxu1 }
 0x122   : > { %740 = vst [vmem:[%s1349_s3 + $0x18] sm:$0xff] %v565_v47  ;;  %756 = vst [vmem:[%s1349_s3 + $0x98] sm:$0xff] %v605_v48 }
 0x126   : > { %v569_v49 = vpop.f32.mrb[4].mxu0  ;;  %v609_v50 = vpop.f32.mrb[4].mxu1  ;;  %v794_v9 = vld [vmem:[%s1349_s3] sm:$0xff] (%p1274_p9) }
 0x127   : > { %741 = vst [vmem:[%s1349_s3 + $0x20] sm:$0xff] %v569_v49  ;;  %757 = vst [vmem:[%s1349_s3 + $0xa0] sm:$0xff] %v609_v50  ;;  %v571_v51 = vpop.f32.mrb[5].mxu0  ;;  %v611_v52 = vpop.f32.mrb[5].mxu1  ;;  %v796_v10 = vld [vmem:[%s1349_s3 + $0x8] sm:$0xff] (%p1274_p9)  ;;  %v826_v25 = vld [vmem:[%s1349_s3 + $0x80] sm:$0xff] (%p1274_p9) }
 0x128   : > { %742 = vst [vmem:[%s1349_s3 + $0x28] sm:$0xff] %v571_v51  ;;  %758 = vst [vmem:[%s1349_s3 + $0xa8] sm:$0xff] %v611_v52  ;;  %v573_v53 = vpop.f32.mrb[6].mxu0  ;;  %v613_v54 = vpop.f32.mrb[6].mxu1  ;;  %v798_v11 = vld [vmem:[%s1349_s3 + $0x10] sm:$0xff] (%p1274_p9)  ;;  %v828_v26 = vld [vmem:[%s1349_s3 + $0x88] sm:$0xff] (%p1274_p9) }
 0x129   : > { %743 = vst [vmem:[%s1349_s3 + $0x30] sm:$0xff] %v573_v53  ;;  %759 = vst [vmem:[%s1349_s3 + $0xb0] sm:$0xff] %v613_v54  ;;  %v575_v55 = vpop.f32.mrb[7].mxu0  ;;  %v615_v56 = vpop.f32.mrb[7].mxu1  ;;  %v800_v12 = vld [vmem:[%s1349_s3 + $0x18] sm:$0xff] (%p1274_p9)  ;;  %v830_v27 = vld [vmem:[%s1349_s3 + $0x90] sm:$0xff] (%p1274_p9) }
 0x12a   : > { %744 = vst [vmem:[%s1349_s3 + $0x38] sm:$0xff] %v575_v55  ;;  %760 = vst [vmem:[%s1349_s3 + $0xb8] sm:$0xff] %v615_v56  ;;  %v832_v28 = vld [vmem:[%s1349_s3 + $0x98] sm:$0xff] (%p1274_p9) }
 0x12b   : > { %795 = vst [vmem:[%s1399_s8] sm:$0xff] (%p1274_p9), %v794_v9  ;;  %797 = vst [vmem:[%s1399_s8 + $0x8] sm:$0xff] (%p1274_p9), %v796_v10 }
 0x12c   : > { %799 = vst [vmem:[%s1399_s8 + $0x20] sm:$0xff] (%p1274_p9), %v798_v11  ;;  %801 = vst [vmem:[%s1399_s8 + $0x28] sm:$0xff] (%p1274_p9), %v800_v12 }
 0x12d   : > { %827 = vst [vmem:[%s1399_s8 + $0x100] sm:$0xff] (%p1274_p9), %v826_v25  ;;  %829 = vst [vmem:[%s1399_s8 + $0x108] sm:$0xff] (%p1274_p9), %v828_v26 }
 0x12e   : > { %v579_v57 = vpop.f32.mrb[8].mxu0  ;;  %v619_v58 = vpop.f32.mrb[8].mxu1  ;;  %v802_v13 = vld [vmem:[%s1349_s3 + $0x20] sm:$0xff] (%p1274_p9)  ;;  %831 = vst [vmem:[%s1399_s8 + $0x120] sm:$0xff] (%p1274_p9), %v830_v27  ;;  %833 = vst [vmem:[%s1399_s8 + $0x128] sm:$0xff] (%p1274_p9), %v832_v28 }
 0x12f   : > { %745 = vst [vmem:[%s1349_s3 + $0x40] sm:$0xff] %v579_v57  ;;  %761 = vst [vmem:[%s1349_s3 + $0xc0] sm:$0xff] %v619_v58  ;;  %v581_v59 = vpop.f32.mrb[9].mxu0  ;;  %v621_v60 = vpop.f32.mrb[9].mxu1  ;;  %v804_v14 = vld [vmem:[%s1349_s3 + $0x28] sm:$0xff] (%p1274_p9)  ;;  %v834_v29 = vld [vmem:[%s1349_s3 + $0xa0] sm:$0xff] (%p1274_p9) }
 0x130   : > { %746 = vst [vmem:[%s1349_s3 + $0x48] sm:$0xff] %v581_v59  ;;  %762 = vst [vmem:[%s1349_s3 + $0xc8] sm:$0xff] %v621_v60  ;;  %v583_v61 = vpop.f32.mrb[10].mxu0  ;;  %v623_v62 = vpop.f32.mrb[10].mxu1  ;;  %v806_v15 = vld [vmem:[%s1349_s3 + $0x30] sm:$0xff] (%p1274_p9)  ;;  %v836_v30 = vld [vmem:[%s1349_s3 + $0xa8] sm:$0xff] (%p1274_p9) }
 0x131   : > { %747 = vst [vmem:[%s1349_s3 + $0x50] sm:$0xff] %v583_v61  ;;  %763 = vst [vmem:[%s1349_s3 + $0xd0] sm:$0xff] %v623_v62  ;;  %v585_v63 = vpop.f32.mrb[11].mxu0  ;;  %v625_v0 = vpop.f32.mrb[11].mxu1  ;;  %v808_v16 = vld [vmem:[%s1349_s3 + $0x38] sm:$0xff] (%p1274_p9)  ;;  %v838_v31 = vld [vmem:[%s1349_s3 + $0xb0] sm:$0xff] (%p1274_p9) }
 0x132   : > { %748 = vst [vmem:[%s1349_s3 + $0x58] sm:$0xff] %v585_v63  ;;  %764 = vst [vmem:[%s1349_s3 + $0xd8] sm:$0xff] %v625_v0  ;;  %v840_v32 = vld [vmem:[%s1349_s3 + $0xb8] sm:$0xff] (%p1274_p9) }
 0x133   : > { %803 = vst [vmem:[%s1399_s8 + $0x40] sm:$0xff] (%p1274_p9), %v802_v13  ;;  %805 = vst [vmem:[%s1399_s8 + $0x48] sm:$0xff] (%p1274_p9), %v804_v14 }
 0x134   : > { %775 = sbr.rel (!%p1274_p9) target bundleno = 324 (0x144), region = 78  ;;  %807 = vst [vmem:[%s1399_s8 + $0x60] sm:$0xff] (%p1274_p9), %v806_v15  ;;  %809 = vst [vmem:[%s1399_s8 + $0x68] sm:$0xff] (%p1274_p9), %v808_v16 }
 0x135   : > { %835 = vst [vmem:[%s1399_s8 + $0x140] sm:$0xff] (%p1274_p9), %v834_v29  ;;  %837 = vst [vmem:[%s1399_s8 + $0x148] sm:$0xff] (%p1274_p9), %v836_v30 }
 0x136   : > { %v589_v1 = vpop.f32.mrb[12].mxu0  ;;  %v629_v2 = vpop.f32.mrb[12].mxu1  ;;  %v810_v17 = vld [vmem:[%s1349_s3 + $0x40] sm:$0xff] (%p1274_p9)  ;;  %839 = vst [vmem:[%s1399_s8 + $0x160] sm:$0xff] (%p1274_p9), %v838_v31  ;;  %841 = vst [vmem:[%s1399_s8 + $0x168] sm:$0xff] (%p1274_p9), %v840_v32 }
 0x137   : > { %749 = vst [vmem:[%s1349_s3 + $0x60] sm:$0xff] %v589_v1  ;;  %765 = vst [vmem:[%s1349_s3 + $0xe0] sm:$0xff] %v629_v2  ;;  %v591_v3 = vpop.f32.mrb[13].mxu0  ;;  %v631_v4 = vpop.f32.mrb[13].mxu1  ;;  %v812_v18 = vld [vmem:[%s1349_s3 + $0x48] sm:$0xff] (%p1274_p9)  ;;  %v842_v33 = vld [vmem:[%s1349_s3 + $0xc0] sm:$0xff] (%p1274_p9) }
 0x138   : > { %750 = vst [vmem:[%s1349_s3 + $0x68] sm:$0xff] %v591_v3  ;;  %766 = vst [vmem:[%s1349_s3 + $0xe8] sm:$0xff] %v631_v4  ;;  %v593_v5 = vpop.f32.mrb[14].mxu0  ;;  %v633_v6 = vpop.f32.mrb[14].mxu1  ;;  %v814_v19 = vld [vmem:[%s1349_s3 + $0x50] sm:$0xff] (%p1274_p9)  ;;  %v844_v34 = vld [vmem:[%s1349_s3 + $0xc8] sm:$0xff] (%p1274_p9) }
 0x139   : > { %751 = vst [vmem:[%s1349_s3 + $0x70] sm:$0xff] %v593_v5  ;;  %767 = vst [vmem:[%s1349_s3 + $0xf0] sm:$0xff] %v633_v6  ;;  %v595_v7 = vpop.f32.mrb[15].mxu0  ;;  %v635_v8 = vpop.f32.mrb[15].mxu1  ;;  %v816_v20 = vld [vmem:[%s1349_s3 + $0x58] sm:$0xff] (%p1274_p9)  ;;  %v846_v35 = vld [vmem:[%s1349_s3 + $0xd0] sm:$0xff] (%p1274_p9) }
 0x13a   : > { %752 = vst [vmem:[%s1349_s3 + $0x78] sm:$0xff] %v595_v7  ;;  %768 = vst [vmem:[%s1349_s3 + $0xf8] sm:$0xff] %v635_v8  ;;  %v848_v36 = vld [vmem:[%s1349_s3 + $0xd8] sm:$0xff] (%p1274_p9) }
 0x13b   : > { %811 = vst [vmem:[%s1399_s8 + $0x80] sm:$0xff] %v810_v17  ;;  %813 = vst [vmem:[%s1399_s8 + $0x88] sm:$0xff] %v812_v18 }
 0x13c   : > { %815 = vst [vmem:[%s1399_s8 + $0xa0] sm:$0xff] %v814_v19  ;;  %817 = vst [vmem:[%s1399_s8 + $0xa8] sm:$0xff] %v816_v20 }
 0x13d   : > { %843 = vst [vmem:[%s1399_s8 + $0x180] sm:$0xff] %v842_v33  ;;  %845 = vst [vmem:[%s1399_s8 + $0x188] sm:$0xff] %v844_v34 }
 0x13e   : > { %v818_v21 = vld [vmem:[%s1349_s3 + $0x60] sm:$0xff]  ;;  %847 = vst [vmem:[%s1399_s8 + $0x1a0] sm:$0xff] %v846_v35  ;;  %849 = vst [vmem:[%s1399_s8 + $0x1a8] sm:$0xff] %v848_v36 }
 0x13f   : > { %v820_v22 = vld [vmem:[%s1349_s3 + $0x68] sm:$0xff]  ;;  %819 = vst [vmem:[%s1399_s8 + $0xc0] sm:$0xff] %v818_v21  ;;  %v850_v37 = vld [vmem:[%s1349_s3 + $0xe0] sm:$0xff] }
 0x140   : > { %v822_v23 = vld [vmem:[%s1349_s3 + $0x70] sm:$0xff]  ;;  %821 = vst [vmem:[%s1399_s8 + $0xc8] sm:$0xff] %v820_v22  ;;  %v852_v38 = vld [vmem:[%s1349_s3 + $0xe8] sm:$0xff]  ;;  %851 = vst [vmem:[%s1399_s8 + $0x1c0] sm:$0xff] %v850_v37 }
 0x141   : > { %823 = vst [vmem:[%s1399_s8 + $0xe0] sm:$0xff] %v822_v23  ;;  %v824_v24 = vld [vmem:[%s1349_s3 + $0x78] sm:$0xff]  ;;  %853 = vst [vmem:[%s1399_s8 + $0x1c8] sm:$0xff] %v852_v38  ;;  %v854_v39 = vld [vmem:[%s1349_s3 + $0xf0] sm:$0xff] }
 0x142   : > { %825 = vst [vmem:[%s1399_s8 + $0xe8] sm:$0xff] %v824_v24  ;;  %v856_v40 = vld [vmem:[%s1349_s3 + $0xf8] sm:$0xff]  ;;  %855 = vst [vmem:[%s1399_s8 + $0x1e0] sm:$0xff] %v854_v39 }
 0x143   : > { %857 = vst [vmem:[%s1399_s8 + $0x1e8] sm:$0xff] %v856_v40 }
 0x144 PF: > { %s12_s17 = sadd.s32 1, %s1189_s17   ;;  %s1487_s9 = smov %s1161_s10 }
 0x145   : > { %p9_p1 = scmp.ge.s32.totalorder %s12_s17, 10   ;;  %s1488_s10 = smov %s1279_s28 }
 0x146   : > { %s1489_s11 = smov %s1169_s12  ;;  %s1490_s12 = smov %s1268_s24 }
 0x147   : > { %s1491_s13 = smov %s1181_s15  ;;  %s1492_s14 = smov %s1185_s16 }
 0x148   : > { %s1493_s15 = smov %s1496_s19  ;;  %s1494_s16 = smov %s1500_s20 }
 0x149   :  { %11 = sbr.rel (!%p9_p1) target bundleno = 5 (0x5), region = 135 }

// kernel: integration_forward.19
= control target key start
LH: loop header
LB: loop body
LE: loop exit
PB: predicated region body
PF: predicated region fallthrough
CT: control target
= control target key end

     0   :  { %s9304_s12 = smov 0   ;;  %s11044_s0 = inlined_call_operand.vmem [shape: f32[4,128,512], index: 0, kind: input, shape index: {}]   ;;  %s11045_s1 = inlined_call_operand.vmem [shape: bf16[9,128,512], index: 1, kind: input, shape index: {}]   ;;  %s11046_s2 = inlined_call_operand.vmem [shape: bf16[9,128,128], index: 2, kind: input, shape index: {}]   ;;  %s11047_s3 = inlined_call_operand.vmem [shape: f32[4,128,128], index: 3, kind: output, shape index: {}]  }
   0x1 LB: > { %s6674_s13 = sadd.s32 4294967295, %s9280_s12   ;;  %p6678_p0 = scmp.ge.s32.totalorder %s9280_s12, 1  ;;  %s9280_s12 = sphi %s9304_s12, %s13_s12  }
   0x2   : > { %p137_p1 = scmp.lt.s32.totalorder %s9280_s12, 5 }
   0x4   : > { %p138_p2 = pnand %p6678_p0, %p137_p1 }
   0x5   : > { %p161_p3 = scmp.lt.s32.totalorder (!%p138_p2), %s6674_s13, 3  ;;  %p6683_p4 = scmp.ne.s32.totalorder (!%p138_p2), %s6674_s13, 0 }
   0x6   : > { %141 = sbr.rel (%p138_p2) target bundleno = 2898 (0xb52), region = 32 }
   0xd   : > { %s162_s14 = scalar_select %p161_p3, %s6674_s13, 3 }
   0xe   : > { %175 = sbr.rel (%p6683_p4) target bundleno = 31 (0x1f), region = 36  ;;  %v9282_v0 = vmov (!%p6683_p4), 0.0  }
   0xf   : > { %s7478_s15 = sshll.u32 %s162_s14, 9  ;;  %s7479_s16 = sshll.u32 %s162_s14, 7  ;;  %176 = vst [vmem:[#allocation2] sm:$0xff] (!%p6683_p4), %v9282_v0  ;;  %177 = vst [vmem:[#allocation2 + $0x8] sm:$0xff] (!%p6683_p4), %v9282_v0 }
  0x10   : > { %s9315_s19 = scalar_lea.vmem %s11044_s0, %s7478_s15  ;;  %s9320_s22 = scalar_lea.vmem %s11047_s3, %s7479_s16  ;;  %178 = vst [vmem:[#allocation2 + $0x10] sm:$0xff] (!%p6683_p4), %v9282_v0  ;;  %179 = vst [vmem:[#allocation2 + $0x18] sm:$0xff] (!%p6683_p4), %v9282_v0 }
  0x11   : > { %180 = vst [vmem:[#allocation2 + $0x20] sm:$0xff] (!%p6683_p4), %v9282_v0  ;;  %181 = vst [vmem:[#allocation2 + $0x28] sm:$0xff] (!%p6683_p4), %v9282_v0 }
  0x12   : > { %182 = vst [vmem:[#allocation2 + $0x30] sm:$0xff] (!%p6683_p4), %v9282_v0  ;;  %183 = vst [vmem:[#allocation2 + $0x38] sm:$0xff] (!%p6683_p4), %v9282_v0 }
  0x13   : > { %184 = vst [vmem:[#allocation2 + $0x40] sm:$0xff] (!%p6683_p4), %v9282_v0  ;;  %185 = vst [vmem:[#allocation2 + $0x48] sm:$0xff] (!%p6683_p4), %v9282_v0 }
  0x14   : > { %186 = vst [vmem:[#allocation2 + $0x50] sm:$0xff] (!%p6683_p4), %v9282_v0  ;;  %187 = vst [vmem:[#allocation2 + $0x58] sm:$0xff] (!%p6683_p4), %v9282_v0 }
  0x15   : > { %188 = vst [vmem:[#allocation2 + $0x60] sm:$0xff] %v9282_v0  ;;  %189 = vst [vmem:[#allocation2 + $0x68] sm:$0xff] %v9282_v0 }
  0x16   : > { %190 = vst [vmem:[#allocation2 + $0x70] sm:$0xff] %v9282_v0  ;;  %191 = vst [vmem:[#allocation2 + $0x78] sm:$0xff] %v9282_v0 }
  0x17   : > { %192 = vst [vmem:[#allocation3] sm:$0xff] %v9282_v0  ;;  %193 = vst [vmem:[#allocation3 + $0x8] sm:$0xff] %v9282_v0 }
  0x18   : > { %194 = vst [vmem:[#allocation3 + $0x10] sm:$0xff] %v9282_v0  ;;  %195 = vst [vmem:[#allocation3 + $0x18] sm:$0xff] %v9282_v0 }
  0x19   : > { %196 = vst [vmem:[#allocation3 + $0x20] sm:$0xff] %v9282_v0  ;;  %197 = vst [vmem:[#allocation3 + $0x28] sm:$0xff] %v9282_v0 }
  0x1a   : > { %198 = vst [vmem:[#allocation3 + $0x30] sm:$0xff] %v9282_v0  ;;  %199 = vst [vmem:[#allocation3 + $0x38] sm:$0xff] %v9282_v0 }
  0x1b   : > { %200 = vst [vmem:[#allocation3 + $0x40] sm:$0xff] %v9282_v0  ;;  %201 = vst [vmem:[#allocation3 + $0x48] sm:$0xff] %v9282_v0 }
  0x1c   : > { %202 = vst [vmem:[#allocation3 + $0x50] sm:$0xff] %v9282_v0  ;;  %203 = vst [vmem:[#allocation3 + $0x58] sm:$0xff] %v9282_v0 }
  0x1d   : > { %204 = vst [vmem:[#allocation3 + $0x60] sm:$0xff] %v9282_v0  ;;  %205 = vst [vmem:[#allocation3 + $0x68] sm:$0xff] %v9282_v0 }
  0x1e   : > { %206 = vst [vmem:[#allocation3 + $0x70] sm:$0xff] %v9282_v0  ;;  %207 = vst [vmem:[#allocation3 + $0x78] sm:$0xff] %v9282_v0 }
  0x1f PF: > { %v8514_v12 = vld [vmem:[%s11046_s2] sm:$0xff]   ;;  %v286_v27 = vld [vmem:[#allocation2 + $0x70] sm:$0xff]  ;;  %v287_v30 = vld [vmem:[#allocation2 + $0x78] sm:$0xff] }
  0x20   : > { %v272_v1 = vld [vmem:[#allocation2] sm:$0xff]  ;;  %v273_v2 = vld [vmem:[#allocation2 + $0x8] sm:$0xff]  ;;  %7640 = vmatprep.mubr.bf16.mxu0 %v8514_v12  ;;  %v9373_v32 = vpack.c.bf16 %v287_v30, %v286_v27  ;;  %v8516_v38 = vld [vmem:[%s11046_s2 + $0x10] sm:$0xff]  }
  0x21   : > { %v274_v3 = vld [vmem:[#allocation2 + $0x10] sm:$0xff]  ;;  %v9322_v4 = vpack.c.bf16 %v273_v2, %v272_v1  ;;  %v275_v5 = vld [vmem:[#allocation2 + $0x18] sm:$0xff]  ;;  %v8515_v36 = vld [vmem:[%s11046_s2 + $0x8] sm:$0xff]   ;;  %v9283_v1 = vmov 0  }
  0x22   : > { %v9324_v6 = vpack.c.bf16 %v275_v5, %v274_v3  ;;  %v276_v7 = vld [vmem:[#allocation2 + $0x20] sm:$0xff]  ;;  %v277_v8 = vld [vmem:[#allocation2 + $0x28] sm:$0xff]  ;;  %v8517_v47 = vld [vmem:[%s11046_s2 + $0x18] sm:$0xff]   ;;  %689 = vmatprep.mubr.bf16.mxu1 %v9283_v1 }
  0x23   : > { %7624 = vmatprep.subr.bf16.mxu0 %v9322_v4  ;;  %v278_v9 = vld [vmem:[#allocation2 + $0x30] sm:$0xff]  ;;  %v9329_v10 = vpack.c.bf16 %v277_v8, %v276_v7  ;;  %v279_v11 = vld [vmem:[#allocation2 + $0x38] sm:$0xff]  ;;  %v8518_v48 = vld [vmem:[%s11046_s2 + $0x20] sm:$0xff]  }
  0x24   : > { %7625 = vmatpush3.bf16.msra.mxu0 %v9322_v4  ;;  %v9336_v13 = vpack.c.bf16 %v279_v11, %v278_v9  ;;  %v280_v14 = vld [vmem:[#allocation2 + $0x40] sm:$0xff]  ;;  %v281_v15 = vld [vmem:[#allocation2 + $0x48] sm:$0xff]  ;;  %v8520_v54 = vld [vmem:[%s11046_s2 + $0x30] sm:$0xff]  }
  0x25   : > { %7626 = vmatprep.subr.bf16.mxu0 %v9324_v6  ;;  %v282_v16 = vld [vmem:[#allocation2 + $0x50] sm:$0xff]  ;;  %v9340_v17 = vpack.c.bf16 %v281_v15, %v280_v14  ;;  %v283_v18 = vld [vmem:[#allocation2 + $0x58] sm:$0xff]  ;;  %v8519_v53 = vld [vmem:[%s11046_s2 + $0x28] sm:$0xff]  }
  0x26   : > { %v8522_v19 = vld [vmem:[%s11045_s1 + $0x4] ss:$16 sps:$4 sm:$0xff]   ;;  %v8524_v20 = vld [vmem:[%s11045_s1] ss:$16 sps:$4 sm:$0xff]   ;;  %v9353_v22 = vpack.c.bf16 %v283_v18, %v282_v16  ;;  %v285_v25 = vld [vmem:[#allocation2 + $0x68] sm:$0xff] }
  0x27   : > { %657 = vmatprep.subr.bf16.mxu1 %v8522_v19  ;;  %v8528_v21 = vld [vmem:[%s11045_s1 + $0x24] ss:$16 sps:$4 sm:$0xff]   ;;  %v8530_v23 = vld [vmem:[%s11045_s1 + $0x20] ss:$16 sps:$4 sm:$0xff]   ;;  %v8527_v35 = vld [vmem:[%s11045_s1 + $0xc] ss:$16 sps:$4 sm:$0xff]  }
  0x28   : > { %7627 = vmatpush3.bf16.msra.mxu0 %v9324_v6  ;;  %658 = vmatpush1.bf16.msra.mxu1 %v8524_v20  ;;  %v284_v24 = vld [vmem:[#allocation2 + $0x60] sm:$0xff]  ;;  %v8525_v39 = vld [vmem:[%s11045_s1 + $0x8] ss:$16 sps:$4 sm:$0xff]   ;;  %v8533_v41 = vld [vmem:[%s11045_s1 + $0x2c] ss:$16 sps:$4 sm:$0xff]  }
  0x29   : > { %7628 = vmatprep.subr.bf16.mxu0 %v9329_v10  ;;  %659 = vmatprep.subr.bf16.mxu1 %v8528_v21  ;;  %v8534_v26 = vld [vmem:[%s11045_s1 + $0x44] ss:$16 sps:$4 sm:$0xff]   ;;  %v9363_v28 = vpack.c.bf16 %v285_v25, %v284_v24  ;;  %v8536_v29 = vld [vmem:[%s11045_s1 + $0x40] ss:$16 sps:$4 sm:$0xff]   ;;  %v8531_v44 = vld [vmem:[%s11045_s1 + $0x28] ss:$16 sps:$4 sm:$0xff]  }
  0x2a   : > { %v8540_v31 = vld [vmem:[%s11045_s1 + $0x64] ss:$16 sps:$4 sm:$0xff]   ;;  %v8542_v33 = vld [vmem:[%s11045_s1 + $0x60] ss:$16 sps:$4 sm:$0xff]   ;;  %v8539_v45 = vld [vmem:[%s11045_s1 + $0x4c] ss:$16 sps:$4 sm:$0xff]  }
  0x2b   : > { %v8546_v34 = vld [vmem:[%s11045_s1 + $0x84] ss:$16 sps:$4 sm:$0xff]   ;;  %v8548_v37 = vld [vmem:[%s11045_s1 + $0x80] ss:$16 sps:$4 sm:$0xff]   ;;  %v8537_v49 = vld [vmem:[%s11045_s1 + $0x48] ss:$16 sps:$4 sm:$0xff]  }
  0x2c   : > { %7629 = vmatpush3.bf16.msra.mxu0 %v9329_v10  ;;  %660 = vmatpush1.bf16.msra.mxu1 %v8530_v23  ;;  %v8552_v40 = vld [vmem:[%s11045_s1 + $0xa4] ss:$16 sps:$4 sm:$0xff]   ;;  %v8554_v42 = vld [vmem:[%s11045_s1 + $0xa0] ss:$16 sps:$4 sm:$0xff]   ;;  %v8545_v50 = vld [vmem:[%s11045_s1 + $0x6c] ss:$16 sps:$4 sm:$0xff]  }
  0x2d   : > { %7630 = vmatprep.subr.bf16.mxu0 %v9336_v13  ;;  %661 = vmatprep.subr.bf16.mxu1 %v8534_v26  ;;  %v8558_v43 = vld [vmem:[%s11045_s1 + $0xc4] ss:$16 sps:$4 sm:$0xff]   ;;  %v8560_v46 = vld [vmem:[%s11045_s1 + $0xc0] ss:$16 sps:$4 sm:$0xff]   ;;  %v8543_v51 = vld [vmem:[%s11045_s1 + $0x68] ss:$16 sps:$4 sm:$0xff]  }
  0x2e   : > { %v8551_v52 = vld [vmem:[%s11045_s1 + $0x8c] ss:$16 sps:$4 sm:$0xff]   ;;  %v8549_v55 = vld [vmem:[%s11045_s1 + $0x88] ss:$16 sps:$4 sm:$0xff]   ;;  %v8564_v61 = vld [vmem:[%s11045_s1 + $0xe4] ss:$16 sps:$4 sm:$0xff]  }
  0x2f   : > { %v8557_v56 = vld [vmem:[%s11045_s1 + $0xac] ss:$16 sps:$4 sm:$0xff]   ;;  %v8555_v57 = vld [vmem:[%s11045_s1 + $0xa8] ss:$16 sps:$4 sm:$0xff]   ;;  %v8566_v63 = vld [vmem:[%s11045_s1 + $0xe0] ss:$16 sps:$4 sm:$0xff]  }
  0x30   : > { %7631 = vmatpush3.bf16.msra.mxu0 %v9336_v13  ;;  %662 = vmatpush1.bf16.msra.mxu1 %v8536_v29  ;;  %v8563_v58 = vld [vmem:[%s11045_s1 + $0xcc] ss:$16 sps:$4 sm:$0xff]   ;;  %v8561_v60 = vld [vmem:[%s11045_s1 + $0xc8] ss:$16 sps:$4 sm:$0xff]  }
  0x31   : > { %7632 = vmatprep.subr.bf16.mxu0 %v9340_v17  ;;  %663 = vmatprep.subr.bf16.mxu1 %v8540_v31  ;;  %v8521_v59 = vld [vmem:[%s11046_s2 + $0x38] sm:$0xff]  }
  0x32   : > { %v8569_v62 = vld [vmem:[%s11045_s1 + $0xec] ss:$16 sps:$4 sm:$0xff]   ;;  %v8567_v0 = vld [vmem:[%s11045_s1 + $0xe8] ss:$16 sps:$4 sm:$0xff]  }
  0x33   : > { %v8580_v2 = vld [vmem:[%s11045_s1 + $0x10c] ss:$16 sps:$4 sm:$0xff]   ;;  %v8578_v12 = vld [vmem:[%s11045_s1 + $0x108] ss:$16 sps:$4 sm:$0xff]  }
  0x34   : > { %7633 = vmatpush3.bf16.msra.mxu0 %v9340_v17  ;;  %664 = vmatpush1.bf16.msra.mxu1 %v8542_v33  ;;  %v8583_v14 = vld [vmem:[%s11045_s1 + $0x12c] ss:$16 sps:$4 sm:$0xff]   ;;  %v8581_v18 = vld [vmem:[%s11045_s1 + $0x128] ss:$16 sps:$4 sm:$0xff]  }
  0x35   : > { %7634 = vmatprep.subr.bf16.mxu0 %v9353_v22  ;;  %665 = vmatprep.subr.bf16.mxu1 %v8546_v34  ;;  %v8586_v24 = vld [vmem:[%s11045_s1 + $0x14c] ss:$16 sps:$4 sm:$0xff]   ;;  %v8584_v25 = vld [vmem:[%s11045_s1 + $0x148] ss:$16 sps:$4 sm:$0xff]  }
  0x36   : > { %v8589_v26 = vld [vmem:[%s11045_s1 + $0x16c] ss:$16 sps:$4 sm:$0xff]   ;;  %v8587_v30 = vld [vmem:[%s11045_s1 + $0x168] ss:$16 sps:$4 sm:$0xff]  }
  0x38   : > { %7635 = vmatpush3.bf16.msra.mxu0 %v9353_v22  ;;  %666 = vmatpush1.bf16.msra.mxu1 %v8548_v37  ;;  %v8590_v37 = vld [vmem:[%s11045_s1 + $0x188] ss:$16 sps:$4 sm:$0xff]  }
  0x39   : > { %7636 = vmatprep.subr.bf16.mxu0 %v9363_v28  ;;  %667 = vmatprep.subr.bf16.mxu1 %v8552_v40 }
  0x3c   : > { %7637 = vmatpush3.bf16.msra.mxu0 %v9363_v28  ;;  %668 = vmatpush1.bf16.msra.mxu1 %v8554_v42 }
  0x3d   : > { %7638 = vmatprep.subr.bf16.mxu0 %v9373_v32  ;;  %669 = vmatprep.subr.bf16.mxu1 %v8558_v43 }
  0x40   : > { %7639 = vmatpush3.bf16.msra.mxu0 %v9373_v32  ;;  %670 = vmatpush1.bf16.msra.mxu1 %v8560_v46  ;;  %v8610_v46 = vld [vmem:[%s11045_s1 + $0x1cc] ss:$16 sps:$4 sm:$0xff]  }
  0x41   : > { %770 = vmatprep.subr.bf16.mxu0 %v8527_v35  ;;  %671 = vmatprep.subr.bf16.mxu1 %v8564_v61  ;;  %v8607_v61 = vld [vmem:[%s11045_s1 + $0x164] ss:$16 sps:$4 sm:$0xff]  }
  0x43   : > { %7641 = vmatmul.mubr.bf16.vlgmr.msra.gmra.mrb[0].mxu0 %v8515_v36  ;;  %v8592_v36 = vld [vmem:[%s11045_s1 + $0x18c] ss:$16 sps:$4 sm:$0xff]  }
  0x44   : > { %7644 = vmatprep.mubr.bf16.mxu0 %v8516_v38  ;;  %771 = vmatpush1.bf16.msra.mxu0 %v8525_v39  ;;  %v8601_v38 = vld [vmem:[%s11045_s1 + $0x1ac] ss:$16 sps:$4 sm:$0xff]  }
  0x45   : > { %772 = vmatprep.subr.bf16.mxu0 %v8533_v41  ;;  %672 = vmatpush1.bf16.msra.mxu1 %v8566_v63  ;;  %v8599_v41 = vld [vmem:[%s11045_s1 + $0x1a8] ss:$16 sps:$4 sm:$0xff]   ;;  %v8613_v63 = vld [vmem:[%s11045_s1 + $0x184] ss:$16 sps:$4 sm:$0xff]  }
  0x46   : > { %7656 = vmatprep.subr.bf16.mxu1 %v9322_v4 }
  0x48   : > { %773 = vmatpush1.bf16.msra.mxu0 %v8531_v44 }
  0x49   : > { %774 = vmatprep.subr.bf16.mxu0 %v8539_v45 }
  0x4b   : > { %7645 = vmatmul.mubr.bf16.gmra.mrb[4].mxu0 %v8517_v47  ;;  %v8608_v47 = vld [vmem:[%s11045_s1 + $0x1c8] ss:$16 sps:$4 sm:$0xff]  }
  0x4c   : > { %7648 = vmatprep.mubr.bf16.mxu0 %v8518_v48  ;;  %775 = vmatpush1.bf16.msra.mxu0 %v8537_v49  ;;  %v8619_v48 = vld [vmem:[%s11045_s1 + $0x1ec] ss:$16 sps:$4 sm:$0xff]   ;;  %v8595_v49 = vld [vmem:[%s11045_s1 + $0x104] ss:$16 sps:$4 sm:$0xff]  }
  0x4d   : > { %776 = vmatprep.subr.bf16.mxu0 %v8545_v50  ;;  %v8617_v50 = vld [vmem:[%s11045_s1 + $0x1e8] ss:$16 sps:$4 sm:$0xff]  }
  0x50   : > { %777 = vmatpush1.bf16.msra.mxu0 %v8543_v51  ;;  %v8570_v51 = vld [vmem:[%s11046_s2 + $0x40] sm:$0xff]  }
  0x51   : > { %778 = vmatprep.subr.bf16.mxu0 %v8551_v52  ;;  %v8571_v52 = vld [vmem:[%s11046_s2 + $0x48] sm:$0xff]  }
  0x53   : > { %7649 = vmatmul.mubr.bf16.gmra.mrb[8].mxu0 %v8519_v53  ;;  %v8572_v53 = vld [vmem:[%s11046_s2 + $0x50] sm:$0xff]  }
  0x54   : > { %7652 = vmatprep.mubr.bf16.mxu0 %v8520_v54  ;;  %779 = vmatpush1.bf16.msra.mxu0 %v8549_v55  ;;  %v8593_v54 = vld [vmem:[%s11045_s1 + $0x100] ss:$16 sps:$4 sm:$0xff]   ;;  %v8598_v55 = vld [vmem:[%s11045_s1 + $0x124] ss:$16 sps:$4 sm:$0xff]  }
  0x55   : > { %780 = vmatprep.subr.bf16.mxu0 %v8557_v56  ;;  %v8596_v56 = vld [vmem:[%s11045_s1 + $0x120] ss:$16 sps:$4 sm:$0xff]  }
  0x58   : > { %781 = vmatpush1.bf16.msra.mxu0 %v8555_v57  ;;  %v8604_v57 = vld [vmem:[%s11045_s1 + $0x144] ss:$16 sps:$4 sm:$0xff]  }
  0x59   : > { %782 = vmatprep.subr.bf16.mxu0 %v8563_v58  ;;  %v8573_v58 = vld [vmem:[%s11046_s2 + $0x58] sm:$0xff]  }
  0x5b   : > { %7653 = vmatmul.mubr.bf16.gmra.mrb[12].mxu0 %v8521_v59  ;;  %v8574_v59 = vld [vmem:[%s11046_s2 + $0x60] sm:$0xff]  }
  0x5c   : > { %783 = vmatpush1.bf16.msra.mxu0 %v8561_v60  ;;  %802 = vmatprep.mubr.bf16.mxu0 %v9283_v1  ;;  %v8602_v60 = vld [vmem:[%s11045_s1 + $0x140] ss:$16 sps:$4 sm:$0xff]  }
  0x5d   : > { %784 = vmatprep.subr.bf16.mxu0 %v8569_v62  ;;  %v8605_v62 = vld [vmem:[%s11045_s1 + $0x160] ss:$16 sps:$4 sm:$0xff]  }
  0x60   : > { %785 = vmatpush1.bf16.msra.mxu0 %v8567_v0  ;;  %v8575_v0 = vld [vmem:[%s11046_s2 + $0x68] sm:$0xff]  }
  0x61   : > { %1423 = vmatprep.subr.bf16.mxu0 %v8580_v2  ;;  %v8576_v2 = vld [vmem:[%s11046_s2 + $0x70] sm:$0xff]  }
 0x116   : > { %v7642_v3 = vpop.f32.mrb[0].mxu0 }
 0x117   : > { %v394_v5 = vpop.f32.mrb[1].mxu0 }
 0x118   : > { %v7643_v7 = vpop.f32.mrb[2].mxu0 }
 0x119   : > { %v458_v8 = vpack.c.bf16 %v7643_v7, %v7642_v3  ;;  %v397_v9 = vpop.f32.mrb[3].mxu0  ;;  %v8611_v3 = vld [vmem:[%s11045_s1 + $0x180] ss:$16 sps:$4 sm:$0xff]  }
 0x11a   : > { %v457_v11 = vpack.c.bf16 %v397_v9, %v394_v5  ;;  %v8616_v5 = vld [vmem:[%s11045_s1 + $0x1a4] ss:$16 sps:$4 sm:$0xff]   ;;  %v8614_v7 = vld [vmem:[%s11045_s1 + $0x1a0] ss:$16 sps:$4 sm:$0xff]   ;;  %v8577_v9 = vld [vmem:[%s11046_s2 + $0x78] sm:$0xff]  }
 0x11c   : > { %690 = vmatmul.mubr.bf16.vlgmr.msra.gmra.mrb[0].mxu1 %v457_v11  ;;  %803 = vmatmul.mubr.bf16.vlgmr.msra.gmra.mrb[16].mxu0 %v457_v11  ;;  %v8620_v11 = vld [vmem:[%s11045_s1 + $0x1c0] ss:$16 sps:$4 sm:$0xff]  }
 0x11d   : > { %7657 = vmatpush3.bf16.msra.mxu1 %v9322_v4  ;;  %699 = vmatprep.mubr.bf16.mxu1 %v9283_v1 }
 0x11e   : > { %v7646_v15 = vpop.f32.mrb[4].mxu0  ;;  %812 = vmatprep.mubr.bf16.mxu0 %v9283_v1  ;;  %7658 = vmatprep.subr.bf16.mxu1 %v9324_v6 }
 0x11f   : > { %v410_v16 = vpop.f32.mrb[5].mxu0  ;;  %1424 = vmatpush1.bf16.msra.mxu0 %v8578_v12  ;;  %v8625_v12 = vld [vmem:[%s11045_s1 + $0x1e4] ss:$16 sps:$4 sm:$0xff]  }
 0x120   : > { %v7647_v19 = vpop.f32.mrb[6].mxu0  ;;  %1425 = vmatprep.subr.bf16.mxu0 %v8583_v14  ;;  %v8623_v14 = vld [vmem:[%s11045_s1 + $0x1e0] ss:$16 sps:$4 sm:$0xff]  }
 0x121   : > { %7659 = vmatpush3.bf16.msra.mxu1 %v9324_v6  ;;  %v460_v20 = vpack.c.bf16 %v7647_v19, %v7646_v15  ;;  %v413_v21 = vpop.f32.mrb[7].mxu0  ;;  %v8636_v15 = vld [vmem:[%s11045_s1 + $0x204] ss:$16 sps:$4 sm:$0xff]  }
 0x122   : > { %v459_v23 = vpack.c.bf16 %v413_v21, %v410_v16  ;;  %7660 = vmatprep.subr.bf16.mxu1 %v9329_v10 }
 0x123   : > { %1426 = vmatpush1.bf16.msra.mxu0 %v8581_v18 }
 0x124   : > { %700 = vmatmul.mubr.bf16.gmra.mrb[4].mxu1 %v458_v8  ;;  %813 = vmatmul.mubr.bf16.gmra.mrb[20].mxu0 %v458_v8  ;;  %v8622_v8 = vld [vmem:[%s11045_s1 + $0x1c4] ss:$16 sps:$4 sm:$0xff]  }
 0x125   : > { %709 = vmatprep.mubr.bf16.mxu1 %v9283_v1  ;;  %822 = vmatprep.mubr.bf16.mxu0 %v9283_v1 }
 0x126   : > { %7661 = vmatpush3.bf16.msra.mxu1 %v9329_v10  ;;  %v7650_v27 = vpop.f32.mrb[8].mxu0  ;;  %1427 = vmatprep.subr.bf16.mxu0 %v8586_v24  ;;  %v8634_v24 = vld [vmem:[%s11045_s1 + $0x200] ss:$16 sps:$4 sm:$0xff]  }
 0x127   : > { %7662 = vmatprep.subr.bf16.mxu1 %v9336_v13  ;;  %v426_v29 = vpop.f32.mrb[9].mxu0  ;;  %1428 = vmatpush1.bf16.msra.mxu0 %v8584_v25  ;;  %v8639_v25 = vld [vmem:[%s11045_s1 + $0x224] ss:$16 sps:$4 sm:$0xff]  }
 0x128   : > { %v7651_v31 = vpop.f32.mrb[10].mxu0  ;;  %1429 = vmatprep.subr.bf16.mxu0 %v8589_v26 }
 0x129   : > { %v462_v33 = vpack.c.bf16 %v7651_v31, %v7650_v27  ;;  %v429_v34 = vpop.f32.mrb[11].mxu0 }
 0x12a   : > { %7663 = vmatpush3.bf16.msra.mxu1 %v9336_v13  ;;  %v461_v35 = vpack.c.bf16 %v429_v34, %v426_v29  ;;  %v8637_v29 = vld [vmem:[%s11045_s1 + $0x220] ss:$16 sps:$4 sm:$0xff]  }
 0x12b   : > { %7664 = vmatprep.subr.bf16.mxu1 %v9340_v17  ;;  %1430 = vmatpush1.bf16.msra.mxu0 %v8587_v30 }
 0x12c   : > { %710 = vmatmul.mubr.bf16.gmra.mrb[8].mxu1 %v459_v23  ;;  %823 = vmatmul.mubr.bf16.gmra.mrb[24].mxu0 %v459_v23 }
 0x12d   : > { %719 = vmatprep.mubr.bf16.mxu1 %v9283_v1  ;;  %832 = vmatprep.mubr.bf16.mxu0 %v9283_v1 }
 0x12e   : > { %7665 = vmatpush3.bf16.msra.mxu1 %v9340_v17  ;;  %v7654_v39 = vpop.f32.mrb[12].mxu0  ;;  %1431 = vmatprep.subr.bf16.mxu0 %v8592_v36  ;;  %v8640_v36 = vld [vmem:[%s11045_s1 + $0x240] ss:$16 sps:$4 sm:$0xff]  }
 0x12f   : > { %7666 = vmatprep.subr.bf16.mxu1 %v9353_v22  ;;  %v442_v40 = vpop.f32.mrb[13].mxu0  ;;  %1432 = vmatpush1.bf16.msra.mxu0 %v8590_v37  ;;  %v8645_v37 = vld [vmem:[%s11045_s1 + $0x264] ss:$16 sps:$4 sm:$0xff]  }
 0x130   : > { %v7655_v42 = vpop.f32.mrb[14].mxu0  ;;  %1433 = vmatprep.subr.bf16.mxu0 %v8601_v38 }
 0x131   : > { %v464_v43 = vpack.c.bf16 %v7655_v42, %v7654_v39  ;;  %v445_v44 = vpop.f32.mrb[15].mxu0 }
 0x132   : > { %7667 = vmatpush3.bf16.msra.mxu1 %v9353_v22  ;;  %v463_v45 = vpack.c.bf16 %v445_v44, %v442_v40  ;;  %v8643_v40 = vld [vmem:[%s11045_s1 + $0x260] ss:$16 sps:$4 sm:$0xff]  }
 0x133   : > { %7668 = vmatprep.subr.bf16.mxu1 %v9363_v28  ;;  %1434 = vmatpush1.bf16.msra.mxu0 %v8599_v41 }
 0x134   : > { %720 = vmatmul.mubr.bf16.gmra.mrb[12].mxu1 %v460_v20  ;;  %833 = vmatmul.mubr.bf16.gmra.mrb[28].mxu0 %v460_v20 }
 0x135   : > { %729 = vmatprep.mubr.bf16.mxu1 %v9283_v1  ;;  %842 = vmatprep.mubr.bf16.mxu0 %v9283_v1 }
 0x136   : > { %7669 = vmatpush3.bf16.msra.mxu1 %v9363_v28  ;;  %1435 = vmatprep.subr.bf16.mxu0 %v8610_v46  ;;  %v8646_v46 = vld [vmem:[%s11045_s1 + $0x280] ss:$16 sps:$4 sm:$0xff]  }
 0x137   : > { %7670 = vmatprep.subr.bf16.mxu1 %v9373_v32  ;;  %1436 = vmatpush1.bf16.msra.mxu0 %v8608_v47  ;;  %v8657_v47 = vld [vmem:[%s11045_s1 + $0x2a4] ss:$16 sps:$4 sm:$0xff]  }
 0x138   : > { %1437 = vmatprep.subr.bf16.mxu0 %v8619_v48 }
 0x13a   : > { %7671 = vmatpush3.bf16.msra.mxu1 %v9373_v32 }
 0x13b   : > { %1310 = vmatprep.subr.bf16.mxu1 %v8595_v49  ;;  %1438 = vmatpush1.bf16.msra.mxu0 %v8617_v50  ;;  %v8655_v50 = vld [vmem:[%s11045_s1 + $0x2a0] ss:$16 sps:$4 sm:$0xff]  }
 0x13c   : > { %730 = vmatmul.mubr.bf16.gmra.mrb[16].mxu1 %v461_v35  ;;  %843 = vmatmul.mubr.bf16.gmra.mrb[32].mxu0 %v461_v35  ;;  %v8642_v35 = vld [vmem:[%s11045_s1 + $0x244] ss:$16 sps:$4 sm:$0xff]  }
 0x13d   : > { %739 = vmatprep.mubr.bf16.mxu1 %v9283_v1  ;;  %852 = vmatprep.mubr.bf16.mxu0 %v9283_v1 }
 0x13e   : > { %7688 = vmatprep.subr.bf16.mxu0 %v9322_v4 }
 0x144   : > { %740 = vmatmul.mubr.bf16.gmra.mrb[20].mxu1 %v462_v33  ;;  %853 = vmatmul.mubr.bf16.gmra.mrb[36].mxu0 %v462_v33 }
 0x145   : > { %749 = vmatprep.mubr.bf16.mxu1 %v9283_v1  ;;  %862 = vmatprep.mubr.bf16.mxu0 %v9283_v1 }
 0x14c   : > { %750 = vmatmul.mubr.bf16.gmra.mrb[24].mxu1 %v463_v45  ;;  %863 = vmatmul.mubr.bf16.gmra.mrb[40].mxu0 %v463_v45  ;;  %v8648_v45 = vld [vmem:[%s11045_s1 + $0x284] ss:$16 sps:$4 sm:$0xff]  }
 0x14d   : > { %759 = vmatprep.mubr.bf16.mxu1 %v9283_v1  ;;  %872 = vmatprep.mubr.bf16.mxu0 %v9283_v1 }
 0x154   : > { %760 = vmatmul.mubr.bf16.gmra.mrb[28].mxu1 %v464_v43  ;;  %873 = vmatmul.mubr.bf16.gmra.mrb[44].mxu0 %v464_v43 }
 0x155   : > { %7672 = vmatprep.mubr.bf16.mxu1 %v8570_v51  ;;  %1455 = vmatprep.mubr.bf16.mxu0 %v9283_v1 }
 0x15c   : > { %7673 = vmatmul.mubr.bf16.vlgmr.msra.gmra.mrb[32].mxu1 %v8571_v52 }
 0x15d   : > { %7676 = vmatprep.mubr.bf16.mxu1 %v8572_v53  ;;  %1311 = vmatpush1.bf16.msra.mxu1 %v8593_v54 }
 0x15e   : > { %1312 = vmatprep.subr.bf16.mxu1 %v8598_v55  ;;  %v8666_v55 = vld [vmem:[%s11045_s1 + $0x2c4] ss:$16 sps:$4 sm:$0xff]  }
 0x161   : > { %1313 = vmatpush1.bf16.msra.mxu1 %v8596_v56  ;;  %v8664_v56 = vld [vmem:[%s11045_s1 + $0x2c0] ss:$16 sps:$4 sm:$0xff]  }
 0x162   : > { %1314 = vmatprep.subr.bf16.mxu1 %v8604_v57  ;;  %v8675_v57 = vld [vmem:[%s11045_s1 + $0x2e4] ss:$16 sps:$4 sm:$0xff]  }
 0x164   : > { %7677 = vmatmul.mubr.bf16.gmra.mrb[36].mxu1 %v8573_v58  ;;  %v8651_v58 = vld [vmem:[%s11045_s1 + $0x20c] ss:$16 sps:$4 sm:$0xff]  }
 0x165   : > { %7680 = vmatprep.mubr.bf16.mxu1 %v8574_v59  ;;  %1315 = vmatpush1.bf16.msra.mxu1 %v8602_v60  ;;  %v8673_v59 = vld [vmem:[%s11045_s1 + $0x2e0] ss:$16 sps:$4 sm:$0xff]  }
 0x166   : > { %1316 = vmatprep.subr.bf16.mxu1 %v8607_v61  ;;  %v8626_v60 = vld [vmem:[%s11046_s2 + $0x80] sm:$0xff]   ;;  %v8627_v61 = vld [vmem:[%s11046_s2 + $0x88] sm:$0xff]  }
 0x169   : > { %1317 = vmatpush1.bf16.msra.mxu1 %v8605_v62  ;;  %v8628_v62 = vld [vmem:[%s11046_s2 + $0x90] sm:$0xff]  }
 0x16a   : > { %1318 = vmatprep.subr.bf16.mxu1 %v8613_v63  ;;  %v8649_v63 = vld [vmem:[%s11045_s1 + $0x208] ss:$16 sps:$4 sm:$0xff]  }
 0x16c   : > { %7681 = vmatmul.mubr.bf16.gmra.mrb[40].mxu1 %v8575_v0  ;;  %v8654_v0 = vld [vmem:[%s11045_s1 + $0x22c] ss:$16 sps:$4 sm:$0xff]  }
 0x16d   : > { %7684 = vmatprep.mubr.bf16.mxu1 %v8576_v2  ;;  %1319 = vmatpush1.bf16.msra.mxu1 %v8611_v3  ;;  %v8652_v2 = vld [vmem:[%s11045_s1 + $0x228] ss:$16 sps:$4 sm:$0xff]   ;;  %v8660_v3 = vld [vmem:[%s11045_s1 + $0x24c] ss:$16 sps:$4 sm:$0xff]  }
 0x16e   : > { %1320 = vmatprep.subr.bf16.mxu1 %v8616_v5  ;;  %v8629_v5 = vld [vmem:[%s11046_s2 + $0x98] sm:$0xff]  }
 0x171   : > { %1321 = vmatpush1.bf16.msra.mxu1 %v8614_v7  ;;  %v8630_v7 = vld [vmem:[%s11046_s2 + $0xa0] sm:$0xff]  }
 0x172   : > { %1322 = vmatprep.subr.bf16.mxu1 %v8622_v8  ;;  %v8658_v8 = vld [vmem:[%s11045_s1 + $0x248] ss:$16 sps:$4 sm:$0xff]  }
 0x174   : > { %7685 = vmatmul.mubr.bf16.gmra.mrb[44].mxu1 %v8577_v9  ;;  %v8663_v9 = vld [vmem:[%s11045_s1 + $0x26c] ss:$16 sps:$4 sm:$0xff]  }
 0x175   : > { %1323 = vmatpush1.bf16.msra.mxu1 %v8620_v11  ;;  %1342 = vmatprep.mubr.bf16.mxu1 %v9283_v1  ;;  %v8661_v11 = vld [vmem:[%s11045_s1 + $0x268] ss:$16 sps:$4 sm:$0xff]  }
 0x176   : > { %1324 = vmatprep.subr.bf16.mxu1 %v8625_v12  ;;  %v8669_v12 = vld [vmem:[%s11045_s1 + $0x28c] ss:$16 sps:$4 sm:$0xff]  }
 0x179   : > { %1325 = vmatpush1.bf16.msra.mxu1 %v8623_v14  ;;  %v8631_v14 = vld [vmem:[%s11046_s2 + $0xa8] sm:$0xff]  }
 0x17a   : > { %1963 = vmatprep.subr.bf16.mxu1 %v8636_v15  ;;  %v8632_v15 = vld [vmem:[%s11046_s2 + $0xb0] sm:$0xff]  }
 0x22f   : > { %v7674_v16 = vpop.f32.mrb[32].mxu1 }
 0x230   : > { %v1046_v18 = vpop.f32.mrb[33].mxu1 }
 0x231   : > { %v7675_v19 = vpop.f32.mrb[34].mxu1 }
 0x232   : > { %v1110_v20 = vpack.c.bf16 %v7675_v19, %v7674_v16  ;;  %v1049_v21 = vpop.f32.mrb[35].mxu1  ;;  %v8667_v16 = vld [vmem:[%s11045_s1 + $0x288] ss:$16 sps:$4 sm:$0xff]  }
 0x233   : > { %v1109_v23 = vpack.c.bf16 %v1049_v21, %v1046_v18  ;;  %v8672_v18 = vld [vmem:[%s11045_s1 + $0x2ac] ss:$16 sps:$4 sm:$0xff]   ;;  %v8670_v19 = vld [vmem:[%s11045_s1 + $0x2a8] ss:$16 sps:$4 sm:$0xff]  }
 0x234   : > { %v8633_v21 = vld [vmem:[%s11046_s2 + $0xb8] sm:$0xff]  }
 0x235   : > { %1343 = vmatmul.mubr.bf16.vlgmr.msra.gmra.mrb[0].mxu1 %v1109_v23  ;;  %1456 = vmatmul.mubr.bf16.vlgmr.msra.gmra.mrb[16].mxu0 %v1109_v23  ;;  %v8676_v23 = vld [vmem:[%s11045_s1 + $0x2c8] ss:$16 sps:$4 sm:$0xff]  }
 0x236   : > { %7689 = vmatpush3.bf16.msra.mxu0 %v9322_v4  ;;  %1352 = vmatprep.mubr.bf16.mxu1 %v9283_v1 }
 0x237   : > { %v7678_v26 = vpop.f32.mrb[36].mxu1  ;;  %1465 = vmatprep.mubr.bf16.mxu0 %v9283_v1  ;;  %7690 = vmatprep.subr.bf16.mxu0 %v9324_v6 }
 0x238   : > { %v1062_v27 = vpop.f32.mrb[37].mxu1  ;;  %1964 = vmatpush1.bf16.msra.mxu1 %v8634_v24  ;;  %v8681_v24 = vld [vmem:[%s11045_s1 + $0x2ec] ss:$16 sps:$4 sm:$0xff]  }
 0x239   : > { %v7679_v30 = vpop.f32.mrb[38].mxu1  ;;  %1965 = vmatprep.subr.bf16.mxu1 %v8639_v25  ;;  %v8679_v25 = vld [vmem:[%s11045_s1 + $0x2e8] ss:$16 sps:$4 sm:$0xff]  }
 0x23a   : > { %7691 = vmatpush3.bf16.msra.mxu0 %v9324_v6  ;;  %v1112_v31 = vpack.c.bf16 %v7679_v30, %v7678_v26  ;;  %v1065_v33 = vpop.f32.mrb[39].mxu1  ;;  %v8692_v26 = vld [vmem:[%s11045_s1 + $0x30c] ss:$16 sps:$4 sm:$0xff]  }
 0x23b   : > { %v1111_v34 = vpack.c.bf16 %v1065_v33, %v1062_v27  ;;  %7692 = vmatprep.subr.bf16.mxu0 %v9329_v10 }
 0x23c   : > { %1966 = vmatpush1.bf16.msra.mxu1 %v8637_v29 }
 0x23d   : > { %1353 = vmatmul.mubr.bf16.gmra.mrb[4].mxu1 %v1110_v20  ;;  %1466 = vmatmul.mubr.bf16.gmra.mrb[20].mxu0 %v1110_v20  ;;  %v8678_v20 = vld [vmem:[%s11045_s1 + $0x2cc] ss:$16 sps:$4 sm:$0xff]  }
 0x23e   : > { %1362 = vmatprep.mubr.bf16.mxu1 %v9283_v1  ;;  %1475 = vmatprep.mubr.bf16.mxu0 %v9283_v1 }
 0x23f   : > { %7693 = vmatpush3.bf16.msra.mxu0 %v9329_v10  ;;  %v7682_v38 = vpop.f32.mrb[40].mxu1  ;;  %1967 = vmatprep.subr.bf16.mxu1 %v8642_v35  ;;  %v8690_v35 = vld [vmem:[%s11045_s1 + $0x308] ss:$16 sps:$4 sm:$0xff]  }
 0x240   : > { %7694 = vmatprep.subr.bf16.mxu0 %v9336_v13  ;;  %v1078_v39 = vpop.f32.mrb[41].mxu1  ;;  %1968 = vmatpush1.bf16.msra.mxu1 %v8640_v36  ;;  %v8695_v36 = vld [vmem:[%s11045_s1 + $0x32c] ss:$16 sps:$4 sm:$0xff]  }
 0x241   : > { %v7683_v41 = vpop.f32.mrb[42].mxu1  ;;  %1969 = vmatprep.subr.bf16.mxu1 %v8645_v37 }
 0x242   : > { %v1114_v42 = vpack.c.bf16 %v7683_v41, %v7682_v38  ;;  %v1081_v43 = vpop.f32.mrb[43].mxu1 }
 0x243   : > { %7695 = vmatpush3.bf16.msra.mxu0 %v9336_v13  ;;  %v1113_v44 = vpack.c.bf16 %v1081_v43, %v1078_v39  ;;  %v8693_v39 = vld [vmem:[%s11045_s1 + $0x328] ss:$16 sps:$4 sm:$0xff]  }
 0x244   : > { %7696 = vmatprep.subr.bf16.mxu0 %v9340_v17  ;;  %1970 = vmatpush1.bf16.msra.mxu1 %v8643_v40 }
 0x245   : > { %1363 = vmatmul.mubr.bf16.gmra.mrb[8].mxu1 %v1111_v34  ;;  %1476 = vmatmul.mubr.bf16.gmra.mrb[24].mxu0 %v1111_v34 }
 0x246   : > { %1372 = vmatprep.mubr.bf16.mxu1 %v9283_v1  ;;  %1485 = vmatprep.mubr.bf16.mxu0 %v9283_v1 }
 0x247   : > { %7697 = vmatpush3.bf16.msra.mxu0 %v9340_v17  ;;  %v7686_v48 = vpop.f32.mrb[44].mxu1  ;;  %1971 = vmatprep.subr.bf16.mxu1 %v8648_v45  ;;  %v8696_v45 = vld [vmem:[%s11045_s1 + $0x348] ss:$16 sps:$4 sm:$0xff]  }
 0x248   : > { %7698 = vmatprep.subr.bf16.mxu0 %v9353_v22  ;;  %v1094_v49 = vpop.f32.mrb[45].mxu1  ;;  %1972 = vmatpush1.bf16.msra.mxu1 %v8646_v46  ;;  %v8701_v46 = vld [vmem:[%s11045_s1 + $0x36c] ss:$16 sps:$4 sm:$0xff]  }
 0x249   : > { %v7687_v51 = vpop.f32.mrb[46].mxu1  ;;  %1973 = vmatprep.subr.bf16.mxu1 %v8657_v47 }
 0x24a   : > { %v1116_v52 = vpack.c.bf16 %v7687_v51, %v7686_v48  ;;  %v1097_v53 = vpop.f32.mrb[47].mxu1 }
 0x24b   : > { %7699 = vmatpush3.bf16.msra.mxu0 %v9353_v22  ;;  %v1115_v54 = vpack.c.bf16 %v1097_v53, %v1094_v49  ;;  %v8699_v49 = vld [vmem:[%s11045_s1 + $0x368] ss:$16 sps:$4 sm:$0xff]  }
 0x24c   : > { %7700 = vmatprep.subr.bf16.mxu0 %v9363_v28  ;;  %1974 = vmatpush1.bf16.msra.mxu1 %v8655_v50 }
 0x24d   : > { %1373 = vmatmul.mubr.bf16.gmra.mrb[12].mxu1 %v1112_v31  ;;  %1486 = vmatmul.mubr.bf16.gmra.mrb[28].mxu0 %v1112_v31 }
 0x24e   : > { %1382 = vmatprep.mubr.bf16.mxu1 %v9283_v1  ;;  %1495 = vmatprep.mubr.bf16.mxu0 %v9283_v1 }
 0x24f   : > { %7701 = vmatpush3.bf16.msra.mxu0 %v9363_v28  ;;  %1975 = vmatprep.subr.bf16.mxu1 %v8666_v55  ;;  %v8702_v55 = vld [vmem:[%s11045_s1 + $0x388] ss:$16 sps:$4 sm:$0xff]  }
 0x250   : > { %7702 = vmatprep.subr.bf16.mxu0 %v9373_v32  ;;  %1976 = vmatpush1.bf16.msra.mxu1 %v8664_v56  ;;  %v8713_v56 = vld [vmem:[%s11045_s1 + $0x3ac] ss:$16 sps:$4 sm:$0xff]  }
 0x251   : > { %1977 = vmatprep.subr.bf16.mxu1 %v8675_v57 }
 0x253   : > { %7703 = vmatpush3.bf16.msra.mxu0 %v9373_v32 }
 0x254   : > { %2076 = vmatprep.subr.bf16.mxu0 %v8651_v58  ;;  %1978 = vmatpush1.bf16.msra.mxu1 %v8673_v59  ;;  %v8711_v59 = vld [vmem:[%s11045_s1 + $0x3a8] ss:$16 sps:$4 sm:$0xff]  }
 0x255   : > { %1383 = vmatmul.mubr.bf16.gmra.mrb[16].mxu1 %v1113_v44  ;;  %1496 = vmatmul.mubr.bf16.gmra.mrb[32].mxu0 %v1113_v44  ;;  %v8698_v44 = vld [vmem:[%s11045_s1 + $0x34c] ss:$16 sps:$4 sm:$0xff]  }
 0x256   : > { %1392 = vmatprep.mubr.bf16.mxu1 %v9283_v1  ;;  %1505 = vmatprep.mubr.bf16.mxu0 %v9283_v1 }
 0x257   : > { %7720 = vmatprep.subr.bf16.mxu1 %v9322_v4 }
 0x25d   : > { %1393 = vmatmul.mubr.bf16.gmra.mrb[20].mxu1 %v1114_v42  ;;  %1506 = vmatmul.mubr.bf16.gmra.mrb[36].mxu0 %v1114_v42 }
 0x25e   : > { %1402 = vmatprep.mubr.bf16.mxu1 %v9283_v1  ;;  %1515 = vmatprep.mubr.bf16.mxu0 %v9283_v1 }
 0x265   : > { %1403 = vmatmul.mubr.bf16.gmra.mrb[24].mxu1 %v1115_v54  ;;  %1516 = vmatmul.mubr.bf16.gmra.mrb[40].mxu0 %v1115_v54  ;;  %v8704_v54 = vld [vmem:[%s11045_s1 + $0x38c] ss:$16 sps:$4 sm:$0xff]  }
 0x266   : > { %1412 = vmatprep.mubr.bf16.mxu1 %v9283_v1  ;;  %1525 = vmatprep.mubr.bf16.mxu0 %v9283_v1 }
 0x26d   : > { %1413 = vmatmul.mubr.bf16.gmra.mrb[28].mxu1 %v1116_v52  ;;  %1526 = vmatmul.mubr.bf16.gmra.mrb[44].mxu0 %v1116_v52 }
 0x26e   : > { %7704 = vmatprep.mubr.bf16.mxu0 %v8626_v60  ;;  %1995 = vmatprep.mubr.bf16.mxu1 %v9283_v1 }
 0x275   : > { %7705 = vmatmul.mubr.bf16.vlgmr.msra.gmra.mrb[48].mxu0 %v8627_v61 }
 0x276   : > { %7708 = vmatprep.mubr.bf16.mxu0 %v8628_v62  ;;  %2077 = vmatpush1.bf16.msra.mxu0 %v8649_v63 }
 0x277   : > { %2078 = vmatprep.subr.bf16.mxu0 %v8654_v0  ;;  %v8722_v0 = vld [vmem:[%s11045_s1 + $0x3cc] ss:$16 sps:$4 sm:$0xff]  }
 0x27a   : > { %2079 = vmatpush1.bf16.msra.mxu0 %v8652_v2  ;;  %v8720_v2 = vld [vmem:[%s11045_s1 + $0x3c8] ss:$16 sps:$4 sm:$0xff]  }
 0x27b   : > { %2080 = vmatprep.subr.bf16.mxu0 %v8660_v3  ;;  %v8731_v3 = vld [vmem:[%s11045_s1 + $0x3ec] ss:$16 sps:$4 sm:$0xff]  }
 0x27d   : > { %7709 = vmatmul.mubr.bf16.gmra.mrb[52].mxu0 %v8629_v5  ;;  %v8707_v5 = vld [vmem:[%s11045_s1 + $0x304] ss:$16 sps:$4 sm:$0xff]  }
 0x27e   : > { %7712 = vmatprep.mubr.bf16.mxu0 %v8630_v7  ;;  %2081 = vmatpush1.bf16.msra.mxu0 %v8658_v8  ;;  %v8729_v7 = vld [vmem:[%s11045_s1 + $0x3e8] ss:$16 sps:$4 sm:$0xff]   ;;  %v8682_v8 = vld [vmem:[%s11046_s2 + $0xc0] sm:$0xff]  }
 0x27f   : > { %2082 = vmatprep.subr.bf16.mxu0 %v8663_v9  ;;  %v8683_v9 = vld [vmem:[%s11046_s2 + $0xc8] sm:$0xff]  }
 0x282   : > { %2083 = vmatpush1.bf16.msra.mxu0 %v8661_v11  ;;  %v8684_v11 = vld [vmem:[%s11046_s2 + $0xd0] sm:$0xff]  }
 0x283   : > { %2084 = vmatprep.subr.bf16.mxu0 %v8669_v12  ;;  %v8705_v12 = vld [vmem:[%s11045_s1 + $0x300] ss:$16 sps:$4 sm:$0xff]  }
 0x285   : > { %7713 = vmatmul.mubr.bf16.gmra.mrb[56].mxu0 %v8631_v14  ;;  %v8710_v14 = vld [vmem:[%s11045_s1 + $0x324] ss:$16 sps:$4 sm:$0xff]  }
 0x286   : > { %7716 = vmatprep.mubr.bf16.mxu0 %v8632_v15  ;;  %2085 = vmatpush1.bf16.msra.mxu0 %v8667_v16  ;;  %v8708_v15 = vld [vmem:[%s11045_s1 + $0x320] ss:$16 sps:$4 sm:$0xff]   ;;  %v8716_v16 = vld [vmem:[%s11045_s1 + $0x344] ss:$16 sps:$4 sm:$0xff]  }
 0x287   : > { %2086 = vmatprep.subr.bf16.mxu0 %v8672_v18  ;;  %v8685_v18 = vld [vmem:[%s11046_s2 + $0xd8] sm:$0xff]  }
 0x28a   : > { %2087 = vmatpush1.bf16.msra.mxu0 %v8670_v19  ;;  %v8686_v19 = vld [vmem:[%s11046_s2 + $0xe0] sm:$0xff]  }
 0x28b   : > { %2088 = vmatprep.subr.bf16.mxu0 %v8678_v20  ;;  %v8714_v20 = vld [vmem:[%s11045_s1 + $0x340] ss:$16 sps:$4 sm:$0xff]  }
 0x28d   : > { %7717 = vmatmul.mubr.bf16.gmra.mrb[60].mxu0 %v8633_v21  ;;  %v8719_v21 = vld [vmem:[%s11045_s1 + $0x364] ss:$16 sps:$4 sm:$0xff]  }
 0x28e   : > { %2089 = vmatpush1.bf16.msra.mxu0 %v8676_v23  ;;  %2108 = vmatprep.mubr.bf16.mxu0 %v9283_v1  ;;  %v8717_v23 = vld [vmem:[%s11045_s1 + $0x360] ss:$16 sps:$4 sm:$0xff]  }
 0x28f   : > { %2090 = vmatprep.subr.bf16.mxu0 %v8681_v24  ;;  %v8725_v24 = vld [vmem:[%s11045_s1 + $0x384] ss:$16 sps:$4 sm:$0xff]  }
 0x292   : > { %2091 = vmatpush1.bf16.msra.mxu0 %v8679_v25  ;;  %v8687_v25 = vld [vmem:[%s11046_s2 + $0xe8] sm:$0xff]  }
 0x293   : > { %2729 = vmatprep.subr.bf16.mxu0 %v8692_v26  ;;  %v8688_v26 = vld [vmem:[%s11046_s2 + $0xf0] sm:$0xff]  }
 0x348   : > { %v7706_v27 = vpop.f32.mrb[48].mxu0 }
 0x349   : > { %v1699_v29 = vpop.f32.mrb[49].mxu0 }
 0x34a   : > { %v7707_v30 = vpop.f32.mrb[50].mxu0 }
 0x34b   : > { %v1763_v31 = vpack.c.bf16 %v7707_v30, %v7706_v27  ;;  %v1702_v33 = vpop.f32.mrb[51].mxu0  ;;  %v8723_v27 = vld [vmem:[%s11045_s1 + $0x380] ss:$16 sps:$4 sm:$0xff]  }
 0x34c   : > { %v1762_v34 = vpack.c.bf16 %v1702_v33, %v1699_v29  ;;  %v8728_v29 = vld [vmem:[%s11045_s1 + $0x3a4] ss:$16 sps:$4 sm:$0xff]   ;;  %v8726_v30 = vld [vmem:[%s11045_s1 + $0x3a0] ss:$16 sps:$4 sm:$0xff]   ;;  %v8689_v33 = vld [vmem:[%s11046_s2 + $0xf8] sm:$0xff]  }
 0x34e   : > { %1996 = vmatmul.mubr.bf16.vlgmr.msra.gmra.mrb[0].mxu1 %v1762_v34  ;;  %2109 = vmatmul.mubr.bf16.vlgmr.msra.gmra.mrb[16].mxu0 %v1762_v34  ;;  %v8732_v34 = vld [vmem:[%s11045_s1 + $0x3c0] ss:$16 sps:$4 sm:$0xff]  }
 0x34f   : > { %7721 = vmatpush3.bf16.msra.mxu1 %v9322_v4  ;;  %2005 = vmatprep.mubr.bf16.mxu1 %v9283_v1 }
 0x350   : > { %v7710_v37 = vpop.f32.mrb[52].mxu0  ;;  %2118 = vmatprep.mubr.bf16.mxu0 %v9283_v1  ;;  %7722 = vmatprep.subr.bf16.mxu1 %v9324_v6 }
 0x351   : > { %v1715_v38 = vpop.f32.mrb[53].mxu0  ;;  %2730 = vmatpush1.bf16.msra.mxu0 %v8690_v35  ;;  %v8737_v35 = vld [vmem:[%s11045_s1 + $0x3e4] ss:$16 sps:$4 sm:$0xff]  }
 0x352   : > { %v7711_v40 = vpop.f32.mrb[54].mxu0  ;;  %2731 = vmatprep.subr.bf16.mxu0 %v8695_v36  ;;  %v8735_v36 = vld [vmem:[%s11045_s1 + $0x3e0] ss:$16 sps:$4 sm:$0xff]  }
 0x353   : > { %7723 = vmatpush3.bf16.msra.mxu1 %v9324_v6  ;;  %v1765_v41 = vpack.c.bf16 %v7711_v40, %v7710_v37  ;;  %v1718_v42 = vpop.f32.mrb[55].mxu0  ;;  %v8748_v37 = vld [vmem:[%s11045_s1 + $0x404] ss:$16 sps:$4 sm:$0xff]  }
 0x354   : > { %v1764_v43 = vpack.c.bf16 %v1718_v42, %v1715_v38  ;;  %7724 = vmatprep.subr.bf16.mxu1 %v9329_v10 }
 0x355   : > { %2732 = vmatpush1.bf16.msra.mxu0 %v8693_v39 }
 0x356   : > { %2006 = vmatmul.mubr.bf16.gmra.mrb[4].mxu1 %v1763_v31  ;;  %2119 = vmatmul.mubr.bf16.gmra.mrb[20].mxu0 %v1763_v31  ;;  %v8734_v31 = vld [vmem:[%s11045_s1 + $0x3c4] ss:$16 sps:$4 sm:$0xff]  }
 0x357   : > { %2015 = vmatprep.mubr.bf16.mxu1 %v9283_v1  ;;  %2128 = vmatprep.mubr.bf16.mxu0 %v9283_v1 }
 0x358   : > { %7725 = vmatpush3.bf16.msra.mxu1 %v9329_v10  ;;  %v7714_v47 = vpop.f32.mrb[56].mxu0  ;;  %2733 = vmatprep.subr.bf16.mxu0 %v8698_v44  ;;  %v8746_v44 = vld [vmem:[%s11045_s1 + $0x400] ss:$16 sps:$4 sm:$0xff]  }
 0x359   : > { %7726 = vmatprep.subr.bf16.mxu1 %v9336_v13  ;;  %v1731_v48 = vpop.f32.mrb[57].mxu0  ;;  %2734 = vmatpush1.bf16.msra.mxu0 %v8696_v45  ;;  %v8751_v45 = vld [vmem:[%s11045_s1 + $0x424] ss:$16 sps:$4 sm:$0xff]  }
 0x35a   : > { %v7715_v50 = vpop.f32.mrb[58].mxu0  ;;  %2735 = vmatprep.subr.bf16.mxu0 %v8701_v46 }
 0x35b   : > { %v1767_v51 = vpack.c.bf16 %v7715_v50, %v7714_v47  ;;  %v1734_v52 = vpop.f32.mrb[59].mxu0 }
 0x35c   : > { %7727 = vmatpush3.bf16.msra.mxu1 %v9336_v13  ;;  %v1766_v53 = vpack.c.bf16 %v1734_v52, %v1731_v48  ;;  %v8749_v48 = vld [vmem:[%s11045_s1 + $0x420] ss:$16 sps:$4 sm:$0xff]  }
 0x35d   : > { %7728 = vmatprep.subr.bf16.mxu1 %v9340_v17  ;;  %2736 = vmatpush1.bf16.msra.mxu0 %v8699_v49 }
 0x35e   : > { %2016 = vmatmul.mubr.bf16.gmra.mrb[8].mxu1 %v1764_v43  ;;  %2129 = vmatmul.mubr.bf16.gmra.mrb[24].mxu0 %v1764_v43 }
 0x35f   : > { %2025 = vmatprep.mubr.bf16.mxu1 %v9283_v1  ;;  %2138 = vmatprep.mubr.bf16.mxu0 %v9283_v1 }
 0x360   : > { %7729 = vmatpush3.bf16.msra.mxu1 %v9340_v17  ;;  %v7718_v57 = vpop.f32.mrb[60].mxu0  ;;  %2737 = vmatprep.subr.bf16.mxu0 %v8704_v54  ;;  %v8752_v54 = vld [vmem:[%s11045_s1 + $0x440] ss:$16 sps:$4 sm:$0xff]  }
 0x361   : > { %7730 = vmatprep.subr.bf16.mxu1 %v9353_v22  ;;  %v1747_v58 = vpop.f32.mrb[61].mxu0  ;;  %2738 = vmatpush1.bf16.msra.mxu0 %v8702_v55  ;;  %v8757_v55 = vld [vmem:[%s11045_s1 + $0x464] ss:$16 sps:$4 sm:$0xff]  }
 0x362   : > { %v7719_v60 = vpop.f32.mrb[62].mxu0  ;;  %2739 = vmatprep.subr.bf16.mxu0 %v8713_v56 }
 0x363   : > { %v1769_v61 = vpack.c.bf16 %v7719_v60, %v7718_v57  ;;  %v1750_v62 = vpop.f32.mrb[63].mxu0 }
 0x364   : > { %7731 = vmatpush3.bf16.msra.mxu1 %v9353_v22  ;;  %v1768_v63 = vpack.c.bf16 %v1750_v62, %v1747_v58  ;;  %v8755_v58 = vld [vmem:[%s11045_s1 + $0x460] ss:$16 sps:$4 sm:$0xff]  }
 0x365   : > { %7732 = vmatprep.subr.bf16.mxu1 %v9363_v28  ;;  %2740 = vmatpush1.bf16.msra.mxu0 %v8711_v59 }
 0x366   : > { %2026 = vmatmul.mubr.bf16.gmra.mrb[12].mxu1 %v1765_v41  ;;  %2139 = vmatmul.mubr.bf16.gmra.mrb[28].mxu0 %v1765_v41 }
 0x367   : > { %2035 = vmatprep.mubr.bf16.mxu1 %v9283_v1  ;;  %2148 = vmatprep.mubr.bf16.mxu0 %v9283_v1 }
 0x368   : > { %7733 = vmatpush3.bf16.msra.mxu1 %v9363_v28  ;;  %2741 = vmatprep.subr.bf16.mxu0 %v8722_v0  ;;  %v8758_v0 = vld [vmem:[%s11045_s1 + $0x480] ss:$16 sps:$4 sm:$0xff]  }
 0x369   : > { %7734 = vmatprep.subr.bf16.mxu1 %v9373_v32  ;;  %2742 = vmatpush1.bf16.msra.mxu0 %v8720_v2  ;;  %v8769_v2 = vld [vmem:[%s11045_s1 + $0x4a4] ss:$16 sps:$4 sm:$0xff]  }
 0x36a   : > { %2743 = vmatprep.subr.bf16.mxu0 %v8731_v3 }
 0x36c   : > { %7735 = vmatpush3.bf16.msra.mxu1 %v9373_v32 }
 0x36d   : > { %2616 = vmatprep.subr.bf16.mxu1 %v8707_v5  ;;  %2744 = vmatpush1.bf16.msra.mxu0 %v8729_v7  ;;  %v8767_v7 = vld [vmem:[%s11045_s1 + $0x4a0] ss:$16 sps:$4 sm:$0xff]  }
 0x36e   : > { %2036 = vmatmul.mubr.bf16.gmra.mrb[16].mxu1 %v1766_v53  ;;  %2149 = vmatmul.mubr.bf16.gmra.mrb[32].mxu0 %v1766_v53  ;;  %v8754_v53 = vld [vmem:[%s11045_s1 + $0x444] ss:$16 sps:$4 sm:$0xff]  }
 0x36f   : > { %2045 = vmatprep.mubr.bf16.mxu1 %v9283_v1  ;;  %2158 = vmatprep.mubr.bf16.mxu0 %v9283_v1 }
 0x370   : > { %7752 = vmatprep.subr.bf16.mxu0 %v9322_v4 }
 0x376   : > { %2046 = vmatmul.mubr.bf16.gmra.mrb[20].mxu1 %v1767_v51  ;;  %2159 = vmatmul.mubr.bf16.gmra.mrb[36].mxu0 %v1767_v51 }
 0x377   : > { %2055 = vmatprep.mubr.bf16.mxu1 %v9283_v1  ;;  %2168 = vmatprep.mubr.bf16.mxu0 %v9283_v1 }
 0x37e   : > { %2056 = vmatmul.mubr.bf16.gmra.mrb[24].mxu1 %v1768_v63  ;;  %2169 = vmatmul.mubr.bf16.gmra.mrb[40].mxu0 %v1768_v63  ;;  %v8760_v63 = vld [vmem:[%s11045_s1 + $0x484] ss:$16 sps:$4 sm:$0xff]  }
 0x37f   : > { %2065 = vmatprep.mubr.bf16.mxu1 %v9283_v1  ;;  %2178 = vmatprep.mubr.bf16.mxu0 %v9283_v1 }
 0x386   : > { %2066 = vmatmul.mubr.bf16.gmra.mrb[28].mxu1 %v1769_v61  ;;  %2179 = vmatmul.mubr.bf16.gmra.mrb[44].mxu0 %v1769_v61 }
 0x387   : > { %7736 = vmatprep.mubr.bf16.mxu1 %v8682_v8  ;;  %2761 = vmatprep.mubr.bf16.mxu0 %v9283_v1 }
 0x38e   : > { %7737 = vmatmul.mubr.bf16.vlgmr.msra.gmra.mrb[48].mxu1 %v8683_v9 }
 0x38f   : > { %7740 = vmatprep.mubr.bf16.mxu1 %v8684_v11  ;;  %2617 = vmatpush1.bf16.msra.mxu1 %v8705_v12 }
 0x390   : > { %2618 = vmatprep.subr.bf16.mxu1 %v8710_v14  ;;  %v8778_v14 = vld [vmem:[%s11045_s1 + $0x4c4] ss:$16 sps:$4 sm:$0xff]  }
 0x393   : > { %2619 = vmatpush1.bf16.msra.mxu1 %v8708_v15  ;;  %v8776_v15 = vld [vmem:[%s11045_s1 + $0x4c0] ss:$16 sps:$4 sm:$0xff]  }
 0x394   : > { %2620 = vmatprep.subr.bf16.mxu1 %v8716_v16  ;;  %v8787_v16 = vld [vmem:[%s11045_s1 + $0x4e4] ss:$16 sps:$4 sm:$0xff]  }
 0x396   : > { %7741 = vmatmul.mubr.bf16.gmra.mrb[52].mxu1 %v8685_v18  ;;  %v8763_v18 = vld [vmem:[%s11045_s1 + $0x40c] ss:$16 sps:$4 sm:$0xff]  }
 0x397   : > { %7744 = vmatprep.mubr.bf16.mxu1 %v8686_v19  ;;  %2621 = vmatpush1.bf16.msra.mxu1 %v8714_v20  ;;  %v8785_v19 = vld [vmem:[%s11045_s1 + $0x4e0] ss:$16 sps:$4 sm:$0xff]  }
 0x398   : > { %2622 = vmatprep.subr.bf16.mxu1 %v8719_v21  ;;  %v8738_v20 = vld [vmem:[%s11046_s2 + $0x100] sm:$0xff]   ;;  %v8739_v21 = vld [vmem:[%s11046_s2 + $0x108] sm:$0xff]  }
 0x39b   : > { %2623 = vmatpush1.bf16.msra.mxu1 %v8717_v23  ;;  %v8740_v23 = vld [vmem:[%s11046_s2 + $0x110] sm:$0xff]  }
 0x39c   : > { %2624 = vmatprep.subr.bf16.mxu1 %v8725_v24  ;;  %v8761_v24 = vld [vmem:[%s11045_s1 + $0x408] ss:$16 sps:$4 sm:$0xff]  }
 0x39e   : > { %7745 = vmatmul.mubr.bf16.gmra.mrb[56].mxu1 %v8687_v25  ;;  %v8766_v25 = vld [vmem:[%s11045_s1 + $0x42c] ss:$16 sps:$4 sm:$0xff]  }
 0x39f   : > { %7748 = vmatprep.mubr.bf16.mxu1 %v8688_v26  ;;  %2625 = vmatpush1.bf16.msra.mxu1 %v8723_v27  ;;  %v8764_v26 = vld [vmem:[%s11045_s1 + $0x428] ss:$16 sps:$4 sm:$0xff]   ;;  %v8772_v27 = vld [vmem:[%s11045_s1 + $0x44c] ss:$16 sps:$4 sm:$0xff]  }
 0x3a0   : > { %2626 = vmatprep.subr.bf16.mxu1 %v8728_v29  ;;  %v8741_v29 = vld [vmem:[%s11046_s2 + $0x118] sm:$0xff]  }
 0x3a3   : > { %2627 = vmatpush1.bf16.msra.mxu1 %v8726_v30  ;;  %v8742_v30 = vld [vmem:[%s11046_s2 + $0x120] sm:$0xff]  }
 0x3a4   : > { %2628 = vmatprep.subr.bf16.mxu1 %v8734_v31  ;;  %v8770_v31 = vld [vmem:[%s11045_s1 + $0x448] ss:$16 sps:$4 sm:$0xff]  }
 0x3a6   : > { %7749 = vmatmul.mubr.bf16.gmra.mrb[60].mxu1 %v8689_v33  ;;  %v8775_v33 = vld [vmem:[%s11045_s1 + $0x46c] ss:$16 sps:$4 sm:$0xff]  }
 0x3a7   : > { %2629 = vmatpush1.bf16.msra.mxu1 %v8732_v34  ;;  %2648 = vmatprep.mubr.bf16.mxu1 %v9283_v1  ;;  %v8773_v34 = vld [vmem:[%s11045_s1 + $0x468] ss:$16 sps:$4 sm:$0xff]  }
 0x3a8   : > { %2630 = vmatprep.subr.bf16.mxu1 %v8737_v35  ;;  %v8781_v35 = vld [vmem:[%s11045_s1 + $0x48c] ss:$16 sps:$4 sm:$0xff]  }
 0x3ab   : > { %2631 = vmatpush1.bf16.msra.mxu1 %v8735_v36  ;;  %v8743_v36 = vld [vmem:[%s11046_s2 + $0x128] sm:$0xff]  }
 0x3ac   : > { %3269 = vmatprep.subr.bf16.mxu1 %v8748_v37  ;;  %v8744_v37 = vld [vmem:[%s11046_s2 + $0x130] sm:$0xff]  }
 0x461   : > { %v7738_v38 = vpop.f32.mrb[48].mxu1 }
 0x462   : > { %v2352_v39 = vpop.f32.mrb[49].mxu1 }
 0x463   : > { %v7739_v40 = vpop.f32.mrb[50].mxu1 }
 0x464   : > { %v2416_v41 = vpack.c.bf16 %v7739_v40, %v7738_v38  ;;  %v2355_v42 = vpop.f32.mrb[51].mxu1  ;;  %v8779_v38 = vld [vmem:[%s11045_s1 + $0x488] ss:$16 sps:$4 sm:$0xff]  }
 0x465   : > { %v2415_v43 = vpack.c.bf16 %v2355_v42, %v2352_v39  ;;  %v8784_v39 = vld [vmem:[%s11045_s1 + $0x4ac] ss:$16 sps:$4 sm:$0xff]   ;;  %v8782_v40 = vld [vmem:[%s11045_s1 + $0x4a8] ss:$16 sps:$4 sm:$0xff]  }
 0x466   : > { %v8745_v42 = vld [vmem:[%s11046_s2 + $0x138] sm:$0xff]  }
 0x467   : > { %2649 = vmatmul.mubr.bf16.vlgmr.msra.gmra.mrb[0].mxu1 %v2415_v43  ;;  %2762 = vmatmul.mubr.bf16.vlgmr.msra.gmra.mrb[16].mxu0 %v2415_v43  ;;  %v8788_v43 = vld [vmem:[%s11045_s1 + $0x4c8] ss:$16 sps:$4 sm:$0xff]  }
 0x468   : > { %7753 = vmatpush3.bf16.msra.mxu0 %v9322_v4  ;;  %2658 = vmatprep.mubr.bf16.mxu1 %v9283_v1 }
 0x469   : > { %v7742_v46 = vpop.f32.mrb[52].mxu1  ;;  %2771 = vmatprep.mubr.bf16.mxu0 %v9283_v1  ;;  %7754 = vmatprep.subr.bf16.mxu0 %v9324_v6 }
 0x46a   : > { %v2368_v47 = vpop.f32.mrb[53].mxu1  ;;  %3270 = vmatpush1.bf16.msra.mxu1 %v8746_v44  ;;  %v8793_v44 = vld [vmem:[%s11045_s1 + $0x4ec] ss:$16 sps:$4 sm:$0xff]  }
 0x46b   : > { %v7743_v49 = vpop.f32.mrb[54].mxu1  ;;  %3271 = vmatprep.subr.bf16.mxu1 %v8751_v45  ;;  %v8791_v45 = vld [vmem:[%s11045_s1 + $0x4e8] ss:$16 sps:$4 sm:$0xff]  }
 0x46c   : > { %7755 = vmatpush3.bf16.msra.mxu0 %v9324_v6  ;;  %v2418_v50 = vpack.c.bf16 %v7743_v49, %v7742_v46  ;;  %v2371_v51 = vpop.f32.mrb[55].mxu1  ;;  %v8804_v46 = vld [vmem:[%s11045_s1 + $0x50c] ss:$16 sps:$4 sm:$0xff]  }
 0x46d   : > { %v2417_v52 = vpack.c.bf16 %v2371_v51, %v2368_v47  ;;  %7756 = vmatprep.subr.bf16.mxu0 %v9329_v10 }
 0x46e   : > { %3272 = vmatpush1.bf16.msra.mxu1 %v8749_v48 }
 0x46f   : > { %2659 = vmatmul.mubr.bf16.gmra.mrb[4].mxu1 %v2416_v41  ;;  %2772 = vmatmul.mubr.bf16.gmra.mrb[20].mxu0 %v2416_v41  ;;  %v8790_v41 = vld [vmem:[%s11045_s1 + $0x4cc] ss:$16 sps:$4 sm:$0xff]  }
 0x470   : > { %2668 = vmatprep.mubr.bf16.mxu1 %v9283_v1  ;;  %2781 = vmatprep.mubr.bf16.mxu0 %v9283_v1 }
 0x471   : > { %7757 = vmatpush3.bf16.msra.mxu0 %v9329_v10  ;;  %v7746_v56 = vpop.f32.mrb[56].mxu1  ;;  %3273 = vmatprep.subr.bf16.mxu1 %v8754_v53  ;;  %v8802_v53 = vld [vmem:[%s11045_s1 + $0x508] ss:$16 sps:$4 sm:$0xff]  }
 0x472   : > { %7758 = vmatprep.subr.bf16.mxu0 %v9336_v13  ;;  %v2384_v57 = vpop.f32.mrb[57].mxu1  ;;  %3274 = vmatpush1.bf16.msra.mxu1 %v8752_v54  ;;  %v8807_v54 = vld [vmem:[%s11045_s1 + $0x52c] ss:$16 sps:$4 sm:$0xff]  }
 0x473   : > { %v7747_v59 = vpop.f32.mrb[58].mxu1  ;;  %3275 = vmatprep.subr.bf16.mxu1 %v8757_v55 }
 0x474   : > { %v2420_v60 = vpack.c.bf16 %v7747_v59, %v7746_v56  ;;  %v2387_v61 = vpop.f32.mrb[59].mxu1 }
 0x475   : > { %7759 = vmatpush3.bf16.msra.mxu0 %v9336_v13  ;;  %v2419_v62 = vpack.c.bf16 %v2387_v61, %v2384_v57  ;;  %v8805_v57 = vld [vmem:[%s11045_s1 + $0x528] ss:$16 sps:$4 sm:$0xff]  }
 0x476   : > { %7760 = vmatprep.subr.bf16.mxu0 %v9340_v17  ;;  %3276 = vmatpush1.bf16.msra.mxu1 %v8755_v58 }
 0x477   : > { %2669 = vmatmul.mubr.bf16.gmra.mrb[8].mxu1 %v2417_v52  ;;  %2782 = vmatmul.mubr.bf16.gmra.mrb[24].mxu0 %v2417_v52 }
 0x478   : > { %2678 = vmatprep.mubr.bf16.mxu1 %v9283_v1  ;;  %2791 = vmatprep.mubr.bf16.mxu0 %v9283_v1 }
 0x479   : > { %7761 = vmatpush3.bf16.msra.mxu0 %v9340_v17  ;;  %v7750_v3 = vpop.f32.mrb[60].mxu1  ;;  %3277 = vmatprep.subr.bf16.mxu1 %v8760_v63  ;;  %v8808_v63 = vld [vmem:[%s11045_s1 + $0x548] ss:$16 sps:$4 sm:$0xff]  }
 0x47a   : > { %7762 = vmatprep.subr.bf16.mxu0 %v9353_v22  ;;  %v2400_v5 = vpop.f32.mrb[61].mxu1  ;;  %3278 = vmatpush1.bf16.msra.mxu1 %v8758_v0  ;;  %v8813_v0 = vld [vmem:[%s11045_s1 + $0x56c] ss:$16 sps:$4 sm:$0xff]  }
 0x47b   : > { %v7751_v8 = vpop.f32.mrb[62].mxu1  ;;  %3279 = vmatprep.subr.bf16.mxu1 %v8769_v2 }
 0x47c   : > { %v2422_v9 = vpack.c.bf16 %v7751_v8, %v7750_v3  ;;  %v2403_v11 = vpop.f32.mrb[63].mxu1 }
 0x47d   : > { %7763 = vmatpush3.bf16.msra.mxu0 %v9353_v22  ;;  %v2421_v12 = vpack.c.bf16 %v2403_v11, %v2400_v5  ;;  %v8811_v5 = vld [vmem:[%s11045_s1 + $0x568] ss:$16 sps:$4 sm:$0xff]  }
 0x47e   : > { %7764 = vmatprep.subr.bf16.mxu0 %v9363_v28  ;;  %3280 = vmatpush1.bf16.msra.mxu1 %v8767_v7 }
 0x47f   : > { %2679 = vmatmul.mubr.bf16.gmra.mrb[12].mxu1 %v2418_v50  ;;  %2792 = vmatmul.mubr.bf16.gmra.mrb[28].mxu0 %v2418_v50 }
 0x480   : > { %2688 = vmatprep.mubr.bf16.mxu1 %v9283_v1  ;;  %2801 = vmatprep.mubr.bf16.mxu0 %v9283_v1 }
 0x481   : > { %7765 = vmatpush3.bf16.msra.mxu0 %v9363_v28  ;;  %3281 = vmatprep.subr.bf16.mxu1 %v8778_v14  ;;  %v8814_v14 = vld [vmem:[%s11045_s1 + $0x588] ss:$16 sps:$4 sm:$0xff]  }
 0x482   : > { %7766 = vmatprep.subr.bf16.mxu0 %v9373_v32  ;;  %3282 = vmatpush1.bf16.msra.mxu1 %v8776_v15  ;;  %v8825_v15 = vld [vmem:[%s11045_s1 + $0x5ac] ss:$16 sps:$4 sm:$0xff]  }
 0x483   : > { %3283 = vmatprep.subr.bf16.mxu1 %v8787_v16 }
 0x485   : > { %7767 = vmatpush3.bf16.msra.mxu0 %v9373_v32 }
 0x486   : > { %3382 = vmatprep.subr.bf16.mxu0 %v8763_v18  ;;  %3284 = vmatpush1.bf16.msra.mxu1 %v8785_v19  ;;  %v8823_v19 = vld [vmem:[%s11045_s1 + $0x5a8] ss:$16 sps:$4 sm:$0xff]  }
 0x487   : > { %2689 = vmatmul.mubr.bf16.gmra.mrb[16].mxu1 %v2419_v62  ;;  %2802 = vmatmul.mubr.bf16.gmra.mrb[32].mxu0 %v2419_v62  ;;  %v8810_v62 = vld [vmem:[%s11045_s1 + $0x54c] ss:$16 sps:$4 sm:$0xff]  }
 0x488   : > { %2698 = vmatprep.mubr.bf16.mxu1 %v9283_v1  ;;  %2811 = vmatprep.mubr.bf16.mxu0 %v9283_v1 }
 0x489   : > { %7784 = vmatprep.subr.bf16.mxu1 %v9322_v4 }
 0x48f   : > { %2699 = vmatmul.mubr.bf16.gmra.mrb[20].mxu1 %v2420_v60  ;;  %2812 = vmatmul.mubr.bf16.gmra.mrb[36].mxu0 %v2420_v60 }
 0x490   : > { %2708 = vmatprep.mubr.bf16.mxu1 %v9283_v1  ;;  %2821 = vmatprep.mubr.bf16.mxu0 %v9283_v1 }
 0x497   : > { %2709 = vmatmul.mubr.bf16.gmra.mrb[24].mxu1 %v2421_v12  ;;  %2822 = vmatmul.mubr.bf16.gmra.mrb[40].mxu0 %v2421_v12  ;;  %v8816_v12 = vld [vmem:[%s11045_s1 + $0x58c] ss:$16 sps:$4 sm:$0xff]  }
 0x498   : > { %2718 = vmatprep.mubr.bf16.mxu1 %v9283_v1  ;;  %2831 = vmatprep.mubr.bf16.mxu0 %v9283_v1 }
 0x49f   : > { %2719 = vmatmul.mubr.bf16.gmra.mrb[28].mxu1 %v2422_v9  ;;  %2832 = vmatmul.mubr.bf16.gmra.mrb[44].mxu0 %v2422_v9 }
 0x4a0   : > { %7768 = vmatprep.mubr.bf16.mxu0 %v8738_v20  ;;  %3301 = vmatprep.mubr.bf16.mxu1 %v9283_v1 }
 0x4a7   : > { %7769 = vmatmul.mubr.bf16.vlgmr.msra.gmra.mrb[64].mxu0 %v8739_v21 }
 0x4a8   : > { %7772 = vmatprep.mubr.bf16.mxu0 %v8740_v23  ;;  %3383 = vmatpush1.bf16.msra.mxu0 %v8761_v24 }
 0x4a9   : > { %3384 = vmatprep.subr.bf16.mxu0 %v8766_v25  ;;  %v8834_v25 = vld [vmem:[%s11045_s1 + $0x5cc] ss:$16 sps:$4 sm:$0xff]  }
 0x4ac   : > { %3385 = vmatpush1.bf16.msra.mxu0 %v8764_v26  ;;  %v8832_v26 = vld [vmem:[%s11045_s1 + $0x5c8] ss:$16 sps:$4 sm:$0xff]  }
 0x4ad   : > { %3386 = vmatprep.subr.bf16.mxu0 %v8772_v27  ;;  %v8843_v27 = vld [vmem:[%s11045_s1 + $0x5ec] ss:$16 sps:$4 sm:$0xff]  }
 0x4af   : > { %7773 = vmatmul.mubr.bf16.gmra.mrb[68].mxu0 %v8741_v29  ;;  %v8819_v29 = vld [vmem:[%s11045_s1 + $0x504] ss:$16 sps:$4 sm:$0xff]  }
 0x4b0   : > { %7776 = vmatprep.mubr.bf16.mxu0 %v8742_v30  ;;  %3387 = vmatpush1.bf16.msra.mxu0 %v8770_v31  ;;  %v8841_v30 = vld [vmem:[%s11045_s1 + $0x5e8] ss:$16 sps:$4 sm:$0xff]   ;;  %v8794_v31 = vld [vmem:[%s11046_s2 + $0x140] sm:$0xff]  }
 0x4b1   : > { %3388 = vmatprep.subr.bf16.mxu0 %v8775_v33  ;;  %v8795_v33 = vld [vmem:[%s11046_s2 + $0x148] sm:$0xff]  }
 0x4b4   : > { %3389 = vmatpush1.bf16.msra.mxu0 %v8773_v34  ;;  %v8796_v34 = vld [vmem:[%s11046_s2 + $0x150] sm:$0xff]  }
 0x4b5   : > { %3390 = vmatprep.subr.bf16.mxu0 %v8781_v35  ;;  %v8817_v35 = vld [vmem:[%s11045_s1 + $0x500] ss:$16 sps:$4 sm:$0xff]  }
 0x4b7   : > { %7777 = vmatmul.mubr.bf16.gmra.mrb[72].mxu0 %v8743_v36  ;;  %v8822_v36 = vld [vmem:[%s11045_s1 + $0x524] ss:$16 sps:$4 sm:$0xff]  }
 0x4b8   : > { %7780 = vmatprep.mubr.bf16.mxu0 %v8744_v37  ;;  %3391 = vmatpush1.bf16.msra.mxu0 %v8779_v38  ;;  %v8820_v37 = vld [vmem:[%s11045_s1 + $0x520] ss:$16 sps:$4 sm:$0xff]   ;;  %v8828_v38 = vld [vmem:[%s11045_s1 + $0x544] ss:$16 sps:$4 sm:$0xff]  }
 0x4b9   : > { %3392 = vmatprep.subr.bf16.mxu0 %v8784_v39  ;;  %v8797_v39 = vld [vmem:[%s11046_s2 + $0x158] sm:$0xff]  }
 0x4bc   : > { %3393 = vmatpush1.bf16.msra.mxu0 %v8782_v40  ;;  %v8798_v40 = vld [vmem:[%s11046_s2 + $0x160] sm:$0xff]  }
 0x4bd   : > { %3394 = vmatprep.subr.bf16.mxu0 %v8790_v41  ;;  %v8826_v41 = vld [vmem:[%s11045_s1 + $0x540] ss:$16 sps:$4 sm:$0xff]  }
 0x4bf   : > { %7781 = vmatmul.mubr.bf16.gmra.mrb[76].mxu0 %v8745_v42  ;;  %v8831_v42 = vld [vmem:[%s11045_s1 + $0x564] ss:$16 sps:$4 sm:$0xff]  }
 0x4c0   : > { %3395 = vmatpush1.bf16.msra.mxu0 %v8788_v43  ;;  %3414 = vmatprep.mubr.bf16.mxu0 %v9283_v1  ;;  %v8829_v43 = vld [vmem:[%s11045_s1 + $0x560] ss:$16 sps:$4 sm:$0xff]  }
 0x4c1   : > { %3396 = vmatprep.subr.bf16.mxu0 %v8793_v44  ;;  %v8837_v44 = vld [vmem:[%s11045_s1 + $0x584] ss:$16 sps:$4 sm:$0xff]  }
 0x4c4   : > { %3397 = vmatpush1.bf16.msra.mxu0 %v8791_v45  ;;  %v8799_v45 = vld [vmem:[%s11046_s2 + $0x168] sm:$0xff]  }
 0x4c5   : > { %4035 = vmatprep.subr.bf16.mxu0 %v8804_v46  ;;  %v8800_v46 = vld [vmem:[%s11046_s2 + $0x170] sm:$0xff]  }
 0x57a   : > { %v7770_v47 = vpop.f32.mrb[64].mxu0 }
 0x57b   : > { %v3005_v48 = vpop.f32.mrb[65].mxu0 }
 0x57c   : > { %v7771_v49 = vpop.f32.mrb[66].mxu0 }
 0x57d   : > { %v3069_v50 = vpack.c.bf16 %v7771_v49, %v7770_v47  ;;  %v3008_v51 = vpop.f32.mrb[67].mxu0  ;;  %v8835_v47 = vld [vmem:[%s11045_s1 + $0x580] ss:$16 sps:$4 sm:$0xff]  }
 0x57e   : > { %v3068_v52 = vpack.c.bf16 %v3008_v51, %v3005_v48  ;;  %v8840_v48 = vld [vmem:[%s11045_s1 + $0x5a4] ss:$16 sps:$4 sm:$0xff]   ;;  %v8838_v49 = vld [vmem:[%s11045_s1 + $0x5a0] ss:$16 sps:$4 sm:$0xff]   ;;  %v8801_v51 = vld [vmem:[%s11046_s2 + $0x178] sm:$0xff]  }
 0x580   : > { %3302 = vmatmul.mubr.bf16.vlgmr.msra.gmra.mrb[0].mxu1 %v3068_v52  ;;  %3415 = vmatmul.mubr.bf16.vlgmr.msra.gmra.mrb[16].mxu0 %v3068_v52  ;;  %v8844_v52 = vld [vmem:[%s11045_s1 + $0x5c0] ss:$16 sps:$4 sm:$0xff]  }
 0x581   : > { %7785 = vmatpush3.bf16.msra.mxu1 %v9322_v4  ;;  %3311 = vmatprep.mubr.bf16.mxu1 %v9283_v1 }
 0x582   : > { %v7774_v55 = vpop.f32.mrb[68].mxu0  ;;  %3424 = vmatprep.mubr.bf16.mxu0 %v9283_v1  ;;  %7786 = vmatprep.subr.bf16.mxu1 %v9324_v6 }
 0x583   : > { %v3021_v56 = vpop.f32.mrb[69].mxu0  ;;  %4036 = vmatpush1.bf16.msra.mxu0 %v8802_v53  ;;  %v8849_v53 = vld [vmem:[%s11045_s1 + $0x5e4] ss:$16 sps:$4 sm:$0xff]  }
 0x584   : > { %v7775_v58 = vpop.f32.mrb[70].mxu0  ;;  %4037 = vmatprep.subr.bf16.mxu0 %v8807_v54  ;;  %v8847_v54 = vld [vmem:[%s11045_s1 + $0x5e0] ss:$16 sps:$4 sm:$0xff]  }
 0x585   : > { %7787 = vmatpush3.bf16.msra.mxu1 %v9324_v6  ;;  %v3071_v59 = vpack.c.bf16 %v7775_v58, %v7774_v55  ;;  %v3024_v60 = vpop.f32.mrb[71].mxu0  ;;  %v8860_v55 = vld [vmem:[%s11045_s1 + $0x604] ss:$16 sps:$4 sm:$0xff]  }
 0x586   : > { %v3070_v61 = vpack.c.bf16 %v3024_v60, %v3021_v56  ;;  %7788 = vmatprep.subr.bf16.mxu1 %v9329_v10 }
 0x587   : > { %4038 = vmatpush1.bf16.msra.mxu0 %v8805_v57 }
 0x588   : > { %3312 = vmatmul.mubr.bf16.gmra.mrb[4].mxu1 %v3069_v50  ;;  %3425 = vmatmul.mubr.bf16.gmra.mrb[20].mxu0 %v3069_v50  ;;  %v8846_v50 = vld [vmem:[%s11045_s1 + $0x5c4] ss:$16 sps:$4 sm:$0xff]  }
 0x589   : > { %3321 = vmatprep.mubr.bf16.mxu1 %v9283_v1  ;;  %3434 = vmatprep.mubr.bf16.mxu0 %v9283_v1 }
 0x58a   : > { %7789 = vmatpush3.bf16.msra.mxu1 %v9329_v10  ;;  %v7778_v2 = vpop.f32.mrb[72].mxu0  ;;  %4039 = vmatprep.subr.bf16.mxu0 %v8810_v62  ;;  %v8858_v62 = vld [vmem:[%s11045_s1 + $0x600] ss:$16 sps:$4 sm:$0xff]  }
 0x58b   : > { %7790 = vmatprep.subr.bf16.mxu1 %v9336_v13  ;;  %v3037_v3 = vpop.f32.mrb[73].mxu0  ;;  %4040 = vmatpush1.bf16.msra.mxu0 %v8808_v63  ;;  %v8863_v63 = vld [vmem:[%s11045_s1 + $0x624] ss:$16 sps:$4 sm:$0xff]  }
 0x58c   : > { %v7779_v7 = vpop.f32.mrb[74].mxu0  ;;  %4041 = vmatprep.subr.bf16.mxu0 %v8813_v0 }
 0x58d   : > { %v3073_v8 = vpack.c.bf16 %v7779_v7, %v7778_v2  ;;  %v3040_v9 = vpop.f32.mrb[75].mxu0 }
 0x58e   : > { %7791 = vmatpush3.bf16.msra.mxu1 %v9336_v13  ;;  %v3072_v11 = vpack.c.bf16 %v3040_v9, %v3037_v3  ;;  %v8861_v3 = vld [vmem:[%s11045_s1 + $0x620] ss:$16 sps:$4 sm:$0xff]  }
 0x58f   : > { %7792 = vmatprep.subr.bf16.mxu1 %v9340_v17  ;;  %4042 = vmatpush1.bf16.msra.mxu0 %v8811_v5 }
 0x590   : > { %3322 = vmatmul.mubr.bf16.gmra.mrb[8].mxu1 %v3070_v61  ;;  %3435 = vmatmul.mubr.bf16.gmra.mrb[24].mxu0 %v3070_v61 }
 0x591   : > { %3331 = vmatprep.mubr.bf16.mxu1 %v9283_v1  ;;  %3444 = vmatprep.mubr.bf16.mxu0 %v9283_v1 }
 0x592   : > { %7793 = vmatpush3.bf16.msra.mxu1 %v9340_v17  ;;  %v7782_v16 = vpop.f32.mrb[76].mxu0  ;;  %4043 = vmatprep.subr.bf16.mxu0 %v8816_v12  ;;  %v8864_v12 = vld [vmem:[%s11045_s1 + $0x640] ss:$16 sps:$4 sm:$0xff]  }
 0x593   : > { %7794 = vmatprep.subr.bf16.mxu1 %v9353_v22  ;;  %v3053_v18 = vpop.f32.mrb[77].mxu0  ;;  %4044 = vmatpush1.bf16.msra.mxu0 %v8814_v14  ;;  %v8869_v14 = vld [vmem:[%s11045_s1 + $0x664] ss:$16 sps:$4 sm:$0xff]  }
 0x594   : > { %v7783_v20 = vpop.f32.mrb[78].mxu0  ;;  %4045 = vmatprep.subr.bf16.mxu0 %v8825_v15 }
 0x595   : > { %v3075_v21 = vpack.c.bf16 %v7783_v20, %v7782_v16  ;;  %v3056_v23 = vpop.f32.mrb[79].mxu0 }
 0x596   : > { %7795 = vmatpush3.bf16.msra.mxu1 %v9353_v22  ;;  %v3074_v24 = vpack.c.bf16 %v3056_v23, %v3053_v18  ;;  %v8867_v18 = vld [vmem:[%s11045_s1 + $0x660] ss:$16 sps:$4 sm:$0xff]  }
 0x597   : > { %7796 = vmatprep.subr.bf16.mxu1 %v9363_v28  ;;  %4046 = vmatpush1.bf16.msra.mxu0 %v8823_v19 }
 0x598   : > { %3332 = vmatmul.mubr.bf16.gmra.mrb[12].mxu1 %v3071_v59  ;;  %3445 = vmatmul.mubr.bf16.gmra.mrb[28].mxu0 %v3071_v59 }
 0x599   : > { %3341 = vmatprep.mubr.bf16.mxu1 %v9283_v1  ;;  %3454 = vmatprep.mubr.bf16.mxu0 %v9283_v1 }
 0x59a   : > { %7797 = vmatpush3.bf16.msra.mxu1 %v9363_v28  ;;  %4047 = vmatprep.subr.bf16.mxu0 %v8834_v25  ;;  %v8870_v25 = vld [vmem:[%s11045_s1 + $0x680] ss:$16 sps:$4 sm:$0xff]  }
 0x59b   : > { %7798 = vmatprep.subr.bf16.mxu1 %v9373_v32  ;;  %4048 = vmatpush1.bf16.msra.mxu0 %v8832_v26  ;;  %v8881_v26 = vld [vmem:[%s11045_s1 + $0x6a4] ss:$16 sps:$4 sm:$0xff]  }
 0x59c   : > { %4049 = vmatprep.subr.bf16.mxu0 %v8843_v27 }
 0x59e   : > { %7799 = vmatpush3.bf16.msra.mxu1 %v9373_v32 }
 0x59f   : > { %3922 = vmatprep.subr.bf16.mxu1 %v8819_v29  ;;  %4050 = vmatpush1.bf16.msra.mxu0 %v8841_v30  ;;  %v8879_v30 = vld [vmem:[%s11045_s1 + $0x6a0] ss:$16 sps:$4 sm:$0xff]  }
 0x5a0   : > { %3342 = vmatmul.mubr.bf16.gmra.mrb[16].mxu1 %v3072_v11  ;;  %3455 = vmatmul.mubr.bf16.gmra.mrb[32].mxu0 %v3072_v11  ;;  %v8866_v11 = vld [vmem:[%s11045_s1 + $0x644] ss:$16 sps:$4 sm:$0xff]  }
 0x5a1   : > { %3351 = vmatprep.mubr.bf16.mxu1 %v9283_v1  ;;  %3464 = vmatprep.mubr.bf16.mxu0 %v9283_v1 }
 0x5a2   : > { %7816 = vmatprep.subr.bf16.mxu0 %v9322_v4 }
 0x5a8   : > { %3352 = vmatmul.mubr.bf16.gmra.mrb[20].mxu1 %v3073_v8  ;;  %3465 = vmatmul.mubr.bf16.gmra.mrb[36].mxu0 %v3073_v8 }
 0x5a9   : > { %3361 = vmatprep.mubr.bf16.mxu1 %v9283_v1  ;;  %3474 = vmatprep.mubr.bf16.mxu0 %v9283_v1 }
 0x5b0   : > { %3362 = vmatmul.mubr.bf16.gmra.mrb[24].mxu1 %v3074_v24  ;;  %3475 = vmatmul.mubr.bf16.gmra.mrb[40].mxu0 %v3074_v24  ;;  %v8872_v24 = vld [vmem:[%s11045_s1 + $0x684] ss:$16 sps:$4 sm:$0xff]  }
 0x5b1   : > { %3371 = vmatprep.mubr.bf16.mxu1 %v9283_v1  ;;  %3484 = vmatprep.mubr.bf16.mxu0 %v9283_v1 }
 0x5b8   : > { %3372 = vmatmul.mubr.bf16.gmra.mrb[28].mxu1 %v3075_v21  ;;  %3485 = vmatmul.mubr.bf16.gmra.mrb[44].mxu0 %v3075_v21 }
 0x5b9   : > { %7800 = vmatprep.mubr.bf16.mxu1 %v8794_v31  ;;  %4067 = vmatprep.mubr.bf16.mxu0 %v9283_v1 }
 0x5c0   : > { %7801 = vmatmul.mubr.bf16.vlgmr.msra.gmra.mrb[64].mxu1 %v8795_v33 }
 0x5c1   : > { %7804 = vmatprep.mubr.bf16.mxu1 %v8796_v34  ;;  %3923 = vmatpush1.bf16.msra.mxu1 %v8817_v35 }
 0x5c2   : > { %3924 = vmatprep.subr.bf16.mxu1 %v8822_v36  ;;  %v8890_v36 = vld [vmem:[%s11045_s1 + $0x6c4] ss:$16 sps:$4 sm:$0xff]  }
 0x5c5   : > { %3925 = vmatpush1.bf16.msra.mxu1 %v8820_v37  ;;  %v8888_v37 = vld [vmem:[%s11045_s1 + $0x6c0] ss:$16 sps:$4 sm:$0xff]  }
 0x5c6   : > { %3926 = vmatprep.subr.bf16.mxu1 %v8828_v38  ;;  %v8899_v38 = vld [vmem:[%s11045_s1 + $0x6e4] ss:$16 sps:$4 sm:$0xff]  }
 0x5c8   : > { %7805 = vmatmul.mubr.bf16.gmra.mrb[68].mxu1 %v8797_v39  ;;  %v8875_v39 = vld [vmem:[%s11045_s1 + $0x60c] ss:$16 sps:$4 sm:$0xff]  }
 0x5c9   : > { %7808 = vmatprep.mubr.bf16.mxu1 %v8798_v40  ;;  %3927 = vmatpush1.bf16.msra.mxu1 %v8826_v41  ;;  %v8897_v40 = vld [vmem:[%s11045_s1 + $0x6e0] ss:$16 sps:$4 sm:$0xff]  }
 0x5ca   : > { %3928 = vmatprep.subr.bf16.mxu1 %v8831_v42  ;;  %v8850_v41 = vld [vmem:[%s11046_s2 + $0x180] sm:$0xff]   ;;  %v8851_v42 = vld [vmem:[%s11046_s2 + $0x188] sm:$0xff]  }
 0x5cd   : > { %3929 = vmatpush1.bf16.msra.mxu1 %v8829_v43  ;;  %v8852_v43 = vld [vmem:[%s11046_s2 + $0x190] sm:$0xff]  }
 0x5ce   : > { %3930 = vmatprep.subr.bf16.mxu1 %v8837_v44  ;;  %v8873_v44 = vld [vmem:[%s11045_s1 + $0x608] ss:$16 sps:$4 sm:$0xff]  }
 0x5d0   : > { %7809 = vmatmul.mubr.bf16.gmra.mrb[72].mxu1 %v8799_v45  ;;  %v8878_v45 = vld [vmem:[%s11045_s1 + $0x62c] ss:$16 sps:$4 sm:$0xff]  }
 0x5d1   : > { %7812 = vmatprep.mubr.bf16.mxu1 %v8800_v46  ;;  %3931 = vmatpush1.bf16.msra.mxu1 %v8835_v47  ;;  %v8876_v46 = vld [vmem:[%s11045_s1 + $0x628] ss:$16 sps:$4 sm:$0xff]   ;;  %v8884_v47 = vld [vmem:[%s11045_s1 + $0x64c] ss:$16 sps:$4 sm:$0xff]  }
 0x5d2   : > { %3932 = vmatprep.subr.bf16.mxu1 %v8840_v48  ;;  %v8853_v48 = vld [vmem:[%s11046_s2 + $0x198] sm:$0xff]  }
 0x5d5   : > { %3933 = vmatpush1.bf16.msra.mxu1 %v8838_v49  ;;  %v8854_v49 = vld [vmem:[%s11046_s2 + $0x1a0] sm:$0xff]  }
 0x5d6   : > { %3934 = vmatprep.subr.bf16.mxu1 %v8846_v50  ;;  %v8882_v50 = vld [vmem:[%s11045_s1 + $0x648] ss:$16 sps:$4 sm:$0xff]  }
 0x5d8   : > { %7813 = vmatmul.mubr.bf16.gmra.mrb[76].mxu1 %v8801_v51  ;;  %v8887_v51 = vld [vmem:[%s11045_s1 + $0x66c] ss:$16 sps:$4 sm:$0xff]  }
 0x5d9   : > { %3935 = vmatpush1.bf16.msra.mxu1 %v8844_v52  ;;  %3954 = vmatprep.mubr.bf16.mxu1 %v9283_v1  ;;  %v8885_v52 = vld [vmem:[%s11045_s1 + $0x668] ss:$16 sps:$4 sm:$0xff]  }
 0x5da   : > { %3936 = vmatprep.subr.bf16.mxu1 %v8849_v53  ;;  %v8893_v53 = vld [vmem:[%s11045_s1 + $0x68c] ss:$16 sps:$4 sm:$0xff]  }
 0x5dd   : > { %3937 = vmatpush1.bf16.msra.mxu1 %v8847_v54  ;;  %v8855_v54 = vld [vmem:[%s11046_s2 + $0x1a8] sm:$0xff]  }
 0x5de   : > { %4575 = vmatprep.subr.bf16.mxu1 %v8860_v55  ;;  %v8856_v55 = vld [vmem:[%s11046_s2 + $0x1b0] sm:$0xff]  }
 0x693   : > { %v7802_v56 = vpop.f32.mrb[64].mxu1 }
 0x694   : > { %v3658_v57 = vpop.f32.mrb[65].mxu1 }
 0x695   : > { %v7803_v58 = vpop.f32.mrb[66].mxu1 }
 0x696   : > { %v3722_v59 = vpack.c.bf16 %v7803_v58, %v7802_v56  ;;  %v3661_v60 = vpop.f32.mrb[67].mxu1  ;;  %v8891_v56 = vld [vmem:[%s11045_s1 + $0x688] ss:$16 sps:$4 sm:$0xff]  }
 0x697   : > { %v3721_v61 = vpack.c.bf16 %v3661_v60, %v3658_v57  ;;  %v8896_v57 = vld [vmem:[%s11045_s1 + $0x6ac] ss:$16 sps:$4 sm:$0xff]   ;;  %v8894_v58 = vld [vmem:[%s11045_s1 + $0x6a8] ss:$16 sps:$4 sm:$0xff]  }
 0x698   : > { %v8857_v60 = vld [vmem:[%s11046_s2 + $0x1b8] sm:$0xff]  }
 0x699   : > { %3955 = vmatmul.mubr.bf16.vlgmr.msra.gmra.mrb[0].mxu1 %v3721_v61  ;;  %4068 = vmatmul.mubr.bf16.vlgmr.msra.gmra.mrb[16].mxu0 %v3721_v61  ;;  %v8900_v61 = vld [vmem:[%s11045_s1 + $0x6c8] ss:$16 sps:$4 sm:$0xff]  }
 0x69a   : > { %7817 = vmatpush3.bf16.msra.mxu0 %v9322_v4  ;;  %3964 = vmatprep.mubr.bf16.mxu1 %v9283_v1 }
 0x69b   : > { %v7806_v0 = vpop.f32.mrb[68].mxu1  ;;  %4077 = vmatprep.mubr.bf16.mxu0 %v9283_v1  ;;  %7818 = vmatprep.subr.bf16.mxu0 %v9324_v6 }
 0x69c   : > { %v3674_v2 = vpop.f32.mrb[69].mxu1  ;;  %4576 = vmatpush1.bf16.msra.mxu1 %v8858_v62  ;;  %v8905_v62 = vld [vmem:[%s11045_s1 + $0x6ec] ss:$16 sps:$4 sm:$0xff]  }
 0x69d   : > { %v7807_v5 = vpop.f32.mrb[70].mxu1  ;;  %4577 = vmatprep.subr.bf16.mxu1 %v8863_v63  ;;  %v8903_v63 = vld [vmem:[%s11045_s1 + $0x6e8] ss:$16 sps:$4 sm:$0xff]  }
 0x69e   : > { %7819 = vmatpush3.bf16.msra.mxu0 %v9324_v6  ;;  %v3724_v7 = vpack.c.bf16 %v7807_v5, %v7806_v0  ;;  %v3677_v8 = vpop.f32.mrb[71].mxu1  ;;  %v8916_v0 = vld [vmem:[%s11045_s1 + $0x70c] ss:$16 sps:$4 sm:$0xff]  }
 0x69f   : > { %v3723_v9 = vpack.c.bf16 %v3677_v8, %v3674_v2  ;;  %7820 = vmatprep.subr.bf16.mxu0 %v9329_v10 }
 0x6a0   : > { %4578 = vmatpush1.bf16.msra.mxu1 %v8861_v3 }
 0x6a1   : > { %3965 = vmatmul.mubr.bf16.gmra.mrb[4].mxu1 %v3722_v59  ;;  %4078 = vmatmul.mubr.bf16.gmra.mrb[20].mxu0 %v3722_v59  ;;  %v8902_v59 = vld [vmem:[%s11045_s1 + $0x6cc] ss:$16 sps:$4 sm:$0xff]  }
 0x6a2   : > { %3974 = vmatprep.mubr.bf16.mxu1 %v9283_v1  ;;  %4087 = vmatprep.mubr.bf16.mxu0 %v9283_v1 }
 0x6a3   : > { %7821 = vmatpush3.bf16.msra.mxu0 %v9329_v10  ;;  %v7810_v15 = vpop.f32.mrb[72].mxu1  ;;  %4579 = vmatprep.subr.bf16.mxu1 %v8866_v11  ;;  %v8914_v11 = vld [vmem:[%s11045_s1 + $0x708] ss:$16 sps:$4 sm:$0xff]  }
 0x6a4   : > { %7822 = vmatprep.subr.bf16.mxu0 %v9336_v13  ;;  %v3690_v16 = vpop.f32.mrb[73].mxu1  ;;  %4580 = vmatpush1.bf16.msra.mxu1 %v8864_v12  ;;  %v8919_v12 = vld [vmem:[%s11045_s1 + $0x72c] ss:$16 sps:$4 sm:$0xff]  }
 0x6a5   : > { %v7811_v19 = vpop.f32.mrb[74].mxu1  ;;  %4581 = vmatprep.subr.bf16.mxu1 %v8869_v14 }
 0x6a6   : > { %v3726_v20 = vpack.c.bf16 %v7811_v19, %v7810_v15  ;;  %v3693_v21 = vpop.f32.mrb[75].mxu1 }
 0x6a7   : > { %7823 = vmatpush3.bf16.msra.mxu0 %v9336_v13  ;;  %v3725_v23 = vpack.c.bf16 %v3693_v21, %v3690_v16  ;;  %v8917_v16 = vld [vmem:[%s11045_s1 + $0x728] ss:$16 sps:$4 sm:$0xff]  }
 0x6a8   : > { %7824 = vmatprep.subr.bf16.mxu0 %v9340_v17  ;;  %4582 = vmatpush1.bf16.msra.mxu1 %v8867_v18 }
 0x6a9   : > { %3975 = vmatmul.mubr.bf16.gmra.mrb[8].mxu1 %v3723_v9  ;;  %4088 = vmatmul.mubr.bf16.gmra.mrb[24].mxu0 %v3723_v9 }
 0x6aa   : > { %3984 = vmatprep.mubr.bf16.mxu1 %v9283_v1  ;;  %4097 = vmatprep.mubr.bf16.mxu0 %v9283_v1 }
 0x6ab   : > { %7825 = vmatpush3.bf16.msra.mxu0 %v9340_v17  ;;  %v7814_v27 = vpop.f32.mrb[76].mxu1  ;;  %4583 = vmatprep.subr.bf16.mxu1 %v8872_v24  ;;  %v8920_v24 = vld [vmem:[%s11045_s1 + $0x748] ss:$16 sps:$4 sm:$0xff]  }
 0x6ac   : > { %7826 = vmatprep.subr.bf16.mxu0 %v9353_v22  ;;  %v3706_v29 = vpop.f32.mrb[77].mxu1  ;;  %4584 = vmatpush1.bf16.msra.mxu1 %v8870_v25  ;;  %v8925_v25 = vld [vmem:[%s11045_s1 + $0x76c] ss:$16 sps:$4 sm:$0xff]  }
 0x6ad   : > { %v7815_v31 = vpop.f32.mrb[78].mxu1  ;;  %4585 = vmatprep.subr.bf16.mxu1 %v8881_v26 }
 0x6ae   : > { %v3728_v33 = vpack.c.bf16 %v7815_v31, %v7814_v27  ;;  %v3709_v34 = vpop.f32.mrb[79].mxu1 }
 0x6af   : > { %7827 = vmatpush3.bf16.msra.mxu0 %v9353_v22  ;;  %v3727_v35 = vpack.c.bf16 %v3709_v34, %v3706_v29  ;;  %v8923_v29 = vld [vmem:[%s11045_s1 + $0x768] ss:$16 sps:$4 sm:$0xff]  }
 0x6b0   : > { %7828 = vmatprep.subr.bf16.mxu0 %v9363_v28  ;;  %4586 = vmatpush1.bf16.msra.mxu1 %v8879_v30 }
 0x6b1   : > { %3985 = vmatmul.mubr.bf16.gmra.mrb[12].mxu1 %v3724_v7  ;;  %4098 = vmatmul.mubr.bf16.gmra.mrb[28].mxu0 %v3724_v7 }
 0x6b2   : > { %3994 = vmatprep.mubr.bf16.mxu1 %v9283_v1  ;;  %4107 = vmatprep.mubr.bf16.mxu0 %v9283_v1 }
 0x6b3   : > { %7829 = vmatpush3.bf16.msra.mxu0 %v9363_v28  ;;  %4587 = vmatprep.subr.bf16.mxu1 %v8890_v36  ;;  %v8926_v36 = vld [vmem:[%s11045_s1 + $0x788] ss:$16 sps:$4 sm:$0xff]  }
 0x6b4   : > { %7830 = vmatprep.subr.bf16.mxu0 %v9373_v32  ;;  %4588 = vmatpush1.bf16.msra.mxu1 %v8888_v37  ;;  %v8937_v37 = vld [vmem:[%s11045_s1 + $0x7ac] ss:$16 sps:$4 sm:$0xff]  }
 0x6b5   : > { %4589 = vmatprep.subr.bf16.mxu1 %v8899_v38 }
 0x6b7   : > { %7831 = vmatpush3.bf16.msra.mxu0 %v9373_v32 }
 0x6b8   : > { %4688 = vmatprep.subr.bf16.mxu0 %v8875_v39  ;;  %4590 = vmatpush1.bf16.msra.mxu1 %v8897_v40  ;;  %v8935_v40 = vld [vmem:[%s11045_s1 + $0x7a8] ss:$16 sps:$4 sm:$0xff]  }
 0x6b9   : > { %3995 = vmatmul.mubr.bf16.gmra.mrb[16].mxu1 %v3725_v23  ;;  %4108 = vmatmul.mubr.bf16.gmra.mrb[32].mxu0 %v3725_v23  ;;  %v8922_v23 = vld [vmem:[%s11045_s1 + $0x74c] ss:$16 sps:$4 sm:$0xff]  }
 0x6ba   : > { %4004 = vmatprep.mubr.bf16.mxu1 %v9283_v1  ;;  %4117 = vmatprep.mubr.bf16.mxu0 %v9283_v1 }
 0x6bb   : > { %7848 = vmatprep.subr.bf16.mxu1 %v9322_v4 }
 0x6c1   : > { %4005 = vmatmul.mubr.bf16.gmra.mrb[20].mxu1 %v3726_v20  ;;  %4118 = vmatmul.mubr.bf16.gmra.mrb[36].mxu0 %v3726_v20 }
 0x6c2   : > { %4014 = vmatprep.mubr.bf16.mxu1 %v9283_v1  ;;  %4127 = vmatprep.mubr.bf16.mxu0 %v9283_v1 }
 0x6c9   : > { %4015 = vmatmul.mubr.bf16.gmra.mrb[24].mxu1 %v3727_v35  ;;  %4128 = vmatmul.mubr.bf16.gmra.mrb[40].mxu0 %v3727_v35  ;;  %v8928_v35 = vld [vmem:[%s11045_s1 + $0x78c] ss:$16 sps:$4 sm:$0xff]  }
 0x6ca   : > { %4024 = vmatprep.mubr.bf16.mxu1 %v9283_v1  ;;  %4137 = vmatprep.mubr.bf16.mxu0 %v9283_v1 }
 0x6d1   : > { %4025 = vmatmul.mubr.bf16.gmra.mrb[28].mxu1 %v3728_v33  ;;  %4138 = vmatmul.mubr.bf16.gmra.mrb[44].mxu0 %v3728_v33 }
 0x6d2   : > { %7832 = vmatprep.mubr.bf16.mxu0 %v8850_v41  ;;  %4607 = vmatprep.mubr.bf16.mxu1 %v9283_v1 }
 0x6d9   : > { %7833 = vmatmul.mubr.bf16.vlgmr.msra.gmra.mrb[80].mxu0 %v8851_v42 }
 0x6da   : > { %7836 = vmatprep.mubr.bf16.mxu0 %v8852_v43  ;;  %4689 = vmatpush1.bf16.msra.mxu0 %v8873_v44 }
 0x6db   : > { %4690 = vmatprep.subr.bf16.mxu0 %v8878_v45  ;;  %v8946_v45 = vld [vmem:[%s11045_s1 + $0x7cc] ss:$16 sps:$4 sm:$0xff]  }
 0x6de   : > { %4691 = vmatpush1.bf16.msra.mxu0 %v8876_v46  ;;  %v8944_v46 = vld [vmem:[%s11045_s1 + $0x7c8] ss:$16 sps:$4 sm:$0xff]  }
 0x6df   : > { %4692 = vmatprep.subr.bf16.mxu0 %v8884_v47  ;;  %v8955_v47 = vld [vmem:[%s11045_s1 + $0x7ec] ss:$16 sps:$4 sm:$0xff]  }
 0x6e1   : > { %7837 = vmatmul.mubr.bf16.gmra.mrb[84].mxu0 %v8853_v48  ;;  %v8931_v48 = vld [vmem:[%s11045_s1 + $0x704] ss:$16 sps:$4 sm:$0xff]  }
 0x6e2   : > { %7840 = vmatprep.mubr.bf16.mxu0 %v8854_v49  ;;  %4693 = vmatpush1.bf16.msra.mxu0 %v8882_v50  ;;  %v8953_v49 = vld [vmem:[%s11045_s1 + $0x7e8] ss:$16 sps:$4 sm:$0xff]   ;;  %v8906_v50 = vld [vmem:[%s11046_s2 + $0x1c0] sm:$0xff]  }
 0x6e3   : > { %4694 = vmatprep.subr.bf16.mxu0 %v8887_v51  ;;  %v8907_v51 = vld [vmem:[%s11046_s2 + $0x1c8] sm:$0xff]  }
 0x6e6   : > { %4695 = vmatpush1.bf16.msra.mxu0 %v8885_v52  ;;  %v8908_v52 = vld [vmem:[%s11046_s2 + $0x1d0] sm:$0xff]  }
 0x6e7   : > { %4696 = vmatprep.subr.bf16.mxu0 %v8893_v53  ;;  %v8929_v53 = vld [vmem:[%s11045_s1 + $0x700] ss:$16 sps:$4 sm:$0xff]  }
 0x6e9   : > { %7841 = vmatmul.mubr.bf16.gmra.mrb[88].mxu0 %v8855_v54  ;;  %v8934_v54 = vld [vmem:[%s11045_s1 + $0x724] ss:$16 sps:$4 sm:$0xff]  }
 0x6ea   : > { %7844 = vmatprep.mubr.bf16.mxu0 %v8856_v55  ;;  %4697 = vmatpush1.bf16.msra.mxu0 %v8891_v56  ;;  %v8932_v55 = vld [vmem:[%s11045_s1 + $0x720] ss:$16 sps:$4 sm:$0xff]   ;;  %v8940_v56 = vld [vmem:[%s11045_s1 + $0x744] ss:$16 sps:$4 sm:$0xff]  }
 0x6eb   : > { %4698 = vmatprep.subr.bf16.mxu0 %v8896_v57  ;;  %v8909_v57 = vld [vmem:[%s11046_s2 + $0x1d8] sm:$0xff]  }
 0x6ee   : > { %4699 = vmatpush1.bf16.msra.mxu0 %v8894_v58  ;;  %v8910_v58 = vld [vmem:[%s11046_s2 + $0x1e0] sm:$0xff]  }
 0x6ef   : > { %4700 = vmatprep.subr.bf16.mxu0 %v8902_v59  ;;  %v8938_v59 = vld [vmem:[%s11045_s1 + $0x740] ss:$16 sps:$4 sm:$0xff]  }
 0x6f1   : > { %7845 = vmatmul.mubr.bf16.gmra.mrb[92].mxu0 %v8857_v60  ;;  %v8943_v60 = vld [vmem:[%s11045_s1 + $0x764] ss:$16 sps:$4 sm:$0xff]  }
 0x6f2   : > { %4701 = vmatpush1.bf16.msra.mxu0 %v8900_v61  ;;  %4720 = vmatprep.mubr.bf16.mxu0 %v9283_v1  ;;  %v8941_v61 = vld [vmem:[%s11045_s1 + $0x760] ss:$16 sps:$4 sm:$0xff]  }
 0x6f3   : > { %4702 = vmatprep.subr.bf16.mxu0 %v8905_v62  ;;  %v8949_v62 = vld [vmem:[%s11045_s1 + $0x784] ss:$16 sps:$4 sm:$0xff]  }
 0x6f6   : > { %4703 = vmatpush1.bf16.msra.mxu0 %v8903_v63  ;;  %v8911_v63 = vld [vmem:[%s11046_s2 + $0x1e8] sm:$0xff]  }
 0x6f7   : > { %5341 = vmatprep.subr.bf16.mxu0 %v8916_v0  ;;  %v8912_v0 = vld [vmem:[%s11046_s2 + $0x1f0] sm:$0xff]  }
 0x7ac   : > { %v7834_v2 = vpop.f32.mrb[80].mxu0 }
 0x7ad   : > { %v4311_v3 = vpop.f32.mrb[81].mxu0 }
 0x7ae   : > { %v7835_v5 = vpop.f32.mrb[82].mxu0 }
 0x7af   : > { %v4375_v7 = vpack.c.bf16 %v7835_v5, %v7834_v2  ;;  %v4314_v8 = vpop.f32.mrb[83].mxu0  ;;  %v8947_v2 = vld [vmem:[%s11045_s1 + $0x780] ss:$16 sps:$4 sm:$0xff]  }
 0x7b0   : > { %v4374_v9 = vpack.c.bf16 %v4314_v8, %v4311_v3  ;;  %v8952_v3 = vld [vmem:[%s11045_s1 + $0x7a4] ss:$16 sps:$4 sm:$0xff]   ;;  %v8950_v5 = vld [vmem:[%s11045_s1 + $0x7a0] ss:$16 sps:$4 sm:$0xff]   ;;  %v8913_v8 = vld [vmem:[%s11046_s2 + $0x1f8] sm:$0xff]  }
 0x7b2   : > { %4608 = vmatmul.mubr.bf16.vlgmr.msra.gmra.mrb[0].mxu1 %v4374_v9  ;;  %4721 = vmatmul.mubr.bf16.vlgmr.msra.gmra.mrb[16].mxu0 %v4374_v9  ;;  %v8956_v9 = vld [vmem:[%s11045_s1 + $0x7c0] ss:$16 sps:$4 sm:$0xff]  }
 0x7b3   : > { %7849 = vmatpush3.bf16.msra.mxu1 %v9322_v4  ;;  %4617 = vmatprep.mubr.bf16.mxu1 %v9283_v1 }
 0x7b4   : > { %v7838_v14 = vpop.f32.mrb[84].mxu0  ;;  %4730 = vmatprep.mubr.bf16.mxu0 %v9283_v1  ;;  %7850 = vmatprep.subr.bf16.mxu1 %v9324_v6 }
 0x7b5   : > { %v4327_v15 = vpop.f32.mrb[85].mxu0  ;;  %5342 = vmatpush1.bf16.msra.mxu0 %v8914_v11  ;;  %v8961_v11 = vld [vmem:[%s11045_s1 + $0x7e4] ss:$16 sps:$4 sm:$0xff]  }
 0x7b6   : > { %v7839_v18 = vpop.f32.mrb[86].mxu0  ;;  %5343 = vmatprep.subr.bf16.mxu0 %v8919_v12  ;;  %v8959_v12 = vld [vmem:[%s11045_s1 + $0x7e0] ss:$16 sps:$4 sm:$0xff]  }
 0x7b7   : > { %7851 = vmatpush3.bf16.msra.mxu1 %v9324_v6  ;;  %v4377_v19 = vpack.c.bf16 %v7839_v18, %v7838_v14  ;;  %v4330_v20 = vpop.f32.mrb[87].mxu0  ;;  %v8972_v14 = vld [vmem:[%s11045_s1 + $0x804] ss:$16 sps:$4 sm:$0xff]  }
 0x7b8   : > { %v4376_v21 = vpack.c.bf16 %v4330_v20, %v4327_v15  ;;  %7852 = vmatprep.subr.bf16.mxu1 %v9329_v10 }
 0x7b9   : > { %5344 = vmatpush1.bf16.msra.mxu0 %v8917_v16 }
 0x7ba   : > { %4618 = vmatmul.mubr.bf16.gmra.mrb[4].mxu1 %v4375_v7  ;;  %4731 = vmatmul.mubr.bf16.gmra.mrb[20].mxu0 %v4375_v7  ;;  %v8958_v7 = vld [vmem:[%s11045_s1 + $0x7c4] ss:$16 sps:$4 sm:$0xff]  }
 0x7bb   : > { %4627 = vmatprep.mubr.bf16.mxu1 %v9283_v1  ;;  %4740 = vmatprep.mubr.bf16.mxu0 %v9283_v1 }
 0x7bc   : > { %7853 = vmatpush3.bf16.msra.mxu1 %v9329_v10  ;;  %v7842_v26 = vpop.f32.mrb[88].mxu0  ;;  %5345 = vmatprep.subr.bf16.mxu0 %v8922_v23  ;;  %v8970_v23 = vld [vmem:[%s11045_s1 + $0x800] ss:$16 sps:$4 sm:$0xff]  }
 0x7bd   : > { %7854 = vmatprep.subr.bf16.mxu1 %v9336_v13  ;;  %v4343_v27 = vpop.f32.mrb[89].mxu0  ;;  %5346 = vmatpush1.bf16.msra.mxu0 %v8920_v24  ;;  %v8975_v24 = vld [vmem:[%s11045_s1 + $0x824] ss:$16 sps:$4 sm:$0xff]  }
 0x7be   : > { %v7843_v30 = vpop.f32.mrb[90].mxu0  ;;  %5347 = vmatprep.subr.bf16.mxu0 %v8925_v25 }
 0x7bf   : > { %v4379_v31 = vpack.c.bf16 %v7843_v30, %v7842_v26  ;;  %v4346_v33 = vpop.f32.mrb[91].mxu0 }
 0x7c0   : > { %7855 = vmatpush3.bf16.msra.mxu1 %v9336_v13  ;;  %v4378_v34 = vpack.c.bf16 %v4346_v33, %v4343_v27  ;;  %v8973_v27 = vld [vmem:[%s11045_s1 + $0x820] ss:$16 sps:$4 sm:$0xff]   ;;  %v8978_v33 = vld [vmem:[%s11045_s1 + $0x844] ss:$16 sps:$4 sm:$0xff]  }
 0x7c1   : > { %7856 = vmatprep.subr.bf16.mxu1 %v9340_v17  ;;  %5348 = vmatpush1.bf16.msra.mxu0 %v8923_v29 }
 0x7c2   : > { %4628 = vmatmul.mubr.bf16.gmra.mrb[8].mxu1 %v4376_v21  ;;  %4741 = vmatmul.mubr.bf16.gmra.mrb[24].mxu0 %v4376_v21 }
 0x7c3   : > { %4637 = vmatprep.mubr.bf16.mxu1 %v9283_v1  ;;  %4750 = vmatprep.mubr.bf16.mxu0 %v9283_v1 }
 0x7c4   : > { %7857 = vmatpush3.bf16.msra.mxu1 %v9340_v17  ;;  %v7846_v38 = vpop.f32.mrb[92].mxu0  ;;  %5349 = vmatprep.subr.bf16.mxu0 %v8928_v35 }
 0x7c5   : > { %7858 = vmatprep.subr.bf16.mxu1 %v9353_v22  ;;  %v4359_v39 = vpop.f32.mrb[93].mxu0  ;;  %5350 = vmatpush1.bf16.msra.mxu0 %v8926_v36 }
 0x7c6   : > { %v7847_v41 = vpop.f32.mrb[94].mxu0  ;;  %5351 = vmatprep.subr.bf16.mxu0 %v8937_v37  ;;  %v8979_v37 = vld [vmem:[%s11045_s1 + $0x860] ss:$16 sps:$4 sm:$0xff]  }
 0x7c7   : > { %v4381_v42 = vpack.c.bf16 %v7847_v41, %v7846_v38  ;;  %v4362_v43 = vpop.f32.mrb[95].mxu0 }
 0x7c8   : > { %7859 = vmatpush3.bf16.msra.mxu1 %v9353_v22  ;;  %v4380_v44 = vpack.c.bf16 %v4362_v43, %v4359_v39  ;;  %v8993_v43 = vld [vmem:[%s11045_s1 + $0x8a4] ss:$16 sps:$4 sm:$0xff]  }
 0x7c9   : > { %7860 = vmatprep.subr.bf16.mxu1 %v9363_v28  ;;  %5352 = vmatpush1.bf16.msra.mxu0 %v8935_v40 }
 0x7ca   : > { %4638 = vmatmul.mubr.bf16.gmra.mrb[12].mxu1 %v4377_v19  ;;  %4751 = vmatmul.mubr.bf16.gmra.mrb[28].mxu0 %v4377_v19 }
 0x7cb   : > { %4647 = vmatprep.mubr.bf16.mxu1 %v9283_v1  ;;  %4760 = vmatprep.mubr.bf16.mxu0 %v9283_v1 }
 0x7cc   : > { %7861 = vmatpush3.bf16.msra.mxu1 %v9363_v28  ;;  %5353 = vmatprep.subr.bf16.mxu0 %v8946_v45  ;;  %v8991_v45 = vld [vmem:[%s11045_s1 + $0x8a0] ss:$16 sps:$4 sm:$0xff]  }
 0x7cd   : > { %7862 = vmatprep.subr.bf16.mxu1 %v9373_v32  ;;  %5354 = vmatpush1.bf16.msra.mxu0 %v8944_v46 }
 0x7ce   : > { %5355 = vmatprep.subr.bf16.mxu0 %v8955_v47 }
 0x7d0   : > { %7863 = vmatpush3.bf16.msra.mxu1 %v9373_v32 }
 0x7d1   : > { %5228 = vmatprep.subr.bf16.mxu1 %v8931_v48  ;;  %5356 = vmatpush1.bf16.msra.mxu0 %v8953_v49 }
 0x7d2   : > { %4648 = vmatmul.mubr.bf16.gmra.mrb[16].mxu1 %v4378_v34  ;;  %4761 = vmatmul.mubr.bf16.gmra.mrb[32].mxu0 %v4378_v34  ;;  %v8976_v34 = vld [vmem:[%s11045_s1 + $0x840] ss:$16 sps:$4 sm:$0xff]  }
 0x7d3   : > { %4657 = vmatprep.mubr.bf16.mxu1 %v9283_v1  ;;  %4770 = vmatprep.mubr.bf16.mxu0 %v9283_v1 }
 0x7d4   : > { %7880 = vmatprep.subr.bf16.mxu0 %v9322_v4 }
 0x7da   : > { %4658 = vmatmul.mubr.bf16.gmra.mrb[20].mxu1 %v4379_v31  ;;  %4771 = vmatmul.mubr.bf16.gmra.mrb[36].mxu0 %v4379_v31 }
 0x7db   : > { %4667 = vmatprep.mubr.bf16.mxu1 %v9283_v1  ;;  %4780 = vmatprep.mubr.bf16.mxu0 %v9283_v1 }
 0x7e2   : > { %4668 = vmatmul.mubr.bf16.gmra.mrb[24].mxu1 %v4380_v44  ;;  %4781 = vmatmul.mubr.bf16.gmra.mrb[40].mxu0 %v4380_v44 }
 0x7e3   : > { %4677 = vmatprep.mubr.bf16.mxu1 %v9283_v1  ;;  %4790 = vmatprep.mubr.bf16.mxu0 %v9283_v1 }
 0x7ea   : > { %4678 = vmatmul.mubr.bf16.gmra.mrb[28].mxu1 %v4381_v42  ;;  %4791 = vmatmul.mubr.bf16.gmra.mrb[44].mxu0 %v4381_v42  ;;  %v8982_v42 = vld [vmem:[%s11045_s1 + $0x880] ss:$16 sps:$4 sm:$0xff]  }
 0x7eb   : > { %7864 = vmatprep.mubr.bf16.mxu1 %v8906_v50  ;;  %5373 = vmatprep.mubr.bf16.mxu0 %v9283_v1  ;;  %v10625_v50 = vld [vmem:[%s11045_s1 + $0x808] ss:$16 sps:$4 sm:$0xff]  }
 0x7f2   : > { %7865 = vmatmul.mubr.bf16.vlgmr.msra.gmra.mrb[80].mxu1 %v8907_v51  ;;  %v10630_v51 = vld [vmem:[%s11045_s1 + $0x82c] ss:$16 sps:$4 sm:$0xff]  }
 0x7f3   : > { %7868 = vmatprep.mubr.bf16.mxu1 %v8908_v52  ;;  %5229 = vmatpush1.bf16.msra.mxu1 %v8929_v53  ;;  %v10636_v52 = vld [vmem:[%s11045_s1 + $0x828] ss:$16 sps:$4 sm:$0xff]   ;;  %v10642_v53 = vld [vmem:[%s11045_s1 + $0x84c] ss:$16 sps:$4 sm:$0xff]  }
 0x7f4   : > { %5230 = vmatprep.subr.bf16.mxu1 %v8934_v54  ;;  %v8965_v54 = vld [vmem:[%s11046_s2 + $0x218] sm:$0xff]  }
 0x7f7   : > { %5231 = vmatpush1.bf16.msra.mxu1 %v8932_v55  ;;  %v8966_v55 = vld [vmem:[%s11046_s2 + $0x220] sm:$0xff]  }
 0x7f8   : > { %5232 = vmatprep.subr.bf16.mxu1 %v8940_v56  ;;  %v10654_v56 = vld [vmem:[%s11045_s1 + $0x848] ss:$16 sps:$4 sm:$0xff]  }
 0x7fa   : > { %7869 = vmatmul.mubr.bf16.gmra.mrb[84].mxu1 %v8909_v57  ;;  %v8967_v57 = vld [vmem:[%s11046_s2 + $0x228] sm:$0xff]  }
 0x7fb   : > { %7872 = vmatprep.mubr.bf16.mxu1 %v8910_v58  ;;  %5233 = vmatpush1.bf16.msra.mxu1 %v8938_v59  ;;  %v8968_v58 = vld [vmem:[%s11046_s2 + $0x230] sm:$0xff]   ;;  %v8969_v59 = vld [vmem:[%s11046_s2 + $0x238] sm:$0xff]  }
 0x7fc   : > { %5234 = vmatprep.subr.bf16.mxu1 %v8943_v60  ;;  %v8999_v60 = vld [vmem:[%s11045_s1 + $0x86c] ss:$16 sps:$4 sm:$0xff]  }
 0x7ff   : > { %5235 = vmatpush1.bf16.msra.mxu1 %v8941_v61  ;;  %v10674_v61 = vld [vmem:[%s11045_s1 + $0x868] ss:$16 sps:$4 sm:$0xff]  }
 0x800   : > { %5236 = vmatprep.subr.bf16.mxu1 %v8949_v62  ;;  %v9000_v62 = vld [vmem:[%s11045_s1 + $0x8c0] ss:$16 sps:$4 sm:$0xff]  }
 0x802   : > { %7873 = vmatmul.mubr.bf16.gmra.mrb[88].mxu1 %v8911_v63  ;;  %v9002_v63 = vld [vmem:[%s11045_s1 + $0x8c4] ss:$16 sps:$4 sm:$0xff]  }
 0x803   : > { %7876 = vmatprep.mubr.bf16.mxu1 %v8912_v0  ;;  %5237 = vmatpush1.bf16.msra.mxu1 %v8947_v2  ;;  %v10686_v0 = vld [vmem:[%s11045_s1 + $0x888] ss:$16 sps:$4 sm:$0xff]   ;;  %v10691_v2 = vld [vmem:[%s11045_s1 + $0x88c] ss:$16 sps:$4 sm:$0xff]  }
 0x804   : > { %5238 = vmatprep.subr.bf16.mxu1 %v8952_v3  ;;  %v10698_v3 = vld [vmem:[%s11045_s1 + $0x8ac] ss:$16 sps:$4 sm:$0xff]  }
 0x807   : > { %5239 = vmatpush1.bf16.msra.mxu1 %v8950_v5  ;;  %v10703_v5 = vld [vmem:[%s11045_s1 + $0x8a8] ss:$16 sps:$4 sm:$0xff]  }
 0x808   : > { %5240 = vmatprep.subr.bf16.mxu1 %v8958_v7  ;;  %v9009_v7 = vld [vmem:[%s11045_s1 + $0x8e0] ss:$16 sps:$4 sm:$0xff]  }
 0x80a   : > { %7877 = vmatmul.mubr.bf16.gmra.mrb[92].mxu1 %v8913_v8  ;;  %v9011_v8 = vld [vmem:[%s11045_s1 + $0x8e4] ss:$16 sps:$4 sm:$0xff]  }
 0x80b   : > { %5241 = vmatpush1.bf16.msra.mxu1 %v8956_v9  ;;  %5260 = vmatprep.mubr.bf16.mxu1 %v9283_v1  ;;  %v10716_v9 = vld [vmem:[%s11045_s1 + $0x8c8] ss:$16 sps:$4 sm:$0xff]  }
 0x80c   : > { %5242 = vmatprep.subr.bf16.mxu1 %v8961_v11  ;;  %v10721_v11 = vld [vmem:[%s11045_s1 + $0x8cc] ss:$16 sps:$4 sm:$0xff]  }
 0x80f   : > { %5243 = vmatpush1.bf16.msra.mxu1 %v8959_v12  ;;  %v10728_v12 = vld [vmem:[%s11045_s1 + $0x8ec] ss:$16 sps:$4 sm:$0xff]  }
 0x810   : > { %5881 = vmatprep.subr.bf16.mxu1 %v8972_v14  ;;  %v10734_v14 = vld [vmem:[%s11045_s1 + $0x8e8] ss:$16 sps:$4 sm:$0xff]  }
 0x8c5   : > { %v7866_v15 = vpop.f32.mrb[80].mxu1 }
 0x8c6   : > { %v4964_v16 = vpop.f32.mrb[81].mxu1 }
 0x8c7   : > { %v7867_v18 = vpop.f32.mrb[82].mxu1 }
 0x8c8   : > { %v5028_v19 = vpack.c.bf16 %v7867_v18, %v7866_v15  ;;  %v4967_v20 = vpop.f32.mrb[83].mxu1 }
 0x8c9   : > { %v5027_v21 = vpack.c.bf16 %v4967_v20, %v4964_v16 }
 0x8cb   : > { %5261 = vmatmul.mubr.bf16.vlgmr.msra.gmra.mrb[0].mxu1 %v5027_v21  ;;  %5374 = vmatmul.mubr.bf16.vlgmr.msra.gmra.mrb[16].mxu0 %v5027_v21 }
 0x8cc   : > { %7881 = vmatpush3.bf16.msra.mxu0 %v9322_v4  ;;  %5270 = vmatprep.mubr.bf16.mxu1 %v9283_v1 }
 0x8cd   : > { %v7870_v25 = vpop.f32.mrb[84].mxu1  ;;  %5383 = vmatprep.mubr.bf16.mxu0 %v9283_v1  ;;  %7882 = vmatprep.subr.bf16.mxu0 %v9324_v6 }
 0x8ce   : > { %v4980_v26 = vpop.f32.mrb[85].mxu1  ;;  %5882 = vmatpush1.bf16.msra.mxu1 %v8970_v23 }
 0x8cf   : > { %v7871_v29 = vpop.f32.mrb[86].mxu1  ;;  %5883 = vmatprep.subr.bf16.mxu1 %v8975_v24 }
 0x8d0   : > { %7883 = vmatpush3.bf16.msra.mxu0 %v9324_v6  ;;  %v5030_v30 = vpack.c.bf16 %v7871_v29, %v7870_v25  ;;  %v4983_v31 = vpop.f32.mrb[87].mxu1  ;;  %v8981_v6 = vld [vmem:[%s11045_s1 + $0x864] ss:$16 sps:$4 sm:$0xff]  }
 0x8d1   : > { %v5029_v4 = vpack.c.bf16 %v4983_v31, %v4980_v26  ;;  %7884 = vmatprep.subr.bf16.mxu0 %v9329_v10 }
 0x8d2   : > { %5884 = vmatpush1.bf16.msra.mxu1 %v8973_v27 }
 0x8d3   : > { %5271 = vmatmul.mubr.bf16.gmra.mrb[4].mxu1 %v5028_v19  ;;  %5384 = vmatmul.mubr.bf16.gmra.mrb[20].mxu0 %v5028_v19 }
 0x8d4   : > { %5280 = vmatprep.mubr.bf16.mxu1 %v9283_v1  ;;  %5393 = vmatprep.mubr.bf16.mxu0 %v9283_v1 }
 0x8d5   : > { %7885 = vmatpush3.bf16.msra.mxu0 %v9329_v10  ;;  %v7874_v35 = vpop.f32.mrb[88].mxu1  ;;  %5885 = vmatprep.subr.bf16.mxu1 %v8978_v33  ;;  %v8984_v10 = vld [vmem:[%s11045_s1 + $0x884] ss:$16 sps:$4 sm:$0xff]  }
 0x8d6   : > { %7886 = vmatprep.subr.bf16.mxu0 %v9336_v13  ;;  %v4996_v36 = vpop.f32.mrb[89].mxu1  ;;  %5886 = vmatpush1.bf16.msra.mxu1 %v8976_v34 }
 0x8d7   : > { %v7875_v38 = vpop.f32.mrb[90].mxu1  ;;  %5887 = vmatprep.subr.bf16.mxu1 %v8981_v6 }
 0x8d8   : > { %v5032_v39 = vpack.c.bf16 %v7875_v38, %v7874_v35  ;;  %v4999_v40 = vpop.f32.mrb[91].mxu1 }
 0x8d9   : > { %7887 = vmatpush3.bf16.msra.mxu0 %v9336_v13  ;;  %v5031_v41 = vpack.c.bf16 %v4999_v40, %v4996_v36 }
 0x8da   : > { %7888 = vmatprep.subr.bf16.mxu0 %v9340_v17  ;;  %5888 = vmatpush1.bf16.msra.mxu1 %v8979_v37 }
 0x8db   : > { %5281 = vmatmul.mubr.bf16.gmra.mrb[8].mxu1 %v5029_v4  ;;  %5394 = vmatmul.mubr.bf16.gmra.mrb[24].mxu0 %v5029_v4 }
 0x8dc   : > { %5290 = vmatprep.mubr.bf16.mxu1 %v9283_v1  ;;  %5403 = vmatprep.mubr.bf16.mxu0 %v9283_v1 }
 0x8dd   : > { %7889 = vmatpush3.bf16.msra.mxu0 %v9340_v17  ;;  %v7878_v13 = vpop.f32.mrb[92].mxu1  ;;  %5889 = vmatprep.subr.bf16.mxu1 %v8984_v10  ;;  %v10602_v17 = vld [vmem:[%s11045_s1 + $0x80c] ss:$16 sps:$4 sm:$0xff]  }
 0x8de   : > { %7890 = vmatprep.subr.bf16.mxu0 %v9353_v22  ;;  %v5012_v44 = vpop.f32.mrb[93].mxu1  ;;  %5890 = vmatpush1.bf16.msra.mxu1 %v8982_v42 }
 0x8df   : > { %v7879_v46 = vpop.f32.mrb[94].mxu1  ;;  %5891 = vmatprep.subr.bf16.mxu1 %v8993_v43 }
 0x8e0   : > { %v5034_v47 = vpack.c.bf16 %v7879_v46, %v7878_v13  ;;  %v5015_v48 = vpop.f32.mrb[95].mxu1 }
 0x8e1   : > { %7891 = vmatpush3.bf16.msra.mxu0 %v9353_v22  ;;  %v5033_v49 = vpack.c.bf16 %v5015_v48, %v5012_v44  ;;  %v8962_v22 = vld [vmem:[%s11046_s2 + $0x200] sm:$0xff]   ;;  %v210_v48 = vld [vmem:[%s9315_s19 + $0x10] sm:$0xff] }
 0x8e2   : > { %7892 = vmatprep.subr.bf16.mxu0 %v9363_v28  ;;  %5892 = vmatpush1.bf16.msra.mxu1 %v8991_v45 }
 0x8e3   : > { %5291 = vmatmul.mubr.bf16.gmra.mrb[12].mxu1 %v5030_v30  ;;  %5404 = vmatmul.mubr.bf16.gmra.mrb[28].mxu0 %v5030_v30 }
 0x8e4   : > { %5300 = vmatprep.mubr.bf16.mxu1 %v9283_v1  ;;  %5413 = vmatprep.mubr.bf16.mxu0 %v9283_v1 }
 0x8e5   : > { %7893 = vmatpush3.bf16.msra.mxu0 %v9363_v28  ;;  %v8963_v28 = vld [vmem:[%s11046_s2 + $0x208] sm:$0xff]   ;;  %5893 = vmatprep.subr.bf16.mxu1 %v9002_v63 }
 0x8e6   : > { %7894 = vmatprep.subr.bf16.mxu0 %v9373_v32  ;;  %5894 = vmatpush1.bf16.msra.mxu1 %v9000_v62 }
 0x8e7   : > { %5895 = vmatprep.subr.bf16.mxu1 %v9011_v8 }
 0x8e9   : > { %7895 = vmatpush3.bf16.msra.mxu0 %v9373_v32  ;;  %v8964_v32 = vld [vmem:[%s11046_s2 + $0x210] sm:$0xff]  }
 0x8ea   : > { %5994 = vmatprep.subr.bf16.mxu0 %v10602_v17  ;;  %5896 = vmatpush1.bf16.msra.mxu1 %v9009_v7 }
 0x8eb   : > { %5301 = vmatmul.mubr.bf16.gmra.mrb[16].mxu1 %v5031_v41  ;;  %5414 = vmatmul.mubr.bf16.gmra.mrb[32].mxu0 %v5031_v41 }
 0x8ec   : > { %5310 = vmatprep.mubr.bf16.mxu1 %v9283_v1  ;;  %5423 = vmatprep.mubr.bf16.mxu0 %v9283_v1 }
 0x8ed   : > { %7912 = vmatprep.subr.bf16.mxu1 %v10602_v17  ;;  %v211_v17 = vld [vmem:[%s9315_s19 + $0x18] sm:$0xff] }
 0x8f3   : > { %5311 = vmatmul.mubr.bf16.gmra.mrb[20].mxu1 %v5032_v39  ;;  %5424 = vmatmul.mubr.bf16.gmra.mrb[36].mxu0 %v5032_v39 }
 0x8f4   : > { %5320 = vmatprep.mubr.bf16.mxu1 %v9283_v1  ;;  %5433 = vmatprep.mubr.bf16.mxu0 %v9283_v1 }
 0x8fb   : > { %5321 = vmatmul.mubr.bf16.gmra.mrb[24].mxu1 %v5033_v49  ;;  %5434 = vmatmul.mubr.bf16.gmra.mrb[40].mxu0 %v5033_v49  ;;  %v209_v49 = vld [vmem:[%s9315_s19 + $0x8] sm:$0xff] }
 0x8fc   : > { %5330 = vmatprep.mubr.bf16.mxu1 %v9283_v1  ;;  %5443 = vmatprep.mubr.bf16.mxu0 %v9283_v1 }
 0x903   : > { %5331 = vmatmul.mubr.bf16.gmra.mrb[28].mxu1 %v5034_v47  ;;  %5444 = vmatmul.mubr.bf16.gmra.mrb[44].mxu0 %v5034_v47  ;;  %v208_v47 = vld [vmem:[%s9315_s19] sm:$0xff] }
 0x904   : > { %7896 = vmatprep.mubr.bf16.mxu0 %v8962_v22  ;;  %5913 = vmatprep.mubr.bf16.mxu1 %v9283_v1 }
 0x90b   : > { %7897 = vmatmul.mubr.bf16.vlgmr.msra.gmra.mrb[96].mxu0 %v8963_v28 }
 0x90c   : > { %7900 = vmatprep.mubr.bf16.mxu0 %v8964_v32  ;;  %5995 = vmatpush1.bf16.msra.mxu0 %v10625_v50  ;;  %v212_v32 = vld [vmem:[%s9315_s19 + $0x20] sm:$0xff] }
 0x90d   : > { %5996 = vmatprep.subr.bf16.mxu0 %v10630_v51 }
 0x910   : > { %5997 = vmatpush1.bf16.msra.mxu0 %v10636_v52 }
 0x911   : > { %5998 = vmatprep.subr.bf16.mxu0 %v10642_v53 }
 0x913   : > { %7901 = vmatmul.mubr.bf16.gmra.mrb[100].mxu0 %v8965_v54 }
 0x914   : > { %7904 = vmatprep.mubr.bf16.mxu0 %v8966_v55  ;;  %5999 = vmatpush1.bf16.msra.mxu0 %v10654_v56  ;;  %v213_v55 = vld [vmem:[%s9315_s19 + $0x28] sm:$0xff] }
 0x915   : > { %6000 = vmatprep.subr.bf16.mxu0 %v8999_v60 }
 0x918   : > { %6001 = vmatpush1.bf16.msra.mxu0 %v10674_v61 }
 0x919   : > { %6002 = vmatprep.subr.bf16.mxu0 %v10691_v2 }
 0x91b   : > { %7905 = vmatmul.mubr.bf16.gmra.mrb[104].mxu0 %v8967_v57 }
 0x91c   : > { %7908 = vmatprep.mubr.bf16.mxu0 %v8968_v58  ;;  %6003 = vmatpush1.bf16.msra.mxu0 %v10686_v0 }
 0x91d   : > { %6004 = vmatprep.subr.bf16.mxu0 %v10698_v3 }
 0x920   : > { %6005 = vmatpush1.bf16.msra.mxu0 %v10703_v5 }
 0x921   : > { %6006 = vmatprep.subr.bf16.mxu0 %v10721_v11 }
 0x923   : > { %7909 = vmatmul.mubr.bf16.gmra.mrb[108].mxu0 %v8969_v59 }
 0x924   : > { %6026 = vmatprep.mubr.bf16.mxu0 %v9283_v1  ;;  %6007 = vmatpush1.bf16.msra.mxu0 %v10716_v9 }
 0x925   : > { %6008 = vmatprep.subr.bf16.mxu0 %v10728_v12 }
 0x928   : > { %6009 = vmatpush1.bf16.msra.mxu0 %v10734_v14 }
 0x9ce   : > { %v10738_v15 = vpop.f32.mrb[40].mxu0 }
 0x9cf   : > { %v10740_v16 = vpop.f32.mrb[41].mxu0 }
 0x9d0   : > { %v10742_v18 = vpop.f32.mrb[42].mxu0 }
 0x9d1   : > { %v10744_v19 = vpop.f32.mrb[43].mxu0 }
 0x9d6   : > { %v10746_v20 = vpop.f32.mrb[44].mxu0 }
 0x9d7   : > { %v10748_v21 = vpop.f32.mrb[45].mxu0 }
 0x9d8   : > { %v10750_v23 = vpop.f32.mrb[46].mxu0 }
 0x9d9   : > { %v10752_v24 = vpop.f32.mrb[47].mxu0 }
 0x9de   : > { %v7898_v25 = vpop.f32.mrb[96].mxu0 }
 0x9df   : > { %v5617_v26 = vpop.f32.mrb[97].mxu0 }
 0x9e0   : > { %v7899_v27 = vpop.f32.mrb[98].mxu0 }
 0x9e1   : > { %v5681_v29 = vpack.c.bf16 %v7899_v27, %v7898_v25  ;;  %v5620_v30 = vpop.f32.mrb[99].mxu0  ;;  %v217_v25 = vld [vmem:[%s9315_s19 + $0x48] sm:$0xff] }
 0x9e2   : > { %v5680_v31 = vpack.c.bf16 %v5620_v30, %v5617_v26  ;;  %v219_v26 = vld [vmem:[%s9315_s19 + $0x58] sm:$0xff]  ;;  %v220_v30 = vld [vmem:[%s9315_s19 + $0x60] sm:$0xff] }
 0x9e4   : > { %5914 = vmatmul.mubr.bf16.vlgmr.msra.gmra.mrb[0].mxu1 %v5680_v31  ;;  %6027 = vmatmul.mubr.bf16.vlgmr.msra.gmra.mrb[16].mxu0 %v5680_v31 }
 0x9e5   : > { %7920 = vmatpush1.bf16.msra.mxu1 %v10625_v50  ;;  %5923 = vmatprep.mubr.bf16.mxu1 %v9283_v1  ;;  %v214_v50 = vld [vmem:[%s9315_s19 + $0x30] sm:$0xff] }
 0x9e6   : > { %v7902_v4 = vpop.f32.mrb[100].mxu0  ;;  %7913 = vmatprep.subr.bf16.mxu1 %v10630_v51  ;;  %6036 = vmatprep.mubr.bf16.mxu0 %v9283_v1 }
 0x9e7   : > { %v5633_v33 = vpop.f32.mrb[101].mxu0 }
 0x9e8   : > { %v7903_v34 = vpop.f32.mrb[102].mxu0 }
 0x9e9   : > { %7921 = vmatpush1.bf16.msra.mxu1 %v10636_v52  ;;  %v5683_v6 = vpack.c.bf16 %v7903_v34, %v7902_v4  ;;  %v5636_v35 = vpop.f32.mrb[103].mxu0 }
 0x9ea   : > { %v5682_v36 = vpack.c.bf16 %v5636_v35, %v5633_v33  ;;  %7914 = vmatprep.subr.bf16.mxu1 %v10642_v53 }
 0x9ec   : > { %5924 = vmatmul.mubr.bf16.gmra.mrb[4].mxu1 %v5681_v29  ;;  %6037 = vmatmul.mubr.bf16.gmra.mrb[20].mxu0 %v5681_v29 }
 0x9ed   : > { %5933 = vmatprep.mubr.bf16.mxu1 %v9283_v1  ;;  %6046 = vmatprep.mubr.bf16.mxu0 %v9283_v1 }
 0x9ee   : > { %7922 = vmatpush1.bf16.msra.mxu1 %v10654_v56  ;;  %v7906_v37 = vpop.f32.mrb[104].mxu0 }
 0x9ef   : > { %7915 = vmatprep.subr.bf16.mxu1 %v8999_v60  ;;  %v5649_v38 = vpop.f32.mrb[105].mxu0 }
 0x9f0   : > { %v7907_v39 = vpop.f32.mrb[106].mxu0 }
 0x9f1   : > { %v5685_v40 = vpack.c.bf16 %v7907_v39, %v7906_v37  ;;  %v5652_v41 = vpop.f32.mrb[107].mxu0 }
 0x9f2   : > { %7923 = vmatpush1.bf16.msra.mxu1 %v10674_v61  ;;  %v5684_v10 = vpack.c.bf16 %v5652_v41, %v5649_v38 }
 0x9f3   : > { %7916 = vmatprep.subr.bf16.mxu1 %v10691_v2 }
 0x9f4   : > { %5934 = vmatmul.mubr.bf16.gmra.mrb[8].mxu1 %v5682_v36  ;;  %6047 = vmatmul.mubr.bf16.gmra.mrb[24].mxu0 %v5682_v36 }
 0x9f5   : > { %5943 = vmatprep.mubr.bf16.mxu1 %v9283_v1  ;;  %6056 = vmatprep.mubr.bf16.mxu0 %v9283_v1 }
 0x9f6   : > { %7924 = vmatpush1.bf16.msra.mxu1 %v10686_v0  ;;  %v7910_v42 = vpop.f32.mrb[108].mxu0 }
 0x9f7   : > { %7917 = vmatprep.subr.bf16.mxu1 %v10698_v3  ;;  %v5665_v43 = vpop.f32.mrb[109].mxu0 }
 0x9f8   : > { %v7911_v13 = vpop.f32.mrb[110].mxu0 }
 0x9f9   : > { %v5687_v44 = vpack.c.bf16 %v7911_v13, %v7910_v42  ;;  %v5668_v45 = vpop.f32.mrb[111].mxu0 }
 0x9fa   : > { %7925 = vmatpush1.bf16.msra.mxu1 %v10703_v5  ;;  %v5686_v46 = vpack.c.bf16 %v5668_v45, %v5665_v43  ;;  %v215_v5 = vld [vmem:[%s9315_s19 + $0x38] sm:$0xff]  ;;  %v221_v45 = vld [vmem:[%s9315_s19 + $0x68] sm:$0xff] }
 0x9fb   : > { %7918 = vmatprep.subr.bf16.mxu1 %v10721_v11  ;;  %v216_v11 = vld [vmem:[%s9315_s19 + $0x40] sm:$0xff] }
 0x9fc   : > { %5944 = vmatmul.mubr.bf16.gmra.mrb[12].mxu1 %v5683_v6  ;;  %6057 = vmatmul.mubr.bf16.gmra.mrb[28].mxu0 %v5683_v6  ;;  %v222_v6 = vld [vmem:[%s9315_s19 + $0x70] sm:$0xff] }
 0x9fd   : > { %5953 = vmatprep.mubr.bf16.mxu1 %v9283_v1  ;;  %6066 = vmatprep.mubr.bf16.mxu0 %v9283_v1 }
 0x9fe   : > { %7926 = vmatpush1.bf16.msra.mxu1 %v10716_v9 }
 0x9ff   : > { %7919 = vmatprep.subr.bf16.mxu1 %v10728_v12  ;;  %v218_v12 = vld [vmem:[%s9315_s19 + $0x50] sm:$0xff] }
 0xa02   : > { %7927 = vmatpush1.bf16.msra.mxu1 %v10734_v14 }
 0xa04   : > { %5954 = vmatmul.mubr.bf16.gmra.mrb[16].mxu1 %v5684_v10  ;;  %6067 = vmatmul.mubr.bf16.gmra.mrb[32].mxu0 %v5684_v10 }
 0xa05   : > { %5963 = vmatprep.mubr.bf16.mxu1 %v9283_v1  ;;  %6076 = vmatprep.mubr.bf16.mxu0 %v9283_v1 }
 0xa0c   : > { %5964 = vmatmul.mubr.bf16.gmra.mrb[20].mxu1 %v5685_v40  ;;  %6077 = vmatmul.mubr.bf16.gmra.mrb[36].mxu0 %v5685_v40 }
 0xa0d   : > { %5973 = vmatprep.mubr.bf16.mxu1 %v9283_v1 }
 0xa14   : > { %5974 = vmatmul.mubr.bf16.gmra.mrb[24].mxu1 %v5686_v46 }
 0xa15   : > { %5983 = vmatprep.mubr.bf16.mxu1 %v9283_v1 }
 0xa1c   : > { %5984 = vmatmul.mubr.bf16.gmra.mrb[28].mxu1 %v5687_v44 }
 0xa1d   : > { %6086 = vmatprep.mubr.bf16.mxu1 %v9283_v1 }
 0xa24   : > { %6087 = vmatmul.mubr.bf16.vlgmr.msra.gmra.mrb[96].mxu1 %v5686_v46 }
 0xa25   : > { %6096 = vmatprep.mubr.bf16.mxu1 %v9283_v1 }
 0xa2c   : > { %6097 = vmatmul.mubr.bf16.gmra.mrb[100].mxu1 %v5687_v44 }
 0xab7   : > { %v5915_v22 = vpop.f32.mrb[0].mxu1  ;;  %v6028_v28 = vpop.f32.mrb[16].mxu0 }
 0xab8   : > { %v7928_v51 = vadd.f32 %v5915_v22, %v208_v47  ;;  %v7960_v52 = vadd.f32 %v6028_v28, %v210_v48  ;;  %v5917_v53 = vpop.f32.mrb[1].mxu1  ;;  %v6030_v54 = vpop.f32.mrb[17].mxu0 }
 0xab9   : > { %v7929_v56 = vadd.f32 %v5917_v53, %v209_v49  ;;  %v7961_v57 = vadd.f32 %v6030_v54, %v211_v17  ;;  %v5919_v58 = vpop.f32.mrb[2].mxu1  ;;  %v6032_v59 = vpop.f32.mrb[18].mxu0 }
 0xaba   : > { %v7428_v1 = vmul.f32 -1.442695, %v7928_v51  ;;  %v7460_v60 = vmul.f32 -1.442695, %v7960_v52  ;;  %v7930_v61 = vadd.f32 %v5919_v58, %v212_v32  ;;  %v7962_v62 = vadd.f32 %v6032_v59, %v214_v50  ;;  %v5921_v63 = vpop.f32.mrb[3].mxu1  ;;  %v6034_v0 = vpop.f32.mrb[19].mxu0 }
 0xabb   : > { %v7444_v2 = vmul.f32 -1.442695, %v7929_v56  ;;  %9018 = vtanh.f32 %v7961_v57  ;;  %v7931_v3 = vadd.f32 %v5921_v63, %v213_v55  ;;  %v7963_v14 = vadd.f32 %v6034_v0, %v215_v5  ;;  %v223_v56 = vld [vmem:[%s9315_s19 + $0x78] sm:$0xff]  ;;  %v224_v0 = vld [vmem:[%s9315_s19 + $0x80] sm:$0xff] }
 0xabc   : > { %9020 = vpow2.f32 %v7428_v1  ;;  %v7429_v7 = vmul.f32 -1.442695, %v7930_v61  ;;  %v7461_v8 = vmul.f32 -1.442695, %v7962_v62 }
 0xabd   : > { %9022 = vpow2.f32 %v7460_v60  ;;  %v7445_v9 = vmul.f32 -1.442695, %v7931_v3 }
 0xabe   : > { %9024 = vpow2.f32 %v7444_v2 }
 0xabf   : > { %9026 = vpow2.f32 %v7429_v7  ;;  %v5925_v27 = vpop.f32.mrb[4].mxu1  ;;  %v6038_v29 = vpop.f32.mrb[20].mxu0 }
 0xac0   : > { %9028 = vpow2.f32 %v7461_v8  ;;  %v7932_v31 = vadd.f32 %v5925_v27, %v216_v11  ;;  %v7964_v4 = vadd.f32 %v6038_v29, %v218_v12  ;;  %v5927_v33 = vpop.f32.mrb[5].mxu1  ;;  %v6040_v34 = vpop.f32.mrb[21].mxu0  ;;  %v226_v8 = vld [vmem:[%s9315_s19 + $0x90] sm:$0xff]  ;;  %v225_v11 = vld [vmem:[%s9315_s19 + $0x88] sm:$0xff] }
 0xac1   : > { %9030 = vpow2.f32 %v7445_v9  ;;  %v7933_v35 = vadd.f32 %v5927_v33, %v217_v25  ;;  %v7965_v36 = vadd.f32 %v6040_v34, %v219_v26  ;;  %v5929_v37 = vpop.f32.mrb[6].mxu1  ;;  %v6042_v38 = vpop.f32.mrb[22].mxu0  ;;  %v228_v34 = vld [vmem:[%s9315_s19 + $0xa0] sm:$0xff] }
 0xac2   : > { %9032 = vtanh.f32 %v7963_v14  ;;  %v7430_v39 = vmul.f32 -1.442695, %v7932_v31  ;;  %v7462_v40 = vmul.f32 -1.442695, %v7964_v4  ;;  %v7934_v41 = vadd.f32 %v5929_v37, %v220_v30  ;;  %v5931_v10 = vpop.f32.mrb[7].mxu1  ;;  %v6044_v42 = vpop.f32.mrb[23].mxu0 }
 0xac3   : > { %v7446_v43 = vmul.f32 -1.442695, %v7933_v35  ;;  %9034 = vtanh.f32 %v7965_v36  ;;  %v7966_v13 = vadd.f32 %v6042_v38, %v222_v6  ;;  %v7935_v22 = vadd.f32 %v5931_v10, %v221_v45 }
 0xac4   : > { %9036 = vpow2.f32 %v7430_v39  ;;  %v7431_v44 = vmul.f32 -1.442695, %v7934_v41  ;;  %v7967_v7 = vadd.f32 %v6044_v42, %v223_v56  ;;  %v227_v42 = vld [vmem:[%s9315_s19 + $0x98] sm:$0xff]  ;;  %v6476_v56 = vld [vmem:[#allocation3 + $0x8] sm:$0xff] }
 0xac5   : > { %v10797_v46 = vpop.eup %9018  ;;  %9038 = vpow2.f32 %v7462_v40  ;;  %v7463_v47 = vmul.f32 -1.442695, %v7966_v13  ;;  %v7447_v63 = vmul.f32 -1.442695, %v7935_v22 }
 0xac6   : > { %v9021_v48 = vpop.eup %9020  ;;  %9040 = vpow2.f32 %v7446_v43 }
 0xac7   : > { %v9023_v49 = vpop.eup %9022  ;;  %v6219_v17 = vadd.f32 1.0, %v9021_v48  ;;  %9042 = vpow2.f32 %v7431_v44  ;;  %v5935_v28 = vpop.f32.mrb[8].mxu1  ;;  %v6475_v44 = vld [vmem:[#allocation3] sm:$0xff] }
 0xac8   : > { %v6048_v32 = vpop.f32.mrb[24].mxu0  ;;  %v9025_v50 = vpop.eup %9024  ;;  %v6411_v51 = vadd.f32 1.0, %v9023_v49  ;;  %9044 = vpow2.f32 %v7463_v47  ;;  %v7936_v14 = vadd.f32 %v5935_v28, %v224_v0  ;;  %v230_v49 = vld [vmem:[%s9315_s19 + $0xb0] sm:$0xff] }
 0xac9   : > { %v5937_v52 = vpop.f32.mrb[9].mxu1  ;;  %v10799_v53 = vpop.f32.mrb[25].mxu0  ;;  %9046 = vrcp.f32 %v6219_v17  ;;  %v6315_v55 = vadd.f32 1.0, %v9025_v50  ;;  %v7968_v27 = vadd.f32 %v6048_v32, %v226_v8  ;;  %v229_v50 = vld [vmem:[%s9315_s19 + $0xa8] sm:$0xff] }
 0xaca   : > { %v9027_v54 = vpop.eup %9026  ;;  %v5939_v57 = vpop.f32.mrb[10].mxu1  ;;  %9048 = vrcp.f32 %v6411_v51  ;;  %v7937_v33 = vadd.f32 %v5937_v52, %v225_v11  ;;  %v7432_v10 = vmul.f32 -1.442695, %v7936_v14  ;;  %v7969_v52 = vadd.f32 %v10799_v53, %v227_v42  ;;  %v233_v42 = vld [vmem:[%s9315_s19 + $0xc8] sm:$0xff] }
 0xacb   : > { %v10802_v58 = vpop.f32.mrb[26].mxu0  ;;  %v9029_v59 = vpop.eup %9028  ;;  %v6220_v1 = vadd.f32 1.0, %v9027_v54  ;;  %9050 = vrcp.f32 %v6315_v55  ;;  %v7464_v47 = vmul.f32 -1.442695, %v7968_v27  ;;  %v7938_v48 = vadd.f32 %v5939_v57, %v228_v34  ;;  %v6477_v34 = vld [vmem:[#allocation3 + $0x10] sm:$0xff] }
 0xacc   : > { %v10804_v60 = vpop.f32.mrb[11].mxu1  ;;  %v9031_v61 = vpop.eup %9030  ;;  %v6412_v62 = vadd.f32 1.0, %v9029_v59  ;;  %v7448_v32 = vmul.f32 -1.442695, %v7937_v33  ;;  %v7970_v57 = vadd.f32 %v10802_v58, %v230_v49  ;;  %v232_v59 = vld [vmem:[%s9315_s19 + $0xc0] sm:$0xff] }
 0xacd   : > { %v10807_v2 = vpop.f32.mrb[27].mxu0  ;;  %v9033_v3 = vpop.eup %9032  ;;  %9052 = vrcp.f32 %v6220_v1  ;;  %v6316_v5 = vadd.f32 1.0, %v9031_v61 }
 0xace   : > { %v10810_v9 = vpop.eup %9034  ;;  %9054 = vrcp.f32 %v6412_v62  ;;  %v7939_v62 = vadd.f32 %v10804_v60, %v229_v50  ;;  %v7465_v27 = vmul.f32 -1.442695, %v7970_v57 }
 0xacf   : > { %v9037_v12 = vpop.eup %9036  ;;  %9056 = vrcp.f32 %v6316_v5  ;;  %v5945_v29 = vpop.f32.mrb[12].mxu1 }
 0xad0   : > { %v9039_v25 = vpop.eup %9038  ;;  %v6221_v26 = vadd.f32 1.0, %v9037_v12  ;;  %9058 = vpow2.f32 %v7447_v63  ;;  %v10813_v30 = vpop.f32.mrb[28].mxu0  ;;  %v7940_v12 = vadd.f32 %v5945_v29, %v232_v59 }
 0xad1   : > { %v9041_v31 = vpop.eup %9040  ;;  %v6413_v4 = vadd.f32 1.0, %v9039_v25  ;;  %9060 = vtanh.f32 %v7967_v7  ;;  %v10816_v6 = vpop.f32.mrb[13].mxu1 }
 0xad2   : > { %v10818_v35 = vpop.f32.mrb[29].mxu0  ;;  %v9043_v36 = vpop.eup %9042  ;;  %9062 = vrcp.f32 %v6221_v26  ;;  %v6317_v37 = vadd.f32 1.0, %v9041_v31 }
 0xad3   : > { %v10820_v38 = vpop.f32.mrb[14].mxu1  ;;  %v10822_v39 = vpop.f32.mrb[30].mxu0  ;;  %9064 = vrcp.f32 %v6413_v4  ;;  %v6222_v41 = vadd.f32 1.0, %v9043_v36  ;;  %v7449_v36 = vmul.f32 -1.442695, %v7939_v62  ;;  %v235_v62 = vld [vmem:[%s9315_s19 + $0xd8] sm:$0xff] }
 0xad4   : > { %v9045_v40 = vpop.eup %9044  ;;  %v10825_v43 = vpop.f32.mrb[15].mxu1  ;;  %9066 = vrcp.f32 %v6317_v37  ;;  %v234_v37 = vld [vmem:[%s9315_s19 + $0xd0] sm:$0xff] }
 0xad5   : > { %v9047_v13 = vpop.eup %9046  ;;  %v6414_v45 = vadd.f32 1.0, %v9045_v40  ;;  %v10828_v17 = vpop.f32.mrb[31].mxu0  ;;  %9068 = vrcp.f32 %v6222_v41 }
 0xad6   : > { %v10830_v22 = vpop.eup %9048  ;;  %v6507_v28 = vmul.f32 %v9047_v13, %v10797_v46  ;;  %v7433_v46 = vmul.f32 -1.442695, %v7938_v48  ;;  %v7972_v48 = vadd.f32 %v10813_v30, %v234_v37 }
 0xad7   : > { %v9051_v51 = vpop.eup %9050  ;;  %9070 = vrcp.f32 %v6414_v45  ;;  %v10840_v63 = vpop.f32.mrb[16].mxu1 }
 0xad8   : > { %v9053_v54 = vpop.eup %9052  ;;  %v6491_v55 = vmul.f32 %v9051_v51, %v6475_v44  ;;  %9072 = vpow2.f32 %v7432_v10  ;;  %v10842_v0 = vpop.f32.mrb[32].mxu0  ;;  %v7434_v44 = vmul.f32 -1.442695, %v7940_v12 }
 0xad9   : > { %v10837_v1 = vpop.eup %9054  ;;  %v6508_v61 = vmul.f32 %v9053_v54, %v9033_v3  ;;  %9074 = vpow2.f32 %v7464_v47  ;;  %v10844_v7 = vpop.f32.mrb[17].mxu1  ;;  %v231_v3 = vld [vmem:[%s9315_s19 + $0xb8] sm:$0xff] }
 0xada   : > { %v9057_v53 = vpop.eup %9056  ;;  %v6523_v5 = vadd.f32 %v6507_v28, %v6491_v55  ;;  %9076 = vpow2.f32 %v7448_v32  ;;  %v10846_v8 = vpop.f32.mrb[33].mxu0  ;;  %v7971_v10 = vadd.f32 %v10807_v2, %v231_v3  ;;  %v236_v32 = vld [vmem:[%s9315_s19 + $0xe0] sm:$0xff] }
 0xadb   : > { %v9059_v58 = vpop.eup %9058  ;;  %v6492_v11 = vmul.f32 %v9057_v53, %v6476_v56  ;;  %9078 = vtanh.f32 %v7969_v52  ;;  %v10849_v14 = vpop.f32.mrb[18].mxu1  ;;  %v7942_v53 = vadd.f32 %v10820_v38, %v236_v32  ;;  %v7973_v38 = vadd.f32 %v10818_v35, %v235_v62 }
 0xadc   : > { %v10851_v60 = vpop.f32.mrb[34].mxu0  ;;  %v9061_v25 = vpop.eup %9060  ;;  %9080 = vtanh.f32 %v6523_v5  ;;  %6571 = vst [vmem:[#allocation3] sm:$0xff] %v6523_v5  ;;  %v6318_v26 = vadd.f32 1.0, %v9059_v58 }
 0xadd   : > { %v10853_v31 = vpop.f32.mrb[19].mxu1  ;;  %v9063_v4 = vpop.eup %9062  ;;  %v6524_v33 = vadd.f32 %v6508_v61, %v6492_v11  ;;  %9082 = vpow2.f32 %v7433_v46  ;;  %v7466_v46 = vmul.f32 -1.442695, %v7972_v48 }
 0xade   : > { %v10856_v40 = vpop.f32.mrb[35].mxu0  ;;  %v10858_v29 = vpop.eup %9064  ;;  %v6509_v41 = vmul.f32 %v9063_v4, %v10810_v9  ;;  %9084 = vrcp.f32 %v6318_v26  ;;  %v7941_v9 = vadd.f32 %v10816_v6, %v233_v42  ;;  %v6478_v26 = vld [vmem:[#allocation3 + $0x18] sm:$0xff] }
 0xadf   : > { %v9067_v13 = vpop.eup %9066  ;;  %9086 = vtanh.f32 %v6524_v33  ;;  %6572 = vst [vmem:[#allocation3 + $0x8] sm:$0xff] %v6524_v33  ;;  %v10868_v50 = vpop.f32.mrb[20].mxu1 }
 0xae0   : > { %v9069_v45 = vpop.eup %9068  ;;  %v6493_v47 = vmul.f32 %v9067_v13, %v6477_v34  ;;  %9088 = vpow2.f32 %v7465_v27  ;;  %v10870_v2 = vpop.f32.mrb[36].mxu0  ;;  %v7450_v3 = vmul.f32 -1.442695, %v7941_v9  ;;  %v238_v27 = vld [vmem:[%s9315_s19 + $0xf0] sm:$0xff]  ;;  %v237_v34 = vld [vmem:[%s9315_s19 + $0xe8] sm:$0xff] }
 0xae1   : > { %v10864_v49 = vpop.eup %9070  ;;  %v6510_v28 = vmul.f32 %v9069_v45, %v9061_v25  ;;  %9090 = vpow2.f32 %v7449_v36  ;;  %v10872_v54 = vpop.f32.mrb[21].mxu1  ;;  %v7974_v13 = vadd.f32 %v10822_v39, %v238_v27  ;;  %v241_v27 = vld [vmem:[%s9315_s19 + $0x108] sm:$0xff] }
 0xae2   : > { %v9073_v51 = vpop.eup %9072  ;;  %v6525_v52 = vadd.f32 %v6509_v41, %v6493_v47  ;;  %9092 = vtanh.f32 %v7971_v10  ;;  %v10874_v55 = vpop.f32.mrb[37].mxu0  ;;  %v7435_v41 = vmul.f32 -1.442695, %v7942_v53  ;;  %v7943_v47 = vadd.f32 %v10825_v43, %v237_v34 }
 0xae3   : > { %v9075_v30 = vpop.eup %9074  ;;  %v6223_v56 = vadd.f32 1.0, %v9073_v51  ;;  %9094 = vpow2.f32 %v7434_v44  ;;  %v10876_v57 = vpop.f32.mrb[22].mxu1  ;;  %v240_v44 = vld [vmem:[%s9315_s19 + $0x100] sm:$0xff] }
 0xae4   : > { %v10878_v59 = vpop.f32.mrb[38].mxu0  ;;  %v9077_v6 = vpop.eup %9076  ;;  %9096 = vtanh.f32 %v6525_v52  ;;  %6573 = vst [vmem:[#allocation3 + $0x10] sm:$0xff] %v6525_v52  ;;  %v6415_v61 = vadd.f32 1.0, %v9075_v30  ;;  %v7451_v53 = vmul.f32 -1.442695, %v7943_v47 }
 0xae5   : > { %v10882_v5 = vpop.f32.mrb[23].mxu1  ;;  %v9079_v58 = vpop.eup %9078  ;;  %9098 = vrcp.f32 %v6223_v56  ;;  %v6319_v11 = vadd.f32 1.0, %v9077_v6  ;;  %v239_v56 = vld [vmem:[%s9315_s19 + $0xf8] sm:$0xff]  ;;  %v242_v6 = vld [vmem:[%s9315_s19 + $0x110] sm:$0xff] }
 0xae6   : > { %v10884_v12 = vpop.f32.mrb[39].mxu0  ;;  %v9081_v25 = vpop.eup %9080  ;;  %9100 = vrcp.f32 %v6415_v61 }
 0xae7   : > { %v9083_v4 = vpop.eup %9082  ;;  %v6555_v33 = vmul.f32 %v9081_v25, %v10830_v22  ;;  %9102 = vrcp.f32 %v6319_v11  ;;  %v10893_v45 = vpop.f32.mrb[24].mxu1  ;;  %v6479_v25 = vld [vmem:[#allocation3 + $0x20] sm:$0xff] }
 0xae8   : > { %v9085_v36 = vpop.eup %9084  ;;  %v6224_v37 = vadd.f32 1.0, %v9083_v4  ;;  %9104 = vpow2.f32 %v7466_v46  ;;  %v10897_v48 = vpop.f32.mrb[25].mxu1 }
 0xae9   : > { %v9087_v10 = vpop.eup %9086  ;;  %6587 = vst [vmem:[#allocation2] sm:$0xff] %v6555_v33  ;;  %6603 = vst [vmem:[%s9320_s22] sm:$0xff] %v6555_v33  ;;  %v6494_v42 = vmul.f32 %v9085_v36, %v6478_v26  ;;  %9106 = vpow2.f32 %v7450_v3  ;;  %v10899_v52 = vpop.f32.mrb[26].mxu1  ;;  %v7976_v26 = vadd.f32 %v10842_v0, %v242_v6  ;;  %v244_v36 = vld [vmem:[%s9315_s19 + $0x120] sm:$0xff]  ;;  %v246_v0 = vld [vmem:[%s9315_s19 + $0x130] sm:$0xff] }
 0xaea   : > { %v9089_v22 = vpop.eup %9088  ;;  %v6556_v35 = vmul.f32 %v9087_v10, %v10837_v1  ;;  %9108 = vrcp.f32 %v6224_v37  ;;  %v7944_v1 = vadd.f32 %v10840_v63, %v240_v44  ;;  %v10905_v61 = vpop.f32.mrb[27].mxu1  ;;  %v7975_v63 = vadd.f32 %v10828_v17, %v239_v56 }
 0xaeb   : > { %v9091_v9 = vpop.eup %9090  ;;  %v6526_v32 = vadd.f32 %v6510_v28, %v6494_v42  ;;  %v6416_v51 = vadd.f32 1.0, %v9089_v22  ;;  %9110 = vtanh.f32 %v7973_v38  ;;  %v7467_v28 = vmul.f32 -1.442695, %v7974_v13 }
 0xaec   : > { %v9093_v39 = vpop.eup %9092  ;;  %6588 = vst [vmem:[#allocation2 + $0x8] sm:$0xff] %v6556_v35  ;;  %6604 = vst [vmem:[%s9320_s22 + $0x8] sm:$0xff] %v6556_v35  ;;  %v6320_v30 = vadd.f32 1.0, %v9091_v9  ;;  %9112 = vpow2.f32 %v7435_v41  ;;  %v7436_v38 = vmul.f32 -1.442695, %v7944_v1  ;;  %v7945_v17 = vadd.f32 %v10844_v7, %v241_v27  ;;  %v243_v9 = vld [vmem:[%s9315_s19 + $0x118] sm:$0xff] }
 0xaed   : > { %v9095_v43 = vpop.eup %9094  ;;  %9114 = vtanh.f32 %v6526_v32  ;;  %6574 = vst [vmem:[#allocation3 + $0x18] sm:$0xff] %v6526_v32  ;;  %v7468_v13 = vmul.f32 -1.442695, %v7976_v26  ;;  %v7946_v32 = vadd.f32 %v10849_v14, %v244_v36  ;;  %v7978_v1 = vadd.f32 %v10851_v60, %v246_v0  ;;  %v263_v60 = vld [vmem:[%s9315_s19 + $0x1b8] sm:$0xff]  ;;  %v248_v36 = vld [vmem:[%s9315_s19 + $0x140] sm:$0xff] }
 0xaee   : > { %v9097_v46 = vpop.eup %9096  ;;  %9116 = vrcp.f32 %v6416_v51  ;;  %v6225_v62 = vadd.f32 1.0, %v9095_v43  ;;  %v259_v43 = vld [vmem:[%s9315_s19 + $0x198] sm:$0xff] }
 0xaef   : > { %v9099_v11 = vpop.eup %9098  ;;  %v6557_v3 = vmul.f32 %v9097_v46, %v10858_v29  ;;  %9118 = vrcp.f32 %v6320_v30  ;;  %v10915_v37 = vpop.f32.mrb[28].mxu1  ;;  %v258_v30 = vld [vmem:[%s9315_s19 + $0x190] sm:$0xff]  ;;  %v7452_v46 = vmul.f32 -1.442695, %v7945_v17  ;;  %v7437_v26 = vmul.f32 -1.442695, %v7946_v32 }
 0xaf0   : > { %v10911_v4 = vpop.eup %9100  ;;  %v6511_v33 = vmul.f32 %v9099_v11, %v9079_v58  ;;  %9120 = vrcp.f32 %v6225_v62  ;;  %v10919_v10 = vpop.f32.mrb[29].mxu1  ;;  %v7977_v11 = vadd.f32 %v10846_v8, %v243_v9  ;;  %v250_v9 = vld [vmem:[%s9315_s19 + $0x150] sm:$0xff] }
 0xaf1   : > { %v9103_v34 = vpop.eup %9102  ;;  %6589 = vst [vmem:[#allocation2 + $0x10] sm:$0xff] %v6557_v3  ;;  %6605 = vst [vmem:[%s9320_s22 + $0x10] sm:$0xff] %v6557_v3  ;;  %9122 = vpow2.f32 %v7467_v28  ;;  %v10921_v44 = vpop.f32.mrb[30].mxu1  ;;  %v262_v28 = vld [vmem:[%s9315_s19 + $0x1b0] sm:$0xff]  ;;  %v245_v3 = vld [vmem:[%s9315_s19 + $0x128] sm:$0xff] }
 0xaf2   : > { %v9105_v29 = vpop.eup %9104  ;;  %v6495_v41 = vmul.f32 %v9103_v34, %v6479_v25  ;;  %9124 = vpow2.f32 %v7451_v53  ;;  %v10925_v7 = vpop.f32.mrb[31].mxu1  ;;  %v6480_v53 = vld [vmem:[#allocation3 + $0x28] sm:$0xff]  ;;  %v7984_v25 = vadd.f32 %v10738_v15, %v258_v30  ;;  %v7469_v34 = vmul.f32 -1.442695, %v7978_v1  ;;  %v266_v1 = vld [vmem:[%s9315_s19 + $0x1d0] sm:$0xff] }
 0xaf3   : > { %v9107_v58 = vpop.eup %9106  ;;  %v6417_v42 = vadd.f32 1.0, %v9105_v29  ;;  %9126 = vtanh.f32 %v7975_v63  ;;  %v7947_v15 = vadd.f32 %v10853_v31, %v245_v3  ;;  %v247_v31 = vld [vmem:[%s9315_s19 + $0x138] sm:$0xff]  ;;  %v7980_v3 = vadd.f32 %v10870_v2, %v250_v9 }
 0xaf4   : > { %v9109_v22 = vpop.eup %9108  ;;  %v6527_v35 = vadd.f32 %v6511_v33, %v6495_v41  ;;  %v6321_v47 = vadd.f32 1.0, %v9107_v58  ;;  %9128 = vpow2.f32 %v7436_v38  ;;  %v7986_v33 = vadd.f32 %v10740_v16, %v259_v43 }
 0xaf5   : > { %v9111_v51 = vpop.eup %9110  ;;  %v6512_v56 = vmul.f32 %v9109_v22, %v9093_v39  ;;  %9130 = vrcp.f32 %v6417_v42  ;;  %v7988_v38 = vadd.f32 %v10742_v18, %v262_v28  ;;  %v7990_v18 = vadd.f32 %v10744_v19, %v263_v60 }
 0xaf6   : > { %v9113_v6 = vpop.eup %9112  ;;  %9132 = vtanh.f32 %v6527_v35  ;;  %6575 = vst [vmem:[#allocation3 + $0x20] sm:$0xff] %v6527_v35 }
 0xaf7   : > { %v9115_v62 = vpop.eup %9114  ;;  %9134 = vrcp.f32 %v6321_v47  ;;  %v6226_v14 = vadd.f32 1.0, %v9113_v6  ;;  %v6088_v8 = vpop.f32.mrb[96].mxu1  ;;  %v7948_v47 = vadd.f32 %v10868_v50, %v248_v36  ;;  %v267_v6 = vld [vmem:[%s9315_s19 + $0x1d8] sm:$0xff]  ;;  %v6481_v50 = vld [vmem:[#allocation3 + $0x30] sm:$0xff] }
 0xaf8   : > { %v10933_v39 = vpop.eup %9116  ;;  %v6558_v63 = vmul.f32 %v9115_v62, %v10864_v49  ;;  %9136 = vpow2.f32 %v7468_v13  ;;  %v10943_v49 = vadd.f32 %v7984_v25, %v6088_v8  ;;  %v6090_v17 = vpop.f32.mrb[97].mxu1  ;;  %v7453_v62 = vmul.f32 -1.442695, %v7947_v15  ;;  %v249_v25 = vld [vmem:[%s9315_s19 + $0x148] sm:$0xff] }
 0xaf9   : > { %v9119_v27 = vpop.eup %9118  ;;  %9138 = vrcp.f32 %v6226_v14  ;;  %v10946_v58 = vadd.f32 %v7986_v33, %v6090_v17  ;;  %v6092_v42 = vpop.f32.mrb[98].mxu1 }
 0xafa   : > { %v9121_v29 = vpop.eup %9120  ;;  %6590 = vst [vmem:[#allocation2 + $0x18] sm:$0xff] %v6558_v63  ;;  %6606 = vst [vmem:[%s9320_s22 + $0x18] sm:$0xff] %v6558_v63  ;;  %v6496_v41 = vmul.f32 %v9119_v27, %v6480_v53  ;;  %9140 = vpow2.f32 %v7452_v46  ;;  %v6094_v32 = vpop.f32.mrb[99].mxu1  ;;  %v271_v46 = vld [vmem:[%s9315_s19 + $0x1f8] sm:$0xff]  ;;  %v7992_v63 = vadd.f32 %v10746_v20, %v266_v1  ;;  %v7438_v27 = vmul.f32 -1.442695, %v7948_v47 }
 0xafb   : > { %v9123_v16 = vpop.eup %9122  ;;  %v6513_v0 = vmul.f32 %v9121_v29, %v9111_v51  ;;  %9142 = vtanh.f32 %v7977_v11  ;;  %v10953_v51 = vadd.f32 %v7988_v38, %v6092_v42  ;;  %v10955_v43 = vadd.f32 %v7990_v18, %v6094_v32  ;;  %v251_v47 = vld [vmem:[%s9315_s19 + $0x158] sm:$0xff] }
 0xafc   : > { %v9125_v13 = vpop.eup %9124  ;;  %v6528_v22 = vadd.f32 %v6512_v56, %v6496_v41  ;;  %v6418_v35 = vadd.f32 1.0, %v9123_v16  ;;  %9144 = vpow2.f32 %v7437_v26  ;;  %v270_v56 = vld [vmem:[%s9315_s19 + $0x1f0] sm:$0xff]  ;;  %v7979_v11 = vadd.f32 %v10856_v40, %v247_v31  ;;  %v252_v40 = vld [vmem:[%s9315_s19 + $0x160] sm:$0xff] }
 0xafd   : > { %v9127_v30 = vpop.eup %9126  ;;  %v6322_v19 = vadd.f32 1.0, %v9125_v13  ;;  %9146 = vpow2.f32 %v7469_v34  ;;  %v7994_v26 = vadd.f32 %v10748_v21, %v267_v6  ;;  %v7996_v38 = vadd.f32 %v10750_v23, %v270_v56  ;;  %v6482_v56 = vld [vmem:[#allocation3 + $0x38] sm:$0xff] }
 0xafe   : > { %v9129_v28 = vpop.eup %9128  ;;  %9148 = vtanh.f32 %v6528_v22  ;;  %6576 = vst [vmem:[#allocation3 + $0x28] sm:$0xff] %v6528_v22  ;;  %v7998_v34 = vadd.f32 %v10752_v24, %v271_v46  ;;  %v7949_v20 = vadd.f32 %v10872_v54, %v249_v25  ;;  %v7470_v24 = vmul.f32 -1.442695, %v7980_v3 }
 0xaff   : > { %v10959_v53 = vpop.eup %9130  ;;  %9150 = vrcp.f32 %v6418_v35  ;;  %v6227_v14 = vadd.f32 1.0, %v9129_v28  ;;  %v6098_v2 = vpop.f32.mrb[100].mxu1  ;;  %v7950_v54 = vadd.f32 %v10876_v57, %v252_v40 }
 0xb00   : > { %v9133_v60 = vpop.eup %9132  ;;  %9152 = vrcp.f32 %v6322_v19  ;;  %v10971_v21 = vadd.f32 %v7992_v63, %v6098_v2  ;;  %v6100_v41 = vpop.f32.mrb[101].mxu1  ;;  %v7454_v57 = vmul.f32 -1.442695, %v7949_v20  ;;  %v253_v19 = vld [vmem:[%s9315_s19 + $0x168] sm:$0xff]  ;;  %v6483_v20 = vld [vmem:[#allocation3 + $0x40] sm:$0xff] }
 0xb01   : > { %v9135_v33 = vpop.eup %9134  ;;  %v6559_v36 = vmul.f32 %v9133_v60, %v10911_v4  ;;  %9154 = vrcp.f32 %v6227_v14  ;;  %v254_v4 = vld [vmem:[%s9315_s19 + $0x170] sm:$0xff]  ;;  %v10975_v17 = vadd.f32 %v7994_v26, %v6100_v41  ;;  %v6102_v16 = vpop.f32.mrb[102].mxu1  ;;  %v7951_v60 = vadd.f32 %v10882_v5, %v253_v19 }
 0xb02   : > { %v9137_v8 = vpop.eup %9136  ;;  %v6497_v29 = vmul.f32 %v9135_v33, %v6481_v50  ;;  %9156 = vpow2.f32 %v7453_v62  ;;  %v6104_v22 = vpop.f32.mrb[103].mxu1  ;;  %v10979_v9 = vadd.f32 %v7996_v38, %v6102_v16  ;;  %v7981_v62 = vadd.f32 %v10874_v55, %v251_v47  ;;  %v257_v38 = vld [vmem:[%s9315_s19 + $0x188] sm:$0xff] }
 0xb03   : > { %v9139_v15 = vpop.eup %9138  ;;  %6591 = vst [vmem:[#allocation2 + $0x20] sm:$0xff] %v6559_v36  ;;  %6607 = vst [vmem:[%s9320_s22 + $0x20] sm:$0xff] %v6559_v36  ;;  %v6419_v23 = vadd.f32 1.0, %v9137_v8  ;;  %9158 = vtanh.f32 %v7979_v11  ;;  %v10981_v32 = vadd.f32 %v7998_v34, %v6104_v22  ;;  %v7439_v11 = vmul.f32 -1.442695, %v7950_v54  ;;  %v260_v8 = vld [vmem:[%s9315_s19 + $0x1a0] sm:$0xff] }
 0xb04   : > { %v9141_v18 = vpop.eup %9140  ;;  %v6529_v42 = vadd.f32 %v6513_v0, %v6497_v29  ;;  %v6514_v13 = vmul.f32 %v9139_v15, %v9127_v30  ;;  %9160 = vpow2.f32 %v7438_v27  ;;  %v7982_v0 = vadd.f32 %v10878_v59, %v254_v4  ;;  %v256_v59 = vld [vmem:[%s9315_s19 + $0x180] sm:$0xff] }
 0xb05   : > { %v9143_v35 = vpop.eup %9142  ;;  %9162 = vrcp.f32 %v6419_v23  ;;  %v6323_v31 = vadd.f32 1.0, %v9141_v18  ;;  %v7952_v33 = vadd.f32 %v10893_v45, %v256_v59  ;;  %v7455_v5 = vmul.f32 -1.442695, %v7951_v60  ;;  %v264_v22 = vld [vmem:[%s9315_s19 + $0x1c0] sm:$0xff]  ;;  %v269_v59 = vld [vmem:[%s9315_s19 + $0x1e8] sm:$0xff] }
 0xb06   : > { %v9145_v1 = vpop.eup %9144  ;;  %9164 = vtanh.f32 %v6529_v42  ;;  %6577 = vst [vmem:[#allocation3 + $0x30] sm:$0xff] %v6529_v42  ;;  %v7471_v25 = vmul.f32 -1.442695, %v7982_v0  ;;  %v7953_v45 = vadd.f32 %v10897_v48, %v257_v38  ;;  %v7954_v18 = vadd.f32 %v10899_v52, %v260_v8  ;;  %v261_v42 = vld [vmem:[%s9315_s19 + $0x1a8] sm:$0xff] }
 0xb07   : > { %v9147_v30 = vpop.eup %9146  ;;  %9166 = vrcp.f32 %v6323_v31  ;;  %v6228_v6 = vadd.f32 1.0, %v9145_v1  ;;  %v265_v31 = vld [vmem:[%s9315_s19 + $0x1c8] sm:$0xff]  ;;  %v7955_v52 = vadd.f32 %v10905_v61, %v261_v42 }
 0xb08   : > { %v9149_v28 = vpop.eup %9148  ;;  %v6420_v46 = vadd.f32 1.0, %v9147_v30  ;;  %9168 = vpow2.f32 %v7470_v24  ;;  %v7440_v24 = vmul.f32 -1.442695, %v7952_v33  ;;  %v7456_v48 = vmul.f32 -1.442695, %v7953_v45 }
 0xb09   : > { %v10986_v50 = vpop.eup %9150  ;;  %v6560_v14 = vmul.f32 %v9149_v28, %v10933_v39  ;;  %9170 = vrcp.f32 %v6228_v6  ;;  %v255_v39 = vld [vmem:[%s9315_s19 + $0x178] sm:$0xff]  ;;  %v7441_v30 = vmul.f32 -1.442695, %v7954_v18  ;;  %v7956_v6 = vadd.f32 %v10915_v37, %v264_v22 }
 0xb0a   : > { %v9153_v3 = vpop.eup %9152  ;;  %9172 = vrcp.f32 %v6420_v46  ;;  %v7983_v15 = vadd.f32 %v10884_v12, %v255_v39  ;;  %v7957_v28 = vadd.f32 %v10919_v10, %v265_v31  ;;  %v268_v46 = vld [vmem:[%s9315_s19 + $0x1e0] sm:$0xff]  ;;  %v7457_v61 = vmul.f32 -1.442695, %v7955_v52 }
 0xb0b   : > { %v9155_v63 = vpop.eup %9154  ;;  %6592 = vst [vmem:[#allocation2 + $0x28] sm:$0xff] %v6560_v14  ;;  %6608 = vst [vmem:[%s9320_s22 + $0x28] sm:$0xff] %v6560_v14  ;;  %v6498_v26 = vmul.f32 %v9153_v3, %v6482_v56  ;;  %9174 = vpow2.f32 %v7454_v57  ;;  %v6484_v14 = vld [vmem:[#allocation3 + $0x48] sm:$0xff]  ;;  %v7442_v37 = vmul.f32 -1.442695, %v7956_v6  ;;  %v7958_v10 = vadd.f32 %v10921_v44, %v268_v46 }
 0xb0c   : > { %v9157_v55 = vpop.eup %9156  ;;  %v6515_v27 = vmul.f32 %v9155_v63, %v9143_v35  ;;  %9176 = vtanh.f32 %v7981_v62  ;;  %v7959_v39 = vadd.f32 %v10925_v7, %v269_v59  ;;  %v7472_v45 = vmul.f32 -1.442695, %v10943_v49 }
 0xb0d   : > { %v9159_v34 = vpop.eup %9158  ;;  %v6530_v36 = vadd.f32 %v6514_v13, %v6498_v26  ;;  %v6324_v40 = vadd.f32 1.0, %v9157_v55  ;;  %9178 = vpow2.f32 %v7439_v11  ;;  %v7458_v26 = vmul.f32 -1.442695, %v7957_v28 }
 0xb0e   : > { %v9161_v2 = vpop.eup %9160  ;;  %9180 = vpow2.f32 %v7471_v25  ;;  %v7459_v8 = vmul.f32 -1.442695, %v7959_v39  ;;  %v7474_v6 = vmul.f32 -1.442695, %v10971_v21 }
 0xb0f   : > { %v10996_v29 = vpop.eup %9162  ;;  %9182 = vtanh.f32 %v6530_v36  ;;  %6578 = vst [vmem:[#allocation3 + $0x38] sm:$0xff] %v6530_v36  ;;  %v6229_v41 = vadd.f32 1.0, %v9161_v2 }
 0xb10   : > { %v9165_v23 = vpop.eup %9164  ;;  %9184 = vrcp.f32 %v6324_v40 }
 0xb11   : > { %v9167_v4 = vpop.eup %9166  ;;  %v6561_v16 = vmul.f32 %v9165_v23, %v10959_v53  ;;  %9186 = vrcp.f32 %v6229_v41 }
 0xb12   : > { %v9169_v13 = vpop.eup %9168  ;;  %v6499_v54 = vmul.f32 %v9167_v4, %v6483_v20  ;;  %9188 = vpow2.f32 %v7455_v5  ;;  %v6485_v20 = vld [vmem:[#allocation3 + $0x50] sm:$0xff] }
 0xb13   : > { %v9171_v35 = vpop.eup %9170  ;;  %6593 = vst [vmem:[#allocation2 + $0x30] sm:$0xff] %v6561_v16  ;;  %6609 = vst [vmem:[%s9320_s22 + $0x30] sm:$0xff] %v6561_v16  ;;  %v6421_v12 = vadd.f32 1.0, %v9169_v13  ;;  %9190 = vtanh.f32 %v7983_v15 }
 0xb14   : > { %v11006_v47 = vpop.eup %9172  ;;  %v6531_v1 = vadd.f32 %v6515_v27, %v6499_v54  ;;  %v6516_v53 = vmul.f32 %v9171_v35, %v9159_v34  ;;  %9192 = vpow2.f32 %v7440_v24 }
 0xb15   : > { %v9175_v0 = vpop.eup %9174  ;;  %9194 = vrcp.f32 %v6421_v12 }
 0xb16   : > { %v9177_v57 = vpop.eup %9176  ;;  %9196 = vtanh.f32 %v6531_v1  ;;  %6579 = vst [vmem:[#allocation3 + $0x40] sm:$0xff] %v6531_v1  ;;  %v6325_v19 = vadd.f32 1.0, %v9175_v0  ;;  %v7473_v1 = vmul.f32 -1.442695, %v10953_v51 }
 0xb17   : > { %v9179_v56 = vpop.eup %9178  ;;  %9198 = vpow2.f32 %v7456_v48  ;;  %v6486_v48 = vld [vmem:[#allocation3 + $0x58] sm:$0xff] }
 0xb18   : > { %v9181_v62 = vpop.eup %9180  ;;  %9200 = vrcp.f32 %v6325_v19  ;;  %v6230_v11 = vadd.f32 1.0, %v9179_v56 }
 0xb19   : > { %v9183_v3 = vpop.eup %9182  ;;  %v6422_v25 = vadd.f32 1.0, %v9181_v62  ;;  %9202 = vpow2.f32 %v7441_v30  ;;  %v6487_v62 = vld [vmem:[#allocation3 + $0x60] sm:$0xff] }
 0xb1a   : > { %v9185_v60 = vpop.eup %9184  ;;  %v6562_v63 = vmul.f32 %v9183_v3, %v10986_v50  ;;  %9204 = vrcp.f32 %v6230_v11  ;;  %v7443_v50 = vmul.f32 -1.442695, %v7958_v10 }
 0xb1b   : > { %v9187_v55 = vpop.eup %9186  ;;  %v6500_v27 = vmul.f32 %v9185_v60, %v6484_v14  ;;  %9206 = vrcp.f32 %v6422_v25  ;;  %v6488_v60 = vld [vmem:[#allocation3 + $0x68] sm:$0xff] }
 0xb1c   : > { %v9189_v33 = vpop.eup %9188  ;;  %6594 = vst [vmem:[#allocation2 + $0x38] sm:$0xff] %v6562_v63  ;;  %6610 = vst [vmem:[%s9320_s22 + $0x38] sm:$0xff] %v6562_v63  ;;  %v6517_v38 = vmul.f32 %v9187_v55, %v9177_v57  ;;  %9208 = vpow2.f32 %v7457_v61  ;;  %v7475_v61 = vmul.f32 -1.442695, %v10979_v9 }
 0xb1d   : > { %v9191_v34 = vpop.eup %9190  ;;  %v6532_v36 = vadd.f32 %v6516_v53, %v6500_v27  ;;  %v6326_v40 = vadd.f32 1.0, %v9189_v33  ;;  %9210 = vpow2.f32 %v7442_v37 }
 0xb1e   : > { %v9193_v2 = vpop.eup %9192  ;;  %9212 = vpow2.f32 %v7458_v26 }
 0xb1f   : > { %v11017_v5 = vpop.eup %9194  ;;  %9214 = vtanh.f32 %v6532_v36  ;;  %6580 = vst [vmem:[#allocation3 + $0x48] sm:$0xff] %v6532_v36  ;;  %v6231_v44 = vadd.f32 1.0, %v9193_v2 }
 0xb20   : > { %v9197_v7 = vpop.eup %9196  ;;  %9216 = vrcp.f32 %v6326_v40  ;;  %v6489_v40 = vld [vmem:[#allocation3 + $0x70] sm:$0xff] }
 0xb21   : > { %v9199_v41 = vpop.eup %9198  ;;  %v6563_v15 = vmul.f32 %v9197_v7, %v10996_v29  ;;  %9218 = vrcp.f32 %v6231_v44  ;;  %v6490_v44 = vld [vmem:[#allocation3 + $0x78] sm:$0xff] }
 0xb22   : > { %v9201_v23 = vpop.eup %9200  ;;  %v6327_v24 = vadd.f32 1.0, %v9199_v41  ;;  %9220 = vpow2.f32 %v7443_v50 }
 0xb23   : > { %v9203_v4 = vpop.eup %9202  ;;  %6595 = vst [vmem:[#allocation2 + $0x40] sm:$0xff] %v6563_v15  ;;  %6611 = vst [vmem:[%s9320_s22 + $0x40] sm:$0xff] %v6563_v15  ;;  %v6501_v16 = vmul.f32 %v9201_v23, %v6485_v20  ;;  %9222 = vpow2.f32 %v7459_v8 }
 0xb24   : > { %v9205_v18 = vpop.eup %9204  ;;  %9224 = vrcp.f32 %v6327_v24  ;;  %v6232_v42 = vadd.f32 1.0, %v9203_v4 }
 0xb25   : > { %v11022_v13 = vpop.eup %9206  ;;  %v6533_v54 = vadd.f32 %v6517_v38, %v6501_v16  ;;  %v6518_v22 = vmul.f32 %v9205_v18, %v9191_v34  ;;  %9226 = vpow2.f32 %v7472_v45 }
 0xb26   : > { %v9209_v29 = vpop.eup %9208  ;;  %9228 = vrcp.f32 %v6232_v42 }
 0xb27   : > { %v9211_v35 = vpop.eup %9210  ;;  %9230 = vtanh.f32 %v6533_v54  ;;  %6581 = vst [vmem:[#allocation3 + $0x50] sm:$0xff] %v6533_v54  ;;  %v6328_v49 = vadd.f32 1.0, %v9209_v29 }
 0xb28   : > { %v9213_v12 = vpop.eup %9212  ;;  %v6233_v31 = vadd.f32 1.0, %v9211_v35  ;;  %9232 = vtanh.f32 %v10946_v58 }
 0xb29   : > { %v9215_v53 = vpop.eup %9214  ;;  %9234 = vrcp.f32 %v6328_v49  ;;  %v6329_v52 = vadd.f32 1.0, %v9213_v12 }
 0xb2a   : > { %v9217_v0 = vpop.eup %9216  ;;  %v6564_v30 = vmul.f32 %v9215_v53, %v11006_v47  ;;  %9236 = vrcp.f32 %v6233_v31 }
 0xb2b   : > { %v9219_v57 = vpop.eup %9218  ;;  %v6502_v19 = vmul.f32 %v9217_v0, %v6486_v48  ;;  %9238 = vrcp.f32 %v6329_v52 }
 0xb2c   : > { %v9221_v28 = vpop.eup %9220  ;;  %6596 = vst [vmem:[#allocation2 + $0x48] sm:$0xff] %v6564_v30  ;;  %6612 = vst [vmem:[%s9320_s22 + $0x48] sm:$0xff] %v6564_v30  ;;  %9240 = vpow2.f32 %v7473_v1 }
 0xb2d   : > { %v9223_v56 = vpop.eup %9222  ;;  %v6534_v58 = vadd.f32 %v6518_v22, %v6502_v19  ;;  %v6234_v46 = vadd.f32 1.0, %v9221_v28  ;;  %9242 = vtanh.f32 %v10955_v43 }
 0xb2e   : > { %v9225_v51 = vpop.eup %9224  ;;  %v6330_v14 = vadd.f32 1.0, %v9223_v56  ;;  %9244 = vpow2.f32 %v7474_v6 }
 0xb2f   : > { %v9227_v47 = vpop.eup %9226  ;;  %9246 = vtanh.f32 %v6534_v58  ;;  %6582 = vst [vmem:[#allocation3 + $0x58] sm:$0xff] %v6534_v58  ;;  %v6503_v3 = vmul.f32 %v9225_v51, %v6487_v62 }
 0xb30   : > { %v9229_v21 = vpop.eup %9228  ;;  %9248 = vrcp.f32 %v6234_v46  ;;  %v6423_v11 = vadd.f32 1.0, %v9227_v47 }
 0xb31   : > { %v9231_v59 = vpop.eup %9230  ;;  %9250 = vrcp.f32 %v6330_v14 }
 0xb32   : > { %v9233_v25 = vpop.eup %9232  ;;  %v6565_v37 = vmul.f32 %v9231_v59, %v11017_v5  ;;  %9252 = vrcp.f32 %v6423_v11 }
 0xb33   : > { %v9235_v43 = vpop.eup %9234  ;;  %v6519_v63 = vmul.f32 %v9233_v25, %v9219_v57  ;;  %9254 = vtanh.f32 %v10975_v17 }
 0xb34   : > { %v9237_v26 = vpop.eup %9236  ;;  %6597 = vst [vmem:[#allocation2 + $0x50] sm:$0xff] %v6565_v37  ;;  %6613 = vst [vmem:[%s9320_s22 + $0x50] sm:$0xff] %v6565_v37  ;;  %9256 = vpow2.f32 %v7475_v61  ;;  %v6504_v27 = vmul.f32 %v9235_v43, %v6488_v60 }
 0xb35   : > { %v9239_v10 = vpop.eup %9238  ;;  %v6535_v55 = vadd.f32 %v6519_v63, %v6503_v3  ;;  %9258 = vtanh.f32 %v10981_v32 }
 0xb36   : > { %v9241_v9 = vpop.eup %9240  ;;  %v6505_v32 = vmul.f32 %v9239_v10, %v6489_v40 }
 0xb37   : > { %v9243_v39 = vpop.eup %9242  ;;  %9260 = vtanh.f32 %v6535_v55  ;;  %6583 = vst [vmem:[#allocation3 + $0x60] sm:$0xff] %v6535_v55  ;;  %v6424_v33 = vadd.f32 1.0, %v9241_v9 }
 0xb38   : > { %v9245_v38 = vpop.eup %9244  ;;  %v6520_v34 = vmul.f32 %v9243_v39, %v9229_v21 }
 0xb39   : > { %v9247_v36 = vpop.eup %9246  ;;  %9262 = vrcp.f32 %v6424_v33  ;;  %v6425_v7 = vadd.f32 1.0, %v9245_v38 }
 0xb3a   : > { %v9249_v17 = vpop.eup %9248  ;;  %v6566_v2 = vmul.f32 %v9247_v36, %v11022_v13  ;;  %v6536_v50 = vadd.f32 %v6520_v34, %v6504_v27 }
 0xb3b   : > { %v9251_v5 = vpop.eup %9250 }
 0xb3c   : > { %v9253_v8 = vpop.eup %9252  ;;  %6598 = vst [vmem:[#allocation2 + $0x58] sm:$0xff] %v6566_v2  ;;  %6614 = vst [vmem:[%s9320_s22 + $0x58] sm:$0xff] %v6566_v2  ;;  %9264 = vtanh.f32 %v6536_v50  ;;  %v6506_v15 = vmul.f32 %v9251_v5, %v6490_v44 }
 0xb3d   : > { %6584 = vst [vmem:[#allocation3 + $0x68] sm:$0xff] %v6536_v50  ;;  %v9255_v20 = vpop.eup %9254  ;;  %9266 = vrcp.f32 %v6425_v7 }
 0xb3e   : > { %v9257_v41 = vpop.eup %9256  ;;  %v6521_v45 = vmul.f32 %v9255_v20, %v9237_v26 }
 0xb3f   : > { %v9259_v23 = vpop.eup %9258  ;;  %v6426_v24 = vadd.f32 1.0, %v9257_v41 }
 0xb40   : > { %v6537_v4 = vadd.f32 %v6521_v45, %v6505_v32  ;;  %v6522_v16 = vmul.f32 %v9259_v23, %v9249_v17 }
 0xb41   : > { %v9261_v18 = vpop.eup %9260  ;;  %9268 = vrcp.f32 %v6426_v24 }
 0xb42   : > { %v6567_v42 = vmul.f32 %v9261_v18, %v9253_v8  ;;  %9270 = vtanh.f32 %v6537_v4  ;;  %6585 = vst [vmem:[#allocation3 + $0x70] sm:$0xff] %v6537_v4  ;;  %v6538_v13 = vadd.f32 %v6522_v16, %v6506_v15 }
 0xb43   : > { %v9263_v54 = vpop.eup %9262 }
 0xb44   : > { %6599 = vst [vmem:[#allocation2 + $0x60] sm:$0xff] %v6567_v42  ;;  %6615 = vst [vmem:[%s9320_s22 + $0x60] sm:$0xff] %v6567_v42  ;;  %9272 = vtanh.f32 %v6538_v13 }
 0xb45   : > { %6586 = vst [vmem:[#allocation3 + $0x78] sm:$0xff] %v6538_v13 }
 0xb46   : > { %v9265_v22 = vpop.eup %9264 }
 0xb47   : > { %v6568_v29 = vmul.f32 %v9265_v22, %v9263_v54  ;;  %v9267_v35 = vpop.eup %9266 }
 0xb49   : > { %6600 = vst [vmem:[#allocation2 + $0x68] sm:$0xff] %v6568_v29  ;;  %6616 = vst [vmem:[%s9320_s22 + $0x68] sm:$0xff] %v6568_v29 }
 0xb4b   : > { %v9269_v49 = vpop.eup %9268 }
 0xb4c   : > { %v9271_v12 = vpop.eup %9270 }
 0xb4d   : > { %v6569_v48 = vmul.f32 %v9271_v12, %v9267_v35 }
 0xb4e   : > { %v9273_v31 = vpop.eup %9272 }
 0xb4f   : > { %6601 = vst [vmem:[#allocation2 + $0x70] sm:$0xff] %v6569_v48  ;;  %6617 = vst [vmem:[%s9320_s22 + $0x70] sm:$0xff] %v6569_v48  ;;  %v6570_v1 = vmul.f32 %v9273_v31, %v9269_v49 }
 0xb51   : > { %6602 = vst [vmem:[#allocation2 + $0x78] sm:$0xff] %v6570_v1  ;;  %6618 = vst [vmem:[%s9320_s22 + $0x78] sm:$0xff] %v6570_v1 }
 0xb52 PF: > { %s13_s12 = sadd.s32 1, %s9280_s12  }
 0xb53   : > { %p10_p5 = scmp.ge.s32.totalorder %s13_s12, 6  }
 0xb55   :  { %12 = sbr.rel (!%p10_p5) target bundleno = 1 (0x1), region = 82 }

// kernel: integration_forward.20
= control target key start
LH: loop header
LB: loop body
LE: loop exit
PB: predicated region body
PF: predicated region fallthrough
CT: control target
= control target key end

     0   :  { %s2597_s9 = smov 0   ;;  %s2599_s10 = smov 0   ;;  %s3243_s0 = inlined_call_operand.vmem [shape: bf16[512,640], index: 0, kind: input, shape index: {}]   ;;  %s3244_s1 = inlined_call_operand.vmem [shape: bf16[640,512], index: 1, kind: input, shape index: {}]   ;;  %s3245_s2 = inlined_call_operand.vmem [shape: f32[512,512], index: 2, kind: output, shape index: {}]  }
   0x1   :  { %s2601_s11 = smov 0   ;;  %s2603_s12 = smov 0  }
   0x2   :  { %s2605_s13 = smov 0   ;;  %s2607_s14 = smov 0  }
   0x3   :  { %s2609_s15 = smov 0   ;;  %s2611_s16 = smov 0  }
   0x4   :  { %s2613_s17 = smov 0  }
   0x5 LB: > { %s2022_s18 = sadd.s32 4294967295, %s2579_s17   ;;  %s27_s19 = sadd.s32 1, %s2571_s15  ;;  %s2579_s17 = sphi %s2613_s17, %s12_s17   ;;  %s2575_s16 = sphi %s2611_s16, %s3254_s16   ;;  %s2571_s15 = sphi %s2609_s15, %s3253_s15   ;;  %s2567_s14 = sphi %s2607_s14, %s3252_s14   ;;  %s2563_s13 = sphi %s2605_s13, %s3251_s13   ;;  %s2559_s12 = sphi %s2603_s12, %s3250_s12   ;;  %s2555_s11 = sphi %s2601_s11, %s3249_s11   ;;  %s2551_s10 = sphi %s2599_s10, %s3248_s10   ;;  %s2547_s9 = sphi %s2597_s9, %s3247_s9  }
   0x6   : > { %p29_p0 = scmp.ge.s32.totalorder %s27_s19, 2  ;;  %s31_s20 = sadd.s32 1, %s2575_s16 }
   0x7   : > { %s68_s21 = sadd.s32 1, %s2559_s12  ;;  %p75_p1 = scmp.ne.s32.totalorder %s2559_s12, %s2555_s11 }
   0x8   : > { %s3256_s19 = smov (%p29_p0, %s27_s19), 0  ;;  %s3258_s20 = smov (!%p29_p0, %s31_s20), %s2575_s16 }
   0x9   : > { %s64_s22 = ssub.s32 %s2571_s15, %s3256_s19  ;;  %p76_p2 = scmp.eq.s32.totalorder %s2579_s17, 0 }
   0xa   : > { %p33_p3 = scmp.ge.s32.totalorder %s3258_s20, 4  ;;  %p66_p4 = scmp.eq.s32.totalorder %s64_s22, 0 }
   0xb   : > { %p77_p5 = por %p76_p2, %p75_p1  ;;  %s96_s23 = sadd.s32 1, %s2551_s10 }
   0xc   : > { %s3260_s20 = smov (%p33_p3, %s3258_s20), 0  ;;  %p106_p6 = scmp.ne.s32.totalorder %s2551_s10, %s2547_s9 }
   0xd   : > { %s2658_s24 = scalar_select %p66_p4, %s2559_s12, %s68_s21  }
   0xe   : > { %s91_s25 = ssub.s32 %s2575_s16, %s3260_s20  ;;  %p107_p7 = scmp.eq.s32.totalorder %s2022_s18, 7 }
   0xf   : > { %s93_s26 = sor.u32 %s91_s25, %s64_s22  ;;  %p2025_p10 = scmp.ge.s32.totalorder %s2579_s17, 8 }
  0x10   : > { %p94_p8 = scmp.eq.s32.totalorder %s93_s26, 0  ;;  %p2664_p9 = por %p107_p7, %p106_p6 }
  0x11   : > { %129 = sbr.rel (%p2025_p10) target bundleno = 68 (0x44), region = 16 }
  0x12   : > { %s2669_s28 = scalar_select %p94_p8, %s2551_s10, %s96_s23  }
  0x18   : > { %147 = sbr.rel (!%p77_p5) target bundleno = 68 (0x44), region = 24  ;;  %s149_s29 = sand.u32 (%p77_p5), 1, %s2559_s12  }
  0x19   : > { %s2159_s30 = sshll.u32 (%p77_p5), %s2571_s15, 3  ;;  %s2257_s3 = smul.u32 (%p77_p5), 640, %s149_s29 }
  0x1a   : > { %s2677_s6 = scalar_lea.vmem (%p77_p5), %s3244_s1, %s2159_s30 }
  0x1b   : > { %v343_v0 = vld [vmem:[%s2677_s6] sm:$0xff] (%p77_p5)  ;;  %v345_v1 = vld [vmem:[%s2677_s6 + $0x10] sm:$0xff] (%p77_p5)  ;;  %s2685_s7 = scalar_lea.vmem (%p77_p5), [#allocation3], %s2257_s3 }
  0x1c   : > { %v347_v2 = vld [vmem:[%s2677_s6 + $0x20] sm:$0xff] (%p77_p5)  ;;  %v349_v3 = vld [vmem:[%s2677_s6 + $0x30] sm:$0xff] (%p77_p5)  ;;  %344 = vst [vmem:[%s2685_s7] sm:$0xff] (%p77_p5), %v343_v0  ;;  %346 = vst [vmem:[%s2685_s7 + $0x8] sm:$0xff] (%p77_p5), %v345_v1 }
  0x1d   : > { %v351_v4 = vld [vmem:[%s2677_s6 + $0x40] sm:$0xff] (%p77_p5)  ;;  %v353_v5 = vld [vmem:[%s2677_s6 + $0x50] sm:$0xff] (%p77_p5)  ;;  %348 = vst [vmem:[%s2685_s7 + $0x10] sm:$0xff] (%p77_p5), %v347_v2  ;;  %350 = vst [vmem:[%s2685_s7 + $0x18] sm:$0xff] (%p77_p5), %v349_v3 }
  0x1e   : > { %352 = vst [vmem:[%s2685_s7 + $0x20] sm:$0xff] (%p77_p5), %v351_v4  ;;  %354 = vst [vmem:[%s2685_s7 + $0x28] sm:$0xff] (%p77_p5), %v353_v5  ;;  %v355_v6 = vld [vmem:[%s2677_s6 + $0x60] sm:$0xff] (%p77_p5)  ;;  %v357_v7 = vld [vmem:[%s2677_s6 + $0x70] sm:$0xff] (%p77_p5) }
  0x1f   : > { %v359_v8 = vld [vmem:[%s2677_s6 + $0x80] sm:$0xff]  ;;  %356 = vst [vmem:[%s2685_s7 + $0x30] sm:$0xff] %v355_v6  ;;  %358 = vst [vmem:[%s2685_s7 + $0x38] sm:$0xff] %v357_v7  ;;  %v361_v9 = vld [vmem:[%s2677_s6 + $0x90] sm:$0xff] }
  0x20   : > { %360 = vst [vmem:[%s2685_s7 + $0x40] sm:$0xff] %v359_v8  ;;  %v363_v10 = vld [vmem:[%s2677_s6 + $0xa0] sm:$0xff]  ;;  %v365_v11 = vld [vmem:[%s2677_s6 + $0xb0] sm:$0xff]  ;;  %362 = vst [vmem:[%s2685_s7 + $0x48] sm:$0xff] %v361_v9 }
  0x21   : > { %364 = vst [vmem:[%s2685_s7 + $0x50] sm:$0xff] %v363_v10  ;;  %366 = vst [vmem:[%s2685_s7 + $0x58] sm:$0xff] %v365_v11  ;;  %v367_v12 = vld [vmem:[%s2677_s6 + $0xc0] sm:$0xff]  ;;  %v369_v13 = vld [vmem:[%s2677_s6 + $0xd0] sm:$0xff] }
  0x22   : > { %v371_v14 = vld [vmem:[%s2677_s6 + $0xe0] sm:$0xff]  ;;  %368 = vst [vmem:[%s2685_s7 + $0x60] sm:$0xff] %v367_v12  ;;  %370 = vst [vmem:[%s2685_s7 + $0x68] sm:$0xff] %v369_v13  ;;  %v373_v15 = vld [vmem:[%s2677_s6 + $0xf0] sm:$0xff] }
  0x23   : > { %372 = vst [vmem:[%s2685_s7 + $0x70] sm:$0xff] %v371_v14  ;;  %v375_v16 = vld [vmem:[%s2677_s6 + $0x100] sm:$0xff]  ;;  %v377_v17 = vld [vmem:[%s2677_s6 + $0x110] sm:$0xff]  ;;  %374 = vst [vmem:[%s2685_s7 + $0x78] sm:$0xff] %v373_v15 }
  0x24   : > { %376 = vst [vmem:[%s2685_s7 + $0x80] sm:$0xff] %v375_v16  ;;  %378 = vst [vmem:[%s2685_s7 + $0x88] sm:$0xff] %v377_v17  ;;  %v379_v18 = vld [vmem:[%s2677_s6 + $0x120] sm:$0xff]  ;;  %v381_v19 = vld [vmem:[%s2677_s6 + $0x130] sm:$0xff] }
  0x25   : > { %v383_v20 = vld [vmem:[%s2677_s6 + $0x140] sm:$0xff]  ;;  %380 = vst [vmem:[%s2685_s7 + $0x90] sm:$0xff] %v379_v18  ;;  %382 = vst [vmem:[%s2685_s7 + $0x98] sm:$0xff] %v381_v19  ;;  %v385_v21 = vld [vmem:[%s2677_s6 + $0x150] sm:$0xff] }
  0x26   : > { %384 = vst [vmem:[%s2685_s7 + $0xa0] sm:$0xff] %v383_v20  ;;  %v387_v22 = vld [vmem:[%s2677_s6 + $0x160] sm:$0xff]  ;;  %v389_v23 = vld [vmem:[%s2677_s6 + $0x170] sm:$0xff]  ;;  %386 = vst [vmem:[%s2685_s7 + $0xa8] sm:$0xff] %v385_v21 }
  0x27   : > { %388 = vst [vmem:[%s2685_s7 + $0xb0] sm:$0xff] %v387_v22  ;;  %390 = vst [vmem:[%s2685_s7 + $0xb8] sm:$0xff] %v389_v23  ;;  %v391_v24 = vld [vmem:[%s2677_s6 + $0x180] sm:$0xff]  ;;  %v393_v25 = vld [vmem:[%s2677_s6 + $0x190] sm:$0xff] }
  0x28   : > { %v395_v26 = vld [vmem:[%s2677_s6 + $0x1a0] sm:$0xff]  ;;  %392 = vst [vmem:[%s2685_s7 + $0xc0] sm:$0xff] %v391_v24  ;;  %394 = vst [vmem:[%s2685_s7 + $0xc8] sm:$0xff] %v393_v25  ;;  %v397_v27 = vld [vmem:[%s2677_s6 + $0x1b0] sm:$0xff] }
  0x29   : > { %396 = vst [vmem:[%s2685_s7 + $0xd0] sm:$0xff] %v395_v26  ;;  %v399_v28 = vld [vmem:[%s2677_s6 + $0x1c0] sm:$0xff]  ;;  %v401_v29 = vld [vmem:[%s2677_s6 + $0x1d0] sm:$0xff]  ;;  %398 = vst [vmem:[%s2685_s7 + $0xd8] sm:$0xff] %v397_v27 }
  0x2a   : > { %400 = vst [vmem:[%s2685_s7 + $0xe0] sm:$0xff] %v399_v28  ;;  %402 = vst [vmem:[%s2685_s7 + $0xe8] sm:$0xff] %v401_v29  ;;  %v403_v30 = vld [vmem:[%s2677_s6 + $0x1e0] sm:$0xff]  ;;  %v405_v31 = vld [vmem:[%s2677_s6 + $0x1f0] sm:$0xff] }
  0x2b   : > { %v407_v32 = vld [vmem:[%s2677_s6 + $0x200] sm:$0xff]  ;;  %404 = vst [vmem:[%s2685_s7 + $0xf0] sm:$0xff] %v403_v30  ;;  %406 = vst [vmem:[%s2685_s7 + $0xf8] sm:$0xff] %v405_v31  ;;  %v409_v33 = vld [vmem:[%s2677_s6 + $0x210] sm:$0xff] }
  0x2c   : > { %408 = vst [vmem:[%s2685_s7 + $0x100] sm:$0xff] %v407_v32  ;;  %v411_v34 = vld [vmem:[%s2677_s6 + $0x220] sm:$0xff]  ;;  %v413_v35 = vld [vmem:[%s2677_s6 + $0x230] sm:$0xff]  ;;  %410 = vst [vmem:[%s2685_s7 + $0x108] sm:$0xff] %v409_v33 }
  0x2d   : > { %412 = vst [vmem:[%s2685_s7 + $0x110] sm:$0xff] %v411_v34  ;;  %414 = vst [vmem:[%s2685_s7 + $0x118] sm:$0xff] %v413_v35  ;;  %v415_v36 = vld [vmem:[%s2677_s6 + $0x240] sm:$0xff]  ;;  %v417_v37 = vld [vmem:[%s2677_s6 + $0x250] sm:$0xff] }
  0x2e   : > { %v419_v38 = vld [vmem:[%s2677_s6 + $0x260] sm:$0xff]  ;;  %416 = vst [vmem:[%s2685_s7 + $0x120] sm:$0xff] %v415_v36  ;;  %418 = vst [vmem:[%s2685_s7 + $0x128] sm:$0xff] %v417_v37  ;;  %v421_v39 = vld [vmem:[%s2677_s6 + $0x270] sm:$0xff] }
  0x2f   : > { %420 = vst [vmem:[%s2685_s7 + $0x130] sm:$0xff] %v419_v38  ;;  %v423_v40 = vld [vmem:[%s2677_s6 + $0x280] sm:$0xff]  ;;  %v425_v41 = vld [vmem:[%s2677_s6 + $0x290] sm:$0xff]  ;;  %422 = vst [vmem:[%s2685_s7 + $0x138] sm:$0xff] %v421_v39 }
  0x30   : > { %424 = vst [vmem:[%s2685_s7 + $0x140] sm:$0xff] %v423_v40  ;;  %426 = vst [vmem:[%s2685_s7 + $0x148] sm:$0xff] %v425_v41  ;;  %v427_v42 = vld [vmem:[%s2677_s6 + $0x2a0] sm:$0xff]  ;;  %v429_v43 = vld [vmem:[%s2677_s6 + $0x2b0] sm:$0xff] }
  0x31   : > { %v431_v44 = vld [vmem:[%s2677_s6 + $0x2c0] sm:$0xff]  ;;  %428 = vst [vmem:[%s2685_s7 + $0x150] sm:$0xff] %v427_v42  ;;  %430 = vst [vmem:[%s2685_s7 + $0x158] sm:$0xff] %v429_v43  ;;  %v433_v45 = vld [vmem:[%s2677_s6 + $0x2d0] sm:$0xff] }
  0x32   : > { %432 = vst [vmem:[%s2685_s7 + $0x160] sm:$0xff] %v431_v44  ;;  %v435_v46 = vld [vmem:[%s2677_s6 + $0x2e0] sm:$0xff]  ;;  %v437_v47 = vld [vmem:[%s2677_s6 + $0x2f0] sm:$0xff]  ;;  %434 = vst [vmem:[%s2685_s7 + $0x168] sm:$0xff] %v433_v45 }
  0x33   : > { %436 = vst [vmem:[%s2685_s7 + $0x170] sm:$0xff] %v435_v46  ;;  %438 = vst [vmem:[%s2685_s7 + $0x178] sm:$0xff] %v437_v47  ;;  %v439_v48 = vld [vmem:[%s2677_s6 + $0x300] sm:$0xff]  ;;  %v441_v49 = vld [vmem:[%s2677_s6 + $0x310] sm:$0xff] }
  0x34   : > { %v443_v50 = vld [vmem:[%s2677_s6 + $0x320] sm:$0xff]  ;;  %440 = vst [vmem:[%s2685_s7 + $0x180] sm:$0xff] %v439_v48  ;;  %442 = vst [vmem:[%s2685_s7 + $0x188] sm:$0xff] %v441_v49  ;;  %v445_v51 = vld [vmem:[%s2677_s6 + $0x330] sm:$0xff] }
  0x35   : > { %444 = vst [vmem:[%s2685_s7 + $0x190] sm:$0xff] %v443_v50  ;;  %v447_v52 = vld [vmem:[%s2677_s6 + $0x340] sm:$0xff]  ;;  %v449_v53 = vld [vmem:[%s2677_s6 + $0x350] sm:$0xff]  ;;  %446 = vst [vmem:[%s2685_s7 + $0x198] sm:$0xff] %v445_v51 }
  0x36   : > { %448 = vst [vmem:[%s2685_s7 + $0x1a0] sm:$0xff] %v447_v52  ;;  %450 = vst [vmem:[%s2685_s7 + $0x1a8] sm:$0xff] %v449_v53  ;;  %v451_v54 = vld [vmem:[%s2677_s6 + $0x360] sm:$0xff]  ;;  %v453_v55 = vld [vmem:[%s2677_s6 + $0x370] sm:$0xff] }
  0x37   : > { %v455_v56 = vld [vmem:[%s2677_s6 + $0x380] sm:$0xff]  ;;  %452 = vst [vmem:[%s2685_s7 + $0x1b0] sm:$0xff] %v451_v54  ;;  %454 = vst [vmem:[%s2685_s7 + $0x1b8] sm:$0xff] %v453_v55  ;;  %v457_v57 = vld [vmem:[%s2677_s6 + $0x390] sm:$0xff] }
  0x38   : > { %456 = vst [vmem:[%s2685_s7 + $0x1c0] sm:$0xff] %v455_v56  ;;  %v459_v58 = vld [vmem:[%s2677_s6 + $0x3a0] sm:$0xff]  ;;  %v461_v59 = vld [vmem:[%s2677_s6 + $0x3b0] sm:$0xff]  ;;  %458 = vst [vmem:[%s2685_s7 + $0x1c8] sm:$0xff] %v457_v57 }
  0x39   : > { %460 = vst [vmem:[%s2685_s7 + $0x1d0] sm:$0xff] %v459_v58  ;;  %462 = vst [vmem:[%s2685_s7 + $0x1d8] sm:$0xff] %v461_v59  ;;  %v463_v60 = vld [vmem:[%s2677_s6 + $0x3c0] sm:$0xff]  ;;  %v465_v61 = vld [vmem:[%s2677_s6 + $0x3d0] sm:$0xff] }
  0x3a   : > { %v467_v62 = vld [vmem:[%s2677_s6 + $0x3e0] sm:$0xff]  ;;  %464 = vst [vmem:[%s2685_s7 + $0x1e0] sm:$0xff] %v463_v60  ;;  %466 = vst [vmem:[%s2685_s7 + $0x1e8] sm:$0xff] %v465_v61  ;;  %v469_v63 = vld [vmem:[%s2677_s6 + $0x3f0] sm:$0xff] }
  0x3b   : > { %468 = vst [vmem:[%s2685_s7 + $0x1f0] sm:$0xff] %v467_v62  ;;  %v471_v0 = vld [vmem:[%s2677_s6 + $0x400] sm:$0xff]  ;;  %v473_v1 = vld [vmem:[%s2677_s6 + $0x410] sm:$0xff]  ;;  %470 = vst [vmem:[%s2685_s7 + $0x1f8] sm:$0xff] %v469_v63 }
  0x3c   : > { %472 = vst [vmem:[%s2685_s7 + $0x200] sm:$0xff] %v471_v0  ;;  %474 = vst [vmem:[%s2685_s7 + $0x208] sm:$0xff] %v473_v1  ;;  %v475_v2 = vld [vmem:[%s2677_s6 + $0x420] sm:$0xff]  ;;  %v477_v3 = vld [vmem:[%s2677_s6 + $0x430] sm:$0xff] }
  0x3d   : > { %v479_v4 = vld [vmem:[%s2677_s6 + $0x440] sm:$0xff]  ;;  %476 = vst [vmem:[%s2685_s7 + $0x210] sm:$0xff] %v475_v2  ;;  %478 = vst [vmem:[%s2685_s7 + $0x218] sm:$0xff] %v477_v3  ;;  %v481_v5 = vld [vmem:[%s2677_s6 + $0x450] sm:$0xff] }
  0x3e   : > { %480 = vst [vmem:[%s2685_s7 + $0x220] sm:$0xff] %v479_v4  ;;  %v483_v6 = vld [vmem:[%s2677_s6 + $0x460] sm:$0xff]  ;;  %v485_v7 = vld [vmem:[%s2677_s6 + $0x470] sm:$0xff]  ;;  %482 = vst [vmem:[%s2685_s7 + $0x228] sm:$0xff] %v481_v5 }
  0x3f   : > { %484 = vst [vmem:[%s2685_s7 + $0x230] sm:$0xff] %v483_v6  ;;  %486 = vst [vmem:[%s2685_s7 + $0x238] sm:$0xff] %v485_v7  ;;  %v487_v8 = vld [vmem:[%s2677_s6 + $0x480] sm:$0xff]  ;;  %v489_v9 = vld [vmem:[%s2677_s6 + $0x490] sm:$0xff] }
  0x40   : > { %v491_v10 = vld [vmem:[%s2677_s6 + $0x4a0] sm:$0xff]  ;;  %488 = vst [vmem:[%s2685_s7 + $0x240] sm:$0xff] %v487_v8  ;;  %490 = vst [vmem:[%s2685_s7 + $0x248] sm:$0xff] %v489_v9  ;;  %v493_v11 = vld [vmem:[%s2677_s6 + $0x4b0] sm:$0xff] }
  0x41   : > { %492 = vst [vmem:[%s2685_s7 + $0x250] sm:$0xff] %v491_v10  ;;  %v495_v12 = vld [vmem:[%s2677_s6 + $0x4c0] sm:$0xff]  ;;  %v497_v13 = vld [vmem:[%s2677_s6 + $0x4d0] sm:$0xff]  ;;  %494 = vst [vmem:[%s2685_s7 + $0x258] sm:$0xff] %v493_v11 }
  0x42   : > { %496 = vst [vmem:[%s2685_s7 + $0x260] sm:$0xff] %v495_v12  ;;  %498 = vst [vmem:[%s2685_s7 + $0x268] sm:$0xff] %v497_v13  ;;  %v499_v14 = vld [vmem:[%s2677_s6 + $0x4e0] sm:$0xff]  ;;  %v501_v15 = vld [vmem:[%s2677_s6 + $0x4f0] sm:$0xff] }
  0x43   : > { %500 = vst [vmem:[%s2685_s7 + $0x270] sm:$0xff] %v499_v14  ;;  %502 = vst [vmem:[%s2685_s7 + $0x278] sm:$0xff] %v501_v15 }
  0x44 PF: > { %p2028_p11 = scmp.ge.s32.totalorder %s2579_s17, 1  ;;  %p507_p12 = scmp.lt.s32.totalorder %s2579_s17, 9 }
  0x46   : > { %p508_p13 = pnand %p2028_p11, %p507_p12 }
  0x47   : > { %s514_s8 = sand.u32 (!%p508_p13), 1, %s2555_s11   ;;  %s2030_s11 = sshll.u32 (!%p508_p13), %s2567_s14, 4 }
  0x48   : > { %511 = sbr.rel (%p508_p13) target bundleno = 456 (0x1c8), region = 62  ;;  %p546_p0 = scmp.lt.s32.totalorder (!%p508_p13), %s2030_s11, 63 }
  0x49   : > { %s2258_s18 = smul.u32 (!%p508_p13), 640, %s514_s8  ;;  %s541_s29 = sand.u32 (!%p508_p13), 1, %s2547_s9  }
  0x4a   : > { %s2029_s30 = sshll.u32 (!%p508_p13), %s541_s29, 8 }
  0x4b   : > { %s2844_s21 = scalar_lea.vmem (!%p508_p13), [#allocation3], %s2258_s18  ;;  %s3109_s3 = scalar_lea.vmem (!%p508_p13), [#allocation4], %s2029_s30 }
  0x4c   : > { %v2333_v16 = vld [vmem:[%s2844_s21 + $0x4] ss:$8 sps:$4 sm:$0xff] (!%p508_p13)   ;;  %v2337_v18 = vld [vmem:[%s2844_s21] ss:$8 sps:$4 sm:$0xff] (!%p508_p13)   ;;  %v2339_v20 = vld [vmem:[%s2844_s21 + $0x14] ss:$8 sps:$4 sm:$0xff] (!%p508_p13)  }
  0x4d   : > { %v2848_v17 = vld [vmem:[%s2844_s21 + $0x104] ss:$8 sps:$4 sm:$0xff] (!%p508_p13)   ;;  %1365 = vmatprep.subr.bf16.mxu1 (!%p508_p13), %v2333_v16  ;;  %v2852_v19 = vld [vmem:[%s2844_s21 + $0x100] ss:$8 sps:$4 sm:$0xff] (!%p508_p13)   ;;  %v2858_v21 = vld [vmem:[%s2844_s21 + $0x114] ss:$8 sps:$4 sm:$0xff] (!%p508_p13)  }
  0x4e   : > { %1478 = vmatprep.subr.bf16.mxu0 (!%p508_p13), %v2848_v17  ;;  %1366 = vmatpush1.bf16.msra.mxu1 (!%p508_p13), %v2337_v18  ;;  %v2343_v22 = vld [vmem:[%s2844_s21 + $0x10] ss:$8 sps:$4 sm:$0xff] (!%p508_p13)   ;;  %v2345_v24 = vld [vmem:[%s2844_s21 + $0x24] ss:$8 sps:$4 sm:$0xff] (!%p508_p13)   ;;  %v2349_v26 = vld [vmem:[%s2844_s21 + $0x20] ss:$8 sps:$4 sm:$0xff] (!%p508_p13)  }
  0x4f   : > { %1479 = vmatpush1.bf16.msra.mxu0 %v2852_v19  ;;  %1367 = vmatprep.subr.bf16.mxu1 %v2339_v20  ;;  %v2862_v23 = vld [vmem:[%s2844_s21 + $0x110] ss:$8 sps:$4 sm:$0xff]   ;;  %v2867_v25 = vld [vmem:[%s2844_s21 + $0x124] ss:$8 sps:$4 sm:$0xff]   ;;  %v2871_v27 = vld [vmem:[%s2844_s21 + $0x120] ss:$8 sps:$4 sm:$0xff]  }
  0x50   : > { %1480 = vmatprep.subr.bf16.mxu0 %v2858_v21  ;;  %v2351_v28 = vld [vmem:[%s2844_s21 + $0x34] ss:$8 sps:$4 sm:$0xff]   ;;  %v2355_v30 = vld [vmem:[%s2844_s21 + $0x30] ss:$8 sps:$4 sm:$0xff]   ;;  %v2357_v32 = vld [vmem:[%s2844_s21 + $0x44] ss:$8 sps:$4 sm:$0xff]  }
  0x51   : > { %v2877_v29 = vld [vmem:[%s2844_s21 + $0x134] ss:$8 sps:$4 sm:$0xff]   ;;  %v2882_v31 = vld [vmem:[%s2844_s21 + $0x130] ss:$8 sps:$4 sm:$0xff]   ;;  %v2887_v33 = vld [vmem:[%s2844_s21 + $0x144] ss:$8 sps:$4 sm:$0xff]  }
  0x52   : > { %1368 = vmatpush1.bf16.msra.mxu1 %v2343_v22  ;;  %v2361_v34 = vld [vmem:[%s2844_s21 + $0x40] ss:$8 sps:$4 sm:$0xff]   ;;  %v2363_v36 = vld [vmem:[%s2844_s21 + $0x54] ss:$8 sps:$4 sm:$0xff]   ;;  %v2367_v38 = vld [vmem:[%s2844_s21 + $0x50] ss:$8 sps:$4 sm:$0xff]  }
  0x53   : > { %1481 = vmatpush1.bf16.msra.mxu0 %v2862_v23  ;;  %1369 = vmatprep.subr.bf16.mxu1 %v2345_v24  ;;  %v2891_v35 = vld [vmem:[%s2844_s21 + $0x140] ss:$8 sps:$4 sm:$0xff]   ;;  %v2897_v37 = vld [vmem:[%s2844_s21 + $0x154] ss:$8 sps:$4 sm:$0xff]   ;;  %v2902_v39 = vld [vmem:[%s2844_s21 + $0x150] ss:$8 sps:$4 sm:$0xff]  }
  0x54   : > { %1482 = vmatprep.subr.bf16.mxu0 %v2867_v25  ;;  %v2369_v40 = vld [vmem:[%s2844_s21 + $0x64] ss:$8 sps:$4 sm:$0xff]   ;;  %v2373_v42 = vld [vmem:[%s2844_s21 + $0x60] ss:$8 sps:$4 sm:$0xff]   ;;  %v2375_v44 = vld [vmem:[%s2844_s21 + $0x74] ss:$8 sps:$4 sm:$0xff]  }
  0x55   : > { %v2907_v41 = vld [vmem:[%s2844_s21 + $0x164] ss:$8 sps:$4 sm:$0xff]   ;;  %v2911_v43 = vld [vmem:[%s2844_s21 + $0x160] ss:$8 sps:$4 sm:$0xff]   ;;  %v2917_v45 = vld [vmem:[%s2844_s21 + $0x174] ss:$8 sps:$4 sm:$0xff]  }
  0x56   : > { %1370 = vmatpush1.bf16.msra.mxu1 %v2349_v26  ;;  %v2379_v46 = vld [vmem:[%s2844_s21 + $0x70] ss:$8 sps:$4 sm:$0xff]   ;;  %v2381_v48 = vld [vmem:[%s2844_s21 + $0x84] ss:$8 sps:$4 sm:$0xff]   ;;  %v2385_v50 = vld [vmem:[%s2844_s21 + $0x80] ss:$8 sps:$4 sm:$0xff]  }
  0x57   : > { %1483 = vmatpush1.bf16.msra.mxu0 %v2871_v27  ;;  %1371 = vmatprep.subr.bf16.mxu1 %v2351_v28  ;;  %v2923_v47 = vld [vmem:[%s2844_s21 + $0x170] ss:$8 sps:$4 sm:$0xff]   ;;  %v2928_v49 = vld [vmem:[%s2844_s21 + $0x184] ss:$8 sps:$4 sm:$0xff]   ;;  %v2932_v51 = vld [vmem:[%s2844_s21 + $0x180] ss:$8 sps:$4 sm:$0xff]  }
  0x58   : > { %1484 = vmatprep.subr.bf16.mxu0 %v2877_v29  ;;  %v2387_v52 = vld [vmem:[%s2844_s21 + $0x94] ss:$8 sps:$4 sm:$0xff]   ;;  %s3262_s11 = smov (!%p546_p0, %s2030_s11), 63  ;;  %v2391_v54 = vld [vmem:[%s2844_s21 + $0x90] ss:$8 sps:$4 sm:$0xff]   ;;  %s2154_s9 = sshll.u32 (%p2664_p9), %s2563_s13, 1 }
  0x59   : > { %v2938_v53 = vld [vmem:[%s2844_s21 + $0x194] ss:$8 sps:$4 sm:$0xff]   ;;  %v2943_v55 = vld [vmem:[%s2844_s21 + $0x190] ss:$8 sps:$4 sm:$0xff]   ;;  %v2393_v56 = vld [vmem:[%s2844_s21 + $0xa4] ss:$8 sps:$4 sm:$0xff]  }
  0x5a   : > { %1372 = vmatpush1.bf16.msra.mxu1 %v2355_v30  ;;  %s2259_s22 = smul.u32 20, %s3262_s11  ;;  %v2948_v57 = vld [vmem:[%s2844_s21 + $0x1a4] ss:$8 sps:$4 sm:$0xff]   ;;  %v2397_v58 = vld [vmem:[%s2844_s21 + $0xa0] ss:$8 sps:$4 sm:$0xff]   ;;  %s2160_s4 = sshll.u32 (%p2664_p9), %s2567_s14, 6 }
  0x5b   : > { %1485 = vmatpush1.bf16.msra.mxu0 %v2882_v31  ;;  %1373 = vmatprep.subr.bf16.mxu1 %v2357_v32  ;;  %v2952_v59 = vld [vmem:[%s2844_s21 + $0x1a0] ss:$8 sps:$4 sm:$0xff]   ;;  %v2399_v60 = vld [vmem:[%s2844_s21 + $0xb4] ss:$8 sps:$4 sm:$0xff]   ;;  %v2403_v62 = vld [vmem:[%s2844_s21 + $0xb0] ss:$8 sps:$4 sm:$0xff]   ;;  %s1845_s27 = sadd.s32 (%p2664_p9), %s2160_s4, %s2154_s9 }
  0x5c   : > { %1486 = vmatprep.subr.bf16.mxu0 %v2887_v33  ;;  %s2959_s26 = scalar_lea.vmem %s3243_s0, %s2259_s22  ;;  %v2963_v61 = vld [vmem:[%s2844_s21 + $0x1b4] ss:$8 sps:$4 sm:$0xff]   ;;  %v2967_v63 = vld [vmem:[%s2844_s21 + $0x1b0] ss:$8 sps:$4 sm:$0xff]   ;;  %v2405_v0 = vld [vmem:[%s2844_s21 + $0xc4] ss:$8 sps:$4 sm:$0xff]  }
  0x5d   : > { %v2431_v1 = vld [vmem:[%s2959_s26 + $0x4] ss:$20 sps:$4 sm:$0xff]   ;;  %v2434_v3 = vld [vmem:[%s2959_s26 + $0xc] ss:$20 sps:$4 sm:$0xff]   ;;  %v2411_v6 = vld [vmem:[%s2844_s21 + $0xd4] ss:$8 sps:$4 sm:$0xff]  }
  0x5e   : > { %1374 = vmatpush1.bf16.msra.mxu1 %v2361_v34  ;;  %v2973_v2 = vld [vmem:[%s2844_s21 + $0x1c4] ss:$8 sps:$4 sm:$0xff]   ;;  %1397 = vmatprep.mubr.bf16.mxu1 %v2431_v1  ;;  %v2409_v4 = vld [vmem:[%s2844_s21 + $0xc0] ss:$8 sps:$4 sm:$0xff]   ;;  %v2985_v7 = vld [vmem:[%s2844_s21 + $0x1d4] ss:$8 sps:$4 sm:$0xff]  }
  0x5f   : > { %1487 = vmatpush1.bf16.msra.mxu0 %v2891_v35  ;;  %1375 = vmatprep.subr.bf16.mxu1 %v2363_v36  ;;  %v2979_v5 = vld [vmem:[%s2844_s21 + $0x1c0] ss:$8 sps:$4 sm:$0xff]   ;;  %v2415_v8 = vld [vmem:[%s2844_s21 + $0xd0] ss:$8 sps:$4 sm:$0xff]   ;;  %v2417_v10 = vld [vmem:[%s2844_s21 + $0xe4] ss:$8 sps:$4 sm:$0xff]  }
  0x60   : > { %1488 = vmatprep.subr.bf16.mxu0 %v2897_v37  ;;  %1510 = vmatprep.mubr.bf16.mxu0 %v2434_v3  ;;  %v2989_v9 = vld [vmem:[%s2844_s21 + $0x1d0] ss:$8 sps:$4 sm:$0xff]   ;;  %v2995_v11 = vld [vmem:[%s2844_s21 + $0x1e4] ss:$8 sps:$4 sm:$0xff]   ;;  %v2421_v12 = vld [vmem:[%s2844_s21 + $0xe0] ss:$8 sps:$4 sm:$0xff]  }
  0x61   : > { %v2999_v13 = vld [vmem:[%s2844_s21 + $0x1e0] ss:$8 sps:$4 sm:$0xff]   ;;  %v2423_v14 = vld [vmem:[%s2844_s21 + $0xf4] ss:$8 sps:$4 sm:$0xff]   ;;  %v2427_v16 = vld [vmem:[%s2844_s21 + $0xf0] ss:$8 sps:$4 sm:$0xff]  }
  0x62   : > { %1376 = vmatpush1.bf16.msra.mxu1 %v2367_v38  ;;  %v3005_v15 = vld [vmem:[%s2844_s21 + $0x1f4] ss:$8 sps:$4 sm:$0xff]   ;;  %v3010_v18 = vld [vmem:[%s2844_s21 + $0x1f0] ss:$8 sps:$4 sm:$0xff]   ;;  %v2437_v20 = vld [vmem:[%s2844_s21 + $0x204] ss:$8 sps:$4 sm:$0xff]  }
  0x63   : > { %1489 = vmatpush1.bf16.msra.mxu0 %v2902_v39  ;;  %1377 = vmatprep.subr.bf16.mxu1 %v2369_v40  ;;  %v2429_v22 = vld [vmem:[%s2959_s26] ss:$20 sps:$4 sm:$0xff]   ;;  %v2432_v24 = vld [vmem:[%s2959_s26 + $0x8] ss:$20 sps:$4 sm:$0xff]   ;;  %v2438_v34 = vld [vmem:[%s2844_s21 + $0x210] ss:$8 sps:$4 sm:$0xff]  }
  0x64   : > { %1490 = vmatprep.subr.bf16.mxu0 %v2907_v41  ;;  %v2435_v26 = vld [vmem:[%s2844_s21 + $0x200] ss:$8 sps:$4 sm:$0xff]   ;;  %v2440_v28 = vld [vmem:[%s2844_s21 + $0x214] ss:$8 sps:$4 sm:$0xff]   ;;  %v2449_v36 = vld [vmem:[%s2844_s21 + $0x224] ss:$8 sps:$4 sm:$0xff]  }
  0x65   : > { %v2441_v30 = vld [vmem:[%s2959_s26 + $0x2c] ss:$20 sps:$4 sm:$0xff]   ;;  %v2443_v32 = vld [vmem:[%s2959_s26 + $0x34] ss:$20 sps:$4 sm:$0xff]   ;;  %v2446_v38 = vld [vmem:[%s2959_s26 + $0x30] ss:$20 sps:$4 sm:$0xff]  }
  0x66   : > { %1378 = vmatpush1.bf16.msra.mxu1 %v2373_v42  ;;  %v2447_v40 = vld [vmem:[%s2844_s21 + $0x220] ss:$8 sps:$4 sm:$0xff]   ;;  %v2499_v1 = vld [vmem:[%s2959_s26 + $0xd0] ss:$20 sps:$4 sm:$0xff]   ;;  %s2156_s5 = sshll.u32 (%p2664_p9), %s1845_s27, 3 }
  0x67   : > { %1491 = vmatpush1.bf16.msra.mxu0 %v2911_v43  ;;  %1379 = vmatprep.subr.bf16.mxu1 %v2375_v44  ;;  %v2453_v42 = vld [vmem:[%s2959_s26 + $0x54] ss:$20 sps:$4 sm:$0xff]   ;;  %v2461_v44 = vld [vmem:[%s2844_s21 + $0x244] ss:$8 sps:$4 sm:$0xff]   ;;  %v2501_v3 = vld [vmem:[%s2959_s26 + $0xfc] ss:$20 sps:$4 sm:$0xff]   ;;  %s3159_s8 = scalar_lea.vmem (%p2664_p9), %s3245_s2, %s2156_s5 }
  0x68   : > { %1492 = vmatprep.subr.bf16.mxu0 %v2917_v45 }
  0x6a   : > { %1380 = vmatpush1.bf16.msra.mxu1 %v2379_v46  ;;  %v2458_v46 = vld [vmem:[%s2959_s26 + $0x58] ss:$20 sps:$4 sm:$0xff]  }
  0x6b   : > { %1493 = vmatpush1.bf16.msra.mxu0 %v2923_v47  ;;  %1381 = vmatprep.subr.bf16.mxu1 %v2381_v48  ;;  %v2459_v48 = vld [vmem:[%s2844_s21 + $0x240] ss:$8 sps:$4 sm:$0xff]  }
  0x6c   : > { %1494 = vmatprep.subr.bf16.mxu0 %v2928_v49 }
  0x6e   : > { %1382 = vmatpush1.bf16.msra.mxu1 %v2385_v50  ;;  %v2465_v50 = vld [vmem:[%s2959_s26 + $0x7c] ss:$20 sps:$4 sm:$0xff]  }
  0x6f   : > { %1495 = vmatpush1.bf16.msra.mxu0 %v2932_v51  ;;  %1383 = vmatprep.subr.bf16.mxu1 %v2387_v52  ;;  %v2462_v52 = vld [vmem:[%s2844_s21 + $0x250] ss:$8 sps:$4 sm:$0xff]  }
  0x70   : > { %1496 = vmatprep.subr.bf16.mxu0 %v2938_v53 }
  0x72   : > { %1384 = vmatpush1.bf16.msra.mxu1 %v2391_v54  ;;  %v2470_v54 = vld [vmem:[%s2959_s26 + $0x80] ss:$20 sps:$4 sm:$0xff]  }
  0x73   : > { %1497 = vmatpush1.bf16.msra.mxu0 %v2943_v55  ;;  %1385 = vmatprep.subr.bf16.mxu1 %v2393_v56  ;;  %v2471_v56 = vld [vmem:[%s2844_s21 + $0x260] ss:$8 sps:$4 sm:$0xff]  }
  0x74   : > { %1498 = vmatprep.subr.bf16.mxu0 %v2948_v57 }
  0x76   : > { %1386 = vmatpush1.bf16.msra.mxu1 %v2397_v58  ;;  %v2477_v58 = vld [vmem:[%s2959_s26 + $0xa4] ss:$20 sps:$4 sm:$0xff]  }
  0x77   : > { %1499 = vmatpush1.bf16.msra.mxu0 %v2952_v59  ;;  %1387 = vmatprep.subr.bf16.mxu1 %v2399_v60  ;;  %v2480_v60 = vld [vmem:[%s2959_s26 + $0x10] ss:$20 sps:$4 sm:$0xff]  }
  0x78   : > { %1500 = vmatprep.subr.bf16.mxu0 %v2963_v61 }
  0x7a   : > { %1388 = vmatpush1.bf16.msra.mxu1 %v2403_v62  ;;  %v2481_v62 = vld [vmem:[%s2959_s26 + $0xcc] ss:$20 sps:$4 sm:$0xff]  }
  0x7b   : > { %1501 = vmatpush1.bf16.msra.mxu0 %v2967_v63  ;;  %1389 = vmatprep.subr.bf16.mxu1 %v2405_v0  ;;  %v2497_v0 = vld [vmem:[%s2959_s26 + $0xd4] ss:$20 sps:$4 sm:$0xff]  }
  0x7c   : > { %1502 = vmatprep.subr.bf16.mxu0 %v2973_v2 }
  0x7e   : > { %1390 = vmatpush1.bf16.msra.mxu1 %v2409_v4  ;;  %v2503_v4 = vld [vmem:[%s2959_s26 + $0xf8] ss:$20 sps:$4 sm:$0xff]  }
  0x7f   : > { %1503 = vmatpush1.bf16.msra.mxu0 %v2979_v5  ;;  %1391 = vmatprep.subr.bf16.mxu1 %v2411_v6  ;;  %v2505_v6 = vld [vmem:[%s2959_s26 + $0x124] ss:$20 sps:$4 sm:$0xff]  }
  0x80   : > { %1504 = vmatprep.subr.bf16.mxu0 %v2985_v7 }
  0x82   : > { %1392 = vmatpush1.bf16.msra.mxu1 %v2415_v8  ;;  %v2508_v8 = vld [vmem:[%s2959_s26 + $0x128] ss:$20 sps:$4 sm:$0xff]  }
  0x83   : > { %1505 = vmatpush1.bf16.msra.mxu0 %v2989_v9  ;;  %1393 = vmatprep.subr.bf16.mxu1 %v2417_v10 }
  0x84   : > { %1506 = vmatprep.subr.bf16.mxu0 %v2995_v11 }
  0x86   : > { %1394 = vmatpush1.bf16.msra.mxu1 %v2421_v12 }
  0x87   : > { %1507 = vmatpush1.bf16.msra.mxu0 %v2999_v13  ;;  %1395 = vmatprep.subr.bf16.mxu1 %v2423_v14 }
  0x88   : > { %1508 = vmatprep.subr.bf16.mxu0 %v3005_v15 }
  0x8a   : > { %1396 = vmatpush1.bf16.msra.mxu1 %v2427_v16 }
  0x8b   : > { %1509 = vmatpush1.bf16.msra.mxu0 %v3010_v18  ;;  %2161 = vmatprep.subr.bf16.mxu1 %v2848_v17  ;;  %v2445_v17 = vld [vmem:[%s2959_s26 + $0x28] ss:$20 sps:$4 sm:$0xff]  }
  0x8c   : > { %1591 = vmatprep.subr.bf16.mxu0 %v2437_v20 }
  0x8d   : > { %1398 = vmatmul.mubr.bf16.vlgmr.msra.gmra.mrb[0].mxu1 %v2429_v22 }
  0x8e   : > { %1511 = vmatmul.mubr.bf16.vlgmr.msra.gmra.mrb[0].mxu0 %v2432_v24  ;;  %2177 = vmatpush1.bf16.msra.mxu1 %v2852_v19  ;;  %v2452_v19 = vld [vmem:[%s2844_s21 + $0x234] ss:$8 sps:$4 sm:$0xff]  }
  0x8f   : > { %1592 = vmatpush1.bf16.msra.mxu0 %v2435_v26  ;;  %2162 = vmatprep.subr.bf16.mxu1 %v2858_v21  ;;  %v2455_v21 = vld [vmem:[%s2959_s26 + $0x5c] ss:$20 sps:$4 sm:$0xff]  }
  0x90   : > { %1593 = vmatprep.subr.bf16.mxu0 %v2440_v28  ;;  %1407 = vmatprep.mubr.bf16.mxu1 %v2441_v30 }
  0x91   : > { %1520 = vmatprep.mubr.bf16.mxu0 %v2443_v32 }
  0x92   : > { %2178 = vmatpush1.bf16.msra.mxu1 %v2862_v23  ;;  %v2450_v23 = vld [vmem:[%s2844_s21 + $0x230] ss:$8 sps:$4 sm:$0xff]  }
  0x93   : > { %1594 = vmatpush1.bf16.msra.mxu0 %v2438_v34  ;;  %2163 = vmatprep.subr.bf16.mxu1 %v2867_v25  ;;  %v2457_v25 = vld [vmem:[%s2959_s26 + $0x50] ss:$20 sps:$4 sm:$0xff]  }
  0x94   : > { %1595 = vmatprep.subr.bf16.mxu0 %v2449_v36 }
  0x95   : > { %1408 = vmatmul.mubr.bf16.gmra.mrb[4].mxu1 %v2445_v17 }
  0x96   : > { %1521 = vmatmul.mubr.bf16.gmra.mrb[4].mxu0 %v2446_v38  ;;  %2179 = vmatpush1.bf16.msra.mxu1 %v2871_v27  ;;  %v2464_v27 = vld [vmem:[%s2844_s21 + $0x254] ss:$8 sps:$4 sm:$0xff]  }
  0x97   : > { %1596 = vmatpush1.bf16.msra.mxu0 %v2447_v40  ;;  %2164 = vmatprep.subr.bf16.mxu1 %v2877_v29  ;;  %v2467_v29 = vld [vmem:[%s2959_s26 + $0x84] ss:$20 sps:$4 sm:$0xff]  }
  0x98   : > { %1597 = vmatprep.subr.bf16.mxu0 %v2452_v19  ;;  %1417 = vmatprep.mubr.bf16.mxu1 %v2453_v42 }
  0x99   : > { %1530 = vmatprep.mubr.bf16.mxu0 %v2455_v21 }
  0x9a   : > { %2180 = vmatpush1.bf16.msra.mxu1 %v2882_v31  ;;  %v2473_v31 = vld [vmem:[%s2844_s21 + $0x264] ss:$8 sps:$4 sm:$0xff]  }
  0x9b   : > { %1598 = vmatpush1.bf16.msra.mxu0 %v2450_v23  ;;  %2165 = vmatprep.subr.bf16.mxu1 %v2887_v33  ;;  %v2469_v33 = vld [vmem:[%s2959_s26 + $0x78] ss:$20 sps:$4 sm:$0xff]  }
  0x9c   : > { %1599 = vmatprep.subr.bf16.mxu0 %v2461_v44 }
  0x9d   : > { %1418 = vmatmul.mubr.bf16.gmra.mrb[8].mxu1 %v2457_v25 }
  0x9e   : > { %1531 = vmatmul.mubr.bf16.gmra.mrb[8].mxu0 %v2458_v46  ;;  %2181 = vmatpush1.bf16.msra.mxu1 %v2891_v35  ;;  %v2476_v35 = vld [vmem:[%s2844_s21 + $0x274] ss:$8 sps:$4 sm:$0xff]  }
  0x9f   : > { %1600 = vmatpush1.bf16.msra.mxu0 %v2459_v48  ;;  %2166 = vmatprep.subr.bf16.mxu1 %v2897_v37  ;;  %v2474_v37 = vld [vmem:[%s2844_s21 + $0x270] ss:$8 sps:$4 sm:$0xff]  }
  0xa0   : > { %1601 = vmatprep.subr.bf16.mxu0 %v2464_v27  ;;  %1427 = vmatprep.mubr.bf16.mxu1 %v2465_v50 }
  0xa1   : > { %1540 = vmatprep.mubr.bf16.mxu0 %v2467_v29 }
  0xa2   : > { %2182 = vmatpush1.bf16.msra.mxu1 %v2902_v39  ;;  %v2581_v39 = vmov 0  }
  0xa3   : > { %1602 = vmatpush1.bf16.msra.mxu0 %v2462_v52  ;;  %2167 = vmatprep.subr.bf16.mxu1 %v2907_v41  ;;  %v2479_v41 = vld [vmem:[%s2959_s26 + $0xa0] ss:$20 sps:$4 sm:$0xff]  }
  0xa4   : > { %1603 = vmatprep.subr.bf16.mxu0 %v2473_v31 }
  0xa5   : > { %1428 = vmatmul.mubr.bf16.gmra.mrb[12].mxu1 %v2469_v33 }
  0xa6   : > { %1541 = vmatmul.mubr.bf16.gmra.mrb[12].mxu0 %v2470_v54  ;;  %2183 = vmatpush1.bf16.msra.mxu1 %v2911_v43  ;;  %v2483_v43 = vld [vmem:[%s2959_s26 + $0xc8] ss:$20 sps:$4 sm:$0xff]  }
  0xa7   : > { %1604 = vmatpush1.bf16.msra.mxu0 %v2471_v56  ;;  %2168 = vmatprep.subr.bf16.mxu1 %v2917_v45  ;;  %v2484_v45 = vld [vmem:[%s2959_s26 + $0x38] ss:$20 sps:$4 sm:$0xff]  }
  0xa8   : > { %1605 = vmatprep.subr.bf16.mxu0 %v2476_v35  ;;  %1437 = vmatprep.mubr.bf16.mxu1 %v2477_v58 }
  0xa9   : > { %1623 = vmatprep.mubr.bf16.mxu0 %v2581_v39 }
  0xaa   : > { %2184 = vmatpush1.bf16.msra.mxu1 %v2923_v47  ;;  %v2485_v47 = vld [vmem:[%s2959_s26 + $0xf4] ss:$20 sps:$4 sm:$0xff]  }
  0xab   : > { %1606 = vmatpush1.bf16.msra.mxu0 %v2474_v37  ;;  %2169 = vmatprep.subr.bf16.mxu1 %v2928_v49  ;;  %v2487_v49 = vld [vmem:[%s2959_s26 + $0xf0] ss:$20 sps:$4 sm:$0xff]  }
  0xad   : > { %1438 = vmatmul.mubr.bf16.gmra.mrb[16].mxu1 %v2479_v41 }
  0xae   : > { %1624 = vmatmul.mubr.bf16.vlgmr.msra.gmra.mrb[0].mxu0 %v2480_v60  ;;  %2185 = vmatpush1.bf16.msra.mxu1 %v2932_v51  ;;  %v2488_v51 = vld [vmem:[%s2959_s26 + $0x60] ss:$20 sps:$4 sm:$0xff]  }
  0xaf   : > { %1447 = vmatprep.mubr.bf16.mxu1 %v2481_v62  ;;  %2170 = vmatprep.subr.bf16.mxu1 %v2938_v53  ;;  %v2489_v53 = vld [vmem:[%s2959_s26 + $0x11c] ss:$20 sps:$4 sm:$0xff]  }
  0xb0   : > { %1633 = vmatprep.mubr.bf16.mxu0 %v2581_v39 }
  0xb2   : > { %2186 = vmatpush1.bf16.msra.mxu1 %v2943_v55  ;;  %v2491_v55 = vld [vmem:[%s2959_s26 + $0x118] ss:$20 sps:$4 sm:$0xff]  }
  0xb3   : > { %2171 = vmatprep.subr.bf16.mxu1 %v2948_v57  ;;  %v2492_v57 = vld [vmem:[%s2959_s26 + $0x88] ss:$20 sps:$4 sm:$0xff]  }
  0xb5   : > { %1448 = vmatmul.mubr.bf16.gmra.mrb[20].mxu1 %v2483_v43 }
  0xb6   : > { %1634 = vmatmul.mubr.bf16.gmra.mrb[4].mxu0 %v2484_v45  ;;  %2187 = vmatpush1.bf16.msra.mxu1 %v2952_v59  ;;  %v2495_v59 = vld [vmem:[%s2959_s26 + $0xac] ss:$20 sps:$4 sm:$0xff]  }
  0xb7   : > { %1457 = vmatprep.mubr.bf16.mxu1 %v2485_v47  ;;  %2172 = vmatprep.subr.bf16.mxu1 %v2963_v61  ;;  %v2493_v61 = vld [vmem:[%s2959_s26 + $0xa8] ss:$20 sps:$4 sm:$0xff]  }
  0xb8   : > { %1643 = vmatprep.mubr.bf16.mxu0 %v2581_v39 }
  0xba   : > { %2188 = vmatpush1.bf16.msra.mxu1 %v2967_v63  ;;  %v2496_v63 = vld [vmem:[%s2959_s26 + $0xb0] ss:$20 sps:$4 sm:$0xff]  }
  0xbb   : > { %2173 = vmatprep.subr.bf16.mxu1 %v2973_v2  ;;  %v2500_v2 = vld [vmem:[%s2959_s26 + $0xd8] ss:$20 sps:$4 sm:$0xff]  }
  0xbd   : > { %1458 = vmatmul.mubr.bf16.gmra.mrb[24].mxu1 %v2487_v49 }
  0xbe   : > { %1644 = vmatmul.mubr.bf16.gmra.mrb[8].mxu0 %v2488_v51  ;;  %2189 = vmatpush1.bf16.msra.mxu1 %v2979_v5  ;;  %v2504_v5 = vld [vmem:[%s2959_s26 + $0x100] ss:$20 sps:$4 sm:$0xff]  }
  0xbf   : > { %1467 = vmatprep.mubr.bf16.mxu1 %v2489_v53  ;;  %2174 = vmatprep.subr.bf16.mxu1 %v2985_v7  ;;  %v2507_v7 = vld [vmem:[%s2959_s26 + $0x120] ss:$20 sps:$4 sm:$0xff]  }
  0xc0   : > { %1653 = vmatprep.mubr.bf16.mxu0 %v2581_v39 }
  0xc2   : > { %2190 = vmatpush1.bf16.msra.mxu1 %v2989_v9 }
  0xc3   : > { %2175 = vmatprep.subr.bf16.mxu1 %v2995_v11 }
  0xc5   : > { %1468 = vmatmul.mubr.bf16.gmra.mrb[28].mxu1 %v2491_v55 }
  0xc6   : > { %1654 = vmatmul.mubr.bf16.gmra.mrb[12].mxu0 %v2492_v57  ;;  %2191 = vmatpush1.bf16.msra.mxu1 %v2999_v13 }
  0xc7   : > { %1550 = vmatprep.mubr.bf16.mxu1 %v2495_v59  ;;  %2176 = vmatprep.subr.bf16.mxu1 %v3005_v15 }
  0xc8   : > { %1663 = vmatprep.mubr.bf16.mxu0 %v2581_v39 }
  0xca   : > { %2192 = vmatpush1.bf16.msra.mxu1 %v3010_v18 }
  0xcd   : > { %1551 = vmatmul.mubr.bf16.vlgmr.msra.gmra.mrb[16].mxu1 %v2493_v61 }
  0xce   : > { %1664 = vmatmul.mubr.bf16.gmra.mrb[16].mxu0 %v2496_v63  ;;  %1560 = vmatprep.mubr.bf16.mxu1 %v2497_v0 }
  0xcf   : > { %1673 = vmatprep.mubr.bf16.mxu0 %v2581_v39 }
  0xd5   : > { %1561 = vmatmul.mubr.bf16.gmra.mrb[20].mxu1 %v2499_v1 }
  0xd6   : > { %1674 = vmatmul.mubr.bf16.gmra.mrb[20].mxu0 %v2500_v2  ;;  %1570 = vmatprep.mubr.bf16.mxu1 %v2501_v3 }
  0xd7   : > { %1683 = vmatprep.mubr.bf16.mxu0 %v2581_v39 }
  0xdd   : > { %1571 = vmatmul.mubr.bf16.gmra.mrb[24].mxu1 %v2503_v4 }
  0xde   : > { %1684 = vmatmul.mubr.bf16.gmra.mrb[24].mxu0 %v2504_v5  ;;  %1580 = vmatprep.mubr.bf16.mxu1 %v2505_v6 }
  0xdf   : > { %1693 = vmatprep.mubr.bf16.mxu0 %v2581_v39 }
  0xe5   : > { %1581 = vmatmul.mubr.bf16.gmra.mrb[28].mxu1 %v2507_v7 }
  0xe6   : > { %1694 = vmatmul.mubr.bf16.gmra.mrb[28].mxu0 %v2508_v8 }
 0x160   : > { %v1399_v9 = vpop.f32.mrb[0].mxu1 }
 0x161   : > { %v1401_v10 = vpop.f32.mrb[1].mxu1 }
 0x162   : > { %v1403_v11 = vpop.f32.mrb[2].mxu1 }
 0x163   : > { %v1405_v12 = vpop.f32.mrb[3].mxu1 }
 0x168   : > { %v1409_v13 = vpop.f32.mrb[4].mxu1 }
 0x169   : > { %v1411_v14 = vpop.f32.mrb[5].mxu1 }
 0x16a   : > { %v1413_v15 = vpop.f32.mrb[6].mxu1 }
 0x16b   : > { %v1415_v16 = vpop.f32.mrb[7].mxu1 }
 0x170   : > { %v1419_v18 = vpop.f32.mrb[8].mxu1 }
 0x171   : > { %v1421_v20 = vpop.f32.mrb[9].mxu1 }
 0x172   : > { %v1423_v22 = vpop.f32.mrb[10].mxu1 }
 0x173   : > { %v1425_v24 = vpop.f32.mrb[11].mxu1 }
 0x178   : > { %v1429_v26 = vpop.f32.mrb[12].mxu1 }
 0x179   : > { %v1431_v28 = vpop.f32.mrb[13].mxu1 }
 0x17a   : > { %v1433_v30 = vpop.f32.mrb[14].mxu1 }
 0x17b   : > { %v1435_v32 = vpop.f32.mrb[15].mxu1 }
 0x181   : > { %v1625_v34 = vpop.f32.mrb[0].mxu0 }
 0x182   : > { %v2193_v36 = vadd.f32 %v1625_v34, %v1399_v9  ;;  %v1627_v17 = vpop.f32.mrb[1].mxu0 }
 0x183   : > { %v2194_v38 = vadd.f32 %v1627_v17, %v1401_v10  ;;  %v1629_v40 = vpop.f32.mrb[2].mxu0 }
 0x184   : > { %1803 = vst [vmem:[%s3109_s3] sm:$0xff] %v2193_v36  ;;  %v2195_v19 = vadd.f32 %v1629_v40, %v1403_v11  ;;  %v1631_v42 = vpop.f32.mrb[3].mxu0 }
 0x185   : > { %1804 = vst [vmem:[%s3109_s3 + $0x8] sm:$0xff] %v2194_v38  ;;  %v2196_v21 = vadd.f32 %v1631_v42, %v1405_v12 }
 0x186   : > { %1805 = vst [vmem:[%s3109_s3 + $0x10] sm:$0xff] %v2195_v19 }
 0x187   : > { %1806 = vst [vmem:[%s3109_s3 + $0x18] sm:$0xff] %v2196_v21 }
 0x189   : > { %v1635_v23 = vpop.f32.mrb[4].mxu0 }
 0x18a   : > { %v2197_v44 = vadd.f32 %v1635_v23, %v1409_v13  ;;  %v1637_v25 = vpop.f32.mrb[5].mxu0 }
 0x18b   : > { %v2198_v46 = vadd.f32 %v1637_v25, %v1411_v14  ;;  %v1639_v48 = vpop.f32.mrb[6].mxu0 }
 0x18c   : > { %1807 = vst [vmem:[%s3109_s3 + $0x20] sm:$0xff] %v2197_v44  ;;  %v2199_v27 = vadd.f32 %v1639_v48, %v1413_v15  ;;  %v1641_v50 = vpop.f32.mrb[7].mxu0 }
 0x18d   : > { %1808 = vst [vmem:[%s3109_s3 + $0x28] sm:$0xff] %v2198_v46  ;;  %v2200_v29 = vadd.f32 %v1641_v50, %v1415_v16 }
 0x18e   : > { %1809 = vst [vmem:[%s3109_s3 + $0x30] sm:$0xff] %v2199_v27 }
 0x18f   : > { %1810 = vst [vmem:[%s3109_s3 + $0x38] sm:$0xff] %v2200_v29 }
 0x191   : > { %v1645_v52 = vpop.f32.mrb[8].mxu0 }
 0x192   : > { %v2201_v31 = vadd.f32 %v1645_v52, %v1419_v18  ;;  %v1647_v33 = vpop.f32.mrb[9].mxu0  ;;  %v1860_v52 = vld [vmem:[%s3109_s3] sm:$0xff] (%p2664_p9) }
 0x193   : > { %v2202_v54 = vadd.f32 %v1647_v33, %v1421_v20  ;;  %v1649_v56 = vpop.f32.mrb[10].mxu0  ;;  %v1864_v33 = vld [vmem:[%s3109_s3 + $0x10] sm:$0xff] (%p2664_p9)  ;;  %1861 = vst [vmem:[%s3159_s8] sm:$0xff] (%p2664_p9), %v1860_v52 }
 0x194   : > { %1811 = vst [vmem:[%s3109_s3 + $0x40] sm:$0xff] %v2201_v31  ;;  %v2203_v35 = vadd.f32 %v1649_v56, %v1423_v22  ;;  %v1651_v58 = vpop.f32.mrb[11].mxu0  ;;  %v1862_v31 = vld [vmem:[%s3109_s3 + $0x8] sm:$0xff] (%p2664_p9)  ;;  %v1868_v56 = vld [vmem:[%s3109_s3 + $0x20] sm:$0xff] (%p2664_p9)  ;;  %1865 = vst [vmem:[%s3159_s8 + $0x20] sm:$0xff] (%p2664_p9), %v1864_v33 }
 0x195   : > { %1812 = vst [vmem:[%s3109_s3 + $0x48] sm:$0xff] %v2202_v54  ;;  %v2204_v37 = vadd.f32 %v1651_v58, %v1425_v24  ;;  %v1866_v54 = vld [vmem:[%s3109_s3 + $0x18] sm:$0xff] (%p2664_p9)  ;;  %v1872_v58 = vld [vmem:[%s3109_s3 + $0x30] sm:$0xff] (%p2664_p9)  ;;  %1863 = vst [vmem:[%s3159_s8 + $0x8] sm:$0xff] (%p2664_p9), %v1862_v31 }
 0x196   : > { %1813 = vst [vmem:[%s3109_s3 + $0x50] sm:$0xff] %v2203_v35  ;;  %v1870_v35 = vld [vmem:[%s3109_s3 + $0x28] sm:$0xff] (%p2664_p9)  ;;  %1867 = vst [vmem:[%s3159_s8 + $0x28] sm:$0xff] (%p2664_p9), %v1866_v54 }
 0x197   : > { %1814 = vst [vmem:[%s3109_s3 + $0x58] sm:$0xff] %v2204_v37  ;;  %v1874_v37 = vld [vmem:[%s3109_s3 + $0x38] sm:$0xff] (%p2664_p9)  ;;  %1869 = vst [vmem:[%s3159_s8 + $0x40] sm:$0xff] (%p2664_p9), %v1868_v56 }
 0x198   : > { %1871 = vst [vmem:[%s3159_s8 + $0x48] sm:$0xff] (%p2664_p9), %v1870_v35  ;;  %1873 = vst [vmem:[%s3159_s8 + $0x60] sm:$0xff] (%p2664_p9), %v1872_v58 }
 0x199   : > { %v1655_v39 = vpop.f32.mrb[12].mxu0  ;;  %1875 = vst [vmem:[%s3159_s8 + $0x68] sm:$0xff] (%p2664_p9), %v1874_v37 }
 0x19a   : > { %v2205_v41 = vadd.f32 %v1655_v39, %v1429_v26  ;;  %v1657_v60 = vpop.f32.mrb[13].mxu0 }
 0x19b   : > { %v2206_v62 = vadd.f32 %v1657_v60, %v1431_v28  ;;  %v1659_v43 = vpop.f32.mrb[14].mxu0  ;;  %v1876_v39 = vld [vmem:[%s3109_s3 + $0x40] sm:$0xff] (%p2664_p9) }
 0x19c   : > { %1815 = vst [vmem:[%s3109_s3 + $0x60] sm:$0xff] %v2205_v41  ;;  %v2207_v45 = vadd.f32 %v1659_v43, %v1433_v30  ;;  %v1661_v47 = vpop.f32.mrb[15].mxu0  ;;  %v1878_v41 = vld [vmem:[%s3109_s3 + $0x48] sm:$0xff] (%p2664_p9)  ;;  %1877 = vst [vmem:[%s3159_s8 + $0x80] sm:$0xff] (%p2664_p9), %v1876_v39 }
 0x19d   : > { %1816 = vst [vmem:[%s3109_s3 + $0x68] sm:$0xff] %v2206_v62  ;;  %v2208_v49 = vadd.f32 %v1661_v47, %v1435_v32  ;;  %v1880_v60 = vld [vmem:[%s3109_s3 + $0x50] sm:$0xff] (%p2664_p9)  ;;  %1879 = vst [vmem:[%s3159_s8 + $0x88] sm:$0xff] (%p2664_p9), %v1878_v41 }
 0x19e   : > { %1817 = vst [vmem:[%s3109_s3 + $0x70] sm:$0xff] %v2207_v45  ;;  %v1882_v62 = vld [vmem:[%s3109_s3 + $0x58] sm:$0xff] (%p2664_p9)  ;;  %1881 = vst [vmem:[%s3159_s8 + $0xa0] sm:$0xff] (%p2664_p9), %v1880_v60 }
 0x19f   : > { %1818 = vst [vmem:[%s3109_s3 + $0x78] sm:$0xff] %v2208_v49  ;;  %1883 = vst [vmem:[%s3159_s8 + $0xa8] sm:$0xff] (%p2664_p9), %v1882_v62 }
 0x1a0   : > { %v1552_v51 = vpop.f32.mrb[16].mxu1 }
 0x1a1   : > { %v1665_v53 = vpop.f32.mrb[16].mxu0  ;;  %v1554_v57 = vpop.f32.mrb[17].mxu1 }
 0x1a2   : > { %v2209_v55 = vadd.f32 %v1665_v53, %v1552_v51  ;;  %v1667_v59 = vpop.f32.mrb[17].mxu0  ;;  %v1556_v63 = vpop.f32.mrb[18].mxu1 }
 0x1a3   : > { %v2210_v61 = vadd.f32 %v1667_v59, %v1554_v57  ;;  %v1669_v0 = vpop.f32.mrb[18].mxu0  ;;  %v1558_v2 = vpop.f32.mrb[19].mxu1  ;;  %v1884_v43 = vld [vmem:[%s3109_s3 + $0x60] sm:$0xff] (%p2664_p9) }
 0x1a4   : > { %1819 = vst [vmem:[%s3109_s3 + $0x80] sm:$0xff] %v2209_v55  ;;  %v2211_v1 = vadd.f32 %v1669_v0, %v1556_v63  ;;  %v1671_v3 = vpop.f32.mrb[19].mxu0  ;;  %v1886_v45 = vld [vmem:[%s3109_s3 + $0x68] sm:$0xff] (%p2664_p9)  ;;  %1885 = vst [vmem:[%s3159_s8 + $0xc0] sm:$0xff] (%p2664_p9), %v1884_v43 }
 0x1a5   : > { %1820 = vst [vmem:[%s3109_s3 + $0x88] sm:$0xff] %v2210_v61  ;;  %v2212_v4 = vadd.f32 %v1671_v3, %v1558_v2  ;;  %v1888_v47 = vld [vmem:[%s3109_s3 + $0x70] sm:$0xff] (%p2664_p9)  ;;  %1887 = vst [vmem:[%s3159_s8 + $0xc8] sm:$0xff] (%p2664_p9), %v1886_v45 }
 0x1a6   : > { %1821 = vst [vmem:[%s3109_s3 + $0x90] sm:$0xff] %v2211_v1  ;;  %1889 = vst [vmem:[%s3159_s8 + $0xe0] sm:$0xff] (%p2664_p9), %v1888_v47  ;;  %v1890_v49 = vld [vmem:[%s3109_s3 + $0x78] sm:$0xff] (%p2664_p9) }
 0x1a7   : > { %1822 = vst [vmem:[%s3109_s3 + $0x98] sm:$0xff] %v2212_v4  ;;  %1891 = vst [vmem:[%s3159_s8 + $0xe8] sm:$0xff] (%p2664_p9), %v1890_v49 }
 0x1a8   : > { %v1562_v5 = vpop.f32.mrb[20].mxu1 }
 0x1a9   : > { %v1675_v6 = vpop.f32.mrb[20].mxu0  ;;  %v1564_v8 = vpop.f32.mrb[21].mxu1 }
 0x1aa   : > { %v2213_v7 = vadd.f32 %v1675_v6, %v1562_v5  ;;  %v1677_v9 = vpop.f32.mrb[21].mxu0  ;;  %v1566_v11 = vpop.f32.mrb[22].mxu1 }
 0x1ab   : > { %v2214_v10 = vadd.f32 %v1677_v9, %v1564_v8  ;;  %v1679_v12 = vpop.f32.mrb[22].mxu0  ;;  %v1568_v14 = vpop.f32.mrb[23].mxu1  ;;  %v1892_v51 = vld [vmem:[%s3109_s3 + $0x80] sm:$0xff] (%p2664_p9) }
 0x1ac   : > { %1823 = vst [vmem:[%s3109_s3 + $0xa0] sm:$0xff] %v2213_v7  ;;  %v2215_v13 = vadd.f32 %v1679_v12, %v1566_v11  ;;  %v1681_v15 = vpop.f32.mrb[23].mxu0  ;;  %v1894_v53 = vld [vmem:[%s3109_s3 + $0x88] sm:$0xff] (%p2664_p9)  ;;  %1893 = vst [vmem:[%s3159_s8 + $0x100] sm:$0xff] (%p2664_p9), %v1892_v51 }
 0x1ad   : > { %1824 = vst [vmem:[%s3109_s3 + $0xa8] sm:$0xff] %v2214_v10  ;;  %v2216_v16 = vadd.f32 %v1681_v15, %v1568_v14  ;;  %1895 = vst [vmem:[%s3159_s8 + $0x108] sm:$0xff] (%p2664_p9), %v1894_v53  ;;  %v1896_v55 = vld [vmem:[%s3109_s3 + $0x90] sm:$0xff] (%p2664_p9) }
 0x1ae   : > { %1825 = vst [vmem:[%s3109_s3 + $0xb0] sm:$0xff] %v2215_v13  ;;  %v1898_v57 = vld [vmem:[%s3109_s3 + $0x98] sm:$0xff] (%p2664_p9)  ;;  %1897 = vst [vmem:[%s3159_s8 + $0x120] sm:$0xff] (%p2664_p9), %v1896_v55 }
 0x1af   : > { %1826 = vst [vmem:[%s3109_s3 + $0xb8] sm:$0xff] %v2216_v16  ;;  %1899 = vst [vmem:[%s3159_s8 + $0x128] sm:$0xff] (%p2664_p9), %v1898_v57 }
 0x1b0   : > { %v1572_v18 = vpop.f32.mrb[24].mxu1 }
 0x1b1   : > { %v1685_v20 = vpop.f32.mrb[24].mxu0  ;;  %v1574_v24 = vpop.f32.mrb[25].mxu1 }
 0x1b2   : > { %v2217_v22 = vadd.f32 %v1685_v20, %v1572_v18  ;;  %v1687_v26 = vpop.f32.mrb[25].mxu0  ;;  %v1576_v30 = vpop.f32.mrb[26].mxu1 }
 0x1b3   : > { %v2218_v28 = vadd.f32 %v1687_v26, %v1574_v24  ;;  %v1689_v32 = vpop.f32.mrb[26].mxu0  ;;  %v1578_v36 = vpop.f32.mrb[27].mxu1  ;;  %v1900_v59 = vld [vmem:[%s3109_s3 + $0xa0] sm:$0xff] (%p2664_p9) }
 0x1b4   : > { %1827 = vst [vmem:[%s3109_s3 + $0xc0] sm:$0xff] %v2217_v22  ;;  %v2219_v34 = vadd.f32 %v1689_v32, %v1576_v30  ;;  %v1691_v17 = vpop.f32.mrb[27].mxu0  ;;  %1901 = vst [vmem:[%s3159_s8 + $0x140] sm:$0xff] (%p2664_p9), %v1900_v59  ;;  %v1902_v61 = vld [vmem:[%s3109_s3 + $0xa8] sm:$0xff] (%p2664_p9) }
 0x1b5   : > { %1828 = vst [vmem:[%s3109_s3 + $0xc8] sm:$0xff] %v2218_v28  ;;  %v2220_v38 = vadd.f32 %v1691_v17, %v1578_v36  ;;  %v1904_v63 = vld [vmem:[%s3109_s3 + $0xb0] sm:$0xff] (%p2664_p9)  ;;  %1903 = vst [vmem:[%s3159_s8 + $0x148] sm:$0xff] (%p2664_p9), %v1902_v61 }
 0x1b6   : > { %1829 = vst [vmem:[%s3109_s3 + $0xd0] sm:$0xff] %v2219_v34  ;;  %v1906_v0 = vld [vmem:[%s3109_s3 + $0xb8] sm:$0xff] (%p2664_p9)  ;;  %1905 = vst [vmem:[%s3159_s8 + $0x160] sm:$0xff] (%p2664_p9), %v1904_v63 }
 0x1b7   : > { %1830 = vst [vmem:[%s3109_s3 + $0xd8] sm:$0xff] %v2220_v38  ;;  %1907 = vst [vmem:[%s3159_s8 + $0x168] sm:$0xff] (%p2664_p9), %v1906_v0 }
 0x1b8   : > { %v1582_v40 = vpop.f32.mrb[28].mxu1 }
 0x1b9   : > { %v1695_v19 = vpop.f32.mrb[28].mxu0  ;;  %v1584_v21 = vpop.f32.mrb[29].mxu1  ;;  %1841 = sbr.rel (!%p2664_p9) target bundleno = 456 (0x1c8), region = 78 }
 0x1ba   : > { %v2221_v42 = vadd.f32 %v1695_v19, %v1582_v40  ;;  %v1697_v23 = vpop.f32.mrb[29].mxu0  ;;  %v1586_v25 = vpop.f32.mrb[30].mxu1 }
 0x1bb   : > { %v2222_v44 = vadd.f32 %v1697_v23, %v1584_v21  ;;  %v1699_v46 = vpop.f32.mrb[30].mxu0  ;;  %v1588_v27 = vpop.f32.mrb[31].mxu1  ;;  %v1908_v1 = vld [vmem:[%s3109_s3 + $0xc0] sm:$0xff] (%p2664_p9) }
 0x1bc   : > { %1831 = vst [vmem:[%s3109_s3 + $0xe0] sm:$0xff] %v2221_v42  ;;  %v2223_v48 = vadd.f32 %v1699_v46, %v1586_v25  ;;  %v1701_v50 = vpop.f32.mrb[31].mxu0  ;;  %v1910_v2 = vld [vmem:[%s3109_s3 + $0xc8] sm:$0xff] (%p2664_p9)  ;;  %1909 = vst [vmem:[%s3159_s8 + $0x180] sm:$0xff] (%p2664_p9), %v1908_v1 }
 0x1bd   : > { %1832 = vst [vmem:[%s3109_s3 + $0xe8] sm:$0xff] %v2222_v44  ;;  %v2224_v29 = vadd.f32 %v1701_v50, %v1588_v27  ;;  %v1912_v3 = vld [vmem:[%s3109_s3 + $0xd0] sm:$0xff] (%p2664_p9)  ;;  %1911 = vst [vmem:[%s3159_s8 + $0x188] sm:$0xff] (%p2664_p9), %v1910_v2 }
 0x1be   : > { %1833 = vst [vmem:[%s3109_s3 + $0xf0] sm:$0xff] %v2223_v48  ;;  %1913 = vst [vmem:[%s3159_s8 + $0x1a0] sm:$0xff] (%p2664_p9), %v1912_v3  ;;  %v1914_v4 = vld [vmem:[%s3109_s3 + $0xd8] sm:$0xff] (%p2664_p9) }
 0x1bf   : > { %1834 = vst [vmem:[%s3109_s3 + $0xf8] sm:$0xff] %v2224_v29  ;;  %1915 = vst [vmem:[%s3159_s8 + $0x1a8] sm:$0xff] (%p2664_p9), %v1914_v4 }
 0x1c3   : > { %v1916_v5 = vld [vmem:[%s3109_s3 + $0xe0] sm:$0xff] }
 0x1c4   : > { %v1918_v6 = vld [vmem:[%s3109_s3 + $0xe8] sm:$0xff]  ;;  %1917 = vst [vmem:[%s3159_s8 + $0x1c0] sm:$0xff] %v1916_v5 }
 0x1c5   : > { %1919 = vst [vmem:[%s3159_s8 + $0x1c8] sm:$0xff] %v1918_v6  ;;  %v1920_v7 = vld [vmem:[%s3109_s3 + $0xf0] sm:$0xff] }
 0x1c6   : > { %v1922_v8 = vld [vmem:[%s3109_s3 + $0xf8] sm:$0xff]  ;;  %1921 = vst [vmem:[%s3159_s8 + $0x1e0] sm:$0xff] %v1920_v7 }
 0x1c7   : > { %1923 = vst [vmem:[%s3159_s8 + $0x1e8] sm:$0xff] %v1922_v8 }
 0x1c8 PF: > { %s12_s17 = sadd.s32 1, %s2579_s17   ;;  %s3247_s9 = smov %s2551_s10 }
 0x1c9   : > { %p9_p1 = scmp.ge.s32.totalorder %s12_s17, 10   ;;  %s3248_s10 = smov %s2669_s28 }
 0x1ca   : > { %s3249_s11 = smov %s2559_s12  ;;  %s3250_s12 = smov %s2658_s24 }
 0x1cb   : > { %s3251_s13 = smov %s2571_s15  ;;  %s3252_s14 = smov %s2575_s16 }
 0x1cc   : > { %s3253_s15 = smov %s3256_s19  ;;  %s3254_s16 = smov %s3260_s20 }
 0x1cd   :  { %11 = sbr.rel (!%p9_p1) target bundleno = 5 (0x5), region = 135 }

// kernel: integration_forward.24
= control target key start
LH: loop header
LB: loop body
LE: loop exit
PB: predicated region body
PF: predicated region fallthrough
CT: control target
= control target key end

     0   :  { %s2276_s9 = smov 0   ;;  %s2278_s10 = smov 0   ;;  %s2458_s0 = inlined_call_operand.vmem [shape: bf16[8,8192], index: 0, kind: input, shape index: {}]   ;;  %s2459_s1 = inlined_call_operand.vmem [shape: bf16[8192,128], index: 1, kind: input, shape index: {}]   ;;  %s2460_s2 = inlined_call_operand.vmem [shape: f32[8,128], index: 2, kind: output, shape index: {}]  }
   0x1   :  { %s2280_s11 = smov 0  }
   0x2 LB: > { %s24_s12 = sadd.s32 1, %s2254_s10  ;;  %p1737_p0 = scmp.ge.s32.totalorder %s2258_s11, 1  ;;  %s2258_s11 = sphi %s2280_s11, %s12_s11   ;;  %s2254_s10 = sphi %s2278_s10, %s2462_s10   ;;  %s2250_s9 = sphi %s2276_s9, %s2461_s9  }
   0x3   : > { %p25_p1 = scmp.ge.s32.totalorder %s24_s12, 4  ;;  %p156_p2 = scmp.lt.s32.totalorder %s2258_s11, 5 }
   0x5   : > { %s2464_s12 = smov (%p25_p1, %s24_s12), 0  ;;  %p157_p3 = pnand %p1737_p0, %p156_p2 }
   0x6   : > { %s1738_s13 = sshll.u32 (!%p157_p3), %s2250_s9, 4  ;;  %s1740_s14 = sshll.u32 (!%p157_p3), %s2250_s9, 8 }
   0x7   : > { %160 = sbr.rel (%p157_p3) target bundleno = 384 (0x180), region = 28  ;;  %p195_p4 = scmp.lt.s32.totalorder (!%p157_p3), %s1738_s13, 63 }
   0x8   : > { %p203_p5 = scmp.lt.s32.totalorder (!%p157_p3), %s1740_s14, 1023  ;;  %p1742_p6 = scmp.ne.s32.totalorder (!%p157_p3), %s2250_s9, 0 }
   0xe   : > { %s2466_s13 = smov (!%p195_p4, %s1738_s13), 63  ;;  %s2468_s14 = smov (!%p203_p5, %s1740_s14), 1023 }
   0xf   : > { %s1739_s15 = sshll.u32 %s2466_s13, 2  ;;  %s1741_s19 = sshll.u32 %s2468_s14, 2  ;;  %v2260_v0 = vmov (!%p1742_p6), 0.0  }
  0x10   : > { %s2301_s18 = scalar_lea.vmem %s2458_s0, %s1739_s15  ;;  %s2306_s22 = scalar_lea.vmem %s2459_s1, %s1741_s19  ;;  %223 = vst [vmem:[#allocation2] sm:$0xff] (!%p1742_p6), %v2260_v0 }
  0x11   : > { %222 = sbr.rel (%p1742_p6) target bundleno = 24 (0x18), region = 32 }
  0x18 PF: > { %v2092_v1 = vld [vmem:[%s2306_s22 + $0x40] sm:$0xff]   ;;  %v2096_v5 = vld [vmem:[%s2306_s22 + $0x48] sm:$0xff]   ;;  %v2100_v9 = vld [vmem:[%s2306_s22 + $0x50] sm:$0xff]   ;;  %p1887_p7 = scmp.ne.s32.totalorder %s2250_s9, 3 }
  0x19   : > { %v2093_v2 = vld [vmem:[%s2306_s22 + $0xc0] sm:$0xff]   ;;  %1891 = vmatprep.subr.bf16.mxu0 %v2092_v1  ;;  %v2097_v6 = vld [vmem:[%s2306_s22 + $0xc8] sm:$0xff]   ;;  %v2101_v10 = vld [vmem:[%s2306_s22 + $0xd0] sm:$0xff]  }
  0x1a   : > { %v2094_v3 = vld [vmem:[%s2306_s22] sm:$0xff]   ;;  %1913 = vmatprep.subr.bf16.mxu1 %v2093_v2  ;;  %v2098_v7 = vld [vmem:[%s2306_s22 + $0x8] sm:$0xff]   ;;  %v2102_v11 = vld [vmem:[%s2306_s22 + $0x10] sm:$0xff]  }
  0x1b   : > { %v2095_v4 = vld [vmem:[%s2306_s22 + $0x80] sm:$0xff]   ;;  %1892 = vmatpush3.bf16.msra.mxu0 %v2094_v3  ;;  %v2099_v8 = vld [vmem:[%s2306_s22 + $0x88] sm:$0xff]   ;;  %v2103_v12 = vld [vmem:[%s2306_s22 + $0x90] sm:$0xff]  }
  0x1c   : > { %1914 = vmatpush3.bf16.msra.mxu1 %v2095_v4  ;;  %1893 = vmatprep.subr.bf16.mxu0 %v2096_v5  ;;  %v2104_v13 = vld [vmem:[%s2306_s22 + $0x58] sm:$0xff]   ;;  %v2108_v17 = vld [vmem:[%s2306_s22 + $0x60] sm:$0xff]   ;;  %v2112_v21 = vld [vmem:[%s2306_s22 + $0x68] sm:$0xff]  }
  0x1d   : > { %1915 = vmatprep.subr.bf16.mxu1 %v2097_v6  ;;  %v2105_v14 = vld [vmem:[%s2306_s22 + $0xd8] sm:$0xff]   ;;  %v2109_v18 = vld [vmem:[%s2306_s22 + $0xe0] sm:$0xff]   ;;  %v2113_v22 = vld [vmem:[%s2306_s22 + $0xe8] sm:$0xff]  }
  0x1e   : > { %v2106_v15 = vld [vmem:[%s2306_s22 + $0x18] sm:$0xff]   ;;  %v2110_v19 = vld [vmem:[%s2306_s22 + $0x20] sm:$0xff]   ;;  %v2114_v23 = vld [vmem:[%s2306_s22 + $0x28] sm:$0xff]  }
  0x1f   : > { %1894 = vmatpush3.bf16.msra.mxu0 %v2098_v7  ;;  %v2107_v16 = vld [vmem:[%s2306_s22 + $0x98] sm:$0xff]   ;;  %v2111_v20 = vld [vmem:[%s2306_s22 + $0xa0] sm:$0xff]   ;;  %v2115_v24 = vld [vmem:[%s2306_s22 + $0xa8] sm:$0xff]  }
  0x20   : > { %1916 = vmatpush3.bf16.msra.mxu1 %v2099_v8  ;;  %1895 = vmatprep.subr.bf16.mxu0 %v2100_v9  ;;  %v2116_v25 = vld [vmem:[%s2306_s22 + $0x70] sm:$0xff]   ;;  %v2120_v29 = vld [vmem:[%s2306_s22 + $0x78] sm:$0xff]   ;;  %v225_v33 = vld [vmem:[%s2301_s18] sm:$0xff] }
  0x21   : > { %1917 = vmatprep.subr.bf16.mxu1 %v2101_v10  ;;  %v2117_v26 = vld [vmem:[%s2306_s22 + $0xf0] sm:$0xff]   ;;  %v2121_v30 = vld [vmem:[%s2306_s22 + $0xf8] sm:$0xff]   ;;  %v226_v34 = vld [vmem:[%s2301_s18 + $0x8] sm:$0xff]  ;;  %v1743_v35 = vcombine.low %v225_v33, %v225_v33  ;;  %v1744_v36 = vcombine.high %v225_v33, %v225_v33 }
  0x22   : > { %v2118_v27 = vld [vmem:[%s2306_s22 + $0x30] sm:$0xff]   ;;  %v2122_v31 = vld [vmem:[%s2306_s22 + $0x38] sm:$0xff]   ;;  %v1745_v37 = vcombine.low %v226_v34, %v226_v34  ;;  %v1746_v38 = vcombine.high %v226_v34, %v226_v34  ;;  %v2128_v39 = vld [vmem:[%s2306_s22 + $0x140] sm:$0xff]  }
  0x23   : > { %1896 = vmatpush3.bf16.msra.mxu0 %v2102_v11  ;;  %v2119_v28 = vld [vmem:[%s2306_s22 + $0xb0] sm:$0xff]   ;;  %v2123_v32 = vld [vmem:[%s2306_s22 + $0xb8] sm:$0xff]   ;;  %v2129_v40 = vld [vmem:[%s2306_s22 + $0x1c0] sm:$0xff]   ;;  %1345 = vmatprep.mubr.bf16.mxu0 %v1744_v36 }
  0x24   : > { %1918 = vmatpush3.bf16.msra.mxu1 %v2103_v12  ;;  %1897 = vmatprep.subr.bf16.mxu0 %v2104_v13  ;;  %v2130_v41 = vld [vmem:[%s2306_s22 + $0x100] sm:$0xff]   ;;  %v2132_v43 = vld [vmem:[%s2306_s22 + $0x148] sm:$0xff]   ;;  %v2136_v47 = vld [vmem:[%s2306_s22 + $0x150] sm:$0xff]  }
  0x25   : > { %1919 = vmatprep.subr.bf16.mxu1 %v2105_v14  ;;  %1385 = vmatprep.mubr.bf16.mxu1 %v1746_v38  ;;  %v2131_v42 = vld [vmem:[%s2306_s22 + $0x180] sm:$0xff]   ;;  %v2133_v44 = vld [vmem:[%s2306_s22 + $0x1c8] sm:$0xff]   ;;  %v2137_v48 = vld [vmem:[%s2306_s22 + $0x1d0] sm:$0xff]  }
  0x26   : > { %v2134_v45 = vld [vmem:[%s2306_s22 + $0x108] sm:$0xff]   ;;  %v2138_v49 = vld [vmem:[%s2306_s22 + $0x110] sm:$0xff]   ;;  %v2140_v51 = vld [vmem:[%s2306_s22 + $0x158] sm:$0xff]  }
  0x27   : > { %1898 = vmatpush3.bf16.msra.mxu0 %v2106_v15  ;;  %v2135_v46 = vld [vmem:[%s2306_s22 + $0x188] sm:$0xff]   ;;  %v2139_v50 = vld [vmem:[%s2306_s22 + $0x190] sm:$0xff]   ;;  %v2141_v52 = vld [vmem:[%s2306_s22 + $0x1d8] sm:$0xff]  }
  0x28   : > { %1920 = vmatpush3.bf16.msra.mxu1 %v2107_v16  ;;  %1899 = vmatprep.subr.bf16.mxu0 %v2108_v17  ;;  %v2142_v53 = vld [vmem:[%s2306_s22 + $0x118] sm:$0xff]   ;;  %v2144_v55 = vld [vmem:[%s2306_s22 + $0x160] sm:$0xff]   ;;  %v2148_v59 = vld [vmem:[%s2306_s22 + $0x168] sm:$0xff]  }
  0x29   : > { %1921 = vmatprep.subr.bf16.mxu1 %v2109_v18  ;;  %v2143_v54 = vld [vmem:[%s2306_s22 + $0x198] sm:$0xff]   ;;  %v2145_v56 = vld [vmem:[%s2306_s22 + $0x1e0] sm:$0xff]   ;;  %v2149_v60 = vld [vmem:[%s2306_s22 + $0x1e8] sm:$0xff]  }
  0x2a   : > { %v2146_v57 = vld [vmem:[%s2306_s22 + $0x120] sm:$0xff]   ;;  %v2150_v61 = vld [vmem:[%s2306_s22 + $0x128] sm:$0xff]   ;;  %v2152_v63 = vld [vmem:[%s2306_s22 + $0x170] sm:$0xff]  }
  0x2b   : > { %1900 = vmatpush3.bf16.msra.mxu0 %v2110_v19  ;;  %v2147_v58 = vld [vmem:[%s2306_s22 + $0x1a0] sm:$0xff]   ;;  %v2151_v62 = vld [vmem:[%s2306_s22 + $0x1a8] sm:$0xff]   ;;  %v2153_v0 = vld [vmem:[%s2306_s22 + $0x1f0] sm:$0xff]  }
  0x2c   : > { %1922 = vmatpush3.bf16.msra.mxu1 %v2111_v20  ;;  %1901 = vmatprep.subr.bf16.mxu0 %v2112_v21  ;;  %v2154_v1 = vld [vmem:[%s2306_s22 + $0x130] sm:$0xff]   ;;  %v2156_v3 = vld [vmem:[%s2306_s22 + $0x178] sm:$0xff]   ;;  %v2164_v13 = vld [vmem:[%s2306_s22 + $0x240] sm:$0xff]  }
  0x2d   : > { %1923 = vmatprep.subr.bf16.mxu1 %v2113_v22  ;;  %v2155_v2 = vld [vmem:[%s2306_s22 + $0x1b0] sm:$0xff]   ;;  %v2157_v4 = vld [vmem:[%s2306_s22 + $0x1f8] sm:$0xff]   ;;  %v2165_v14 = vld [vmem:[%s2306_s22 + $0x2c0] sm:$0xff]  }
  0x2e   : > { %v2158_v5 = vld [vmem:[%s2306_s22 + $0x138] sm:$0xff]   ;;  %v227_v7 = vld [vmem:[%s2301_s18 + $0x10] sm:$0xff]  ;;  %v2166_v15 = vld [vmem:[%s2306_s22 + $0x200] sm:$0xff]  }
  0x2f   : > { %1902 = vmatpush3.bf16.msra.mxu0 %v2114_v23  ;;  %v2159_v6 = vld [vmem:[%s2306_s22 + $0x1b8] sm:$0xff]   ;;  %v1747_v8 = vcombine.low %v227_v7, %v227_v7  ;;  %v1748_v9 = vcombine.high %v227_v7, %v227_v7  ;;  %v2167_v16 = vld [vmem:[%s2306_s22 + $0x280] sm:$0xff]   ;;  %v2168_v17 = vld [vmem:[%s2306_s22 + $0x248] sm:$0xff]  }
  0x30   : > { %1924 = vmatpush3.bf16.msra.mxu1 %v2115_v24  ;;  %1903 = vmatprep.subr.bf16.mxu0 %v2116_v25  ;;  %v228_v10 = vld [vmem:[%s2301_s18 + $0x18] sm:$0xff]  ;;  %v2169_v18 = vld [vmem:[%s2306_s22 + $0x2c8] sm:$0xff]   ;;  %v2172_v21 = vld [vmem:[%s2306_s22 + $0x250] sm:$0xff]  }
  0x31   : > { %1925 = vmatprep.subr.bf16.mxu1 %v2117_v26  ;;  %v1749_v11 = vcombine.low %v228_v10, %v228_v10  ;;  %v1750_v12 = vcombine.high %v228_v10, %v228_v10  ;;  %v2170_v19 = vld [vmem:[%s2306_s22 + $0x208] sm:$0xff]   ;;  %v2173_v22 = vld [vmem:[%s2306_s22 + $0x2d0] sm:$0xff]   ;;  %v2176_v25 = vld [vmem:[%s2306_s22 + $0x258] sm:$0xff]  }
  0x32   : > { %v2171_v20 = vld [vmem:[%s2306_s22 + $0x288] sm:$0xff]   ;;  %v2174_v23 = vld [vmem:[%s2306_s22 + $0x210] sm:$0xff]   ;;  %v2177_v26 = vld [vmem:[%s2306_s22 + $0x2d8] sm:$0xff]  }
  0x33   : > { %1904 = vmatpush3.bf16.msra.mxu0 %v2118_v27  ;;  %v2175_v24 = vld [vmem:[%s2306_s22 + $0x290] sm:$0xff]   ;;  %v2178_v27 = vld [vmem:[%s2306_s22 + $0x218] sm:$0xff]   ;;  %v2184_v33 = vld [vmem:[%s2306_s22 + $0x268] sm:$0xff]  }
  0x34   : > { %1926 = vmatpush3.bf16.msra.mxu1 %v2119_v28  ;;  %1905 = vmatprep.subr.bf16.mxu0 %v2120_v29  ;;  %v2179_v28 = vld [vmem:[%s2306_s22 + $0x298] sm:$0xff]   ;;  %v2180_v29 = vld [vmem:[%s2306_s22 + $0x260] sm:$0xff]   ;;  %v2185_v34 = vld [vmem:[%s2306_s22 + $0x2e8] sm:$0xff]  }
  0x35   : > { %1927 = vmatprep.subr.bf16.mxu1 %v2121_v30  ;;  %v2181_v30 = vld [vmem:[%s2306_s22 + $0x2e0] sm:$0xff]   ;;  %v2187_v36 = vld [vmem:[%s2306_s22 + $0x2a8] sm:$0xff]   ;;  %v2189_v38 = vld [vmem:[%s2306_s22 + $0x2f0] sm:$0xff]  }
  0x36   : > { %v2220_v7 = vld [vmem:[%s2306_s22 + $0x368] sm:$0xff]  }
  0x37   : > { %1906 = vmatpush3.bf16.msra.mxu0 %v2122_v31  ;;  %v2182_v31 = vld [vmem:[%s2306_s22 + $0x220] sm:$0xff]   ;;  %v2223_v10 = vld [vmem:[%s2306_s22 + $0x3a8] sm:$0xff]  }
  0x38   : > { %1928 = vmatpush3.bf16.msra.mxu1 %v2123_v32  ;;  %1935 = vmatprep.subr.bf16.mxu0 %v2128_v39  ;;  %v2183_v32 = vld [vmem:[%s2306_s22 + $0x2a0] sm:$0xff]   ;;  %v2190_v39 = vld [vmem:[%s2306_s22 + $0x230] sm:$0xff]  }
  0x39   : > { %1957 = vmatprep.subr.bf16.mxu1 %v2129_v40  ;;  %v2191_v40 = vld [vmem:[%s2306_s22 + $0x2b0] sm:$0xff]  }
  0x3a   : > { %1346 = vmatmul.mubr.bf16.vlgmr.msra.gmra.mrb[0].mxu0 %v1743_v35  ;;  %v2186_v35 = vld [vmem:[%s2306_s22 + $0x228] sm:$0xff]  }
  0x3b   : > { %1386 = vmatmul.mubr.bf16.vlgmr.msra.gmra.mrb[0].mxu1 %v1745_v37  ;;  %1936 = vmatpush3.bf16.msra.mxu0 %v2130_v41  ;;  %v2188_v37 = vld [vmem:[%s2306_s22 + $0x270] sm:$0xff]   ;;  %v2192_v41 = vld [vmem:[%s2306_s22 + $0x278] sm:$0xff]  }
  0x3c   : > { %1958 = vmatpush3.bf16.msra.mxu1 %v2131_v42  ;;  %1937 = vmatprep.subr.bf16.mxu0 %v2132_v43  ;;  %v2193_v42 = vld [vmem:[%s2306_s22 + $0x2f8] sm:$0xff]  }
  0x3d   : > { %1959 = vmatprep.subr.bf16.mxu1 %v2133_v44  ;;  %1425 = vmatprep.mubr.bf16.mxu0 %v1748_v9  ;;  %v2194_v43 = vld [vmem:[%s2306_s22 + $0x238] sm:$0xff]   ;;  %v2222_v9 = vld [vmem:[%s2306_s22 + $0x328] sm:$0xff]  }
  0x3e   : > { %1465 = vmatprep.mubr.bf16.mxu1 %v1750_v12  ;;  %v2195_v44 = vld [vmem:[%s2306_s22 + $0x2b8] sm:$0xff]   ;;  %v2225_v12 = vld [vmem:[%s2306_s22 + $0x3f0] sm:$0xff]  }
  0x3f   : > { %1938 = vmatpush3.bf16.msra.mxu0 %v2134_v45  ;;  %v229_v45 = vld [vmem:[%s2301_s18 + $0x20] sm:$0xff] }
  0x40   : > { %1960 = vmatpush3.bf16.msra.mxu1 %v2135_v46  ;;  %1939 = vmatprep.subr.bf16.mxu0 %v2136_v47  ;;  %v230_v46 = vld [vmem:[%s2301_s18 + $0x28] sm:$0xff]  ;;  %v1751_v47 = vcombine.low %v229_v45, %v229_v45 }
  0x41   : > { %1961 = vmatprep.subr.bf16.mxu1 %v2137_v48  ;;  %v1752_v48 = vcombine.high %v229_v45, %v229_v45 }
  0x43   : > { %1940 = vmatpush3.bf16.msra.mxu0 %v2138_v49  ;;  %v1753_v49 = vcombine.low %v230_v46, %v230_v46 }
  0x44   : > { %1962 = vmatpush3.bf16.msra.mxu1 %v2139_v50  ;;  %1941 = vmatprep.subr.bf16.mxu0 %v2140_v51  ;;  %v1754_v50 = vcombine.high %v230_v46, %v230_v46  ;;  %v2200_v51 = vld [vmem:[%s2306_s22 + $0x340] sm:$0xff]  }
  0x45   : > { %1963 = vmatprep.subr.bf16.mxu1 %v2141_v52  ;;  %v2201_v52 = vld [vmem:[%s2306_s22 + $0x3c0] sm:$0xff]  }
  0x47   : > { %1942 = vmatpush3.bf16.msra.mxu0 %v2142_v53  ;;  %v2202_v53 = vld [vmem:[%s2306_s22 + $0x300] sm:$0xff]  }
  0x48   : > { %1964 = vmatpush3.bf16.msra.mxu1 %v2143_v54  ;;  %1943 = vmatprep.subr.bf16.mxu0 %v2144_v55  ;;  %v2203_v54 = vld [vmem:[%s2306_s22 + $0x380] sm:$0xff]   ;;  %v2204_v55 = vld [vmem:[%s2306_s22 + $0x348] sm:$0xff]  }
  0x49   : > { %1965 = vmatprep.subr.bf16.mxu1 %v2145_v56  ;;  %v2205_v56 = vld [vmem:[%s2306_s22 + $0x3c8] sm:$0xff]  }
  0x4b   : > { %1944 = vmatpush3.bf16.msra.mxu0 %v2146_v57  ;;  %v2206_v57 = vld [vmem:[%s2306_s22 + $0x308] sm:$0xff]  }
  0x4c   : > { %1966 = vmatpush3.bf16.msra.mxu1 %v2147_v58  ;;  %1945 = vmatprep.subr.bf16.mxu0 %v2148_v59  ;;  %v2207_v58 = vld [vmem:[%s2306_s22 + $0x388] sm:$0xff]   ;;  %v2208_v59 = vld [vmem:[%s2306_s22 + $0x350] sm:$0xff]  }
  0x4d   : > { %1967 = vmatprep.subr.bf16.mxu1 %v2149_v60  ;;  %v2209_v60 = vld [vmem:[%s2306_s22 + $0x3d0] sm:$0xff]  }
  0x4f   : > { %1946 = vmatpush3.bf16.msra.mxu0 %v2150_v61  ;;  %v2210_v61 = vld [vmem:[%s2306_s22 + $0x310] sm:$0xff]  }
  0x50   : > { %1968 = vmatpush3.bf16.msra.mxu1 %v2151_v62  ;;  %1947 = vmatprep.subr.bf16.mxu0 %v2152_v63  ;;  %v2211_v62 = vld [vmem:[%s2306_s22 + $0x390] sm:$0xff]   ;;  %v2212_v63 = vld [vmem:[%s2306_s22 + $0x358] sm:$0xff]  }
  0x51   : > { %1969 = vmatprep.subr.bf16.mxu1 %v2153_v0  ;;  %v2213_v0 = vld [vmem:[%s2306_s22 + $0x3d8] sm:$0xff]  }
  0x53   : > { %1948 = vmatpush3.bf16.msra.mxu0 %v2154_v1  ;;  %v2214_v1 = vld [vmem:[%s2306_s22 + $0x318] sm:$0xff]  }
  0x54   : > { %1970 = vmatpush3.bf16.msra.mxu1 %v2155_v2  ;;  %1949 = vmatprep.subr.bf16.mxu0 %v2156_v3  ;;  %v2215_v2 = vld [vmem:[%s2306_s22 + $0x398] sm:$0xff]   ;;  %v2216_v3 = vld [vmem:[%s2306_s22 + $0x360] sm:$0xff]  }
  0x55   : > { %1971 = vmatprep.subr.bf16.mxu1 %v2157_v4  ;;  %v2217_v4 = vld [vmem:[%s2306_s22 + $0x3e0] sm:$0xff]  }
  0x57   : > { %1950 = vmatpush3.bf16.msra.mxu0 %v2158_v5  ;;  %v2218_v5 = vld [vmem:[%s2306_s22 + $0x320] sm:$0xff]  }
  0x58   : > { %1972 = vmatpush3.bf16.msra.mxu1 %v2159_v6  ;;  %1979 = vmatprep.subr.bf16.mxu0 %v2164_v13  ;;  %v2219_v6 = vld [vmem:[%s2306_s22 + $0x3a0] sm:$0xff]   ;;  %v2226_v13 = vld [vmem:[%s2306_s22 + $0x330] sm:$0xff]  }
  0x59   : > { %2001 = vmatprep.subr.bf16.mxu1 %v2165_v14  ;;  %v2227_v14 = vld [vmem:[%s2306_s22 + $0x3b0] sm:$0xff]  }
  0x5a   : > { %1426 = vmatmul.mubr.bf16.vlgmr.msra.gmra.mrb[4].mxu0 %v1747_v8  ;;  %v2221_v8 = vld [vmem:[%s2306_s22 + $0x3e8] sm:$0xff]  }
  0x5b   : > { %1466 = vmatmul.mubr.bf16.vlgmr.msra.gmra.mrb[4].mxu1 %v1749_v11  ;;  %1980 = vmatpush3.bf16.msra.mxu0 %v2166_v15  ;;  %v2224_v11 = vld [vmem:[%s2306_s22 + $0x370] sm:$0xff]   ;;  %v2228_v15 = vld [vmem:[%s2306_s22 + $0x378] sm:$0xff]  }
  0x5c   : > { %2002 = vmatpush3.bf16.msra.mxu1 %v2167_v16  ;;  %1981 = vmatprep.subr.bf16.mxu0 %v2168_v17  ;;  %v2229_v16 = vld [vmem:[%s2306_s22 + $0x3f8] sm:$0xff]  }
  0x5d   : > { %2003 = vmatprep.subr.bf16.mxu1 %v2169_v18  ;;  %1505 = vmatprep.mubr.bf16.mxu0 %v1752_v48  ;;  %v2230_v17 = vld [vmem:[%s2306_s22 + $0x338] sm:$0xff]  }
  0x5e   : > { %1545 = vmatprep.mubr.bf16.mxu1 %v1754_v50  ;;  %v2231_v18 = vld [vmem:[%s2306_s22 + $0x3b8] sm:$0xff]  }
  0x5f   : > { %1982 = vmatpush3.bf16.msra.mxu0 %v2170_v19  ;;  %v231_v19 = vld [vmem:[%s2301_s18 + $0x30] sm:$0xff] }
  0x60   : > { %2004 = vmatpush3.bf16.msra.mxu1 %v2171_v20  ;;  %1983 = vmatprep.subr.bf16.mxu0 %v2172_v21  ;;  %v232_v20 = vld [vmem:[%s2301_s18 + $0x38] sm:$0xff]  ;;  %v1755_v21 = vcombine.low %v231_v19, %v231_v19 }
  0x61   : > { %2005 = vmatprep.subr.bf16.mxu1 %v2173_v22  ;;  %v1756_v22 = vcombine.high %v231_v19, %v231_v19 }
  0x63   : > { %1984 = vmatpush3.bf16.msra.mxu0 %v2174_v23  ;;  %v1757_v23 = vcombine.low %v232_v20, %v232_v20 }
  0x64   : > { %2006 = vmatpush3.bf16.msra.mxu1 %v2175_v24  ;;  %1985 = vmatprep.subr.bf16.mxu0 %v2176_v25  ;;  %v1758_v24 = vcombine.high %v232_v20, %v232_v20 }
  0x65   : > { %2007 = vmatprep.subr.bf16.mxu1 %v2177_v26 }
  0x67   : > { %1986 = vmatpush3.bf16.msra.mxu0 %v2178_v27 }
  0x68   : > { %2008 = vmatpush3.bf16.msra.mxu1 %v2179_v28  ;;  %1987 = vmatprep.subr.bf16.mxu0 %v2180_v29 }
  0x69   : > { %2009 = vmatprep.subr.bf16.mxu1 %v2181_v30 }
  0x6b   : > { %1988 = vmatpush3.bf16.msra.mxu0 %v2182_v31 }
  0x6c   : > { %2010 = vmatpush3.bf16.msra.mxu1 %v2183_v32  ;;  %1989 = vmatprep.subr.bf16.mxu0 %v2184_v33 }
  0x6d   : > { %2011 = vmatprep.subr.bf16.mxu1 %v2185_v34 }
  0x6f   : > { %1990 = vmatpush3.bf16.msra.mxu0 %v2186_v35 }
  0x70   : > { %2012 = vmatpush3.bf16.msra.mxu1 %v2187_v36  ;;  %1991 = vmatprep.subr.bf16.mxu0 %v2188_v37 }
  0x71   : > { %2013 = vmatprep.subr.bf16.mxu1 %v2189_v38 }
  0x73   : > { %1992 = vmatpush3.bf16.msra.mxu0 %v2190_v39 }
  0x74   : > { %2014 = vmatpush3.bf16.msra.mxu1 %v2191_v40  ;;  %1993 = vmatprep.subr.bf16.mxu0 %v2192_v41 }
  0x75   : > { %2015 = vmatprep.subr.bf16.mxu1 %v2193_v42 }
  0x77   : > { %1994 = vmatpush3.bf16.msra.mxu0 %v2194_v43 }
  0x78   : > { %2016 = vmatpush3.bf16.msra.mxu1 %v2195_v44  ;;  %2023 = vmatprep.subr.bf16.mxu0 %v2200_v51 }
  0x79   : > { %2045 = vmatprep.subr.bf16.mxu1 %v2201_v52 }
  0x7a   : > { %1506 = vmatmul.mubr.bf16.vlgmr.msra.gmra.mrb[8].mxu0 %v1751_v47 }
  0x7b   : > { %1546 = vmatmul.mubr.bf16.vlgmr.msra.gmra.mrb[8].mxu1 %v1753_v49  ;;  %2024 = vmatpush3.bf16.msra.mxu0 %v2202_v53 }
  0x7c   : > { %2046 = vmatpush3.bf16.msra.mxu1 %v2203_v54  ;;  %2025 = vmatprep.subr.bf16.mxu0 %v2204_v55 }
  0x7d   : > { %2047 = vmatprep.subr.bf16.mxu1 %v2205_v56  ;;  %1585 = vmatprep.mubr.bf16.mxu0 %v1756_v22 }
  0x7e   : > { %1625 = vmatprep.mubr.bf16.mxu1 %v1758_v24 }
  0x7f   : > { %2026 = vmatpush3.bf16.msra.mxu0 %v2206_v57 }
  0x80   : > { %2048 = vmatpush3.bf16.msra.mxu1 %v2207_v58  ;;  %2027 = vmatprep.subr.bf16.mxu0 %v2208_v59 }
  0x81   : > { %2049 = vmatprep.subr.bf16.mxu1 %v2209_v60 }
  0x83   : > { %2028 = vmatpush3.bf16.msra.mxu0 %v2210_v61 }
  0x84   : > { %2050 = vmatpush3.bf16.msra.mxu1 %v2211_v62  ;;  %2029 = vmatprep.subr.bf16.mxu0 %v2212_v63 }
  0x85   : > { %2051 = vmatprep.subr.bf16.mxu1 %v2213_v0 }
  0x87   : > { %2030 = vmatpush3.bf16.msra.mxu0 %v2214_v1 }
  0x88   : > { %2052 = vmatpush3.bf16.msra.mxu1 %v2215_v2  ;;  %2031 = vmatprep.subr.bf16.mxu0 %v2216_v3 }
  0x89   : > { %2053 = vmatprep.subr.bf16.mxu1 %v2217_v4 }
  0x8b   : > { %2032 = vmatpush3.bf16.msra.mxu0 %v2218_v5 }
  0x8c   : > { %2054 = vmatpush3.bf16.msra.mxu1 %v2219_v6  ;;  %2033 = vmatprep.subr.bf16.mxu0 %v2220_v7  ;;  %v224_v7 = vld [vmem:[#allocation2] sm:$0xff] }
  0x8d   : > { %2055 = vmatprep.subr.bf16.mxu1 %v2221_v8 }
  0x8f   : > { %2034 = vmatpush3.bf16.msra.mxu0 %v2222_v9 }
  0x90   : > { %2056 = vmatpush3.bf16.msra.mxu1 %v2223_v10  ;;  %2035 = vmatprep.subr.bf16.mxu0 %v2224_v11 }
  0x91   : > { %2057 = vmatprep.subr.bf16.mxu1 %v2225_v12 }
  0x93   : > { %2036 = vmatpush3.bf16.msra.mxu0 %v2226_v13 }
  0x94   : > { %2058 = vmatpush3.bf16.msra.mxu1 %v2227_v14  ;;  %2037 = vmatprep.subr.bf16.mxu0 %v2228_v15 }
  0x95   : > { %2059 = vmatprep.subr.bf16.mxu1 %v2229_v16 }
  0x97   : > { %2038 = vmatpush3.bf16.msra.mxu0 %v2230_v17 }
  0x98   : > { %2060 = vmatpush3.bf16.msra.mxu1 %v2231_v18 }
  0x9a   : > { %1586 = vmatmul.mubr.bf16.vlgmr.msra.gmra.mrb[12].mxu0 %v1755_v21 }
  0x9b   : > { %1626 = vmatmul.mubr.bf16.vlgmr.msra.gmra.mrb[12].mxu1 %v1757_v23 }
 0x10d   : > { %v1907_v25 = vpop.f32.mrb[0].mxu0 }
 0x10e   : > { %v1929_v26 = vpop.f32.mrb[0].mxu1  ;;  %v1908_v27 = vpop.f32.mrb[1].mxu0 }
 0x10f   : > { %v1930_v28 = vpop.f32.mrb[1].mxu1  ;;  %v1909_v29 = vadd.f32 %v1908_v27, %v1907_v25  ;;  %v1910_v31 = vpop.f32.mrb[2].mxu0 }
 0x110   : > { %v1931_v30 = vadd.f32 %v1930_v28, %v1929_v26  ;;  %v1932_v32 = vpop.f32.mrb[2].mxu1  ;;  %v1911_v33 = vpop.f32.mrb[3].mxu0 }
 0x111   : > { %v1933_v34 = vpop.f32.mrb[3].mxu1 }
 0x112   : > { %v1388_v35 = vadd.f32 %v1931_v30, %v1909_v29 }
 0x12d   : > { %v1951_v36 = vpop.f32.mrb[4].mxu0 }
 0x12e   : > { %v1973_v37 = vpop.f32.mrb[4].mxu1  ;;  %v1952_v38 = vpop.f32.mrb[5].mxu0 }
 0x12f   : > { %v1974_v39 = vpop.f32.mrb[5].mxu1  ;;  %v1953_v40 = vadd.f32 %v1952_v38, %v1951_v36  ;;  %v1954_v42 = vpop.f32.mrb[6].mxu0 }
 0x130   : > { %v1975_v41 = vadd.f32 %v1974_v39, %v1973_v37  ;;  %v1976_v43 = vpop.f32.mrb[6].mxu1  ;;  %v1955_v44 = vpop.f32.mrb[7].mxu0 }
 0x131   : > { %v1977_v45 = vpop.f32.mrb[7].mxu1  ;;  %v1428_v46 = vadd.f32 %v1953_v40, %v1388_v35 }
 0x133   : > { %v1468_v47 = vadd.f32 %v1975_v41, %v1428_v46 }
 0x14d   : > { %v1995_v48 = vpop.f32.mrb[8].mxu0 }
 0x14e   : > { %v2017_v49 = vpop.f32.mrb[8].mxu1  ;;  %v1996_v50 = vpop.f32.mrb[9].mxu0 }
 0x14f   : > { %v1997_v51 = vadd.f32 %v1996_v50, %v1995_v48  ;;  %v2018_v52 = vpop.f32.mrb[9].mxu1  ;;  %v1998_v53 = vpop.f32.mrb[10].mxu0 }
 0x150   : > { %v2019_v54 = vadd.f32 %v2018_v52, %v2017_v49  ;;  %v2020_v55 = vpop.f32.mrb[10].mxu1  ;;  %v1999_v56 = vpop.f32.mrb[11].mxu0 }
 0x151   : > { %v1508_v57 = vadd.f32 %v1997_v51, %v1468_v47  ;;  %v2021_v58 = vpop.f32.mrb[11].mxu1 }
 0x153   : > { %v1548_v59 = vadd.f32 %v2019_v54, %v1508_v57 }
 0x16d   : > { %v2039_v60 = vpop.f32.mrb[12].mxu0 }
 0x16e   : > { %v2061_v61 = vpop.f32.mrb[12].mxu1  ;;  %v2040_v62 = vpop.f32.mrb[13].mxu0 }
 0x16f   : > { %v2041_v63 = vadd.f32 %v2040_v62, %v2039_v60  ;;  %v2062_v0 = vpop.f32.mrb[13].mxu1  ;;  %v2042_v1 = vpop.f32.mrb[14].mxu0 }
 0x170   : > { %v2063_v2 = vadd.f32 %v2062_v0, %v2061_v61  ;;  %v2064_v3 = vpop.f32.mrb[14].mxu1  ;;  %v2043_v4 = vpop.f32.mrb[15].mxu0 }
 0x171   : > { %v1588_v5 = vadd.f32 %v2041_v63, %v1548_v59  ;;  %v2065_v6 = vpop.f32.mrb[15].mxu1  ;;  %1638 = sbr.rel (%p1887_p7) target bundleno = 384 (0x180), region = 36 }
 0x173   : > { %v1628_v8 = vadd.f32 %v2063_v2, %v1588_v5 }
 0x175   : > { %v1633_v9 = vadd.f32 %v1628_v8, %v224_v7 }
 0x177   : > { %1634 = vst [vmem:[#allocation2] sm:$0xff] %v1633_v9 }
 0x17e   : > { %v1639_v10 = vld [vmem:[#allocation2] sm:$0xff] }
 0x17f   : > { %1640 = vst [vmem:[%s2460_s2] sm:$0xff] %v1639_v10 }
 0x180 PF: > { %s12_s11 = sadd.s32 1, %s2258_s11   ;;  %s2461_s9 = smov %s2254_s10 }
 0x181   : > { %p9_p8 = scmp.ge.s32.totalorder %s12_s11, 6   ;;  %s2462_s10 = smov %s2464_s12 }
 0x183   :  { %11 = sbr.rel (!%p9_p8) target bundleno = 2 (0x2), region = 69 }

// kernel: integration_forward.32
= control target key start
LH: loop header
LB: loop body
LE: loop exit
PB: predicated region body
PF: predicated region fallthrough
CT: control target
= control target key end

     0   :  { %s817_s9 = smov 0   ;;  %s819_s10 = smov 0   ;;  %s906_s0 = inlined_call_operand.vmem [shape: bf16[512,128], index: 0, kind: input, shape index: {}]   ;;  %s907_s1 = inlined_call_operand.vmem [shape: bf16[128,128], index: 1, kind: input, shape index: {}]   ;;  %s908_s2 = inlined_call_operand.vmem [shape: f32[512,128], index: 2, kind: output, shape index: {}]  }
   0x1   :  { %s821_s11 = smov 0  }
   0x2 LB: > { %s31_s12 = sadd.s32 1, %s796_s10  ;;  %p651_p0 = scmp.ge.s32.totalorder %s800_s11, 1  ;;  %s800_s11 = sphi %s821_s11, %s12_s11   ;;  %s796_s10 = sphi %s819_s10, %s910_s10   ;;  %s792_s9 = sphi %s817_s9, %s909_s9  }
   0x3   : > { %p33_p1 = scmp.ge.s32.totalorder %s31_s12, 4  ;;  %p155_p2 = scmp.lt.s32.totalorder %s800_s11, 5 }
   0x5   : > { %s912_s12 = smov (%p33_p1, %s31_s12), 0  ;;  %p156_p3 = pnand %p651_p0, %p155_p2 }
   0x6   : > { %v762_v0 = vld [vmem:[%s907_s1] sm:$0xff] (!%p156_p3)   ;;  %s652_s15 = sshll.u32 (!%p156_p3), %s792_s9, 4  ;;  %v763_v1 = vld [vmem:[%s907_s1 + $0x8] sm:$0xff] (!%p156_p3)   ;;  %v764_v2 = vld [vmem:[%s907_s1 + $0x10] sm:$0xff] (!%p156_p3)  }
   0x7   : > { %159 = sbr.rel (%p156_p3) target bundleno = 263 (0x107), region = 28  ;;  %p192_p4 = scmp.lt.s32.totalorder (!%p156_p3), %s652_s15, 63  ;;  %690 = vmatprep.subr.bf16.mxu0 (!%p156_p3), %v762_v0  ;;  %722 = vmatprep.subr.bf16.mxu1 (!%p156_p3), %v762_v0  ;;  %v765_v3 = vld [vmem:[%s907_s1 + $0x18] sm:$0xff] (!%p156_p3)   ;;  %v766_v6 = vld [vmem:[%s907_s1 + $0x20] sm:$0xff] (!%p156_p3)   ;;  %v767_v7 = vld [vmem:[%s907_s1 + $0x28] sm:$0xff] (!%p156_p3)  }
   0x8   : > { %691 = vmatpush3.bf16.msra.mxu0 (!%p156_p3), %v762_v0  ;;  %730 = vmatpush3.bf16.msra.mxu1 (!%p156_p3), %v762_v0  ;;  %v768_v8 = vld [vmem:[%s907_s1 + $0x30] sm:$0xff] (!%p156_p3)   ;;  %v769_v9 = vld [vmem:[%s907_s1 + $0x38] sm:$0xff] (!%p156_p3)  }
   0x9   : > { %692 = vmatprep.subr.bf16.mxu0 (!%p156_p3), %v763_v1  ;;  %723 = vmatprep.subr.bf16.mxu1 (!%p156_p3), %v763_v1 }
   0xc   : > { %693 = vmatpush3.bf16.msra.mxu0 (!%p156_p3), %v763_v1  ;;  %731 = vmatpush3.bf16.msra.mxu1 (!%p156_p3), %v763_v1 }
   0xd   : > { %694 = vmatprep.subr.bf16.mxu0 (!%p156_p3), %v764_v2  ;;  %724 = vmatprep.subr.bf16.mxu1 (!%p156_p3), %v764_v2 }
   0xe   : > { %s914_s15 = smov (!%p192_p4, %s652_s15), 63 }
   0xf   : > { %s653_s20 = sshll.u32 %s914_s15, 2  ;;  %s655_s6 = sshll.u32 %s914_s15, 3 }
  0x10   : > { %s850_s23 = scalar_lea.vmem %s906_s0, %s653_s20  ;;  %695 = vmatpush3.bf16.msra.mxu0 %v764_v2  ;;  %732 = vmatpush3.bf16.msra.mxu1 %v764_v2  ;;  %s879_s9 = scalar_lea.vmem %s908_s2, %s655_s6 }
  0x11   : > { %v770_v4 = vld [vmem:[%s850_s23] sm:$0xff]   ;;  %696 = vmatprep.subr.bf16.mxu0 %v765_v3  ;;  %725 = vmatprep.subr.bf16.mxu1 %v765_v3  ;;  %v772_v10 = vld [vmem:[%s850_s23 + $0x8] sm:$0xff]   ;;  %v774_v12 = vld [vmem:[%s850_s23 + $0x10] sm:$0xff]  }
  0x12   : > { %v771_v5 = vld [vmem:[%s850_s23 + $0x20] sm:$0xff]   ;;  %706 = vmatprep.mubr.bf16.mxu0 %v770_v4  ;;  %v773_v11 = vld [vmem:[%s850_s23 + $0x28] sm:$0xff]   ;;  %v775_v13 = vld [vmem:[%s850_s23 + $0x30] sm:$0xff]  }
  0x13   : > { %714 = vmatprep.mubr.bf16.mxu1 %v771_v5  ;;  %v776_v14 = vld [vmem:[%s850_s23 + $0x18] sm:$0xff]  }
  0x14   : > { %697 = vmatpush3.bf16.msra.mxu0 %v765_v3  ;;  %733 = vmatpush3.bf16.msra.mxu1 %v765_v3  ;;  %v777_v15 = vld [vmem:[%s850_s23 + $0x38] sm:$0xff]  }
  0x15   : > { %698 = vmatprep.subr.bf16.mxu0 %v766_v6  ;;  %726 = vmatprep.subr.bf16.mxu1 %v766_v6 }
  0x18   : > { %699 = vmatpush3.bf16.msra.mxu0 %v766_v6  ;;  %734 = vmatpush3.bf16.msra.mxu1 %v766_v6 }
  0x19   : > { %700 = vmatprep.subr.bf16.mxu0 %v767_v7  ;;  %727 = vmatprep.subr.bf16.mxu1 %v767_v7 }
  0x1c   : > { %701 = vmatpush3.bf16.msra.mxu0 %v767_v7  ;;  %735 = vmatpush3.bf16.msra.mxu1 %v767_v7 }
  0x1d   : > { %702 = vmatprep.subr.bf16.mxu0 %v768_v8  ;;  %728 = vmatprep.subr.bf16.mxu1 %v768_v8 }
  0x20   : > { %703 = vmatpush3.bf16.msra.mxu0 %v768_v8  ;;  %736 = vmatpush3.bf16.msra.mxu1 %v768_v8 }
  0x21   : > { %704 = vmatprep.subr.bf16.mxu0 %v769_v9  ;;  %729 = vmatprep.subr.bf16.mxu1 %v769_v9 }
  0x24   : > { %705 = vmatpush3.bf16.msra.mxu0 %v769_v9  ;;  %737 = vmatpush3.bf16.msra.mxu1 %v769_v9 }
  0x27   : > { %707 = vmatmul.mubr.bf16.vlgmr.msra.gmra.mrb[0].mxu0 %v772_v10  ;;  %715 = vmatmul.mubr.bf16.vlgmr.msra.gmra.mrb[0].mxu1 %v773_v11 }
  0x28   : > { %710 = vmatprep.mubr.bf16.mxu0 %v774_v12  ;;  %718 = vmatprep.mubr.bf16.mxu1 %v775_v13 }
  0x2f   : > { %711 = vmatmul.mubr.bf16.gmra.mrb[4].mxu0 %v776_v14  ;;  %719 = vmatmul.mubr.bf16.gmra.mrb[4].mxu1 %v777_v15 }
  0xfa   : > { %v708_v16 = vpop.f32.mrb[0].mxu0  ;;  %v716_v17 = vpop.f32.mrb[0].mxu1 }
  0xfb   : > { %533 = vst [vmem:[%s879_s9 + $0x10] sm:$0xff] %v708_v16  ;;  %541 = vst [vmem:[%s879_s9 + $0x50] sm:$0xff] %v716_v17  ;;  %v417_v18 = vpop.f32.mrb[1].mxu0  ;;  %v449_v19 = vpop.f32.mrb[1].mxu1 }
  0xfc   : > { %531 = vst [vmem:[%s879_s9] sm:$0xff] %v417_v18  ;;  %539 = vst [vmem:[%s879_s9 + $0x40] sm:$0xff] %v449_v19  ;;  %v709_v20 = vpop.f32.mrb[2].mxu0  ;;  %v717_v21 = vpop.f32.mrb[2].mxu1 }
  0xfd   : > { %534 = vst [vmem:[%s879_s9 + $0x18] sm:$0xff] %v709_v20  ;;  %542 = vst [vmem:[%s879_s9 + $0x58] sm:$0xff] %v717_v21  ;;  %v420_v22 = vpop.f32.mrb[3].mxu0  ;;  %v452_v23 = vpop.f32.mrb[3].mxu1 }
  0xfe   : > { %532 = vst [vmem:[%s879_s9 + $0x8] sm:$0xff] %v420_v22  ;;  %540 = vst [vmem:[%s879_s9 + $0x48] sm:$0xff] %v452_v23 }
 0x102   : > { %v712_v24 = vpop.f32.mrb[4].mxu0  ;;  %v720_v25 = vpop.f32.mrb[4].mxu1 }
 0x103   : > { %537 = vst [vmem:[%s879_s9 + $0x30] sm:$0xff] %v712_v24  ;;  %545 = vst [vmem:[%s879_s9 + $0x70] sm:$0xff] %v720_v25  ;;  %v433_v26 = vpop.f32.mrb[5].mxu0  ;;  %v465_v27 = vpop.f32.mrb[5].mxu1 }
 0x104   : > { %535 = vst [vmem:[%s879_s9 + $0x20] sm:$0xff] %v433_v26  ;;  %543 = vst [vmem:[%s879_s9 + $0x60] sm:$0xff] %v465_v27  ;;  %v713_v28 = vpop.f32.mrb[6].mxu0  ;;  %v721_v29 = vpop.f32.mrb[6].mxu1 }
 0x105   : > { %538 = vst [vmem:[%s879_s9 + $0x38] sm:$0xff] %v713_v28  ;;  %546 = vst [vmem:[%s879_s9 + $0x78] sm:$0xff] %v721_v29  ;;  %v436_v30 = vpop.f32.mrb[7].mxu0  ;;  %v468_v31 = vpop.f32.mrb[7].mxu1 }
 0x106   : > { %536 = vst [vmem:[%s879_s9 + $0x28] sm:$0xff] %v436_v30  ;;  %544 = vst [vmem:[%s879_s9 + $0x68] sm:$0xff] %v468_v31 }
 0x107 PF: > { %s12_s11 = sadd.s32 1, %s800_s11   ;;  %s909_s9 = smov %s796_s10 }
 0x108   : > { %p9_p5 = scmp.ge.s32.totalorder %s12_s11, 6   ;;  %s910_s10 = smov %s912_s12 }
 0x10a   :  { %11 = sbr.rel (!%p9_p5) target bundleno = 2 (0x2), region = 69 }

// kernel: integration_forward.33
= control target key start
LH: loop header
LB: loop body
LE: loop exit
PB: predicated region body
PF: predicated region fallthrough
CT: control target
= control target key end

     0   :  { %s1207_s9 = smov 0   ;;  %s1209_s10 = smov 0   ;;  %s1483_s0 = inlined_call_operand.vmem [shape: bf16[512,128], index: 0, kind: input, shape index: {}]   ;;  %s1484_s1 = inlined_call_operand.vmem [shape: bf16[128,1280], index: 1, kind: input, shape index: {}]   ;;  %s1485_s2 = inlined_call_operand.vmem [shape: f32[512,1280], index: 2, kind: output, shape index: {}]  }
   0x1   :  { %s1211_s11 = smov 0   ;;  %s1213_s12 = smov 0  }
   0x2   :  { %s1215_s13 = smov 0   ;;  %s1217_s14 = smov 0  }
   0x3   :  { %s1219_s15 = smov 0   ;;  %s1221_s16 = smov 0  }
   0x4   :  { %s1223_s17 = smov 0  }
   0x5 LB: > { %s953_s18 = sadd.s32 4294967295, %s1189_s17   ;;  %s27_s19 = sadd.s32 1, %s1181_s15  ;;  %s1189_s17 = sphi %s1223_s17, %s12_s17   ;;  %s1185_s16 = sphi %s1221_s16, %s1494_s16   ;;  %s1181_s15 = sphi %s1219_s15, %s1493_s15   ;;  %s1177_s14 = sphi %s1217_s14, %s1492_s14   ;;  %s1173_s13 = sphi %s1215_s13, %s1491_s13   ;;  %s1169_s12 = sphi %s1213_s12, %s1490_s12   ;;  %s1165_s11 = sphi %s1211_s11, %s1489_s11   ;;  %s1161_s10 = sphi %s1209_s10, %s1488_s10   ;;  %s1157_s9 = sphi %s1207_s9, %s1487_s9  }
   0x6   : > { %p29_p0 = scmp.ge.s32.totalorder %s27_s19, 5  ;;  %s31_s20 = sadd.s32 1, %s1185_s16 }
   0x7   : > { %s68_s21 = sadd.s32 1, %s1169_s12  ;;  %p75_p1 = scmp.ne.s32.totalorder %s1169_s12, %s1165_s11 }
   0x8   : > { %s1496_s19 = smov (%p29_p0, %s27_s19), 0  ;;  %s1498_s20 = smov (!%p29_p0, %s31_s20), %s1185_s16 }
   0x9   : > { %s64_s22 = ssub.s32 %s1181_s15, %s1496_s19  ;;  %p76_p2 = scmp.eq.s32.totalorder %s1189_s17, 0 }
   0xa   : > { %p33_p3 = scmp.ge.s32.totalorder %s1498_s20, 4  ;;  %p66_p4 = scmp.eq.s32.totalorder %s64_s22, 0 }
   0xb   : > { %p77_p5 = por %p76_p2, %p75_p1  ;;  %s96_s23 = sadd.s32 1, %s1161_s10 }
   0xc   : > { %s1500_s20 = smov (%p33_p3, %s1498_s20), 0  ;;  %p106_p6 = scmp.ne.s32.totalorder %s1161_s10, %s1157_s9 }
   0xd   : > { %s1268_s24 = scalar_select %p66_p4, %s1169_s12, %s68_s21  }
   0xe   : > { %s91_s25 = ssub.s32 %s1185_s16, %s1500_s20  ;;  %p107_p7 = scmp.eq.s32.totalorder %s953_s18, 19 }
   0xf   : > { %s93_s26 = sor.u32 %s91_s25, %s64_s22  ;;  %p956_p10 = scmp.ge.s32.totalorder %s1189_s17, 20 }
  0x10   : > { %p94_p8 = scmp.eq.s32.totalorder %s93_s26, 0  ;;  %p1274_p9 = por %p107_p7, %p106_p6 }
  0x11   : > { %129 = sbr.rel (%p956_p10) target bundleno = 36 (0x24), region = 16 }
  0x12   : > { %s1279_s28 = scalar_select %p94_p8, %s1161_s10, %s96_s23  }
  0x18   : > { %144 = sbr.rel (!%p77_p5) target bundleno = 36 (0x24), region = 24  ;;  %s146_s29 = sand.u32 (%p77_p5), 1, %s1169_s12  }
  0x19   : > { %s996_s30 = sshll.u32 (%p77_p5), %s1181_s15, 3  ;;  %s957_s3 = sshll.u32 (%p77_p5), %s146_s29, 7 }
  0x1a   : > { %s1287_s6 = scalar_lea.vmem (%p77_p5), %s1484_s1, %s996_s30  ;;  %s148_s7 = scalar_lea.vmem (%p77_p5), [#allocation3], %s957_s3 }
  0x1b   : > { %v212_v0 = vld [vmem:[%s1287_s6] sm:$0xff] (%p77_p5)  ;;  %v214_v1 = vld [vmem:[%s1287_s6 + $0x28] sm:$0xff] (%p77_p5)  ;;  %v216_v2 = vld [vmem:[%s1287_s6 + $0x50] sm:$0xff] (%p77_p5) }
  0x1c   : > { %213 = vst [vmem:[%s148_s7] sm:$0xff] (%p77_p5), %v212_v0  ;;  %215 = vst [vmem:[%s148_s7 + $0x8] sm:$0xff] (%p77_p5), %v214_v1  ;;  %v218_v3 = vld [vmem:[%s1287_s6 + $0x78] sm:$0xff] (%p77_p5)  ;;  %v220_v4 = vld [vmem:[%s1287_s6 + $0xa0] sm:$0xff] (%p77_p5) }
  0x1d   : > { %217 = vst [vmem:[%s148_s7 + $0x10] sm:$0xff] (%p77_p5), %v216_v2  ;;  %v222_v5 = vld [vmem:[%s1287_s6 + $0xc8] sm:$0xff] (%p77_p5)  ;;  %219 = vst [vmem:[%s148_s7 + $0x18] sm:$0xff] (%p77_p5), %v218_v3  ;;  %v224_v6 = vld [vmem:[%s1287_s6 + $0xf0] sm:$0xff] (%p77_p5) }
  0x1e   : > { %221 = vst [vmem:[%s148_s7 + $0x20] sm:$0xff] (%p77_p5), %v220_v4  ;;  %223 = vst [vmem:[%s148_s7 + $0x28] sm:$0xff] (%p77_p5), %v222_v5  ;;  %v226_v7 = vld [vmem:[%s1287_s6 + $0x118] sm:$0xff] (%p77_p5)  ;;  %v228_v8 = vld [vmem:[%s1287_s6 + $0x140] sm:$0xff] (%p77_p5) }
  0x1f   : > { %225 = vst [vmem:[%s148_s7 + $0x30] sm:$0xff] %v224_v6  ;;  %227 = vst [vmem:[%s148_s7 + $0x38] sm:$0xff] %v226_v7  ;;  %v230_v9 = vld [vmem:[%s1287_s6 + $0x168] sm:$0xff]  ;;  %v232_v10 = vld [vmem:[%s1287_s6 + $0x190] sm:$0xff] }
  0x20   : > { %229 = vst [vmem:[%s148_s7 + $0x40] sm:$0xff] %v228_v8  ;;  %v234_v11 = vld [vmem:[%s1287_s6 + $0x1b8] sm:$0xff]  ;;  %231 = vst [vmem:[%s148_s7 + $0x48] sm:$0xff] %v230_v9  ;;  %v236_v12 = vld [vmem:[%s1287_s6 + $0x1e0] sm:$0xff] }
  0x21   : > { %233 = vst [vmem:[%s148_s7 + $0x50] sm:$0xff] %v232_v10  ;;  %235 = vst [vmem:[%s148_s7 + $0x58] sm:$0xff] %v234_v11  ;;  %v238_v13 = vld [vmem:[%s1287_s6 + $0x208] sm:$0xff]  ;;  %v240_v14 = vld [vmem:[%s1287_s6 + $0x230] sm:$0xff] }
  0x22   : > { %237 = vst [vmem:[%s148_s7 + $0x60] sm:$0xff] %v236_v12  ;;  %239 = vst [vmem:[%s148_s7 + $0x68] sm:$0xff] %v238_v13  ;;  %v242_v15 = vld [vmem:[%s1287_s6 + $0x258] sm:$0xff] }
  0x23   : > { %241 = vst [vmem:[%s148_s7 + $0x70] sm:$0xff] %v240_v14  ;;  %243 = vst [vmem:[%s148_s7 + $0x78] sm:$0xff] %v242_v15 }
  0x24 PF: > { %p960_p11 = scmp.ge.s32.totalorder %s1189_s17, 1  ;;  %p248_p12 = scmp.lt.s32.totalorder %s1189_s17, 21 }
  0x26   : > { %p249_p13 = pnand %p960_p11, %p248_p12 }
  0x27   : > { %s255_s8 = sand.u32 (!%p249_p13), 1, %s1165_s11   ;;  %s963_s18 = sshll.u32 (!%p249_p13), %s1177_s14, 4  ;;  %v1191_v16 = vmov (!%p249_p13), 0  }
  0x28   : > { %252 = sbr.rel (%p249_p13) target bundleno = 324 (0x144), region = 62  ;;  %s961_s21 = sshll.u32 (!%p249_p13), %s255_s8, 7  ;;  %557 = vmatprep.mubr.bf16.mxu0 (!%p249_p13), %v1191_v16  ;;  %597 = vmatprep.mubr.bf16.mxu1 (!%p249_p13), %v1191_v16 }
  0x29   : > { %p284_p0 = scmp.lt.s32.totalorder (!%p249_p13), %s963_s18, 63  ;;  %s1311_s22 = scalar_lea.vmem (!%p249_p13), [#allocation3], %s961_s21 }
  0x2a   : > { %v1087_v17 = vld [vmem:[%s1311_s22 + $0x4] ss:$8 sps:$4 sm:$0xff] (!%p249_p13)   ;;  %v1089_v18 = vld [vmem:[%s1311_s22] ss:$8 sps:$4 sm:$0xff] (!%p249_p13)   ;;  %v1090_v19 = vld [vmem:[%s1311_s22 + $0x14] ss:$8 sps:$4 sm:$0xff] (!%p249_p13)  }
  0x2b   : > { %525 = vmatprep.subr.bf16.mxu0 (!%p249_p13), %v1087_v17  ;;  %997 = vmatprep.subr.bf16.mxu1 (!%p249_p13), %v1087_v17  ;;  %v1092_v20 = vld [vmem:[%s1311_s22 + $0x10] ss:$8 sps:$4 sm:$0xff] (!%p249_p13)   ;;  %v1093_v21 = vld [vmem:[%s1311_s22 + $0x24] ss:$8 sps:$4 sm:$0xff] (!%p249_p13)   ;;  %v1095_v22 = vld [vmem:[%s1311_s22 + $0x20] ss:$8 sps:$4 sm:$0xff] (!%p249_p13)  }
  0x2c   : > { %526 = vmatpush1.bf16.msra.mxu0 (!%p249_p13), %v1089_v18  ;;  %1005 = vmatpush1.bf16.msra.mxu1 (!%p249_p13), %v1089_v18  ;;  %v1096_v23 = vld [vmem:[%s1311_s22 + $0x34] ss:$8 sps:$4 sm:$0xff] (!%p249_p13)   ;;  %v1098_v24 = vld [vmem:[%s1311_s22 + $0x30] ss:$8 sps:$4 sm:$0xff] (!%p249_p13)   ;;  %v1099_v25 = vld [vmem:[%s1311_s22 + $0x44] ss:$8 sps:$4 sm:$0xff] (!%p249_p13)  }
  0x2d   : > { %527 = vmatprep.subr.bf16.mxu0 (!%p249_p13), %v1090_v19  ;;  %998 = vmatprep.subr.bf16.mxu1 (!%p249_p13), %v1090_v19  ;;  %v1101_v26 = vld [vmem:[%s1311_s22 + $0x40] ss:$8 sps:$4 sm:$0xff] (!%p249_p13)   ;;  %v1102_v27 = vld [vmem:[%s1311_s22 + $0x54] ss:$8 sps:$4 sm:$0xff] (!%p249_p13)   ;;  %v1104_v28 = vld [vmem:[%s1311_s22 + $0x50] ss:$8 sps:$4 sm:$0xff] (!%p249_p13)  }
  0x2e   : > { %v1105_v29 = vld [vmem:[%s1311_s22 + $0x64] ss:$8 sps:$4 sm:$0xff] (!%p249_p13)   ;;  %v1107_v30 = vld [vmem:[%s1311_s22 + $0x60] ss:$8 sps:$4 sm:$0xff] (!%p249_p13)   ;;  %v1108_v31 = vld [vmem:[%s1311_s22 + $0x74] ss:$8 sps:$4 sm:$0xff] (!%p249_p13)  }
  0x2f   : > { %s1502_s18 = smov (!%p284_p0, %s963_s18), 63  ;;  %v1110_v32 = vld [vmem:[%s1311_s22 + $0x70] ss:$8 sps:$4 sm:$0xff]   ;;  %s280_s29 = sand.u32 1, %s1157_s9  }
  0x30   : > { %s964_s11 = sshll.u32 %s1502_s18, 2  ;;  %528 = vmatpush1.bf16.msra.mxu0 %v1092_v20  ;;  %1006 = vmatpush1.bf16.msra.mxu1 %v1092_v20  ;;  %s962_s30 = sshll.u32 %s280_s29, 8 }
  0x31   : > { %529 = vmatprep.subr.bf16.mxu0 %v1093_v21  ;;  %999 = vmatprep.subr.bf16.mxu1 %v1093_v21  ;;  %s1323_s26 = scalar_lea.vmem %s1483_s0, %s964_s11  ;;  %s1349_s3 = scalar_lea.vmem [#allocation4], %s962_s30 }
  0x32   : > { %v1111_v33 = vld [vmem:[%s1323_s26] sm:$0xff]   ;;  %v1113_v35 = vld [vmem:[%s1323_s26 + $0x8] sm:$0xff]   ;;  %v1115_v37 = vld [vmem:[%s1323_s26 + $0x10] sm:$0xff]   ;;  %s991_s9 = sshll.u32 (%p1274_p9), %s1173_s13, 1  ;;  %s1013_s4 = smul.u32 (%p1274_p9), 160, %s1177_s14 }
  0x33   : > { %v1112_v34 = vld [vmem:[%s1323_s26 + $0x20] sm:$0xff]   ;;  %v1114_v36 = vld [vmem:[%s1323_s26 + $0x28] sm:$0xff]   ;;  %v1116_v38 = vld [vmem:[%s1323_s26 + $0x30] sm:$0xff]  }
  0x34   : > { %530 = vmatpush1.bf16.msra.mxu0 %v1095_v22  ;;  %1007 = vmatpush1.bf16.msra.mxu1 %v1095_v22  ;;  %v1117_v39 = vld [vmem:[%s1323_s26 + $0x18] sm:$0xff]   ;;  %s779_s27 = sadd.s32 (%p1274_p9), %s1013_s4, %s991_s9 }
  0x35   : > { %531 = vmatprep.subr.bf16.mxu0 %v1096_v23  ;;  %1000 = vmatprep.subr.bf16.mxu1 %v1096_v23  ;;  %v1118_v40 = vld [vmem:[%s1323_s26 + $0x38] sm:$0xff]   ;;  %s993_s5 = sshll.u32 (%p1274_p9), %s779_s27, 3 }
  0x36   : > { %s1402_s14 = scalar_lea.vmem (%p1274_p9), %s1485_s2, %s993_s5 }
  0x38   : > { %532 = vmatpush1.bf16.msra.mxu0 %v1098_v24  ;;  %1008 = vmatpush1.bf16.msra.mxu1 %v1098_v24 }
  0x39   : > { %533 = vmatprep.subr.bf16.mxu0 %v1099_v25  ;;  %1001 = vmatprep.subr.bf16.mxu1 %v1099_v25 }
  0x3c   : > { %534 = vmatpush1.bf16.msra.mxu0 %v1101_v26  ;;  %1009 = vmatpush1.bf16.msra.mxu1 %v1101_v26 }
  0x3d   : > { %535 = vmatprep.subr.bf16.mxu0 %v1102_v27  ;;  %1002 = vmatprep.subr.bf16.mxu1 %v1102_v27 }
  0x40   : > { %536 = vmatpush1.bf16.msra.mxu0 %v1104_v28  ;;  %1010 = vmatpush1.bf16.msra.mxu1 %v1104_v28 }
  0x41   : > { %537 = vmatprep.subr.bf16.mxu0 %v1105_v29  ;;  %1003 = vmatprep.subr.bf16.mxu1 %v1105_v29 }
  0x44   : > { %538 = vmatpush1.bf16.msra.mxu0 %v1107_v30  ;;  %1011 = vmatpush1.bf16.msra.mxu1 %v1107_v30 }
  0x45   : > { %539 = vmatprep.subr.bf16.mxu0 %v1108_v31  ;;  %1004 = vmatprep.subr.bf16.mxu1 %v1108_v31 }
  0x48   : > { %540 = vmatpush1.bf16.msra.mxu0 %v1110_v32  ;;  %1012 = vmatpush1.bf16.msra.mxu1 %v1110_v32 }
  0x4b   : > { %558 = vmatmul.mubr.bf16.vlgmr.msra.gmra.mrb[0].mxu0 %v1111_v33  ;;  %598 = vmatmul.mubr.bf16.vlgmr.msra.gmra.mrb[0].mxu1 %v1112_v34 }
  0x4c   : > { %567 = vmatprep.mubr.bf16.mxu0 %v1191_v16  ;;  %607 = vmatprep.mubr.bf16.mxu1 %v1191_v16 }
  0x53   : > { %568 = vmatmul.mubr.bf16.gmra.mrb[4].mxu0 %v1113_v35  ;;  %608 = vmatmul.mubr.bf16.gmra.mrb[4].mxu1 %v1114_v36 }
  0x54   : > { %577 = vmatprep.mubr.bf16.mxu0 %v1191_v16  ;;  %617 = vmatprep.mubr.bf16.mxu1 %v1191_v16 }
  0x5b   : > { %578 = vmatmul.mubr.bf16.gmra.mrb[8].mxu0 %v1115_v37  ;;  %618 = vmatmul.mubr.bf16.gmra.mrb[8].mxu1 %v1116_v38 }
  0x5c   : > { %587 = vmatprep.mubr.bf16.mxu0 %v1191_v16  ;;  %627 = vmatprep.mubr.bf16.mxu1 %v1191_v16 }
  0x63   : > { %588 = vmatmul.mubr.bf16.gmra.mrb[12].mxu0 %v1117_v39  ;;  %628 = vmatmul.mubr.bf16.gmra.mrb[12].mxu1 %v1118_v40 }
 0x11e   : > { %v559_v41 = vpop.f32.mrb[0].mxu0  ;;  %v599_v42 = vpop.f32.mrb[0].mxu1 }
 0x11f   : > { %737 = vst [vmem:[%s1349_s3] sm:$0xff] %v559_v41  ;;  %753 = vst [vmem:[%s1349_s3 + $0x80] sm:$0xff] %v599_v42  ;;  %v561_v43 = vpop.f32.mrb[1].mxu0  ;;  %v601_v44 = vpop.f32.mrb[1].mxu1 }
 0x120   : > { %738 = vst [vmem:[%s1349_s3 + $0x8] sm:$0xff] %v561_v43  ;;  %754 = vst [vmem:[%s1349_s3 + $0x88] sm:$0xff] %v601_v44  ;;  %v563_v45 = vpop.f32.mrb[2].mxu0  ;;  %v603_v46 = vpop.f32.mrb[2].mxu1 }
 0x121   : > { %739 = vst [vmem:[%s1349_s3 + $0x10] sm:$0xff] %v563_v45  ;;  %755 = vst [vmem:[%s1349_s3 + $0x90] sm:$0xff] %v603_v46  ;;  %v565_v47 = vpop.f32.mrb[3].mxu0  ;;  %v605_v48 = vpop.f32.mrb[3].mxu1 }
 0x122   : > { %740 = vst [vmem:[%s1349_s3 + $0x18] sm:$0xff] %v565_v47  ;;  %756 = vst [vmem:[%s1349_s3 + $0x98] sm:$0xff] %v605_v48 }
 0x126   : > { %v569_v49 = vpop.f32.mrb[4].mxu0  ;;  %v609_v50 = vpop.f32.mrb[4].mxu1  ;;  %v794_v9 = vld [vmem:[%s1349_s3] sm:$0xff] (%p1274_p9) }
 0x127   : > { %741 = vst [vmem:[%s1349_s3 + $0x20] sm:$0xff] %v569_v49  ;;  %757 = vst [vmem:[%s1349_s3 + $0xa0] sm:$0xff] %v609_v50  ;;  %v571_v51 = vpop.f32.mrb[5].mxu0  ;;  %v611_v52 = vpop.f32.mrb[5].mxu1  ;;  %v796_v10 = vld [vmem:[%s1349_s3 + $0x8] sm:$0xff] (%p1274_p9)  ;;  %v826_v25 = vld [vmem:[%s1349_s3 + $0x80] sm:$0xff] (%p1274_p9) }
 0x128   : > { %742 = vst [vmem:[%s1349_s3 + $0x28] sm:$0xff] %v571_v51  ;;  %758 = vst [vmem:[%s1349_s3 + $0xa8] sm:$0xff] %v611_v52  ;;  %v573_v53 = vpop.f32.mrb[6].mxu0  ;;  %v613_v54 = vpop.f32.mrb[6].mxu1  ;;  %v798_v11 = vld [vmem:[%s1349_s3 + $0x10] sm:$0xff] (%p1274_p9)  ;;  %v828_v26 = vld [vmem:[%s1349_s3 + $0x88] sm:$0xff] (%p1274_p9) }
 0x129   : > { %743 = vst [vmem:[%s1349_s3 + $0x30] sm:$0xff] %v573_v53  ;;  %759 = vst [vmem:[%s1349_s3 + $0xb0] sm:$0xff] %v613_v54  ;;  %v575_v55 = vpop.f32.mrb[7].mxu0  ;;  %v615_v56 = vpop.f32.mrb[7].mxu1  ;;  %v800_v12 = vld [vmem:[%s1349_s3 + $0x18] sm:$0xff] (%p1274_p9)  ;;  %v830_v27 = vld [vmem:[%s1349_s3 + $0x90] sm:$0xff] (%p1274_p9) }
 0x12a   : > { %744 = vst [vmem:[%s1349_s3 + $0x38] sm:$0xff] %v575_v55  ;;  %760 = vst [vmem:[%s1349_s3 + $0xb8] sm:$0xff] %v615_v56  ;;  %v832_v28 = vld [vmem:[%s1349_s3 + $0x98] sm:$0xff] (%p1274_p9) }
 0x12b   : > { %795 = vst [vmem:[%s1402_s14] sm:$0xff] (%p1274_p9), %v794_v9  ;;  %797 = vst [vmem:[%s1402_s14 + $0x8] sm:$0xff] (%p1274_p9), %v796_v10 }
 0x12c   : > { %799 = vst [vmem:[%s1402_s14 + $0x50] sm:$0xff] (%p1274_p9), %v798_v11  ;;  %801 = vst [vmem:[%s1402_s14 + $0x58] sm:$0xff] (%p1274_p9), %v800_v12 }
 0x12d   : > { %827 = vst [vmem:[%s1402_s14 + $0x280] sm:$0xff] (%p1274_p9), %v826_v25  ;;  %829 = vst [vmem:[%s1402_s14 + $0x288] sm:$0xff] (%p1274_p9), %v828_v26 }
 0x12e   : > { %v579_v57 = vpop.f32.mrb[8].mxu0  ;;  %v619_v58 = vpop.f32.mrb[8].mxu1  ;;  %v802_v13 = vld [vmem:[%s1349_s3 + $0x20] sm:$0xff] (%p1274_p9)  ;;  %831 = vst [vmem:[%s1402_s14 + $0x2d0] sm:$0xff] (%p1274_p9), %v830_v27  ;;  %833 = vst [vmem:[%s1402_s14 + $0x2d8] sm:$0xff] (%p1274_p9), %v832_v28 }
 0x12f   : > { %745 = vst [vmem:[%s1349_s3 + $0x40] sm:$0xff] %v579_v57  ;;  %761 = vst [vmem:[%s1349_s3 + $0xc0] sm:$0xff] %v619_v58  ;;  %v581_v59 = vpop.f32.mrb[9].mxu0  ;;  %v621_v60 = vpop.f32.mrb[9].mxu1  ;;  %v804_v14 = vld [vmem:[%s1349_s3 + $0x28] sm:$0xff] (%p1274_p9)  ;;  %v834_v29 = vld [vmem:[%s1349_s3 + $0xa0] sm:$0xff] (%p1274_p9) }
 0x130   : > { %746 = vst [vmem:[%s1349_s3 + $0x48] sm:$0xff] %v581_v59  ;;  %762 = vst [vmem:[%s1349_s3 + $0xc8] sm:$0xff] %v621_v60  ;;  %v583_v61 = vpop.f32.mrb[10].mxu0  ;;  %v623_v62 = vpop.f32.mrb[10].mxu1  ;;  %v806_v15 = vld [vmem:[%s1349_s3 + $0x30] sm:$0xff] (%p1274_p9)  ;;  %v836_v30 = vld [vmem:[%s1349_s3 + $0xa8] sm:$0xff] (%p1274_p9) }
 0x131   : > { %747 = vst [vmem:[%s1349_s3 + $0x50] sm:$0xff] %v583_v61  ;;  %763 = vst [vmem:[%s1349_s3 + $0xd0] sm:$0xff] %v623_v62  ;;  %v585_v63 = vpop.f32.mrb[11].mxu0  ;;  %v625_v0 = vpop.f32.mrb[11].mxu1  ;;  %v808_v16 = vld [vmem:[%s1349_s3 + $0x38] sm:$0xff] (%p1274_p9)  ;;  %v838_v31 = vld [vmem:[%s1349_s3 + $0xb0] sm:$0xff] (%p1274_p9) }
 0x132   : > { %748 = vst [vmem:[%s1349_s3 + $0x58] sm:$0xff] %v585_v63  ;;  %764 = vst [vmem:[%s1349_s3 + $0xd8] sm:$0xff] %v625_v0  ;;  %v840_v32 = vld [vmem:[%s1349_s3 + $0xb8] sm:$0xff] (%p1274_p9) }
 0x133   : > { %803 = vst [vmem:[%s1402_s14 + $0xa0] sm:$0xff] (%p1274_p9), %v802_v13  ;;  %805 = vst [vmem:[%s1402_s14 + $0xa8] sm:$0xff] (%p1274_p9), %v804_v14 }
 0x134   : > { %775 = sbr.rel (!%p1274_p9) target bundleno = 324 (0x144), region = 78  ;;  %807 = vst [vmem:[%s1402_s14 + $0xf0] sm:$0xff] (%p1274_p9), %v806_v15  ;;  %809 = vst [vmem:[%s1402_s14 + $0xf8] sm:$0xff] (%p1274_p9), %v808_v16 }
 0x135   : > { %835 = vst [vmem:[%s1402_s14 + $0x320] sm:$0xff] (%p1274_p9), %v834_v29  ;;  %837 = vst [vmem:[%s1402_s14 + $0x328] sm:$0xff] (%p1274_p9), %v836_v30 }
 0x136   : > { %v589_v1 = vpop.f32.mrb[12].mxu0  ;;  %v629_v2 = vpop.f32.mrb[12].mxu1  ;;  %v810_v17 = vld [vmem:[%s1349_s3 + $0x40] sm:$0xff] (%p1274_p9)  ;;  %839 = vst [vmem:[%s1402_s14 + $0x370] sm:$0xff] (%p1274_p9), %v838_v31  ;;  %841 = vst [vmem:[%s1402_s14 + $0x378] sm:$0xff] (%p1274_p9), %v840_v32 }
 0x137   : > { %749 = vst [vmem:[%s1349_s3 + $0x60] sm:$0xff] %v589_v1  ;;  %765 = vst [vmem:[%s1349_s3 + $0xe0] sm:$0xff] %v629_v2  ;;  %v591_v3 = vpop.f32.mrb[13].mxu0  ;;  %v631_v4 = vpop.f32.mrb[13].mxu1  ;;  %v812_v18 = vld [vmem:[%s1349_s3 + $0x48] sm:$0xff] (%p1274_p9)  ;;  %v842_v33 = vld [vmem:[%s1349_s3 + $0xc0] sm:$0xff] (%p1274_p9) }
 0x138   : > { %750 = vst [vmem:[%s1349_s3 + $0x68] sm:$0xff] %v591_v3  ;;  %766 = vst [vmem:[%s1349_s3 + $0xe8] sm:$0xff] %v631_v4  ;;  %v593_v5 = vpop.f32.mrb[14].mxu0  ;;  %v633_v6 = vpop.f32.mrb[14].mxu1  ;;  %v814_v19 = vld [vmem:[%s1349_s3 + $0x50] sm:$0xff] (%p1274_p9)  ;;  %v844_v34 = vld [vmem:[%s1349_s3 + $0xc8] sm:$0xff] (%p1274_p9) }
 0x139   : > { %751 = vst [vmem:[%s1349_s3 + $0x70] sm:$0xff] %v593_v5  ;;  %767 = vst [vmem:[%s1349_s3 + $0xf0] sm:$0xff] %v633_v6  ;;  %v595_v7 = vpop.f32.mrb[15].mxu0  ;;  %v635_v8 = vpop.f32.mrb[15].mxu1  ;;  %v816_v20 = vld [vmem:[%s1349_s3 + $0x58] sm:$0xff] (%p1274_p9)  ;;  %v846_v35 = vld [vmem:[%s1349_s3 + $0xd0] sm:$0xff] (%p1274_p9) }
 0x13a   : > { %752 = vst [vmem:[%s1349_s3 + $0x78] sm:$0xff] %v595_v7  ;;  %768 = vst [vmem:[%s1349_s3 + $0xf8] sm:$0xff] %v635_v8  ;;  %v848_v36 = vld [vmem:[%s1349_s3 + $0xd8] sm:$0xff] (%p1274_p9) }
 0x13b   : > { %811 = vst [vmem:[%s1402_s14 + $0x140] sm:$0xff] %v810_v17  ;;  %813 = vst [vmem:[%s1402_s14 + $0x148] sm:$0xff] %v812_v18 }
 0x13c   : > { %815 = vst [vmem:[%s1402_s14 + $0x190] sm:$0xff] %v814_v19  ;;  %817 = vst [vmem:[%s1402_s14 + $0x198] sm:$0xff] %v816_v20 }
 0x13d   : > { %843 = vst [vmem:[%s1402_s14 + $0x3c0] sm:$0xff] %v842_v33  ;;  %845 = vst [vmem:[%s1402_s14 + $0x3c8] sm:$0xff] %v844_v34 }
 0x13e   : > { %v818_v21 = vld [vmem:[%s1349_s3 + $0x60] sm:$0xff]  ;;  %847 = vst [vmem:[%s1402_s14 + $0x410] sm:$0xff] %v846_v35  ;;  %849 = vst [vmem:[%s1402_s14 + $0x418] sm:$0xff] %v848_v36 }
 0x13f   : > { %v820_v22 = vld [vmem:[%s1349_s3 + $0x68] sm:$0xff]  ;;  %819 = vst [vmem:[%s1402_s14 + $0x1e0] sm:$0xff] %v818_v21  ;;  %v850_v37 = vld [vmem:[%s1349_s3 + $0xe0] sm:$0xff] }
 0x140   : > { %v822_v23 = vld [vmem:[%s1349_s3 + $0x70] sm:$0xff]  ;;  %821 = vst [vmem:[%s1402_s14 + $0x1e8] sm:$0xff] %v820_v22  ;;  %v852_v38 = vld [vmem:[%s1349_s3 + $0xe8] sm:$0xff]  ;;  %851 = vst [vmem:[%s1402_s14 + $0x460] sm:$0xff] %v850_v37 }
 0x141   : > { %823 = vst [vmem:[%s1402_s14 + $0x230] sm:$0xff] %v822_v23  ;;  %v824_v24 = vld [vmem:[%s1349_s3 + $0x78] sm:$0xff]  ;;  %853 = vst [vmem:[%s1402_s14 + $0x468] sm:$0xff] %v852_v38  ;;  %v854_v39 = vld [vmem:[%s1349_s3 + $0xf0] sm:$0xff] }
 0x142   : > { %825 = vst [vmem:[%s1402_s14 + $0x238] sm:$0xff] %v824_v24  ;;  %v856_v40 = vld [vmem:[%s1349_s3 + $0xf8] sm:$0xff]  ;;  %855 = vst [vmem:[%s1402_s14 + $0x4b0] sm:$0xff] %v854_v39 }
 0x143   : > { %857 = vst [vmem:[%s1402_s14 + $0x4b8] sm:$0xff] %v856_v40 }
 0x144 PF: > { %s12_s17 = sadd.s32 1, %s1189_s17   ;;  %s1487_s9 = smov %s1161_s10 }
 0x145   : > { %p9_p1 = scmp.ge.s32.totalorder %s12_s17, 22   ;;  %s1488_s10 = smov %s1279_s28 }
 0x146   : > { %s1489_s11 = smov %s1169_s12  ;;  %s1490_s12 = smov %s1268_s24 }
 0x147   : > { %s1491_s13 = smov %s1181_s15  ;;  %s1492_s14 = smov %s1185_s16 }
 0x148   : > { %s1493_s15 = smov %s1496_s19  ;;  %s1494_s16 = smov %s1500_s20 }
 0x149   :  { %11 = sbr.rel (!%p9_p1) target bundleno = 5 (0x5), region = 135 }

// kernel: integration_forward.34
= control target key start
LH: loop header
LB: loop body
LE: loop exit
PB: predicated region body
PF: predicated region fallthrough
CT: control target
= control target key end

     0   :  { %s1472_s1 = inlined_call_operand.vmem [shape: bf16[1280,128], index: 1, kind: input, shape index: {}]   ;;  %s1473_s0 = inlined_call_operand.vmem [shape: bf16[8,1280], index: 0, kind: input, shape index: {}]   ;;  %s1474_s2 = inlined_call_operand.vmem [shape: f32[8,128], index: 2, kind: output, shape index: {}]  }
   0x1   :  { %v1109_v0 = vld [vmem:[%s1472_s1 + $0x40] sm:$0xff]   ;;  %v1113_v4 = vld [vmem:[%s1472_s1 + $0x48] sm:$0xff]   ;;  %v1117_v8 = vld [vmem:[%s1472_s1 + $0x50] sm:$0xff]  }
   0x2   :  { %v1110_v1 = vld [vmem:[%s1472_s1 + $0xc0] sm:$0xff]   ;;  %999 = vmatprep.subr.bf16.mxu0 %v1109_v0  ;;  %v1114_v5 = vld [vmem:[%s1472_s1 + $0xc8] sm:$0xff]   ;;  %v1118_v9 = vld [vmem:[%s1472_s1 + $0xd0] sm:$0xff]  }
   0x3   :  { %v1111_v2 = vld [vmem:[%s1472_s1] sm:$0xff]   ;;  %1021 = vmatprep.subr.bf16.mxu1 %v1110_v1  ;;  %v1115_v6 = vld [vmem:[%s1472_s1 + $0x8] sm:$0xff]   ;;  %v1119_v10 = vld [vmem:[%s1472_s1 + $0x10] sm:$0xff]  }
   0x4   :  { %v1112_v3 = vld [vmem:[%s1472_s1 + $0x80] sm:$0xff]   ;;  %1000 = vmatpush3.bf16.msra.mxu0 %v1111_v2  ;;  %v1116_v7 = vld [vmem:[%s1472_s1 + $0x88] sm:$0xff]   ;;  %v1120_v11 = vld [vmem:[%s1472_s1 + $0x90] sm:$0xff]  }
   0x5   :  { %1022 = vmatpush3.bf16.msra.mxu1 %v1112_v3  ;;  %1001 = vmatprep.subr.bf16.mxu0 %v1113_v4  ;;  %v1121_v12 = vld [vmem:[%s1472_s1 + $0x58] sm:$0xff]   ;;  %v1125_v16 = vld [vmem:[%s1472_s1 + $0x60] sm:$0xff]   ;;  %v1129_v20 = vld [vmem:[%s1472_s1 + $0x68] sm:$0xff]  }
   0x6   :  { %1023 = vmatprep.subr.bf16.mxu1 %v1114_v5  ;;  %v1122_v13 = vld [vmem:[%s1472_s1 + $0xd8] sm:$0xff]   ;;  %v1126_v17 = vld [vmem:[%s1472_s1 + $0xe0] sm:$0xff]   ;;  %v1130_v21 = vld [vmem:[%s1472_s1 + $0xe8] sm:$0xff]  }
   0x7   :  { %v1123_v14 = vld [vmem:[%s1472_s1 + $0x18] sm:$0xff]   ;;  %v1127_v18 = vld [vmem:[%s1472_s1 + $0x20] sm:$0xff]   ;;  %v1131_v22 = vld [vmem:[%s1472_s1 + $0x28] sm:$0xff]  }
   0x8   :  { %1002 = vmatpush3.bf16.msra.mxu0 %v1115_v6  ;;  %v1124_v15 = vld [vmem:[%s1472_s1 + $0x98] sm:$0xff]   ;;  %v1128_v19 = vld [vmem:[%s1472_s1 + $0xa0] sm:$0xff]   ;;  %v1132_v23 = vld [vmem:[%s1472_s1 + $0xa8] sm:$0xff]  }
   0x9   :  { %1024 = vmatpush3.bf16.msra.mxu1 %v1116_v7  ;;  %1003 = vmatprep.subr.bf16.mxu0 %v1117_v8  ;;  %v1133_v24 = vld [vmem:[%s1472_s1 + $0x70] sm:$0xff]   ;;  %v1137_v28 = vld [vmem:[%s1472_s1 + $0x78] sm:$0xff]   ;;  %v18_v32 = vld [vmem:[%s1473_s0] sm:$0xff] }
   0xa   :  { %1025 = vmatprep.subr.bf16.mxu1 %v1118_v9  ;;  %v1134_v25 = vld [vmem:[%s1472_s1 + $0xf0] sm:$0xff]   ;;  %v1138_v29 = vld [vmem:[%s1472_s1 + $0xf8] sm:$0xff]   ;;  %v19_v33 = vld [vmem:[%s1473_s0 + $0x8] sm:$0xff]  ;;  %v909_v34 = vcombine.low %v18_v32, %v18_v32  ;;  %v910_v35 = vcombine.high %v18_v32, %v18_v32 }
   0xb   :  { %v1135_v26 = vld [vmem:[%s1472_s1 + $0x30] sm:$0xff]   ;;  %v1139_v30 = vld [vmem:[%s1472_s1 + $0x38] sm:$0xff]   ;;  %v911_v36 = vcombine.low %v19_v33, %v19_v33  ;;  %v912_v37 = vcombine.high %v19_v33, %v19_v33  ;;  %v1145_v38 = vld [vmem:[%s1472_s1 + $0x140] sm:$0xff]  }
   0xc   :  { %1004 = vmatpush3.bf16.msra.mxu0 %v1119_v10  ;;  %v1136_v27 = vld [vmem:[%s1472_s1 + $0xb0] sm:$0xff]   ;;  %v1140_v31 = vld [vmem:[%s1472_s1 + $0xb8] sm:$0xff]   ;;  %v1146_v39 = vld [vmem:[%s1472_s1 + $0x100] sm:$0xff]   ;;  %730 = vmatprep.mubr.bf16.mxu0 %v910_v35 }
   0xd   :  { %1026 = vmatpush3.bf16.msra.mxu1 %v1120_v11  ;;  %1005 = vmatprep.subr.bf16.mxu0 %v1121_v12  ;;  %v1147_v40 = vld [vmem:[%s1472_s1 + $0x1c0] sm:$0xff]   ;;  %v1149_v42 = vld [vmem:[%s1472_s1 + $0x148] sm:$0xff]   ;;  %v1153_v46 = vld [vmem:[%s1472_s1 + $0x150] sm:$0xff]  }
   0xe   :  { %1027 = vmatprep.subr.bf16.mxu1 %v1122_v13  ;;  %770 = vmatprep.mubr.bf16.mxu1 %v912_v37  ;;  %v1148_v41 = vld [vmem:[%s1472_s1 + $0x180] sm:$0xff]   ;;  %v1150_v43 = vld [vmem:[%s1472_s1 + $0x108] sm:$0xff]   ;;  %v1154_v47 = vld [vmem:[%s1472_s1 + $0x110] sm:$0xff]  }
   0xf   :  { %v1151_v44 = vld [vmem:[%s1472_s1 + $0x1c8] sm:$0xff]   ;;  %v1155_v48 = vld [vmem:[%s1472_s1 + $0x1d0] sm:$0xff]   ;;  %v1157_v50 = vld [vmem:[%s1472_s1 + $0x158] sm:$0xff]  }
  0x10   :  { %1006 = vmatpush3.bf16.msra.mxu0 %v1123_v14  ;;  %v1152_v45 = vld [vmem:[%s1472_s1 + $0x188] sm:$0xff]   ;;  %v1156_v49 = vld [vmem:[%s1472_s1 + $0x190] sm:$0xff]   ;;  %v1158_v51 = vld [vmem:[%s1472_s1 + $0x118] sm:$0xff]  }
  0x11   :  { %1028 = vmatpush3.bf16.msra.mxu1 %v1124_v15  ;;  %1007 = vmatprep.subr.bf16.mxu0 %v1125_v16  ;;  %v1159_v52 = vld [vmem:[%s1472_s1 + $0x1d8] sm:$0xff]   ;;  %v1161_v54 = vld [vmem:[%s1472_s1 + $0x160] sm:$0xff]   ;;  %v1165_v58 = vld [vmem:[%s1472_s1 + $0x168] sm:$0xff]  }
  0x12   :  { %1029 = vmatprep.subr.bf16.mxu1 %v1126_v17  ;;  %v1160_v53 = vld [vmem:[%s1472_s1 + $0x198] sm:$0xff]   ;;  %v1162_v55 = vld [vmem:[%s1472_s1 + $0x120] sm:$0xff]   ;;  %v1166_v59 = vld [vmem:[%s1472_s1 + $0x128] sm:$0xff]  }
  0x13   :  { %v1163_v56 = vld [vmem:[%s1472_s1 + $0x1e0] sm:$0xff]   ;;  %v1167_v60 = vld [vmem:[%s1472_s1 + $0x1e8] sm:$0xff]   ;;  %v1169_v62 = vld [vmem:[%s1472_s1 + $0x170] sm:$0xff]  }
  0x14   :  { %1008 = vmatpush3.bf16.msra.mxu0 %v1127_v18  ;;  %v1164_v57 = vld [vmem:[%s1472_s1 + $0x1a0] sm:$0xff]   ;;  %v1168_v61 = vld [vmem:[%s1472_s1 + $0x1a8] sm:$0xff]   ;;  %v1170_v63 = vld [vmem:[%s1472_s1 + $0x130] sm:$0xff]  }
  0x15   :  { %1030 = vmatpush3.bf16.msra.mxu1 %v1128_v19  ;;  %1009 = vmatprep.subr.bf16.mxu0 %v1129_v20  ;;  %v1171_v0 = vld [vmem:[%s1472_s1 + $0x1f0] sm:$0xff]   ;;  %v1173_v2 = vld [vmem:[%s1472_s1 + $0x178] sm:$0xff]   ;;  %v1179_v9 = vld [vmem:[%s1472_s1 + $0x240] sm:$0xff]  }
  0x16   :  { %1031 = vmatprep.subr.bf16.mxu1 %v1130_v21  ;;  %v1172_v1 = vld [vmem:[%s1472_s1 + $0x1b0] sm:$0xff]   ;;  %v1174_v3 = vld [vmem:[%s1472_s1 + $0x138] sm:$0xff]   ;;  %v1182_v13 = vld [vmem:[%s1472_s1 + $0x200] sm:$0xff]  }
  0x17   :  { %v1175_v4 = vld [vmem:[%s1472_s1 + $0x1f8] sm:$0xff]   ;;  %v20_v5 = vld [vmem:[%s1473_s0 + $0x10] sm:$0xff]  ;;  %v1183_v14 = vld [vmem:[%s1472_s1 + $0x248] sm:$0xff]  }
  0x18   :  { %1010 = vmatpush3.bf16.msra.mxu0 %v1131_v22  ;;  %v914_v6 = vcombine.high %v20_v5, %v20_v5  ;;  %v1178_v7 = vld [vmem:[%s1472_s1 + $0x1b8] sm:$0xff]   ;;  %v913_v8 = vcombine.low %v20_v5, %v20_v5  ;;  %v1184_v15 = vld [vmem:[%s1472_s1 + $0x208] sm:$0xff]   ;;  %v1185_v16 = vld [vmem:[%s1472_s1 + $0x250] sm:$0xff]  }
  0x19   :  { %1032 = vmatpush3.bf16.msra.mxu1 %v1132_v23  ;;  %1011 = vmatprep.subr.bf16.mxu0 %v1133_v24  ;;  %v21_v10 = vld [vmem:[%s1473_s0 + $0x18] sm:$0xff]  ;;  %v1186_v17 = vld [vmem:[%s1472_s1 + $0x210] sm:$0xff]   ;;  %v1189_v20 = vld [vmem:[%s1472_s1 + $0x260] sm:$0xff]  }
  0x1a   :  { %1033 = vmatprep.subr.bf16.mxu1 %v1134_v25  ;;  %v915_v11 = vcombine.low %v21_v10, %v21_v10  ;;  %v916_v12 = vcombine.high %v21_v10, %v21_v10  ;;  %v1187_v18 = vld [vmem:[%s1472_s1 + $0x258] sm:$0xff]   ;;  %v22_v21 = vld [vmem:[%s1473_s0 + $0x20] sm:$0xff]  ;;  %v1191_v24 = vld [vmem:[%s1472_s1 + $0x268] sm:$0xff]  }
  0x1b   :  { %v1188_v19 = vld [vmem:[%s1472_s1 + $0x218] sm:$0xff]   ;;  %v1190_v22 = vld [vmem:[%s1472_s1 + $0x220] sm:$0xff]   ;;  %v918_v23 = vcombine.high %v22_v21, %v22_v21  ;;  %v1192_v25 = vld [vmem:[%s1472_s1 + $0x228] sm:$0xff]  }
  0x1c   :  { %1012 = vmatpush3.bf16.msra.mxu0 %v1135_v26  ;;  %v1193_v26 = vld [vmem:[%s1472_s1 + $0x270] sm:$0xff]  }
  0x1d   :  { %1034 = vmatpush3.bf16.msra.mxu1 %v1136_v27  ;;  %1013 = vmatprep.subr.bf16.mxu0 %v1137_v28  ;;  %v1194_v27 = vld [vmem:[%s1472_s1 + $0x230] sm:$0xff]   ;;  %v1195_v28 = vld [vmem:[%s1472_s1 + $0x278] sm:$0xff]  }
  0x1e   :  { %1035 = vmatprep.subr.bf16.mxu1 %v1138_v29  ;;  %v1196_v29 = vld [vmem:[%s1472_s1 + $0x238] sm:$0xff]  }
  0x20   :  { %1014 = vmatpush3.bf16.msra.mxu0 %v1139_v30  ;;  %v917_v30 = vcombine.low %v22_v21, %v22_v21 }
  0x21   :  { %1036 = vmatpush3.bf16.msra.mxu1 %v1140_v31  ;;  %1043 = vmatprep.subr.bf16.mxu0 %v1145_v38 }
  0x22   :  { %1065 = vmatprep.subr.bf16.mxu1 %v1147_v40 }
  0x23   :  { %731 = vmatmul.mubr.bf16.vlgmr.msra.gmra.mrb[0].mxu0 %v909_v34 }
  0x24   :  { %771 = vmatmul.mubr.bf16.vlgmr.msra.gmra.mrb[0].mxu1 %v911_v36  ;;  %1044 = vmatpush3.bf16.msra.mxu0 %v1146_v39 }
  0x25   :  { %1066 = vmatpush3.bf16.msra.mxu1 %v1148_v41  ;;  %1045 = vmatprep.subr.bf16.mxu0 %v1149_v42 }
  0x26   :  { %1067 = vmatprep.subr.bf16.mxu1 %v1151_v44  ;;  %810 = vmatprep.mubr.bf16.mxu0 %v914_v6 }
  0x27   :  { %850 = vmatprep.mubr.bf16.mxu1 %v916_v12 }
  0x28   :  { %1046 = vmatpush3.bf16.msra.mxu0 %v1150_v43 }
  0x29   :  { %1068 = vmatpush3.bf16.msra.mxu1 %v1152_v45  ;;  %1047 = vmatprep.subr.bf16.mxu0 %v1153_v46 }
  0x2a   :  { %1069 = vmatprep.subr.bf16.mxu1 %v1155_v48 }
  0x2c   :  { %1048 = vmatpush3.bf16.msra.mxu0 %v1154_v47 }
  0x2d   :  { %1070 = vmatpush3.bf16.msra.mxu1 %v1156_v49  ;;  %1049 = vmatprep.subr.bf16.mxu0 %v1157_v50 }
  0x2e   :  { %1071 = vmatprep.subr.bf16.mxu1 %v1159_v52 }
  0x30   :  { %1050 = vmatpush3.bf16.msra.mxu0 %v1158_v51 }
  0x31   :  { %1072 = vmatpush3.bf16.msra.mxu1 %v1160_v53  ;;  %1051 = vmatprep.subr.bf16.mxu0 %v1161_v54 }
  0x32   :  { %1073 = vmatprep.subr.bf16.mxu1 %v1163_v56 }
  0x34   :  { %1052 = vmatpush3.bf16.msra.mxu0 %v1162_v55 }
  0x35   :  { %1074 = vmatpush3.bf16.msra.mxu1 %v1164_v57  ;;  %1053 = vmatprep.subr.bf16.mxu0 %v1165_v58 }
  0x36   :  { %1075 = vmatprep.subr.bf16.mxu1 %v1167_v60 }
  0x38   :  { %1054 = vmatpush3.bf16.msra.mxu0 %v1166_v59 }
  0x39   :  { %1076 = vmatpush3.bf16.msra.mxu1 %v1168_v61  ;;  %1055 = vmatprep.subr.bf16.mxu0 %v1169_v62 }
  0x3a   :  { %1077 = vmatprep.subr.bf16.mxu1 %v1171_v0 }
  0x3c   :  { %1056 = vmatpush3.bf16.msra.mxu0 %v1170_v63 }
  0x3d   :  { %1078 = vmatpush3.bf16.msra.mxu1 %v1172_v1  ;;  %1057 = vmatprep.subr.bf16.mxu0 %v1173_v2 }
  0x3e   :  { %1079 = vmatprep.subr.bf16.mxu1 %v1175_v4 }
  0x40   :  { %1058 = vmatpush3.bf16.msra.mxu0 %v1174_v3 }
  0x41   :  { %1080 = vmatpush3.bf16.msra.mxu1 %v1178_v7  ;;  %1087 = vmatprep.subr.bf16.mxu0 %v1179_v9 }
  0x43   :  { %811 = vmatmul.mubr.bf16.vlgmr.msra.gmra.mrb[4].mxu0 %v913_v8 }
  0x44   :  { %1088 = vmatpush3.bf16.msra.mxu0 %v1182_v13  ;;  %851 = vmatmul.mubr.bf16.vlgmr.msra.gmra.mrb[4].mxu1 %v915_v11 }
  0x45   :  { %1089 = vmatprep.subr.bf16.mxu0 %v1183_v14  ;;  %890 = vmatprep.mubr.bf16.mxu0 %v918_v23 }
  0x48   :  { %1090 = vmatpush3.bf16.msra.mxu0 %v1184_v15 }
  0x49   :  { %1091 = vmatprep.subr.bf16.mxu0 %v1185_v16 }
  0x4c   :  { %1092 = vmatpush3.bf16.msra.mxu0 %v1186_v17 }
  0x4d   :  { %1093 = vmatprep.subr.bf16.mxu0 %v1187_v18 }
  0x50   :  { %1094 = vmatpush3.bf16.msra.mxu0 %v1188_v19 }
  0x51   :  { %1095 = vmatprep.subr.bf16.mxu0 %v1189_v20 }
  0x54   :  { %1096 = vmatpush3.bf16.msra.mxu0 %v1190_v22 }
  0x55   :  { %1097 = vmatprep.subr.bf16.mxu0 %v1191_v24 }
  0x58   :  { %1098 = vmatpush3.bf16.msra.mxu0 %v1192_v25 }
  0x59   :  { %1099 = vmatprep.subr.bf16.mxu0 %v1193_v26 }
  0x5c   :  { %1100 = vmatpush3.bf16.msra.mxu0 %v1194_v27 }
  0x5d   :  { %1101 = vmatprep.subr.bf16.mxu0 %v1195_v28 }
  0x60   :  { %1102 = vmatpush3.bf16.msra.mxu0 %v1196_v29 }
  0x63   :  { %891 = vmatmul.mubr.bf16.vlgmr.msra.gmra.mrb[8].mxu0 %v917_v30 }
  0xf6   :  { %v1015_v31 = vpop.f32.mrb[0].mxu0 }
  0xf7   :  { %v1037_v32 = vpop.f32.mrb[0].mxu1  ;;  %v1016_v33 = vpop.f32.mrb[1].mxu0 }
  0xf8   :  { %v1038_v34 = vpop.f32.mrb[1].mxu1  ;;  %v1017_v35 = vadd.f32 %v1016_v33, %v1015_v31  ;;  %v1018_v37 = vpop.f32.mrb[2].mxu0 }
  0xf9   :  { %v1039_v36 = vadd.f32 %v1038_v34, %v1037_v32  ;;  %v1040_v38 = vpop.f32.mrb[2].mxu1  ;;  %v1019_v39 = vpop.f32.mrb[3].mxu0 }
  0xfa   :  { %v1041_v40 = vpop.f32.mrb[3].mxu1 }
  0xfb   :  { %v773_v41 = vadd.f32 %v1039_v36, %v1017_v35 }
 0x116   :  { %v1059_v42 = vpop.f32.mrb[4].mxu0 }
 0x117   :  { %v1060_v43 = vpop.f32.mrb[5].mxu0  ;;  %v1081_v44 = vpop.f32.mrb[4].mxu1 }
 0x118   :  { %v1061_v45 = vadd.f32 %v1060_v43, %v1059_v42  ;;  %v1062_v46 = vpop.f32.mrb[6].mxu0  ;;  %v1082_v47 = vpop.f32.mrb[5].mxu1 }
 0x119   :  { %v1063_v48 = vpop.f32.mrb[7].mxu0  ;;  %v1083_v49 = vadd.f32 %v1082_v47, %v1081_v44  ;;  %v1084_v50 = vpop.f32.mrb[6].mxu1 }
 0x11a   :  { %v813_v51 = vadd.f32 %v1061_v45, %v773_v41  ;;  %v1085_v52 = vpop.f32.mrb[7].mxu1 }
 0x11c   :  { %v853_v53 = vadd.f32 %v1083_v49, %v813_v51 }
 0x136   :  { %v1103_v54 = vpop.f32.mrb[8].mxu0 }
 0x137   :  { %v1104_v55 = vpop.f32.mrb[9].mxu0 }
 0x138   :  { %v1105_v56 = vadd.f32 %v1104_v55, %v1103_v54  ;;  %v1106_v57 = vpop.f32.mrb[10].mxu0 }
 0x139   :  { %v1107_v58 = vpop.f32.mrb[11].mxu0 }
 0x13a   :  { %v893_v59 = vadd.f32 %v1105_v56, %v853_v53 }
 0x13c   :  { %904 = vst [vmem:[%s1474_s2] sm:$0xff] %v893_v59 }

// kernel: integration_forward.25
= control target key start
LH: loop header
LB: loop body
LE: loop exit
PB: predicated region body
PF: predicated region fallthrough
CT: control target
= control target key end

     0   :  { %s760_s9 = smov 0   ;;  %s762_s10 = smov 0   ;;  %s857_s0 = inlined_call_operand.vmem [shape: bf16[16,128], index: 0, kind: input, shape index: {}]   ;;  %s858_s1 = inlined_call_operand.vmem [shape: bf16[128,512], index: 1, kind: input, shape index: {}]   ;;  %s859_s2 = inlined_call_operand.vmem [shape: f32[16,512], index: 2, kind: output, shape index: {}]  }
   0x1   :  { %s764_s11 = smov 0   ;;  %s766_s12 = smov 0  }
   0x2   :  { %s768_s13 = smov 0  }
   0x3 LB: > { %s27_s14 = sadd.s32 1, %s738_s12  ;;  %s603_s15 = sadd.s32 4294967295, %s742_s13   ;;  %s742_s13 = sphi %s768_s13, %s12_s13   ;;  %s738_s12 = sphi %s766_s12, %s864_s12   ;;  %s734_s11 = sphi %s764_s11, %s863_s11   ;;  %s730_s10 = sphi %s762_s10, %s862_s10   ;;  %s726_s9 = sphi %s760_s9, %s861_s9  }
   0x4   : > { %p29_p0 = scmp.ge.s32.totalorder %s27_s14, 2  ;;  %p75_p1 = scmp.ne.s32.totalorder %s730_s10, %s726_s9 }
   0x5   : > { %p76_p2 = scmp.eq.s32.totalorder %s742_s13, 0  ;;  %p107_p4 = scmp.eq.s32.totalorder %s603_s15, 1 }
   0x6   : > { %s866_s14 = smov (%p29_p0, %s27_s14), 0  ;;  %s68_s17 = sadd.s32 1, %s730_s10 }
   0x7   : > { %p77_p3 = por %p76_p2, %p75_p1  ;;  %s64_s16 = ssub.s32 %s738_s12, %s866_s14 }
   0x8   : > { %p66_p5 = scmp.eq.s32.totalorder %s64_s16, 0  ;;  %p795_p6 = por %p107_p4, %p75_p1 }
   0x9   : > { %p607_p7 = scmp.ge.s32.totalorder %s742_s13, 2 }
   0xa   : > { %s800_s19 = scalar_select %p66_p5, %s730_s10, %s68_s17  }
   0xb   : > { %141 = sbr.rel (%p607_p7) target bundleno = 30 (0x1e), region = 20 }
  0x12   : > { %144 = sbr.rel (!%p77_p3) target bundleno = 30 (0x1e), region = 24  ;;  %s146_s20 = sand.u32 (%p77_p3), 1, %s730_s10  }
  0x13   : > { %s636_s21 = sshll.u32 (%p77_p3), %s738_s12, 3  ;;  %s608_s22 = sshll.u32 (%p77_p3), %s146_s20, 7 }
  0x14   : > { %s808_s25 = scalar_lea.vmem (%p77_p3), %s858_s1, %s636_s21  ;;  %s148_s26 = scalar_lea.vmem (%p77_p3), [#allocation3], %s608_s22 }
  0x15   : > { %v212_v0 = vld [vmem:[%s808_s25] sm:$0xff] (%p77_p3)  ;;  %v214_v1 = vld [vmem:[%s808_s25 + $0x10] sm:$0xff] (%p77_p3) }
  0x16   : > { %v216_v2 = vld [vmem:[%s808_s25 + $0x20] sm:$0xff] (%p77_p3)  ;;  %213 = vst [vmem:[%s148_s26] sm:$0xff] (%p77_p3), %v212_v0  ;;  %215 = vst [vmem:[%s148_s26 + $0x8] sm:$0xff] (%p77_p3), %v214_v1  ;;  %v218_v3 = vld [vmem:[%s808_s25 + $0x30] sm:$0xff] (%p77_p3) }
  0x17   : > { %217 = vst [vmem:[%s148_s26 + $0x10] sm:$0xff] (%p77_p3), %v216_v2  ;;  %v220_v4 = vld [vmem:[%s808_s25 + $0x40] sm:$0xff] (%p77_p3)  ;;  %v222_v5 = vld [vmem:[%s808_s25 + $0x50] sm:$0xff] (%p77_p3)  ;;  %219 = vst [vmem:[%s148_s26 + $0x18] sm:$0xff] (%p77_p3), %v218_v3 }
  0x18   : > { %221 = vst [vmem:[%s148_s26 + $0x20] sm:$0xff] (%p77_p3), %v220_v4  ;;  %223 = vst [vmem:[%s148_s26 + $0x28] sm:$0xff] (%p77_p3), %v222_v5  ;;  %v224_v6 = vld [vmem:[%s808_s25 + $0x60] sm:$0xff] (%p77_p3)  ;;  %v226_v7 = vld [vmem:[%s808_s25 + $0x70] sm:$0xff] (%p77_p3) }
  0x19   : > { %v228_v8 = vld [vmem:[%s808_s25 + $0x80] sm:$0xff]  ;;  %225 = vst [vmem:[%s148_s26 + $0x30] sm:$0xff] %v224_v6  ;;  %227 = vst [vmem:[%s148_s26 + $0x38] sm:$0xff] %v226_v7  ;;  %v230_v9 = vld [vmem:[%s808_s25 + $0x90] sm:$0xff] }
  0x1a   : > { %229 = vst [vmem:[%s148_s26 + $0x40] sm:$0xff] %v228_v8  ;;  %v232_v10 = vld [vmem:[%s808_s25 + $0xa0] sm:$0xff]  ;;  %v234_v11 = vld [vmem:[%s808_s25 + $0xb0] sm:$0xff]  ;;  %231 = vst [vmem:[%s148_s26 + $0x48] sm:$0xff] %v230_v9 }
  0x1b   : > { %233 = vst [vmem:[%s148_s26 + $0x50] sm:$0xff] %v232_v10  ;;  %235 = vst [vmem:[%s148_s26 + $0x58] sm:$0xff] %v234_v11  ;;  %v236_v12 = vld [vmem:[%s808_s25 + $0xc0] sm:$0xff]  ;;  %v238_v13 = vld [vmem:[%s808_s25 + $0xd0] sm:$0xff] }
  0x1c   : > { %v240_v14 = vld [vmem:[%s808_s25 + $0xe0] sm:$0xff]  ;;  %237 = vst [vmem:[%s148_s26 + $0x60] sm:$0xff] %v236_v12  ;;  %239 = vst [vmem:[%s148_s26 + $0x68] sm:$0xff] %v238_v13  ;;  %v242_v15 = vld [vmem:[%s808_s25 + $0xf0] sm:$0xff] }
  0x1d   : > { %241 = vst [vmem:[%s148_s26 + $0x70] sm:$0xff] %v240_v14  ;;  %243 = vst [vmem:[%s148_s26 + $0x78] sm:$0xff] %v242_v15 }
  0x1e PF: > { %p611_p8 = scmp.ge.s32.totalorder %s742_s13, 1  ;;  %p248_p9 = scmp.lt.s32.totalorder %s742_s13, 3 }
  0x20   : > { %p249_p10 = pnand %p611_p8, %p248_p9 }
  0x21   : > { %s255_s27 = sand.u32 (!%p249_p10), 1, %s726_s9   ;;  %v744_v16 = vmov (!%p249_p10), 0   ;;  %v703_v33 = vld [vmem:[%s857_s0] sm:$0xff] (!%p249_p10)  }
  0x22   : > { %252 = sbr.rel (%p249_p10) target bundleno = 293 (0x125), region = 62  ;;  %s612_s28 = sshll.u32 (!%p249_p10), %s255_s27, 7  ;;  %445 = vmatprep.mubr.bf16.mxu0 (!%p249_p10), %v744_v16 }
  0x23   : > { %s257_s29 = scalar_lea.vmem (!%p249_p10), [#allocation3], %s612_s28  ;;  %s613_s4 = sshll.u32 (!%p249_p10), %s255_s27, 5 }
  0x24   : > { %v679_v17 = vld [vmem:[%s257_s29 + $0x4] ss:$8 sps:$4 sm:$0xff] (!%p249_p10)   ;;  %v681_v18 = vld [vmem:[%s257_s29] ss:$8 sps:$4 sm:$0xff] (!%p249_p10)   ;;  %v682_v19 = vld [vmem:[%s257_s29 + $0x14] ss:$8 sps:$4 sm:$0xff] (!%p249_p10)  }
  0x25   : > { %413 = vmatprep.subr.bf16.mxu0 (!%p249_p10), %v679_v17  ;;  %v684_v20 = vld [vmem:[%s257_s29 + $0x10] ss:$8 sps:$4 sm:$0xff] (!%p249_p10)   ;;  %v685_v21 = vld [vmem:[%s257_s29 + $0x24] ss:$8 sps:$4 sm:$0xff] (!%p249_p10)   ;;  %v687_v22 = vld [vmem:[%s257_s29 + $0x20] ss:$8 sps:$4 sm:$0xff] (!%p249_p10)  }
  0x26   : > { %414 = vmatpush1.bf16.msra.mxu0 (!%p249_p10), %v681_v18  ;;  %v688_v23 = vld [vmem:[%s257_s29 + $0x34] ss:$8 sps:$4 sm:$0xff] (!%p249_p10)   ;;  %v690_v24 = vld [vmem:[%s257_s29 + $0x30] ss:$8 sps:$4 sm:$0xff] (!%p249_p10)   ;;  %v691_v25 = vld [vmem:[%s257_s29 + $0x44] ss:$8 sps:$4 sm:$0xff] (!%p249_p10)  }
  0x27   : > { %415 = vmatprep.subr.bf16.mxu0 (!%p249_p10), %v682_v19  ;;  %v693_v26 = vld [vmem:[%s257_s29 + $0x40] ss:$8 sps:$4 sm:$0xff] (!%p249_p10)   ;;  %v694_v27 = vld [vmem:[%s257_s29 + $0x54] ss:$8 sps:$4 sm:$0xff] (!%p249_p10)   ;;  %v696_v28 = vld [vmem:[%s257_s29 + $0x50] ss:$8 sps:$4 sm:$0xff] (!%p249_p10)  }
  0x28   : > { %v697_v29 = vld [vmem:[%s257_s29 + $0x64] ss:$8 sps:$4 sm:$0xff] (!%p249_p10)   ;;  %v699_v30 = vld [vmem:[%s257_s29 + $0x60] ss:$8 sps:$4 sm:$0xff] (!%p249_p10)   ;;  %v700_v31 = vld [vmem:[%s257_s29 + $0x74] ss:$8 sps:$4 sm:$0xff] (!%p249_p10)  }
  0x29   : > { %v702_v32 = vld [vmem:[%s257_s29 + $0x70] ss:$8 sps:$4 sm:$0xff]   ;;  %s282_s5 = scalar_lea.vmem [#allocation4], %s613_s4  ;;  %s637_s6 = sshll.u32 (%p795_p6), %s734_s11, 4 }
  0x2a   : > { %416 = vmatpush1.bf16.msra.mxu0 %v684_v20  ;;  %s487_s9 = scalar_lea.vmem (%p795_p6), %s859_s2, %s637_s6 }
  0x2b   : > { %417 = vmatprep.subr.bf16.mxu0 %v685_v21 }
  0x2e   : > { %418 = vmatpush1.bf16.msra.mxu0 %v687_v22 }
  0x2f   : > { %419 = vmatprep.subr.bf16.mxu0 %v688_v23 }
  0x32   : > { %420 = vmatpush1.bf16.msra.mxu0 %v690_v24 }
  0x33   : > { %421 = vmatprep.subr.bf16.mxu0 %v691_v25 }
  0x36   : > { %422 = vmatpush1.bf16.msra.mxu0 %v693_v26 }
  0x37   : > { %423 = vmatprep.subr.bf16.mxu0 %v694_v27 }
  0x3a   : > { %424 = vmatpush1.bf16.msra.mxu0 %v696_v28 }
  0x3b   : > { %425 = vmatprep.subr.bf16.mxu0 %v697_v29 }
  0x3e   : > { %426 = vmatpush1.bf16.msra.mxu0 %v699_v30 }
  0x3f   : > { %427 = vmatprep.subr.bf16.mxu0 %v700_v31 }
  0x42   : > { %428 = vmatpush1.bf16.msra.mxu0 %v702_v32 }
  0x45   : > { %446 = vmatmul.mubr.bf16.vlgmr.msra.gmra.mrb[0].mxu0 %v703_v33 }
 0x116   : > { %481 = sbr.rel (!%p795_p6) target bundleno = 293 (0x125), region = 78 }
 0x118   : > { %v447_v34 = vpop.f32.mrb[0].mxu0 }
 0x119   : > { %471 = vst [vmem:[%s282_s5] sm:$0xff] %v447_v34  ;;  %v449_v35 = vpop.f32.mrb[1].mxu0 }
 0x11a   : > { %472 = vst [vmem:[%s282_s5 + $0x8] sm:$0xff] %v449_v35  ;;  %v451_v36 = vpop.f32.mrb[2].mxu0 }
 0x11b   : > { %473 = vst [vmem:[%s282_s5 + $0x10] sm:$0xff] %v451_v36  ;;  %v453_v37 = vpop.f32.mrb[3].mxu0 }
 0x11c   : > { %474 = vst [vmem:[%s282_s5 + $0x18] sm:$0xff] %v453_v37 }
 0x120   : > { %v500_v38 = vld [vmem:[%s282_s5] sm:$0xff] }
 0x121   : > { %v502_v39 = vld [vmem:[%s282_s5 + $0x8] sm:$0xff]  ;;  %501 = vst [vmem:[%s487_s9] sm:$0xff] %v500_v38 }
 0x122   : > { %v504_v40 = vld [vmem:[%s282_s5 + $0x10] sm:$0xff]  ;;  %503 = vst [vmem:[%s487_s9 + $0x8] sm:$0xff] %v502_v39 }
 0x123   : > { %v506_v41 = vld [vmem:[%s282_s5 + $0x18] sm:$0xff]  ;;  %505 = vst [vmem:[%s487_s9 + $0x20] sm:$0xff] %v504_v40 }
 0x124   : > { %507 = vst [vmem:[%s487_s9 + $0x28] sm:$0xff] %v506_v41 }
 0x125 PF: > { %s12_s13 = sadd.s32 1, %s742_s13   ;;  %s861_s9 = smov %s730_s10 }
 0x126   : > { %p9_p11 = scmp.ge.s32.totalorder %s12_s13, 4   ;;  %s862_s10 = smov %s800_s19 }
 0x127   : > { %s863_s11 = smov %s738_s12  ;;  %s864_s12 = smov %s866_s14 }
 0x128   :  { %11 = sbr.rel (!%p9_p11) target bundleno = 3 (0x3), region = 135 }

// kernel: integration_forward.26
= control target key start
LH: loop header
LB: loop body
LE: loop exit
PB: predicated region body
PF: predicated region fallthrough
CT: control target
= control target key end

     0   :  { %s660_s9 = smov 0   ;;  %s782_s0 = inlined_call_operand.vmem [shape: f32[8,8,512], index: 0, kind: input, shape index: {}]   ;;  %s783_s1 = inlined_call_operand.vmem [shape: bf16[128,512], index: 1, kind: input, shape index: {}]   ;;  %s784_s2 = inlined_call_operand.vmem [shape: f32[8,8,128], index: 2, kind: output, shape index: {}]  }
   0x1 LB: > { %s514_s10 = sadd.s32 4294967295, %s641_s9   ;;  %p518_p0 = scmp.ge.s32.totalorder %s641_s9, 1  ;;  %s641_s9 = sphi %s660_s9, %s12_s9  }
   0x2   : > { %p112_p1 = scmp.lt.s32.totalorder %s641_s9, 9 }
   0x4   : > { %p113_p2 = pnand %p518_p0, %p112_p1 }
   0x5   : > { %p133_p3 = scmp.lt.s32.totalorder (!%p113_p2), %s514_s10, 7  ;;  %p522_p4 = scmp.ne.s32.totalorder (!%p113_p2), %s514_s10, 0 }
   0x6   : > { %116 = sbr.rel (%p113_p2) target bundleno = 314 (0x13a), region = 28 }
   0xd   : > { %s134_s11 = scalar_select %p133_p3, %s514_s10, 7 }
   0xe   : > { %146 = sbr.rel (%p522_p4) target bundleno = 21 (0x15), region = 32  ;;  %v643_v0 = vmov (!%p522_p4), 0.0  }
   0xf   : > { %s560_s12 = sshll.u32 %s134_s11, 5  ;;  %s521_s13 = sshll.u32 %s134_s11, 3  ;;  %147 = vst [vmem:[#allocation2] sm:$0xff] (!%p522_p4), %v643_v0  ;;  %148 = vst [vmem:[#allocation3] sm:$0xff] (!%p522_p4), %v643_v0 }
  0x10   : > { %s671_s16 = scalar_lea.vmem %s782_s0, %s560_s12  ;;  %s676_s19 = scalar_lea.vmem %s784_s2, %s521_s13 }
  0x15 PF: > { %v571_v1 = vld [vmem:[%s783_s1 + $0x4] ss:$16 sps:$4 sm:$0xff]   ;;  %v573_v2 = vld [vmem:[%s783_s1] ss:$16 sps:$4 sm:$0xff]   ;;  %v644_v3 = vmov 0   ;;  %v150_v37 = vld [vmem:[%s671_s16 + $0x8] sm:$0xff] }
  0x16   : > { %379 = vmatprep.mubr.bf16.mxu0 %v644_v3  ;;  %420 = vmatprep.mubr.bf16.mxu1 %v644_v3  ;;  %v574_v4 = vld [vmem:[%s783_s1 + $0x24] ss:$16 sps:$4 sm:$0xff]   ;;  %v576_v5 = vld [vmem:[%s783_s1 + $0x20] ss:$16 sps:$4 sm:$0xff]   ;;  %v582_v7 = vld [vmem:[%s783_s1 + $0xc] ss:$16 sps:$4 sm:$0xff]  }
  0x17   : > { %347 = vmatprep.subr.bf16.mxu0 %v571_v1  ;;  %v577_v6 = vld [vmem:[%s783_s1 + $0x44] ss:$16 sps:$4 sm:$0xff]   ;;  %v585_v8 = vld [vmem:[%s783_s1 + $0x8] ss:$16 sps:$4 sm:$0xff]   ;;  %v579_v9 = vld [vmem:[%s783_s1 + $0x40] ss:$16 sps:$4 sm:$0xff]   ;;  %388 = vmatprep.subr.bf16.mxu1 %v582_v7 }
  0x18   : > { %348 = vmatpush1.bf16.msra.mxu0 %v573_v2  ;;  %v580_v10 = vld [vmem:[%s783_s1 + $0x64] ss:$16 sps:$4 sm:$0xff]   ;;  %389 = vmatpush1.bf16.msra.mxu1 %v585_v8  ;;  %v588_v11 = vld [vmem:[%s783_s1 + $0x2c] ss:$16 sps:$4 sm:$0xff]   ;;  %v591_v12 = vld [vmem:[%s783_s1 + $0x28] ss:$16 sps:$4 sm:$0xff]  }
  0x19   : > { %349 = vmatprep.subr.bf16.mxu0 %v574_v4  ;;  %390 = vmatprep.subr.bf16.mxu1 %v588_v11  ;;  %v584_v13 = vld [vmem:[%s783_s1 + $0x60] ss:$16 sps:$4 sm:$0xff]   ;;  %v586_v14 = vld [vmem:[%s783_s1 + $0x84] ss:$16 sps:$4 sm:$0xff]   ;;  %v594_v15 = vld [vmem:[%s783_s1 + $0x4c] ss:$16 sps:$4 sm:$0xff]  }
  0x1a   : > { %v597_v16 = vld [vmem:[%s783_s1 + $0x48] ss:$16 sps:$4 sm:$0xff]   ;;  %v600_v17 = vld [vmem:[%s783_s1 + $0x6c] ss:$16 sps:$4 sm:$0xff]   ;;  %v590_v18 = vld [vmem:[%s783_s1 + $0x80] ss:$16 sps:$4 sm:$0xff]  }
  0x1b   : > { %v592_v19 = vld [vmem:[%s783_s1 + $0xa4] ss:$16 sps:$4 sm:$0xff]   ;;  %v603_v20 = vld [vmem:[%s783_s1 + $0x68] ss:$16 sps:$4 sm:$0xff]   ;;  %v606_v21 = vld [vmem:[%s783_s1 + $0x8c] ss:$16 sps:$4 sm:$0xff]  }
  0x1c   : > { %350 = vmatpush1.bf16.msra.mxu0 %v576_v5  ;;  %391 = vmatpush1.bf16.msra.mxu1 %v591_v12  ;;  %v596_v22 = vld [vmem:[%s783_s1 + $0xa0] ss:$16 sps:$4 sm:$0xff]   ;;  %v598_v23 = vld [vmem:[%s783_s1 + $0xc4] ss:$16 sps:$4 sm:$0xff]   ;;  %v609_v24 = vld [vmem:[%s783_s1 + $0x88] ss:$16 sps:$4 sm:$0xff]  }
  0x1d   : > { %351 = vmatprep.subr.bf16.mxu0 %v577_v6  ;;  %392 = vmatprep.subr.bf16.mxu1 %v594_v15  ;;  %v610_v25 = vld [vmem:[%s783_s1 + $0xac] ss:$16 sps:$4 sm:$0xff]   ;;  %v602_v26 = vld [vmem:[%s783_s1 + $0xc0] ss:$16 sps:$4 sm:$0xff]   ;;  %v604_v27 = vld [vmem:[%s783_s1 + $0xe4] ss:$16 sps:$4 sm:$0xff]  }
  0x1e   : > { %v612_v28 = vld [vmem:[%s783_s1 + $0xa8] ss:$16 sps:$4 sm:$0xff]   ;;  %v613_v29 = vld [vmem:[%s783_s1 + $0xcc] ss:$16 sps:$4 sm:$0xff]   ;;  %v608_v30 = vld [vmem:[%s783_s1 + $0xe0] ss:$16 sps:$4 sm:$0xff]  }
  0x1f   : > { %v153_v31 = vld [vmem:[#allocation2] sm:$0xff]  ;;  %v615_v32 = vld [vmem:[%s783_s1 + $0xc8] ss:$16 sps:$4 sm:$0xff]   ;;  %v616_v33 = vld [vmem:[%s783_s1 + $0xec] ss:$16 sps:$4 sm:$0xff]  }
  0x20   : > { %352 = vmatpush1.bf16.msra.mxu0 %v579_v9  ;;  %393 = vmatpush1.bf16.msra.mxu1 %v597_v16  ;;  %v154_v34 = vpack.c.bf16 %v153_v31, %v153_v31  ;;  %v618_v35 = vld [vmem:[%s783_s1 + $0xe8] ss:$16 sps:$4 sm:$0xff]   ;;  %v149_v36 = vld [vmem:[%s671_s16] sm:$0xff]  ;;  %v151_v52 = vld [vmem:[%s671_s16 + $0x10] sm:$0xff] }
  0x21   : > { %353 = vmatprep.subr.bf16.mxu0 %v580_v10  ;;  %394 = vmatprep.subr.bf16.mxu1 %v600_v17  ;;  %v152_v46 = vld [vmem:[%s671_s16 + $0x18] sm:$0xff]  ;;  %v452_v61 = vld [vmem:[#allocation3] sm:$0xff] }
  0x24   : > { %354 = vmatpush1.bf16.msra.mxu0 %v584_v13  ;;  %395 = vmatpush1.bf16.msra.mxu1 %v603_v20 }
  0x25   : > { %355 = vmatprep.subr.bf16.mxu0 %v586_v14  ;;  %396 = vmatprep.subr.bf16.mxu1 %v606_v21 }
  0x28   : > { %356 = vmatpush1.bf16.msra.mxu0 %v590_v18  ;;  %397 = vmatpush1.bf16.msra.mxu1 %v609_v24 }
  0x29   : > { %357 = vmatprep.subr.bf16.mxu0 %v592_v19  ;;  %398 = vmatprep.subr.bf16.mxu1 %v610_v25 }
  0x2c   : > { %358 = vmatpush1.bf16.msra.mxu0 %v596_v22  ;;  %399 = vmatpush1.bf16.msra.mxu1 %v612_v28 }
  0x2d   : > { %359 = vmatprep.subr.bf16.mxu0 %v598_v23  ;;  %400 = vmatprep.subr.bf16.mxu1 %v613_v29 }
  0x30   : > { %360 = vmatpush1.bf16.msra.mxu0 %v602_v26  ;;  %401 = vmatpush1.bf16.msra.mxu1 %v615_v32 }
  0x31   : > { %361 = vmatprep.subr.bf16.mxu0 %v604_v27  ;;  %402 = vmatprep.subr.bf16.mxu1 %v616_v33 }
  0x34   : > { %362 = vmatpush1.bf16.msra.mxu0 %v608_v30  ;;  %403 = vmatpush1.bf16.msra.mxu1 %v618_v35 }
  0x37   : > { %380 = vmatmul.mubr.bf16.vlgmr.msra.gmra.mrb[0].mxu0 %v154_v34  ;;  %421 = vmatmul.mubr.bf16.vlgmr.msra.gmra.mrb[0].mxu1 %v154_v34 }
 0x10a   : > { %v381_v38 = vpop.f32.mrb[0].mxu0  ;;  %v422_v47 = vpop.f32.mrb[0].mxu1 }
 0x10b   : > { %v429_v39 = vadd.f32 %v381_v38, %v149_v36  ;;  %v383_v40 = vpop.f32.mrb[1].mxu0  ;;  %v424_v48 = vpop.f32.mrb[1].mxu1  ;;  %v431_v54 = vadd.f32 %v422_v47, %v151_v52 }
 0x10c   : > { %v430_v41 = vadd.f32 %v383_v40, %v150_v37  ;;  %v385_v42 = vpop.f32.mrb[2].mxu0  ;;  %v432_v49 = vadd.f32 %v424_v48, %v152_v46  ;;  %v426_v50 = vpop.f32.mrb[2].mxu1 }
 0x10d   : > { %v555_v43 = vmul.f32 -1.442695, %v429_v39  ;;  %v386_v44 = vpop.f32.mrb[3].mxu0  ;;  %v427_v51 = vpop.f32.mrb[3].mxu1 }
 0x10e   : > { %v556_v45 = vmul.f32 -1.442695, %v430_v41  ;;  %v557_v53 = vmul.f32 -1.442695, %v432_v49 }
 0x10f   : > { %619 = vpow2.f32 %v555_v43 }
 0x110   : > { %621 = vpow2.f32 %v556_v45 }
 0x111   : > { %623 = vpow2.f32 %v557_v53 }
 0x112   : > { %625 = vtanh.f32 %v431_v54 }
 0x119   : > { %v620_v55 = vpop.eup %619 }
 0x11a   : > { %v622_v56 = vpop.eup %621  ;;  %v436_v57 = vadd.f32 1.0, %v620_v55 }
 0x11b   : > { %v442_v58 = vadd.f32 1.0, %v622_v56  ;;  %v624_v59 = vpop.eup %623 }
 0x11c   : > { %627 = vrcp.f32 %v436_v57  ;;  %v626_v60 = vpop.eup %625  ;;  %v449_v63 = vadd.f32 1.0, %v624_v59 }
 0x11d   : > { %629 = vrcp.f32 %v442_v58 }
 0x11e   : > { %631 = vrcp.f32 %v449_v63 }
 0x126   : > { %v628_v62 = vpop.eup %627 }
 0x127   : > { %v630_v0 = vpop.eup %629  ;;  %v454_v1 = vmul.f32 %v628_v62, %v626_v60 }
 0x128   : > { %v453_v2 = vmul.f32 %v630_v0, %v452_v61  ;;  %v632_v4 = vpop.eup %631 }
 0x12a   : > { %v455_v3 = vadd.f32 %v454_v1, %v453_v2 }
 0x12c   : > { %633 = vtanh.f32 %v455_v3  ;;  %458 = vst [vmem:[#allocation3] sm:$0xff] %v455_v3 }
 0x136   : > { %v634_v5 = vpop.eup %633 }
 0x137   : > { %v457_v6 = vmul.f32 %v634_v5, %v632_v4 }
 0x139   : > { %459 = vst [vmem:[#allocation2] sm:$0xff] %v457_v6  ;;  %460 = vst [vmem:[%s676_s19] sm:$0xff] %v457_v6 }
 0x13a PF: > { %s12_s9 = sadd.s32 1, %s641_s9  }
 0x13b   : > { %p9_p5 = scmp.ge.s32.totalorder %s12_s9, 10  }
 0x13d   :  { %11 = sbr.rel (!%p9_p5) target bundleno = 1 (0x1), region = 62 }

// kernel: integration_forward.31
= control target key start
LH: loop header
LB: loop body
LE: loop exit
PB: predicated region body
PF: predicated region fallthrough
CT: control target
= control target key end

     0   :  { %v181_v0 = vmov 0.0   ;;  %vm182_vm0 = vmmov 0   ;;  %s228_s1 = inlined_call_operand.vmem [shape: bf16[128,128], index: 1, kind: input, shape index: {}]   ;;  %s229_s0 = inlined_call_operand.vmem [shape: bf16[8,128], index: 0, kind: input, shape index: {}]   ;;  %s230_s2 = inlined_call_operand.vmem [shape: f32[8,128], index: 2, kind: output, shape index: {}]  }
   0x1   :  { %151 = vmatprep.subr.bf16.mxu0 %v181_v0  ;;  %v173_v1 = vld [vmem:[%s228_s1] sm:$0xff]   ;;  %167 = vmatprep.mubr.msk.bf16.mxu0 %vm182_vm0, %v181_v0  ;;  %v174_v2 = vld [vmem:[%s228_s1 + $0x8] sm:$0xff]   ;;  %v175_v3 = vld [vmem:[%s228_s1 + $0x10] sm:$0xff]  }
   0x2   :  { %152 = vmatpush3.bf16.msra.mxu0 %v173_v1  ;;  %v176_v4 = vld [vmem:[%s228_s1 + $0x18] sm:$0xff]   ;;  %v177_v5 = vld [vmem:[%s228_s1 + $0x20] sm:$0xff]   ;;  %v178_v6 = vld [vmem:[%s228_s1 + $0x28] sm:$0xff]  }
   0x3   :  { %153 = vmatprep.subr.bf16.mxu0 %v181_v0  ;;  %v179_v7 = vld [vmem:[%s228_s1 + $0x30] sm:$0xff]   ;;  %v180_v8 = vld [vmem:[%s228_s1 + $0x38] sm:$0xff]   ;;  %v18_v9 = vld [vmem:[%s229_s0] sm:$0xf] }
   0x6   :  { %154 = vmatpush3.bf16.msra.mxu0 %v174_v2 }
   0x7   :  { %155 = vmatprep.subr.bf16.mxu0 %v181_v0 }
   0xa   :  { %156 = vmatpush3.bf16.msra.mxu0 %v175_v3 }
   0xb   :  { %157 = vmatprep.subr.bf16.mxu0 %v181_v0 }
   0xe   :  { %158 = vmatpush3.bf16.msra.mxu0 %v176_v4 }
   0xf   :  { %159 = vmatprep.subr.bf16.mxu0 %v181_v0 }
  0x12   :  { %160 = vmatpush3.bf16.msra.mxu0 %v177_v5 }
  0x13   :  { %161 = vmatprep.subr.bf16.mxu0 %v181_v0 }
  0x16   :  { %162 = vmatpush3.bf16.msra.mxu0 %v178_v6 }
  0x17   :  { %163 = vmatprep.subr.bf16.mxu0 %v181_v0 }
  0x1a   :  { %164 = vmatpush3.bf16.msra.mxu0 %v179_v7 }
  0x1b   :  { %165 = vmatprep.subr.bf16.mxu0 %v181_v0 }
  0x1e   :  { %166 = vmatpush3.bf16.msra.mxu0 %v180_v8 }
  0x21   :  { %168 = vmatmul.mubr.bf16.vlgmr.msra.gmra.mrb[0].mxu0 %v18_v9 }
  0xf4   :  { %v117_v10 = vpop.f32.mrb[0].mxu0 }
  0xf5   :  { %129 = vst [vmem:[%s230_s2] sm:$0xff] %v117_v10  ;;  %v169_v11 = vpop.f32.mrb[1].mxu0 }
  0xf6   :  { %v120_v12 = vpop.f32.mrb[2].mxu0 }
  0xf7   :  { %v170_v13 = vpop.f32.mrb[3].mxu0 }

</bundles_post_ra>
